<compile_context>
chip_gen: v6e
topology: v6e:2x2x1
jax: 0.10.0
libtpu: 0.0.40
codegen_flags: <defaults>
</compile_context>

<pallas_src>
import jax
import jax.numpy as jnp
from jax.experimental import pallas as pl
from jax.experimental.pallas import tpu as pltpu

EPS = 1e-3  # BatchNorm2d eps used by the module

C_SE, C_MID, C_1, C_2 = 86, 2064, 576, 3456
H, W = 7, 7
HW = H * W
HW_PAD = 56          # 49 -> 56 (multiple of 8 sublanes); padded rows stay zero
K_PAD = 128          # pad the tiny 86-wide contraction dim of conv1 to 128
TN = 1152            # output-channel tile (3456 = 3 * 1152, 1152 % 128 == 0)
N_TILES = C_2 // TN  # grid size over the output channels


def _fused_kernel(xse_ref, x_ref, w1_ref, b1_ref, w2_ref,
                  g1_ref, be1_ref, w3_ref, g2_ref, be2_ref, o_ref):
    inv_n = 1.0 / HW  # BN stats are over the 49 real spatial positions only

    # conv2d211 (1x1, 86->2064, bias) on the squeeze vector, then sigmoid.
    # xse_ref: [1, K_PAD] bf16 (zero padded), w1_ref: [K_PAD, 2064] bf16.
    s = jnp.dot(xse_ref[...], w1_ref[...], preferred_element_type=jnp.float32)
    s = jax.nn.sigmoid(s + b1_ref[...])                         # [1, 2064] f32

    # SE gating: broadcast over the (padded) spatial positions; padded rows of
    # x_ref are zero, so padded rows of y are exactly zero.
    y = (s * x_ref[...]).astype(jnp.bfloat16)                   # [56, 2064]

    # conv2d212 (1x1, 2064->576, no bias): native bf16 MXU, f32 accumulate.
    z = jnp.dot(y, w2_ref[...], preferred_element_type=jnp.float32)  # [56, 576]

    # batchnorm2d126 — training-mode batch stats over the 49 real positions,
    # biased variance, single pass (padded rows of z are exact zeros, so sums
    # over 56 rows equal sums over the 49 real rows).
    s1 = jnp.sum(z, axis=0, keepdims=True)
    ss1 = jnp.sum(z * z, axis=0, keepdims=True)
    mu1 = s1 * inv_n
    var1 = ss1 * inv_n - mu1 * mu1
    scale1 = g1_ref[...] * jax.lax.rsqrt(var1 + EPS)
    shift1 = be1_ref[...] - mu1 * scale1
    zn = z * scale1 + shift1                                    # [56, 576] f32

    # Re-zero the padded rows (BN shift made them nonzero) so BN2 stats stay exact.
    row = jax.lax.broadcasted_iota(jnp.int32, (HW_PAD, 1), 0)
    zn = jnp.where(row < HW, zn, 0.0).astype(jnp.bfloat16)

    # conv2d213 (1x1, 576->3456, no bias) — this grid tile's TN output channels.
    u = jnp.dot(zn, w3_ref[...], preferred_element_type=jnp.float32)  # [56, TN]

    # batchnorm2d127 (same training-mode batch-stat normalization, single pass).
    s2 = jnp.sum(u, axis=0, keepdims=True)
    ss2 = jnp.sum(u * u, axis=0, keepdims=True)
    mu2 = s2 * inv_n
    var2 = ss2 * inv_n - mu2 * mu2
    scale2 = g2_ref[...] * jax.lax.rsqrt(var2 + EPS)
    shift2 = be2_ref[...] - mu2 * scale2
    o_ref[...] = u * scale2 + shift2


def prepare_params(p):
    """One-time weight preprocessing (hoisted out of the per-call hot path)."""
    w1t = jnp.transpose(p["w1"].reshape(C_MID, C_SE))                   # [86, 2064]
    w1t = jnp.pad(w1t, ((0, K_PAD - C_SE), (0, 0))).astype(jnp.bfloat16)
    return {
        "w1t": w1t,                                                     # [128, 2064] bf16
        "b1": p["b1"].reshape(1, C_MID).astype(jnp.float32),
        "w2t": jnp.transpose(p["w2"].reshape(C_1, C_MID)).astype(jnp.bfloat16),  # [2064, 576]
        "w3t": jnp.transpose(p["w3"].reshape(C_2, C_1)).astype(jnp.bfloat16),    # [576, 3456]
        "g1": p["bn1_gamma"].reshape(1, C_1).astype(jnp.float32),
        "be1": p["bn1_beta"].reshape(1, C_1).astype(jnp.float32),
        "g2": p["bn2_gamma"].reshape(1, C_2).astype(jnp.float32),
        "be2": p["bn2_beta"].reshape(1, C_2).astype(jnp.float32),
    }


@jax.jit
def fused_forward(x663, x660, pp):
    """x663: [1,86,1,1], x660: [1,2064,7,7], pp: prepare_params(...) -> [1,3456,7,7] f32."""
    # --- activation layout plumbing (NCHW -> [HW_PAD, C], zero-padded rows) ---
    xse = x663.reshape(1, C_SE).astype(jnp.float32)
    xse = jnp.pad(xse, ((0, 0), (0, K_PAD - C_SE))).astype(jnp.bfloat16)     # [1, 128]
    x_hwc = jnp.transpose(x660.reshape(C_MID, HW)).astype(jnp.float32)       # [49, 2064]
    x_hwc = jnp.pad(x_hwc, ((0, HW_PAD - HW), (0, 0)))                       # [56, 2064]

    out = pl.pallas_call(
        _fused_kernel,
        out_shape=jax.ShapeDtypeStruct((HW_PAD, C_2), jnp.float32),
        grid_spec=pltpu.PrefetchScalarGridSpec(
            num_scalar_prefetch=0,
            grid=(N_TILES,),
            in_specs=[
                pl.BlockSpec((1, K_PAD), lambda j: (0, 0)),        # xse
                pl.BlockSpec((HW_PAD, C_MID), lambda j: (0, 0)),   # gated input
                pl.BlockSpec((K_PAD, C_MID), lambda j: (0, 0)),    # w1
                pl.BlockSpec((1, C_MID), lambda j: (0, 0)),        # b1
                pl.BlockSpec((C_MID, C_1), lambda j: (0, 0)),      # w2
                pl.BlockSpec((1, C_1), lambda j: (0, 0)),          # bn1 gamma
                pl.BlockSpec((1, C_1), lambda j: (0, 0)),          # bn1 beta
                pl.BlockSpec((C_1, TN), lambda j: (0, j)),         # w3 tile
                pl.BlockSpec((1, TN), lambda j: (0, j)),           # bn2 gamma tile
                pl.BlockSpec((1, TN), lambda j: (0, j)),           # bn2 beta tile
            ],
            out_specs=pl.BlockSpec((HW_PAD, TN), lambda j: (0, j)),
        ),
        compiler_params=pltpu.CompilerParams(
            dimension_semantics=("parallel",),
            vmem_limit_bytes=32 * 1024 * 1024,
        ),
    )(xse, x_hwc, pp["w1t"], pp["b1"], pp["w2t"], pp["g1"], pp["be1"],
      pp["w3t"], pp["g2"], pp["be2"])

    # drop padded rows, [HW, C2] -> NCHW
    return jnp.transpose(out[:HW]).reshape(1, C_2, H, W)


def reference_forward(x663, x660, p):
    """Pure-JAX f32 reference mirroring the PyTorch forward (train-mode BN)."""
    s = jnp.einsum("oc,nchw->nohw", p["w1"][:, :, 0, 0], x663) + p["b1"][None, :, None, None]
    s = jax.nn.sigmoid(s)
    y = s * x660
    z = jnp.einsum("oc,nchw->nohw", p["w2"][:, :, 0, 0], y)
    mu1 = jnp.mean(z, axis=(0, 2, 3), keepdims=True)
    v1 = jnp.mean((z - mu1) ** 2, axis=(0, 2, 3), keepdims=True)
    zn = (z - mu1) / jnp.sqrt(v1 + EPS) * p["bn1_gamma"][None, :, None, None] \
        + p["bn1_beta"][None, :, None, None]
    u = jnp.einsum("oc,nchw->nohw", p["w3"][:, :, 0, 0], zn)
    mu2 = jnp.mean(u, axis=(0, 2, 3), keepdims=True)
    v2 = jnp.mean((u - mu2) ** 2, axis=(0, 2, 3), keepdims=True)
    return (u - mu2) / jnp.sqrt(v2 + EPS) * p["bn2_gamma"][None, :, None, None] \
        + p["bn2_beta"][None, :, None, None]


def init_params(key):
    """Deterministic synthetic parameters with PyTorch-default-like scales."""
    ks = jax.random.split(key, 8)

    def uni(k, shape, fan_in):
        bound = 1.0 / (fan_in ** 0.5)
        return jax.random.uniform(k, shape, jnp.float32, -bound, bound)

    return {
        "w1": uni(ks[0], (C_MID, C_SE, 1, 1), C_SE),     # Conv2d(86, 2064, 1x1)
        "b1": uni(ks[1], (C_MID,), C_SE),
        "w2": uni(ks[2], (C_1, C_MID, 1, 1), C_MID),     # Conv2d(2064, 576, 1x1, no bias)
        "w3": uni(ks[3], (C_2, C_1, 1, 1), C_1),         # Conv2d(576, 3456, 1x1, no bias)
        "bn1_gamma": 1.0 + 0.1 * jax.random.normal(ks[4], (C_1,), jnp.float32),
        "bn1_beta": 0.1 * jax.random.normal(ks[5], (C_1,), jnp.float32),
        "bn2_gamma": 1.0 + 0.1 * jax.random.normal(ks[6], (C_2,), jnp.float32),
        "bn2_beta": 0.1 * jax.random.normal(ks[7], (C_2,), jnp.float32),
    }
    # TODO(synk): running_mean/running_var momentum updates (a training side effect of
    # BatchNorm2d) are not reproduced; only the forward normalization is implemented.


if __name__ == "__main__":
    root = jax.random.PRNGKey(0)
    k_x660, k_x663, k_params = jax.random.split(root, 3)

    # Shapes fixed by the module's channel counts.
    x660 = jax.random.normal(k_x660, (1, C_MID, H, W), jnp.float32)   # [1, 2064, 7, 7]
    x663 = jax.random.normal(k_x663, (1, C_SE, 1, 1), jnp.float32)    # [1, 86, 1, 1]
    params = init_params(k_params)

    prepped = prepare_params(params)          # one-time weight prep (outside hot path)
    y = fused_forward(x663, x660, prepped)
    jax.block_until_ready(y)

    assert y.shape == (1, C_2, H, W) and y.dtype == jnp.float32
    y_ref = reference_forward(x663, x660, params)
    # bf16 weights/activations in the 2nd/3rd matmuls -> slightly looser atol than pure f32.
    assert jnp.allclose(y, y_ref, rtol=2e-2, atol=3e-2), "mismatch vs pure-JAX reference"

    print("KERNEL_OK")
</pallas_src>

<mosaic_0001>
module attributes {stable_mosaic.version = 11 : i64} {
  func.func @_fused_kernel(%arg0: i32, %arg1: memref<1x128xbf16, #tpu.memory_space<vmem>>, %arg2: memref<56x2064xf32, #tpu.memory_space<vmem>>, %arg3: memref<128x2064xbf16, #tpu.memory_space<vmem>>, %arg4: memref<1x2064xf32, #tpu.memory_space<vmem>>, %arg5: memref<2064x576xbf16, #tpu.memory_space<vmem>>, %arg6: memref<1x576xf32, #tpu.memory_space<vmem>>, %arg7: memref<1x576xf32, #tpu.memory_space<vmem>>, %arg8: memref<576x1152xbf16, #tpu.memory_space<vmem>>, %arg9: memref<1x1152xf32, #tpu.memory_space<vmem>>, %arg10: memref<1x1152xf32, #tpu.memory_space<vmem>>, %arg11: memref<56x1152xf32, #tpu.memory_space<vmem>>) attributes {dimension_semantics = [#tpu.dimension_semantics<parallel>], iteration_bounds = array<i64: 3>, scalar_prefetch = 0 : i64, scratch_operands = 0 : i64, tpu.core_type = #tpu.core_type<tc>, window_params = [{pipeline_mode = #tpu.pipeline_mode<synchronous>, transform_indices = @transform_0, window_bounds = array<i64: 1, 128>}, {pipeline_mode = #tpu.pipeline_mode<synchronous>, transform_indices = @transform_1, window_bounds = array<i64: 56, 2064>}, {pipeline_mode = #tpu.pipeline_mode<synchronous>, transform_indices = @transform_2, window_bounds = array<i64: 128, 2064>}, {pipeline_mode = #tpu.pipeline_mode<synchronous>, transform_indices = @transform_3, window_bounds = array<i64: 1, 2064>}, {pipeline_mode = #tpu.pipeline_mode<synchronous>, transform_indices = @transform_4, window_bounds = array<i64: 2064, 576>}, {pipeline_mode = #tpu.pipeline_mode<synchronous>, transform_indices = @transform_5, window_bounds = array<i64: 1, 576>}, {pipeline_mode = #tpu.pipeline_mode<synchronous>, transform_indices = @transform_6, window_bounds = array<i64: 1, 576>}, {transform_indices = @transform_7, window_bounds = array<i64: 576, 1152>}, {transform_indices = @transform_8, window_bounds = array<i64: 1, 1152>}, {transform_indices = @transform_9, window_bounds = array<i64: 1, 1152>}, {transform_indices = @transform_10, window_bounds = array<i64: 56, 1152>}]} {
    %c0 = arith.constant 0 : index
    %c0_0 = arith.constant 0 : index
    %0 = vector.load %arg1[%c0, %c0_0] : memref<1x128xbf16, #tpu.memory_space<vmem>>, vector<1x128xbf16>
    %c0_1 = arith.constant 0 : index
    %c0_2 = arith.constant 0 : index
    %1 = vector.load %arg3[%c0_1, %c0_2] : memref<128x2064xbf16, #tpu.memory_space<vmem>>, vector<128x2064xbf16>
    %cst = arith.constant dense<0.000000e+00> : vector<1x2064xf32>
    %2 = tpu.matmul %0, %1, %cst {dimension_numbers = #tpu.dot_dimension_numbers<[1], [0], [0], [1], [0, 0, 1, 1], [], []>} : vector<1x128xbf16>, vector<128x2064xbf16>, vector<1x2064xf32> -> vector<1x2064xf32>
    %c0_3 = arith.constant 0 : index
    %c0_4 = arith.constant 0 : index
    %3 = vector.load %arg4[%c0_3, %c0_4] : memref<1x2064xf32, #tpu.memory_space<vmem>>, vector<1x2064xf32>
    %4 = arith.addf %2, %3 : vector<1x2064xf32>
    %5 = arith.negf %4 : vector<1x2064xf32>
    %6 = math.exp %5 : vector<1x2064xf32>
    %cst_5 = arith.constant 1.000000e+00 : f32
    %7 = vector.broadcast %cst_5 : f32 to vector<1x2064xf32>
    %8 = arith.addf %7, %6 : vector<1x2064xf32>
    %9 = arith.divf %7, %8 : vector<1x2064xf32>
    %c0_6 = arith.constant 0 : index
    %c0_7 = arith.constant 0 : index
    %10 = vector.load %arg2[%c0_6, %c0_7] : memref<56x2064xf32, #tpu.memory_space<vmem>>, vector<56x2064xf32>
    %11 = vector.broadcast %9 : vector<1x2064xf32> to vector<56x2064xf32>
    %12 = arith.mulf %11, %10 : vector<56x2064xf32>
    %13 = arith.truncf %12 : vector<56x2064xf32> to vector<56x2064xbf16>
    %c0_8 = arith.constant 0 : index
    %c0_9 = arith.constant 0 : index
    %14 = vector.load %arg5[%c0_8, %c0_9] : memref<2064x576xbf16, #tpu.memory_space<vmem>>, vector<2064x576xbf16>
    %cst_10 = arith.constant dense<0.000000e+00> : vector<56x576xf32>
    %15 = tpu.matmul %13, %14, %cst_10 {dimension_numbers = #tpu.dot_dimension_numbers<[1], [0], [0], [1], [0, 0, 1, 1], [], []>} : vector<56x2064xbf16>, vector<2064x576xbf16>, vector<56x576xf32> -> vector<56x576xf32>
    %cst_11 = arith.constant dense<0.000000e+00> : vector<576xf32>
    %16 = vector.multi_reduction <add>, %15, %cst_11 [0] : vector<56x576xf32> to vector<576xf32>
    %17 = vector.shape_cast %16 : vector<576xf32> to vector<1x576xf32>
    %18 = arith.mulf %15, %15 : vector<56x576xf32>
    %cst_12 = arith.constant dense<0.000000e+00> : vector<576xf32>
    %19 = vector.multi_reduction <add>, %18, %cst_12 [0] : vector<56x576xf32> to vector<576xf32>
    %20 = vector.shape_cast %19 : vector<576xf32> to vector<1x576xf32>
    %cst_13 = arith.constant 0.0204081628 : f32
    %21 = vector.broadcast %cst_13 : f32 to vector<1x576xf32>
    %22 = arith.mulf %17, %21 : vector<1x576xf32>
    %cst_14 = arith.constant 0.0204081628 : f32
    %23 = vector.broadcast %cst_14 : f32 to vector<1x576xf32>
    %24 = arith.mulf %20, %23 : vector<1x576xf32>
    %25 = arith.mulf %22, %22 : vector<1x576xf32>
    %26 = arith.subf %24, %25 : vector<1x576xf32>
    %c0_15 = arith.constant 0 : index
    %c0_16 = arith.constant 0 : index
    %27 = vector.load %arg6[%c0_15, %c0_16] : memref<1x576xf32, #tpu.memory_space<vmem>>, vector<1x576xf32>
    %cst_17 = arith.constant 1.000000e-03 : f32
    %28 = vector.broadcast %cst_17 : f32 to vector<1x576xf32>
    %29 = arith.addf %26, %28 : vector<1x576xf32>
    %30 = math.rsqrt %29 : vector<1x576xf32>
    %31 = arith.mulf %27, %30 : vector<1x576xf32>
    %c0_18 = arith.constant 0 : index
    %c0_19 = arith.constant 0 : index
    %32 = vector.load %arg7[%c0_18, %c0_19] : memref<1x576xf32, #tpu.memory_space<vmem>>, vector<1x576xf32>
    %33 = arith.mulf %22, %31 : vector<1x576xf32>
    %34 = arith.subf %32, %33 : vector<1x576xf32>
    %35 = vector.broadcast %31 : vector<1x576xf32> to vector<56x576xf32>
    %36 = arith.mulf %15, %35 : vector<56x576xf32>
    %37 = vector.broadcast %34 : vector<1x576xf32> to vector<56x576xf32>
    %38 = arith.addf %36, %37 : vector<56x576xf32>
    %39 = tpu.iota {dimensions = array<i32: 0>} : vector<56x1xi32>
    %c49_i32 = arith.constant 49 : i32
    %40 = vector.broadcast %c49_i32 : i32 to vector<56x1xi32>
    %41 = arith.cmpi slt, %39, %40 : vector<56x1xi32>
    %cst_20 = arith.constant 0.000000e+00 : f32
    %42 = vector.shape_cast %41 : vector<56x1xi1> to vector<56x1xi1>
    %43 = vector.broadcast %42 : vector<56x1xi1> to vector<56x576xi1>
    %44 = vector.broadcast %cst_20 : f32 to vector<56x576xf32>
    %45 = arith.select %43, %38, %44 : vector<56x576xi1>, vector<56x576xf32>
    %46 = arith.truncf %45 : vector<56x576xf32> to vector<56x576xbf16>
    %c0_21 = arith.constant 0 : index
    %c0_22 = arith.constant 0 : index
    %47 = vector.load %arg8[%c0_21, %c0_22] : memref<576x1152xbf16, #tpu.memory_space<vmem>>, vector<576x1152xbf16>
    %cst_23 = arith.constant dense<0.000000e+00> : vector<56x1152xf32>
    %48 = tpu.matmul %46, %47, %cst_23 {dimension_numbers = #tpu.dot_dimension_numbers<[1], [0], [0], [1], [0, 0, 1, 1], [], []>} : vector<56x576xbf16>, vector<576x1152xbf16>, vector<56x1152xf32> -> vector<56x1152xf32>
    %cst_24 = arith.constant dense<0.000000e+00> : vector<1152xf32>
    %49 = vector.multi_reduction <add>, %48, %cst_24 [0] : vector<56x1152xf32> to vector<1152xf32>
    %50 = vector.shape_cast %49 : vector<1152xf32> to vector<1x1152xf32>
    %51 = arith.mulf %48, %48 : vector<56x1152xf32>
    %cst_25 = arith.constant dense<0.000000e+00> : vector<1152xf32>
    %52 = vector.multi_reduction <add>, %51, %cst_25 [0] : vector<56x1152xf32> to vector<1152xf32>
    %53 = vector.shape_cast %52 : vector<1152xf32> to vector<1x1152xf32>
    %cst_26 = arith.constant 0.0204081628 : f32
    %54 = vector.broadcast %cst_26 : f32 to vector<1x1152xf32>
    %55 = arith.mulf %50, %54 : vector<1x1152xf32>
    %cst_27 = arith.constant 0.0204081628 : f32
    %56 = vector.broadcast %cst_27 : f32 to vector<1x1152xf32>
    %57 = arith.mulf %53, %56 : vector<1x1152xf32>
    %58 = arith.mulf %55, %55 : vector<1x1152xf32>
    %59 = arith.subf %57, %58 : vector<1x1152xf32>
    %c0_28 = arith.constant 0 : index
    %c0_29 = arith.constant 0 : index
    %60 = vector.load %arg9[%c0_28, %c0_29] : memref<1x1152xf32, #tpu.memory_space<vmem>>, vector<1x1152xf32>
    %cst_30 = arith.constant 1.000000e-03 : f32
    %61 = vector.broadcast %cst_30 : f32 to vector<1x1152xf32>
    %62 = arith.addf %59, %61 : vector<1x1152xf32>
    %63 = math.rsqrt %62 : vector<1x1152xf32>
    %64 = arith.mulf %60, %63 : vector<1x1152xf32>
    %c0_31 = arith.constant 0 : index
    %c0_32 = arith.constant 0 : index
    %65 = vector.load %arg10[%c0_31, %c0_32] : memref<1x1152xf32, #tpu.memory_space<vmem>>, vector<1x1152xf32>
    %66 = arith.mulf %55, %64 : vector<1x1152xf32>
    %67 = arith.subf %65, %66 : vector<1x1152xf32>
    %68 = vector.broadcast %64 : vector<1x1152xf32> to vector<56x1152xf32>
    %69 = arith.mulf %48, %68 : vector<56x1152xf32>
    %70 = vector.broadcast %67 : vector<1x1152xf32> to vector<56x1152xf32>
    %71 = arith.addf %69, %70 : vector<56x1152xf32>
    %c0_33 = arith.constant 0 : index
    %c0_34 = arith.constant 0 : index
    %72 = vector.load %arg11[%c0_33, %c0_34] : memref<56x1152xf32, #tpu.memory_space<vmem>>, vector<56x1152xf32>
    tpu.vector_store %arg11[%c0_33, %c0_34], %71 {strides = array<i32>} : memref<56x1152xf32, #tpu.memory_space<vmem>>, vector<56x1152xf32>,
    return
  }
  func.func @transform_0(%arg0: i32) -> (i32, i32) {
    %c0_i32 = arith.constant 0 : i32
    %c0_i32_0 = arith.constant 0 : i32
    %c0_i32_1 = arith.constant 0 : i32
    return %c0_i32, %c0_i32_0 : i32, i32
  }
  func.func @transform_1(%arg0: i32) -> (i32, i32) {
    %c0_i32 = arith.constant 0 : i32
    %c0_i32_0 = arith.constant 0 : i32
    %c0_i32_1 = arith.constant 0 : i32
    return %c0_i32, %c0_i32_0 : i32, i32
  }
  func.func @transform_2(%arg0: i32) -> (i32, i32) {
    %c0_i32 = arith.constant 0 : i32
    %c0_i32_0 = arith.constant 0 : i32
    %c0_i32_1 = arith.constant 0 : i32
    return %c0_i32, %c0_i32_0 : i32, i32
  }
  func.func @transform_3(%arg0: i32) -> (i32, i32) {
    %c0_i32 = arith.constant 0 : i32
    %c0_i32_0 = arith.constant 0 : i32
    %c0_i32_1 = arith.constant 0 : i32
    return %c0_i32, %c0_i32_0 : i32, i32
  }
  func.func @transform_4(%arg0: i32) -> (i32, i32) {
    %c0_i32 = arith.constant 0 : i32
    %c0_i32_0 = arith.constant 0 : i32
    %c0_i32_1 = arith.constant 0 : i32
    return %c0_i32, %c0_i32_0 : i32, i32
  }
  func.func @transform_5(%arg0: i32) -> (i32, i32) {
    %c0_i32 = arith.constant 0 : i32
    %c0_i32_0 = arith.constant 0 : i32
    %c0_i32_1 = arith.constant 0 : i32
    return %c0_i32, %c0_i32_0 : i32, i32
  }
  func.func @transform_6(%arg0: i32) -> (i32, i32) {
    %c0_i32 = arith.constant 0 : i32
    %c0_i32_0 = arith.constant 0 : i32
    %c0_i32_1 = arith.constant 0 : i32
    return %c0_i32, %c0_i32_0 : i32, i32
  }
  func.func @transform_7(%arg0: i32) -> (i32, i32) {
    %c0_i32 = arith.constant 0 : i32
    %c0_i32_0 = arith.constant 0 : i32
    return %c0_i32, %arg0 : i32, i32
  }
  func.func @transform_8(%arg0: i32) -> (i32, i32) {
    %c0_i32 = arith.constant 0 : i32
    %c0_i32_0 = arith.constant 0 : i32
    return %c0_i32, %arg0 : i32, i32
  }
  func.func @transform_9(%arg0: i32) -> (i32, i32) {
    %c0_i32 = arith.constant 0 : i32
    %c0_i32_0 = arith.constant 0 : i32
    return %c0_i32, %arg0 : i32, i32
  }
  func.func @transform_10(%arg0: i32) -> (i32, i32) {
    %c0_i32 = arith.constant 0 : i32
    %c0_i32_0 = arith.constant 0 : i32
    return %c0_i32, %arg0 : i32, i32
  }
}

</mosaic_0001>

<bundles_post_ra>
// kernel: fused_forward.1
= control target key start
LH: loop header
LB: loop body
LE: loop exit
PB: predicated region body
PF: predicated region fallthrough
CT: control target
= control target key end

     0   :  { %s17120_s13 = smov 0   ;;  %s17122_s14 = smov 0   ;;  %s24021_s0 = inlined_call_operand.vmem [shape: bf16[1,128], index: 0, kind: input, shape index: {}]   ;;  %s24022_s1 = inlined_call_operand.vmem [shape: f32[56,2064], index: 1, kind: input, shape index: {}]   ;;  %s24023_s2 = inlined_call_operand.vmem [shape: bf16[128,2064], index: 2, kind: input, shape index: {}]   ;;  %s24024_s3 = inlined_call_operand.vmem [shape: f32[1,2064], index: 3, kind: input, shape index: {}]   ;;  %s24025_s4 = inlined_call_operand.vmem [shape: bf16[2064,576], index: 4, kind: input, shape index: {}]   ;;  %s24026_s5 = inlined_call_operand.vmem [shape: f32[1,576], index: 5, kind: input, shape index: {}]   ;;  %s24027_s6 = inlined_call_operand.vmem [shape: f32[1,576], index: 6, kind: input, shape index: {}]   ;;  %s24028_s7 = inlined_call_operand.vmem [shape: bf16[576,3456], index: 7, kind: input, shape index: {}]   ;;  %s24029_s8 = inlined_call_operand.vmem [shape: f32[1,3456], index: 8, kind: input, shape index: {}]   ;;  %s24030_s9 = inlined_call_operand.vmem [shape: f32[1,3456], index: 9, kind: input, shape index: {}]   ;;  %s24031_s10 = inlined_call_operand.vmem [shape: f32[56,3456], index: 10, kind: output, shape index: {}]  }
   0x1   :  { %s17124_s15 = smov 0  }
   0x2 LB: > { %s17136_s16 = sadd.s32 4294967295, %s17059_s15   ;;  %s17139_s17 = sadd.s32 1, %s17059_s15   ;;  %s17059_s15 = sphi %s17124_s15, %s24665_s15   ;;  %s17055_s14 = sphi %s17122_s14, %s24664_s14   ;;  %s17051_s13 = sphi %s17120_s13, %s24663_s13  }
   0x3   : > { %s171_s18 = ssub.s32 %s17059_s15, %s17139_s17  ;;  %s174_s19 = sadd.s32 1, %s17055_s14 }
   0x4   : > { %p172_p0 = scmp.eq.s32.totalorder %s171_s18, 0  ;;  %p181_p1 = scmp.ne.s32.totalorder %s17055_s14, %s17051_s13 }
   0x5   : > { %p182_p2 = scmp.eq.s32.totalorder %s17059_s15, 0  ;;  %p263_p3 = scmp.eq.s32.totalorder %s17136_s16, 2 }
   0x6   : > { %s17149_s20 = scalar_select %p172_p0, %s17055_s14, %s174_s19  }
   0x7   : > { %p183_p4 = por %p182_p2, %p181_p1  ;;  %p17151_p5 = por %p263_p3, %p181_p1 }
   0x8   : > { %p13496_p6 = scmp.ge.s32.totalorder %s17059_s15, 3 }
   0xa   : > { %306 = sbr.rel (%p13496_p6) target bundleno = 212 (0xd4), region = 44 }
   0xf   : > { %309 = sbr.rel (!%p183_p4) target bundleno = 212 (0xd4), region = 48  ;;  %s311_s22 = sand.u32 (%p183_p4), 1, %s17055_s14  }
  0x10   : > { %s14861_s23 = smul.u32 (%p183_p4), 36, %s17059_s15 }
  0x11   : > { %s15339_s24 = smul.u32 (%p183_p4), 2592, %s311_s22 }
  0x12   : > { %s17161_s27 = scalar_lea.vmem (%p183_p4), %s24028_s7, %s14861_s23 }
  0x13   : > { %v331_v0 = vld [vmem:[%s17161_s27] sm:$0xff] (%p183_p4)  ;;  %v333_v1 = vld [vmem:[%s17161_s27 + $0x8] sm:$0xff] (%p183_p4)  ;;  %v335_v2 = vld [vmem:[%s17161_s27 + $0x10] sm:$0xff] (%p183_p4)  ;;  %s17166_s28 = scalar_lea.vmem (%p183_p4), [#allocation2], %s15339_s24 }
  0x14   : > { %332 = vst [vmem:[%s17166_s28] sm:$0xff] %v331_v0  ;;  %334 = vst [vmem:[%s17166_s28 + $0x8] sm:$0xff] %v333_v1  ;;  %v337_v3 = vld [vmem:[%s17161_s27 + $0x18] sm:$0xff]  ;;  %v339_v4 = vld [vmem:[%s17161_s27 + $0x6c] sm:$0xff] }
  0x15   : > { %336 = vst [vmem:[%s17166_s28 + $0x10] sm:$0xff] %v335_v2  ;;  %v341_v5 = vld [vmem:[%s17161_s27 + $0x74] sm:$0xff]  ;;  %338 = vst [vmem:[%s17166_s28 + $0x18] sm:$0xff] %v337_v3  ;;  %v343_v6 = vld [vmem:[%s17161_s27 + $0x7c] sm:$0xff] }
  0x16   : > { %340 = vst [vmem:[%s17166_s28 + $0x24] sm:$0xff] %v339_v4  ;;  %342 = vst [vmem:[%s17166_s28 + $0x2c] sm:$0xff] %v341_v5  ;;  %v345_v7 = vld [vmem:[%s17161_s27 + $0x84] sm:$0xff]  ;;  %v347_v8 = vld [vmem:[%s17161_s27 + $0xd8] sm:$0xff] }
  0x17   : > { %344 = vst [vmem:[%s17166_s28 + $0x34] sm:$0xff] %v343_v6  ;;  %346 = vst [vmem:[%s17166_s28 + $0x3c] sm:$0xff] %v345_v7  ;;  %v349_v9 = vld [vmem:[%s17161_s27 + $0xe0] sm:$0xff]  ;;  %v351_v10 = vld [vmem:[%s17161_s27 + $0xe8] sm:$0xff] }
  0x18   : > { %348 = vst [vmem:[%s17166_s28 + $0x48] sm:$0xff] %v347_v8  ;;  %v353_v11 = vld [vmem:[%s17161_s27 + $0xf0] sm:$0xff]  ;;  %350 = vst [vmem:[%s17166_s28 + $0x50] sm:$0xff] %v349_v9  ;;  %v355_v12 = vld [vmem:[%s17161_s27 + $0x144] sm:$0xff] }
  0x19   : > { %352 = vst [vmem:[%s17166_s28 + $0x58] sm:$0xff] %v351_v10  ;;  %354 = vst [vmem:[%s17166_s28 + $0x60] sm:$0xff] %v353_v11  ;;  %v357_v13 = vld [vmem:[%s17161_s27 + $0x14c] sm:$0xff]  ;;  %v359_v14 = vld [vmem:[%s17161_s27 + $0x154] sm:$0xff] }
  0x1a   : > { %356 = vst [vmem:[%s17166_s28 + $0x6c] sm:$0xff] %v355_v12  ;;  %358 = vst [vmem:[%s17166_s28 + $0x74] sm:$0xff] %v357_v13  ;;  %v361_v15 = vld [vmem:[%s17161_s27 + $0x15c] sm:$0xff]  ;;  %v363_v16 = vld [vmem:[%s17161_s27 + $0x1b0] sm:$0xff] }
  0x1b   : > { %360 = vst [vmem:[%s17166_s28 + $0x7c] sm:$0xff] %v359_v14  ;;  %v365_v17 = vld [vmem:[%s17161_s27 + $0x1b8] sm:$0xff]  ;;  %362 = vst [vmem:[%s17166_s28 + $0x84] sm:$0xff] %v361_v15  ;;  %v367_v18 = vld [vmem:[%s17161_s27 + $0x1c0] sm:$0xff] }
  0x1c   : > { %364 = vst [vmem:[%s17166_s28 + $0x90] sm:$0xff] %v363_v16  ;;  %366 = vst [vmem:[%s17166_s28 + $0x98] sm:$0xff] %v365_v17  ;;  %v369_v19 = vld [vmem:[%s17161_s27 + $0x1c8] sm:$0xff]  ;;  %v371_v20 = vld [vmem:[%s17161_s27 + $0x21c] sm:$0xff] }
  0x1d   : > { %368 = vst [vmem:[%s17166_s28 + $0xa0] sm:$0xff] %v367_v18  ;;  %370 = vst [vmem:[%s17166_s28 + $0xa8] sm:$0xff] %v369_v19  ;;  %v373_v21 = vld [vmem:[%s17161_s27 + $0x224] sm:$0xff]  ;;  %v375_v22 = vld [vmem:[%s17161_s27 + $0x22c] sm:$0xff] }
  0x1e   : > { %372 = vst [vmem:[%s17166_s28 + $0xb4] sm:$0xff] %v371_v20  ;;  %v377_v23 = vld [vmem:[%s17161_s27 + $0x234] sm:$0xff]  ;;  %374 = vst [vmem:[%s17166_s28 + $0xbc] sm:$0xff] %v373_v21  ;;  %v379_v24 = vld [vmem:[%s17161_s27 + $0x288] sm:$0xff] }
  0x1f   : > { %376 = vst [vmem:[%s17166_s28 + $0xc4] sm:$0xff] %v375_v22  ;;  %378 = vst [vmem:[%s17166_s28 + $0xcc] sm:$0xff] %v377_v23  ;;  %v381_v25 = vld [vmem:[%s17161_s27 + $0x290] sm:$0xff]  ;;  %v383_v26 = vld [vmem:[%s17161_s27 + $0x298] sm:$0xff] }
  0x20   : > { %380 = vst [vmem:[%s17166_s28 + $0xd8] sm:$0xff] %v379_v24  ;;  %382 = vst [vmem:[%s17166_s28 + $0xe0] sm:$0xff] %v381_v25  ;;  %v385_v27 = vld [vmem:[%s17161_s27 + $0x2a0] sm:$0xff]  ;;  %v387_v28 = vld [vmem:[%s17161_s27 + $0x2f4] sm:$0xff] }
  0x21   : > { %384 = vst [vmem:[%s17166_s28 + $0xe8] sm:$0xff] %v383_v26  ;;  %v389_v29 = vld [vmem:[%s17161_s27 + $0x2fc] sm:$0xff]  ;;  %386 = vst [vmem:[%s17166_s28 + $0xf0] sm:$0xff] %v385_v27  ;;  %v391_v30 = vld [vmem:[%s17161_s27 + $0x304] sm:$0xff] }
  0x22   : > { %388 = vst [vmem:[%s17166_s28 + $0xfc] sm:$0xff] %v387_v28  ;;  %390 = vst [vmem:[%s17166_s28 + $0x104] sm:$0xff] %v389_v29  ;;  %v393_v31 = vld [vmem:[%s17161_s27 + $0x30c] sm:$0xff]  ;;  %v395_v32 = vld [vmem:[%s17161_s27 + $0x360] sm:$0xff] }
  0x23   : > { %392 = vst [vmem:[%s17166_s28 + $0x10c] sm:$0xff] %v391_v30  ;;  %394 = vst [vmem:[%s17166_s28 + $0x114] sm:$0xff] %v393_v31  ;;  %v397_v33 = vld [vmem:[%s17161_s27 + $0x368] sm:$0xff]  ;;  %v399_v34 = vld [vmem:[%s17161_s27 + $0x370] sm:$0xff] }
  0x24   : > { %396 = vst [vmem:[%s17166_s28 + $0x120] sm:$0xff] %v395_v32  ;;  %v401_v35 = vld [vmem:[%s17161_s27 + $0x378] sm:$0xff]  ;;  %398 = vst [vmem:[%s17166_s28 + $0x128] sm:$0xff] %v397_v33  ;;  %v403_v36 = vld [vmem:[%s17161_s27 + $0x3cc] sm:$0xff] }
  0x25   : > { %400 = vst [vmem:[%s17166_s28 + $0x130] sm:$0xff] %v399_v34  ;;  %402 = vst [vmem:[%s17166_s28 + $0x138] sm:$0xff] %v401_v35  ;;  %v405_v37 = vld [vmem:[%s17161_s27 + $0x3d4] sm:$0xff]  ;;  %v407_v38 = vld [vmem:[%s17161_s27 + $0x3dc] sm:$0xff] }
  0x26   : > { %404 = vst [vmem:[%s17166_s28 + $0x144] sm:$0xff] %v403_v36  ;;  %406 = vst [vmem:[%s17166_s28 + $0x14c] sm:$0xff] %v405_v37  ;;  %v409_v39 = vld [vmem:[%s17161_s27 + $0x3e4] sm:$0xff]  ;;  %v411_v40 = vld [vmem:[%s17161_s27 + $0x438] sm:$0xff] }
  0x27   : > { %408 = vst [vmem:[%s17166_s28 + $0x154] sm:$0xff] %v407_v38  ;;  %v413_v41 = vld [vmem:[%s17161_s27 + $0x440] sm:$0xff]  ;;  %410 = vst [vmem:[%s17166_s28 + $0x15c] sm:$0xff] %v409_v39  ;;  %v415_v42 = vld [vmem:[%s17161_s27 + $0x448] sm:$0xff] }
  0x28   : > { %412 = vst [vmem:[%s17166_s28 + $0x168] sm:$0xff] %v411_v40  ;;  %414 = vst [vmem:[%s17166_s28 + $0x170] sm:$0xff] %v413_v41  ;;  %v417_v43 = vld [vmem:[%s17161_s27 + $0x450] sm:$0xff]  ;;  %v419_v44 = vld [vmem:[%s17161_s27 + $0x4a4] sm:$0xff] }
  0x29   : > { %416 = vst [vmem:[%s17166_s28 + $0x178] sm:$0xff] %v415_v42  ;;  %418 = vst [vmem:[%s17166_s28 + $0x180] sm:$0xff] %v417_v43  ;;  %v421_v45 = vld [vmem:[%s17161_s27 + $0x4ac] sm:$0xff]  ;;  %v423_v46 = vld [vmem:[%s17161_s27 + $0x4b4] sm:$0xff] }
  0x2a   : > { %420 = vst [vmem:[%s17166_s28 + $0x18c] sm:$0xff] %v419_v44  ;;  %v425_v47 = vld [vmem:[%s17161_s27 + $0x4bc] sm:$0xff]  ;;  %422 = vst [vmem:[%s17166_s28 + $0x194] sm:$0xff] %v421_v45  ;;  %v427_v48 = vld [vmem:[%s17161_s27 + $0x510] sm:$0xff] }
  0x2b   : > { %424 = vst [vmem:[%s17166_s28 + $0x19c] sm:$0xff] %v423_v46  ;;  %426 = vst [vmem:[%s17166_s28 + $0x1a4] sm:$0xff] %v425_v47  ;;  %v429_v49 = vld [vmem:[%s17161_s27 + $0x518] sm:$0xff]  ;;  %v431_v50 = vld [vmem:[%s17161_s27 + $0x520] sm:$0xff] }
  0x2c   : > { %428 = vst [vmem:[%s17166_s28 + $0x1b0] sm:$0xff] %v427_v48  ;;  %430 = vst [vmem:[%s17166_s28 + $0x1b8] sm:$0xff] %v429_v49  ;;  %v433_v51 = vld [vmem:[%s17161_s27 + $0x528] sm:$0xff]  ;;  %v435_v52 = vld [vmem:[%s17161_s27 + $0x57c] sm:$0xff] }
  0x2d   : > { %432 = vst [vmem:[%s17166_s28 + $0x1c0] sm:$0xff] %v431_v50  ;;  %v437_v53 = vld [vmem:[%s17161_s27 + $0x584] sm:$0xff]  ;;  %434 = vst [vmem:[%s17166_s28 + $0x1c8] sm:$0xff] %v433_v51  ;;  %v439_v54 = vld [vmem:[%s17161_s27 + $0x58c] sm:$0xff] }
  0x2e   : > { %436 = vst [vmem:[%s17166_s28 + $0x1d4] sm:$0xff] %v435_v52  ;;  %438 = vst [vmem:[%s17166_s28 + $0x1dc] sm:$0xff] %v437_v53  ;;  %v441_v55 = vld [vmem:[%s17161_s27 + $0x594] sm:$0xff]  ;;  %v443_v56 = vld [vmem:[%s17161_s27 + $0x5e8] sm:$0xff] }
  0x2f   : > { %440 = vst [vmem:[%s17166_s28 + $0x1e4] sm:$0xff] %v439_v54  ;;  %442 = vst [vmem:[%s17166_s28 + $0x1ec] sm:$0xff] %v441_v55  ;;  %v445_v57 = vld [vmem:[%s17161_s27 + $0x5f0] sm:$0xff]  ;;  %v447_v58 = vld [vmem:[%s17161_s27 + $0x5f8] sm:$0xff] }
  0x30   : > { %444 = vst [vmem:[%s17166_s28 + $0x1f8] sm:$0xff] %v443_v56  ;;  %v449_v59 = vld [vmem:[%s17161_s27 + $0x600] sm:$0xff]  ;;  %446 = vst [vmem:[%s17166_s28 + $0x200] sm:$0xff] %v445_v57  ;;  %v451_v60 = vld [vmem:[%s17161_s27 + $0x654] sm:$0xff] }
  0x31   : > { %448 = vst [vmem:[%s17166_s28 + $0x208] sm:$0xff] %v447_v58  ;;  %450 = vst [vmem:[%s17166_s28 + $0x210] sm:$0xff] %v449_v59  ;;  %v453_v61 = vld [vmem:[%s17161_s27 + $0x65c] sm:$0xff]  ;;  %v455_v62 = vld [vmem:[%s17161_s27 + $0x664] sm:$0xff] }
  0x32   : > { %452 = vst [vmem:[%s17166_s28 + $0x21c] sm:$0xff] %v451_v60  ;;  %454 = vst [vmem:[%s17166_s28 + $0x224] sm:$0xff] %v453_v61  ;;  %v457_v63 = vld [vmem:[%s17161_s27 + $0x66c] sm:$0xff]  ;;  %v459_v0 = vld [vmem:[%s17161_s27 + $0x6c0] sm:$0xff] }
  0x33   : > { %456 = vst [vmem:[%s17166_s28 + $0x22c] sm:$0xff] %v455_v62  ;;  %v461_v1 = vld [vmem:[%s17161_s27 + $0x6c8] sm:$0xff]  ;;  %458 = vst [vmem:[%s17166_s28 + $0x234] sm:$0xff] %v457_v63  ;;  %v463_v2 = vld [vmem:[%s17161_s27 + $0x6d0] sm:$0xff] }
  0x34   : > { %460 = vst [vmem:[%s17166_s28 + $0x240] sm:$0xff] %v459_v0  ;;  %462 = vst [vmem:[%s17166_s28 + $0x248] sm:$0xff] %v461_v1  ;;  %v465_v3 = vld [vmem:[%s17161_s27 + $0x6d8] sm:$0xff]  ;;  %v467_v4 = vld [vmem:[%s17161_s27 + $0x72c] sm:$0xff] }
  0x35   : > { %464 = vst [vmem:[%s17166_s28 + $0x250] sm:$0xff] %v463_v2  ;;  %466 = vst [vmem:[%s17166_s28 + $0x258] sm:$0xff] %v465_v3  ;;  %v469_v5 = vld [vmem:[%s17161_s27 + $0x734] sm:$0xff]  ;;  %v471_v6 = vld [vmem:[%s17161_s27 + $0x73c] sm:$0xff] }
  0x36   : > { %468 = vst [vmem:[%s17166_s28 + $0x264] sm:$0xff] %v467_v4  ;;  %v473_v7 = vld [vmem:[%s17161_s27 + $0x744] sm:$0xff]  ;;  %470 = vst [vmem:[%s17166_s28 + $0x26c] sm:$0xff] %v469_v5  ;;  %v475_v8 = vld [vmem:[%s17161_s27 + $0x798] sm:$0xff] }
  0x37   : > { %472 = vst [vmem:[%s17166_s28 + $0x274] sm:$0xff] %v471_v6  ;;  %474 = vst [vmem:[%s17166_s28 + $0x27c] sm:$0xff] %v473_v7  ;;  %v477_v9 = vld [vmem:[%s17161_s27 + $0x7a0] sm:$0xff]  ;;  %v479_v10 = vld [vmem:[%s17161_s27 + $0x7a8] sm:$0xff] }
  0x38   : > { %476 = vst [vmem:[%s17166_s28 + $0x288] sm:$0xff] %v475_v8  ;;  %478 = vst [vmem:[%s17166_s28 + $0x290] sm:$0xff] %v477_v9  ;;  %v481_v11 = vld [vmem:[%s17161_s27 + $0x7b0] sm:$0xff]  ;;  %v483_v12 = vld [vmem:[%s17161_s27 + $0x804] sm:$0xff] }
  0x39   : > { %480 = vst [vmem:[%s17166_s28 + $0x298] sm:$0xff] %v479_v10  ;;  %v485_v13 = vld [vmem:[%s17161_s27 + $0x80c] sm:$0xff]  ;;  %482 = vst [vmem:[%s17166_s28 + $0x2a0] sm:$0xff] %v481_v11  ;;  %v487_v14 = vld [vmem:[%s17161_s27 + $0x814] sm:$0xff] }
  0x3a   : > { %484 = vst [vmem:[%s17166_s28 + $0x2ac] sm:$0xff] %v483_v12  ;;  %486 = vst [vmem:[%s17166_s28 + $0x2b4] sm:$0xff] %v485_v13  ;;  %v489_v15 = vld [vmem:[%s17161_s27 + $0x81c] sm:$0xff]  ;;  %v491_v16 = vld [vmem:[%s17161_s27 + $0x870] sm:$0xff] }
  0x3b   : > { %488 = vst [vmem:[%s17166_s28 + $0x2bc] sm:$0xff] %v487_v14  ;;  %490 = vst [vmem:[%s17166_s28 + $0x2c4] sm:$0xff] %v489_v15  ;;  %v493_v17 = vld [vmem:[%s17161_s27 + $0x878] sm:$0xff]  ;;  %v495_v18 = vld [vmem:[%s17161_s27 + $0x880] sm:$0xff] }
  0x3c   : > { %492 = vst [vmem:[%s17166_s28 + $0x2d0] sm:$0xff] %v491_v16  ;;  %v497_v19 = vld [vmem:[%s17161_s27 + $0x888] sm:$0xff]  ;;  %494 = vst [vmem:[%s17166_s28 + $0x2d8] sm:$0xff] %v493_v17  ;;  %v499_v20 = vld [vmem:[%s17161_s27 + $0x8dc] sm:$0xff] }
  0x3d   : > { %496 = vst [vmem:[%s17166_s28 + $0x2e0] sm:$0xff] %v495_v18  ;;  %498 = vst [vmem:[%s17166_s28 + $0x2e8] sm:$0xff] %v497_v19  ;;  %v501_v21 = vld [vmem:[%s17161_s27 + $0x8e4] sm:$0xff]  ;;  %v503_v22 = vld [vmem:[%s17161_s27 + $0x8ec] sm:$0xff] }
  0x3e   : > { %500 = vst [vmem:[%s17166_s28 + $0x2f4] sm:$0xff] %v499_v20  ;;  %502 = vst [vmem:[%s17166_s28 + $0x2fc] sm:$0xff] %v501_v21  ;;  %v505_v23 = vld [vmem:[%s17161_s27 + $0x8f4] sm:$0xff]  ;;  %v507_v24 = vld [vmem:[%s17161_s27 + $0x948] sm:$0xff] }
  0x3f   : > { %504 = vst [vmem:[%s17166_s28 + $0x304] sm:$0xff] %v503_v22  ;;  %v509_v25 = vld [vmem:[%s17161_s27 + $0x950] sm:$0xff]  ;;  %506 = vst [vmem:[%s17166_s28 + $0x30c] sm:$0xff] %v505_v23  ;;  %v511_v26 = vld [vmem:[%s17161_s27 + $0x958] sm:$0xff] }
  0x40   : > { %508 = vst [vmem:[%s17166_s28 + $0x318] sm:$0xff] %v507_v24  ;;  %510 = vst [vmem:[%s17166_s28 + $0x320] sm:$0xff] %v509_v25  ;;  %v513_v27 = vld [vmem:[%s17161_s27 + $0x960] sm:$0xff]  ;;  %v515_v28 = vld [vmem:[%s17161_s27 + $0x9b4] sm:$0xff] }
  0x41   : > { %512 = vst [vmem:[%s17166_s28 + $0x328] sm:$0xff] %v511_v26  ;;  %514 = vst [vmem:[%s17166_s28 + $0x330] sm:$0xff] %v513_v27  ;;  %v517_v29 = vld [vmem:[%s17161_s27 + $0x9bc] sm:$0xff]  ;;  %v519_v30 = vld [vmem:[%s17161_s27 + $0x9c4] sm:$0xff] }
  0x42   : > { %516 = vst [vmem:[%s17166_s28 + $0x33c] sm:$0xff] %v515_v28  ;;  %v521_v31 = vld [vmem:[%s17161_s27 + $0x9cc] sm:$0xff]  ;;  %518 = vst [vmem:[%s17166_s28 + $0x344] sm:$0xff] %v517_v29  ;;  %v523_v32 = vld [vmem:[%s17161_s27 + $0xa20] sm:$0xff] }
  0x43   : > { %520 = vst [vmem:[%s17166_s28 + $0x34c] sm:$0xff] %v519_v30  ;;  %522 = vst [vmem:[%s17166_s28 + $0x354] sm:$0xff] %v521_v31  ;;  %v525_v33 = vld [vmem:[%s17161_s27 + $0xa28] sm:$0xff]  ;;  %v527_v34 = vld [vmem:[%s17161_s27 + $0xa30] sm:$0xff] }
  0x44   : > { %524 = vst [vmem:[%s17166_s28 + $0x360] sm:$0xff] %v523_v32  ;;  %526 = vst [vmem:[%s17166_s28 + $0x368] sm:$0xff] %v525_v33  ;;  %v529_v35 = vld [vmem:[%s17161_s27 + $0xa38] sm:$0xff]  ;;  %v531_v36 = vld [vmem:[%s17161_s27 + $0xa8c] sm:$0xff] }
  0x45   : > { %528 = vst [vmem:[%s17166_s28 + $0x370] sm:$0xff] %v527_v34  ;;  %v533_v37 = vld [vmem:[%s17161_s27 + $0xa94] sm:$0xff]  ;;  %530 = vst [vmem:[%s17166_s28 + $0x378] sm:$0xff] %v529_v35  ;;  %v535_v38 = vld [vmem:[%s17161_s27 + $0xa9c] sm:$0xff] }
  0x46   : > { %532 = vst [vmem:[%s17166_s28 + $0x384] sm:$0xff] %v531_v36  ;;  %534 = vst [vmem:[%s17166_s28 + $0x38c] sm:$0xff] %v533_v37  ;;  %v537_v39 = vld [vmem:[%s17161_s27 + $0xaa4] sm:$0xff]  ;;  %v539_v40 = vld [vmem:[%s17161_s27 + $0xaf8] sm:$0xff] }
  0x47   : > { %536 = vst [vmem:[%s17166_s28 + $0x394] sm:$0xff] %v535_v38  ;;  %538 = vst [vmem:[%s17166_s28 + $0x39c] sm:$0xff] %v537_v39  ;;  %v541_v41 = vld [vmem:[%s17161_s27 + $0xb00] sm:$0xff]  ;;  %v543_v42 = vld [vmem:[%s17161_s27 + $0xb08] sm:$0xff] }
  0x48   : > { %540 = vst [vmem:[%s17166_s28 + $0x3a8] sm:$0xff] %v539_v40  ;;  %v545_v43 = vld [vmem:[%s17161_s27 + $0xb10] sm:$0xff]  ;;  %542 = vst [vmem:[%s17166_s28 + $0x3b0] sm:$0xff] %v541_v41  ;;  %v547_v44 = vld [vmem:[%s17161_s27 + $0xb64] sm:$0xff] }
  0x49   : > { %544 = vst [vmem:[%s17166_s28 + $0x3b8] sm:$0xff] %v543_v42  ;;  %546 = vst [vmem:[%s17166_s28 + $0x3c0] sm:$0xff] %v545_v43  ;;  %v549_v45 = vld [vmem:[%s17161_s27 + $0xb6c] sm:$0xff]  ;;  %v551_v46 = vld [vmem:[%s17161_s27 + $0xb74] sm:$0xff] }
  0x4a   : > { %548 = vst [vmem:[%s17166_s28 + $0x3cc] sm:$0xff] %v547_v44  ;;  %550 = vst [vmem:[%s17166_s28 + $0x3d4] sm:$0xff] %v549_v45  ;;  %v553_v47 = vld [vmem:[%s17161_s27 + $0xb7c] sm:$0xff]  ;;  %v555_v48 = vld [vmem:[%s17161_s27 + $0xbd0] sm:$0xff] }
  0x4b   : > { %552 = vst [vmem:[%s17166_s28 + $0x3dc] sm:$0xff] %v551_v46  ;;  %v557_v49 = vld [vmem:[%s17161_s27 + $0xbd8] sm:$0xff]  ;;  %554 = vst [vmem:[%s17166_s28 + $0x3e4] sm:$0xff] %v553_v47  ;;  %v559_v50 = vld [vmem:[%s17161_s27 + $0xbe0] sm:$0xff] }
  0x4c   : > { %556 = vst [vmem:[%s17166_s28 + $0x3f0] sm:$0xff] %v555_v48  ;;  %558 = vst [vmem:[%s17166_s28 + $0x3f8] sm:$0xff] %v557_v49  ;;  %v561_v51 = vld [vmem:[%s17161_s27 + $0xbe8] sm:$0xff]  ;;  %v563_v52 = vld [vmem:[%s17161_s27 + $0xc3c] sm:$0xff] }
  0x4d   : > { %560 = vst [vmem:[%s17166_s28 + $0x400] sm:$0xff] %v559_v50  ;;  %562 = vst [vmem:[%s17166_s28 + $0x408] sm:$0xff] %v561_v51  ;;  %v565_v53 = vld [vmem:[%s17161_s27 + $0xc44] sm:$0xff]  ;;  %v567_v54 = vld [vmem:[%s17161_s27 + $0xc4c] sm:$0xff] }
  0x4e   : > { %564 = vst [vmem:[%s17166_s28 + $0x414] sm:$0xff] %v563_v52  ;;  %v569_v55 = vld [vmem:[%s17161_s27 + $0xc54] sm:$0xff]  ;;  %566 = vst [vmem:[%s17166_s28 + $0x41c] sm:$0xff] %v565_v53  ;;  %v571_v56 = vld [vmem:[%s17161_s27 + $0xca8] sm:$0xff] }
  0x4f   : > { %568 = vst [vmem:[%s17166_s28 + $0x424] sm:$0xff] %v567_v54  ;;  %570 = vst [vmem:[%s17166_s28 + $0x42c] sm:$0xff] %v569_v55  ;;  %v573_v57 = vld [vmem:[%s17161_s27 + $0xcb0] sm:$0xff]  ;;  %v575_v58 = vld [vmem:[%s17161_s27 + $0xcb8] sm:$0xff] }
  0x50   : > { %572 = vst [vmem:[%s17166_s28 + $0x438] sm:$0xff] %v571_v56  ;;  %574 = vst [vmem:[%s17166_s28 + $0x440] sm:$0xff] %v573_v57  ;;  %v577_v59 = vld [vmem:[%s17161_s27 + $0xcc0] sm:$0xff]  ;;  %v579_v60 = vld [vmem:[%s17161_s27 + $0xd14] sm:$0xff] }
  0x51   : > { %576 = vst [vmem:[%s17166_s28 + $0x448] sm:$0xff] %v575_v58  ;;  %v581_v61 = vld [vmem:[%s17161_s27 + $0xd1c] sm:$0xff]  ;;  %578 = vst [vmem:[%s17166_s28 + $0x450] sm:$0xff] %v577_v59  ;;  %v583_v62 = vld [vmem:[%s17161_s27 + $0xd24] sm:$0xff] }
  0x52   : > { %580 = vst [vmem:[%s17166_s28 + $0x45c] sm:$0xff] %v579_v60  ;;  %582 = vst [vmem:[%s17166_s28 + $0x464] sm:$0xff] %v581_v61  ;;  %v585_v63 = vld [vmem:[%s17161_s27 + $0xd2c] sm:$0xff]  ;;  %v587_v0 = vld [vmem:[%s17161_s27 + $0xd80] sm:$0xff] }
  0x53   : > { %584 = vst [vmem:[%s17166_s28 + $0x46c] sm:$0xff] %v583_v62  ;;  %586 = vst [vmem:[%s17166_s28 + $0x474] sm:$0xff] %v585_v63  ;;  %v589_v1 = vld [vmem:[%s17161_s27 + $0xd88] sm:$0xff]  ;;  %v591_v2 = vld [vmem:[%s17161_s27 + $0xd90] sm:$0xff] }
  0x54   : > { %588 = vst [vmem:[%s17166_s28 + $0x480] sm:$0xff] %v587_v0  ;;  %v593_v3 = vld [vmem:[%s17161_s27 + $0xd98] sm:$0xff]  ;;  %590 = vst [vmem:[%s17166_s28 + $0x488] sm:$0xff] %v589_v1  ;;  %v595_v4 = vld [vmem:[%s17161_s27 + $0xdec] sm:$0xff] }
  0x55   : > { %592 = vst [vmem:[%s17166_s28 + $0x490] sm:$0xff] %v591_v2  ;;  %594 = vst [vmem:[%s17166_s28 + $0x498] sm:$0xff] %v593_v3  ;;  %v597_v5 = vld [vmem:[%s17161_s27 + $0xdf4] sm:$0xff]  ;;  %v599_v6 = vld [vmem:[%s17161_s27 + $0xdfc] sm:$0xff] }
  0x56   : > { %596 = vst [vmem:[%s17166_s28 + $0x4a4] sm:$0xff] %v595_v4  ;;  %598 = vst [vmem:[%s17166_s28 + $0x4ac] sm:$0xff] %v597_v5  ;;  %v601_v7 = vld [vmem:[%s17161_s27 + $0xe04] sm:$0xff]  ;;  %v603_v8 = vld [vmem:[%s17161_s27 + $0xe58] sm:$0xff] }
  0x57   : > { %600 = vst [vmem:[%s17166_s28 + $0x4b4] sm:$0xff] %v599_v6  ;;  %v605_v9 = vld [vmem:[%s17161_s27 + $0xe60] sm:$0xff]  ;;  %602 = vst [vmem:[%s17166_s28 + $0x4bc] sm:$0xff] %v601_v7  ;;  %v607_v10 = vld [vmem:[%s17161_s27 + $0xe68] sm:$0xff] }
  0x58   : > { %604 = vst [vmem:[%s17166_s28 + $0x4c8] sm:$0xff] %v603_v8  ;;  %606 = vst [vmem:[%s17166_s28 + $0x4d0] sm:$0xff] %v605_v9  ;;  %v609_v11 = vld [vmem:[%s17161_s27 + $0xe70] sm:$0xff]  ;;  %v611_v12 = vld [vmem:[%s17161_s27 + $0xec4] sm:$0xff] }
  0x59   : > { %608 = vst [vmem:[%s17166_s28 + $0x4d8] sm:$0xff] %v607_v10  ;;  %610 = vst [vmem:[%s17166_s28 + $0x4e0] sm:$0xff] %v609_v11  ;;  %v613_v13 = vld [vmem:[%s17161_s27 + $0xecc] sm:$0xff]  ;;  %v615_v14 = vld [vmem:[%s17161_s27 + $0xed4] sm:$0xff] }
  0x5a   : > { %612 = vst [vmem:[%s17166_s28 + $0x4ec] sm:$0xff] %v611_v12  ;;  %v617_v15 = vld [vmem:[%s17161_s27 + $0xedc] sm:$0xff]  ;;  %614 = vst [vmem:[%s17166_s28 + $0x4f4] sm:$0xff] %v613_v13  ;;  %v619_v16 = vld [vmem:[%s17161_s27 + $0xf30] sm:$0xff] }
  0x5b   : > { %616 = vst [vmem:[%s17166_s28 + $0x4fc] sm:$0xff] %v615_v14  ;;  %618 = vst [vmem:[%s17166_s28 + $0x504] sm:$0xff] %v617_v15  ;;  %v621_v17 = vld [vmem:[%s17161_s27 + $0xf38] sm:$0xff]  ;;  %v623_v18 = vld [vmem:[%s17161_s27 + $0xf40] sm:$0xff] }
  0x5c   : > { %620 = vst [vmem:[%s17166_s28 + $0x510] sm:$0xff] %v619_v16  ;;  %622 = vst [vmem:[%s17166_s28 + $0x518] sm:$0xff] %v621_v17  ;;  %v625_v19 = vld [vmem:[%s17161_s27 + $0xf48] sm:$0xff]  ;;  %v627_v20 = vld [vmem:[%s17161_s27 + $0xf9c] sm:$0xff] }
  0x5d   : > { %624 = vst [vmem:[%s17166_s28 + $0x520] sm:$0xff] %v623_v18  ;;  %v629_v21 = vld [vmem:[%s17161_s27 + $0xfa4] sm:$0xff]  ;;  %626 = vst [vmem:[%s17166_s28 + $0x528] sm:$0xff] %v625_v19  ;;  %v631_v22 = vld [vmem:[%s17161_s27 + $0xfac] sm:$0xff] }
  0x5e   : > { %628 = vst [vmem:[%s17166_s28 + $0x534] sm:$0xff] %v627_v20  ;;  %630 = vst [vmem:[%s17166_s28 + $0x53c] sm:$0xff] %v629_v21  ;;  %v633_v23 = vld [vmem:[%s17161_s27 + $0xfb4] sm:$0xff]  ;;  %v635_v24 = vld [vmem:[%s17161_s27 + $0x1008] sm:$0xff] }
  0x5f   : > { %632 = vst [vmem:[%s17166_s28 + $0x544] sm:$0xff] %v631_v22  ;;  %634 = vst [vmem:[%s17166_s28 + $0x54c] sm:$0xff] %v633_v23  ;;  %v637_v25 = vld [vmem:[%s17161_s27 + $0x1010] sm:$0xff]  ;;  %v639_v26 = vld [vmem:[%s17161_s27 + $0x1018] sm:$0xff] }
  0x60   : > { %636 = vst [vmem:[%s17166_s28 + $0x558] sm:$0xff] %v635_v24  ;;  %v641_v27 = vld [vmem:[%s17161_s27 + $0x1020] sm:$0xff]  ;;  %638 = vst [vmem:[%s17166_s28 + $0x560] sm:$0xff] %v637_v25  ;;  %v643_v28 = vld [vmem:[%s17161_s27 + $0x1074] sm:$0xff] }
  0x61   : > { %640 = vst [vmem:[%s17166_s28 + $0x568] sm:$0xff] %v639_v26  ;;  %642 = vst [vmem:[%s17166_s28 + $0x570] sm:$0xff] %v641_v27  ;;  %v645_v29 = vld [vmem:[%s17161_s27 + $0x107c] sm:$0xff]  ;;  %v647_v30 = vld [vmem:[%s17161_s27 + $0x1084] sm:$0xff] }
  0x62   : > { %644 = vst [vmem:[%s17166_s28 + $0x57c] sm:$0xff] %v643_v28  ;;  %646 = vst [vmem:[%s17166_s28 + $0x584] sm:$0xff] %v645_v29  ;;  %v649_v31 = vld [vmem:[%s17161_s27 + $0x108c] sm:$0xff]  ;;  %v651_v32 = vld [vmem:[%s17161_s27 + $0x10e0] sm:$0xff] }
  0x63   : > { %648 = vst [vmem:[%s17166_s28 + $0x58c] sm:$0xff] %v647_v30  ;;  %v653_v33 = vld [vmem:[%s17161_s27 + $0x10e8] sm:$0xff]  ;;  %650 = vst [vmem:[%s17166_s28 + $0x594] sm:$0xff] %v649_v31  ;;  %v655_v34 = vld [vmem:[%s17161_s27 + $0x10f0] sm:$0xff] }
  0x64   : > { %652 = vst [vmem:[%s17166_s28 + $0x5a0] sm:$0xff] %v651_v32  ;;  %654 = vst [vmem:[%s17166_s28 + $0x5a8] sm:$0xff] %v653_v33  ;;  %v657_v35 = vld [vmem:[%s17161_s27 + $0x10f8] sm:$0xff]  ;;  %v659_v36 = vld [vmem:[%s17161_s27 + $0x114c] sm:$0xff] }
  0x65   : > { %656 = vst [vmem:[%s17166_s28 + $0x5b0] sm:$0xff] %v655_v34  ;;  %658 = vst [vmem:[%s17166_s28 + $0x5b8] sm:$0xff] %v657_v35  ;;  %v661_v37 = vld [vmem:[%s17161_s27 + $0x1154] sm:$0xff]  ;;  %v663_v38 = vld [vmem:[%s17161_s27 + $0x115c] sm:$0xff] }
  0x66   : > { %660 = vst [vmem:[%s17166_s28 + $0x5c4] sm:$0xff] %v659_v36  ;;  %v665_v39 = vld [vmem:[%s17161_s27 + $0x1164] sm:$0xff]  ;;  %662 = vst [vmem:[%s17166_s28 + $0x5cc] sm:$0xff] %v661_v37  ;;  %v667_v40 = vld [vmem:[%s17161_s27 + $0x11b8] sm:$0xff] }
  0x67   : > { %664 = vst [vmem:[%s17166_s28 + $0x5d4] sm:$0xff] %v663_v38  ;;  %666 = vst [vmem:[%s17166_s28 + $0x5dc] sm:$0xff] %v665_v39  ;;  %v669_v41 = vld [vmem:[%s17161_s27 + $0x11c0] sm:$0xff]  ;;  %v671_v42 = vld [vmem:[%s17161_s27 + $0x11c8] sm:$0xff] }
  0x68   : > { %668 = vst [vmem:[%s17166_s28 + $0x5e8] sm:$0xff] %v667_v40  ;;  %670 = vst [vmem:[%s17166_s28 + $0x5f0] sm:$0xff] %v669_v41  ;;  %v673_v43 = vld [vmem:[%s17161_s27 + $0x11d0] sm:$0xff]  ;;  %v675_v44 = vld [vmem:[%s17161_s27 + $0x1224] sm:$0xff] }
  0x69   : > { %672 = vst [vmem:[%s17166_s28 + $0x5f8] sm:$0xff] %v671_v42  ;;  %v677_v45 = vld [vmem:[%s17161_s27 + $0x122c] sm:$0xff]  ;;  %674 = vst [vmem:[%s17166_s28 + $0x600] sm:$0xff] %v673_v43  ;;  %v679_v46 = vld [vmem:[%s17161_s27 + $0x1234] sm:$0xff] }
  0x6a   : > { %676 = vst [vmem:[%s17166_s28 + $0x60c] sm:$0xff] %v675_v44  ;;  %678 = vst [vmem:[%s17166_s28 + $0x614] sm:$0xff] %v677_v45  ;;  %v681_v47 = vld [vmem:[%s17161_s27 + $0x123c] sm:$0xff]  ;;  %v683_v48 = vld [vmem:[%s17161_s27 + $0x1290] sm:$0xff] }
  0x6b   : > { %680 = vst [vmem:[%s17166_s28 + $0x61c] sm:$0xff] %v679_v46  ;;  %682 = vst [vmem:[%s17166_s28 + $0x624] sm:$0xff] %v681_v47  ;;  %v685_v49 = vld [vmem:[%s17161_s27 + $0x1298] sm:$0xff]  ;;  %v687_v50 = vld [vmem:[%s17161_s27 + $0x12a0] sm:$0xff] }
  0x6c   : > { %684 = vst [vmem:[%s17166_s28 + $0x630] sm:$0xff] %v683_v48  ;;  %v689_v51 = vld [vmem:[%s17161_s27 + $0x12a8] sm:$0xff]  ;;  %686 = vst [vmem:[%s17166_s28 + $0x638] sm:$0xff] %v685_v49  ;;  %v691_v52 = vld [vmem:[%s17161_s27 + $0x12fc] sm:$0xff] }
  0x6d   : > { %688 = vst [vmem:[%s17166_s28 + $0x640] sm:$0xff] %v687_v50  ;;  %690 = vst [vmem:[%s17166_s28 + $0x648] sm:$0xff] %v689_v51  ;;  %v693_v53 = vld [vmem:[%s17161_s27 + $0x1304] sm:$0xff]  ;;  %v695_v54 = vld [vmem:[%s17161_s27 + $0x130c] sm:$0xff] }
  0x6e   : > { %692 = vst [vmem:[%s17166_s28 + $0x654] sm:$0xff] %v691_v52  ;;  %694 = vst [vmem:[%s17166_s28 + $0x65c] sm:$0xff] %v693_v53  ;;  %v697_v55 = vld [vmem:[%s17161_s27 + $0x1314] sm:$0xff]  ;;  %v699_v56 = vld [vmem:[%s17161_s27 + $0x1368] sm:$0xff] }
  0x6f   : > { %696 = vst [vmem:[%s17166_s28 + $0x664] sm:$0xff] %v695_v54  ;;  %v701_v57 = vld [vmem:[%s17161_s27 + $0x1370] sm:$0xff]  ;;  %698 = vst [vmem:[%s17166_s28 + $0x66c] sm:$0xff] %v697_v55  ;;  %v703_v58 = vld [vmem:[%s17161_s27 + $0x1378] sm:$0xff] }
  0x70   : > { %700 = vst [vmem:[%s17166_s28 + $0x678] sm:$0xff] %v699_v56  ;;  %702 = vst [vmem:[%s17166_s28 + $0x680] sm:$0xff] %v701_v57  ;;  %v705_v59 = vld [vmem:[%s17161_s27 + $0x1380] sm:$0xff]  ;;  %v707_v60 = vld [vmem:[%s17161_s27 + $0x13d4] sm:$0xff] }
  0x71   : > { %704 = vst [vmem:[%s17166_s28 + $0x688] sm:$0xff] %v703_v58  ;;  %706 = vst [vmem:[%s17166_s28 + $0x690] sm:$0xff] %v705_v59  ;;  %v709_v61 = vld [vmem:[%s17161_s27 + $0x13dc] sm:$0xff]  ;;  %v711_v62 = vld [vmem:[%s17161_s27 + $0x13e4] sm:$0xff] }
  0x72   : > { %708 = vst [vmem:[%s17166_s28 + $0x69c] sm:$0xff] %v707_v60  ;;  %v713_v63 = vld [vmem:[%s17161_s27 + $0x13ec] sm:$0xff]  ;;  %710 = vst [vmem:[%s17166_s28 + $0x6a4] sm:$0xff] %v709_v61  ;;  %v715_v0 = vld [vmem:[%s17161_s27 + $0x1440] sm:$0xff] }
  0x73   : > { %712 = vst [vmem:[%s17166_s28 + $0x6ac] sm:$0xff] %v711_v62  ;;  %714 = vst [vmem:[%s17166_s28 + $0x6b4] sm:$0xff] %v713_v63  ;;  %v717_v1 = vld [vmem:[%s17161_s27 + $0x1448] sm:$0xff]  ;;  %v719_v2 = vld [vmem:[%s17161_s27 + $0x1450] sm:$0xff] }
  0x74   : > { %716 = vst [vmem:[%s17166_s28 + $0x6c0] sm:$0xff] %v715_v0  ;;  %718 = vst [vmem:[%s17166_s28 + $0x6c8] sm:$0xff] %v717_v1  ;;  %v721_v3 = vld [vmem:[%s17161_s27 + $0x1458] sm:$0xff]  ;;  %v723_v4 = vld [vmem:[%s17161_s27 + $0x14ac] sm:$0xff] }
  0x75   : > { %720 = vst [vmem:[%s17166_s28 + $0x6d0] sm:$0xff] %v719_v2  ;;  %v725_v5 = vld [vmem:[%s17161_s27 + $0x14b4] sm:$0xff]  ;;  %722 = vst [vmem:[%s17166_s28 + $0x6d8] sm:$0xff] %v721_v3  ;;  %v727_v6 = vld [vmem:[%s17161_s27 + $0x14bc] sm:$0xff] }
  0x76   : > { %724 = vst [vmem:[%s17166_s28 + $0x6e4] sm:$0xff] %v723_v4  ;;  %726 = vst [vmem:[%s17166_s28 + $0x6ec] sm:$0xff] %v725_v5  ;;  %v729_v7 = vld [vmem:[%s17161_s27 + $0x14c4] sm:$0xff]  ;;  %v731_v8 = vld [vmem:[%s17161_s27 + $0x1518] sm:$0xff] }
  0x77   : > { %728 = vst [vmem:[%s17166_s28 + $0x6f4] sm:$0xff] %v727_v6  ;;  %730 = vst [vmem:[%s17166_s28 + $0x6fc] sm:$0xff] %v729_v7  ;;  %v733_v9 = vld [vmem:[%s17161_s27 + $0x1520] sm:$0xff]  ;;  %v735_v10 = vld [vmem:[%s17161_s27 + $0x1528] sm:$0xff] }
  0x78   : > { %732 = vst [vmem:[%s17166_s28 + $0x708] sm:$0xff] %v731_v8  ;;  %v737_v11 = vld [vmem:[%s17161_s27 + $0x1530] sm:$0xff]  ;;  %734 = vst [vmem:[%s17166_s28 + $0x710] sm:$0xff] %v733_v9  ;;  %v739_v12 = vld [vmem:[%s17161_s27 + $0x1584] sm:$0xff] }
  0x79   : > { %736 = vst [vmem:[%s17166_s28 + $0x718] sm:$0xff] %v735_v10  ;;  %738 = vst [vmem:[%s17166_s28 + $0x720] sm:$0xff] %v737_v11  ;;  %v741_v13 = vld [vmem:[%s17161_s27 + $0x158c] sm:$0xff]  ;;  %v743_v14 = vld [vmem:[%s17161_s27 + $0x1594] sm:$0xff] }
  0x7a   : > { %740 = vst [vmem:[%s17166_s28 + $0x72c] sm:$0xff] %v739_v12  ;;  %742 = vst [vmem:[%s17166_s28 + $0x734] sm:$0xff] %v741_v13  ;;  %v745_v15 = vld [vmem:[%s17161_s27 + $0x159c] sm:$0xff]  ;;  %v747_v16 = vld [vmem:[%s17161_s27 + $0x15f0] sm:$0xff] }
  0x7b   : > { %744 = vst [vmem:[%s17166_s28 + $0x73c] sm:$0xff] %v743_v14  ;;  %v749_v17 = vld [vmem:[%s17161_s27 + $0x15f8] sm:$0xff]  ;;  %746 = vst [vmem:[%s17166_s28 + $0x744] sm:$0xff] %v745_v15  ;;  %v751_v18 = vld [vmem:[%s17161_s27 + $0x1600] sm:$0xff] }
  0x7c   : > { %748 = vst [vmem:[%s17166_s28 + $0x750] sm:$0xff] %v747_v16  ;;  %750 = vst [vmem:[%s17166_s28 + $0x758] sm:$0xff] %v749_v17  ;;  %v753_v19 = vld [vmem:[%s17161_s27 + $0x1608] sm:$0xff]  ;;  %v755_v20 = vld [vmem:[%s17161_s27 + $0x165c] sm:$0xff] }
  0x7d   : > { %752 = vst [vmem:[%s17166_s28 + $0x760] sm:$0xff] %v751_v18  ;;  %754 = vst [vmem:[%s17166_s28 + $0x768] sm:$0xff] %v753_v19  ;;  %v757_v21 = vld [vmem:[%s17161_s27 + $0x1664] sm:$0xff]  ;;  %v759_v22 = vld [vmem:[%s17161_s27 + $0x166c] sm:$0xff] }
  0x7e   : > { %756 = vst [vmem:[%s17166_s28 + $0x774] sm:$0xff] %v755_v20  ;;  %v761_v23 = vld [vmem:[%s17161_s27 + $0x1674] sm:$0xff]  ;;  %758 = vst [vmem:[%s17166_s28 + $0x77c] sm:$0xff] %v757_v21  ;;  %v763_v24 = vld [vmem:[%s17161_s27 + $0x16c8] sm:$0xff] }
  0x7f   : > { %760 = vst [vmem:[%s17166_s28 + $0x784] sm:$0xff] %v759_v22  ;;  %762 = vst [vmem:[%s17166_s28 + $0x78c] sm:$0xff] %v761_v23  ;;  %v765_v25 = vld [vmem:[%s17161_s27 + $0x16d0] sm:$0xff]  ;;  %v767_v26 = vld [vmem:[%s17161_s27 + $0x16d8] sm:$0xff] }
  0x80   : > { %764 = vst [vmem:[%s17166_s28 + $0x798] sm:$0xff] %v763_v24  ;;  %766 = vst [vmem:[%s17166_s28 + $0x7a0] sm:$0xff] %v765_v25  ;;  %v769_v27 = vld [vmem:[%s17161_s27 + $0x16e0] sm:$0xff]  ;;  %v771_v28 = vld [vmem:[%s17161_s27 + $0x1734] sm:$0xff] }
  0x81   : > { %768 = vst [vmem:[%s17166_s28 + $0x7a8] sm:$0xff] %v767_v26  ;;  %v773_v29 = vld [vmem:[%s17161_s27 + $0x173c] sm:$0xff]  ;;  %770 = vst [vmem:[%s17166_s28 + $0x7b0] sm:$0xff] %v769_v27  ;;  %v775_v30 = vld [vmem:[%s17161_s27 + $0x1744] sm:$0xff] }
  0x82   : > { %772 = vst [vmem:[%s17166_s28 + $0x7bc] sm:$0xff] %v771_v28  ;;  %774 = vst [vmem:[%s17166_s28 + $0x7c4] sm:$0xff] %v773_v29  ;;  %v777_v31 = vld [vmem:[%s17161_s27 + $0x174c] sm:$0xff]  ;;  %v779_v32 = vld [vmem:[%s17161_s27 + $0x17a0] sm:$0xff] }
  0x83   : > { %776 = vst [vmem:[%s17166_s28 + $0x7cc] sm:$0xff] %v775_v30  ;;  %778 = vst [vmem:[%s17166_s28 + $0x7d4] sm:$0xff] %v777_v31  ;;  %v781_v33 = vld [vmem:[%s17161_s27 + $0x17a8] sm:$0xff]  ;;  %v783_v34 = vld [vmem:[%s17161_s27 + $0x17b0] sm:$0xff] }
  0x84   : > { %780 = vst [vmem:[%s17166_s28 + $0x7e0] sm:$0xff] %v779_v32  ;;  %v785_v35 = vld [vmem:[%s17161_s27 + $0x17b8] sm:$0xff]  ;;  %782 = vst [vmem:[%s17166_s28 + $0x7e8] sm:$0xff] %v781_v33  ;;  %v787_v36 = vld [vmem:[%s17161_s27 + $0x180c] sm:$0xff] }
  0x85   : > { %784 = vst [vmem:[%s17166_s28 + $0x7f0] sm:$0xff] %v783_v34  ;;  %786 = vst [vmem:[%s17166_s28 + $0x7f8] sm:$0xff] %v785_v35  ;;  %v789_v37 = vld [vmem:[%s17161_s27 + $0x1814] sm:$0xff]  ;;  %v791_v38 = vld [vmem:[%s17161_s27 + $0x181c] sm:$0xff] }
  0x86   : > { %788 = vst [vmem:[%s17166_s28 + $0x804] sm:$0xff] %v787_v36  ;;  %790 = vst [vmem:[%s17166_s28 + $0x80c] sm:$0xff] %v789_v37  ;;  %v793_v39 = vld [vmem:[%s17161_s27 + $0x1824] sm:$0xff]  ;;  %v795_v40 = vld [vmem:[%s17161_s27 + $0x1878] sm:$0xff] }
  0x87   : > { %792 = vst [vmem:[%s17166_s28 + $0x814] sm:$0xff] %v791_v38  ;;  %v797_v41 = vld [vmem:[%s17161_s27 + $0x1880] sm:$0xff]  ;;  %794 = vst [vmem:[%s17166_s28 + $0x81c] sm:$0xff] %v793_v39  ;;  %v799_v42 = vld [vmem:[%s17161_s27 + $0x1888] sm:$0xff] }
  0x88   : > { %796 = vst [vmem:[%s17166_s28 + $0x828] sm:$0xff] %v795_v40  ;;  %798 = vst [vmem:[%s17166_s28 + $0x830] sm:$0xff] %v797_v41  ;;  %v801_v43 = vld [vmem:[%s17161_s27 + $0x1890] sm:$0xff]  ;;  %v803_v44 = vld [vmem:[%s17161_s27 + $0x18e4] sm:$0xff] }
  0x89   : > { %800 = vst [vmem:[%s17166_s28 + $0x838] sm:$0xff] %v799_v42  ;;  %802 = vst [vmem:[%s17166_s28 + $0x840] sm:$0xff] %v801_v43  ;;  %v805_v45 = vld [vmem:[%s17161_s27 + $0x18ec] sm:$0xff]  ;;  %v807_v46 = vld [vmem:[%s17161_s27 + $0x18f4] sm:$0xff] }
  0x8a   : > { %804 = vst [vmem:[%s17166_s28 + $0x84c] sm:$0xff] %v803_v44  ;;  %v809_v47 = vld [vmem:[%s17161_s27 + $0x18fc] sm:$0xff]  ;;  %806 = vst [vmem:[%s17166_s28 + $0x854] sm:$0xff] %v805_v45  ;;  %v811_v48 = vld [vmem:[%s17161_s27 + $0x1950] sm:$0xff] }
  0x8b   : > { %808 = vst [vmem:[%s17166_s28 + $0x85c] sm:$0xff] %v807_v46  ;;  %810 = vst [vmem:[%s17166_s28 + $0x864] sm:$0xff] %v809_v47  ;;  %v813_v49 = vld [vmem:[%s17161_s27 + $0x1958] sm:$0xff]  ;;  %v815_v50 = vld [vmem:[%s17161_s27 + $0x1960] sm:$0xff] }
  0x8c   : > { %812 = vst [vmem:[%s17166_s28 + $0x870] sm:$0xff] %v811_v48  ;;  %814 = vst [vmem:[%s17166_s28 + $0x878] sm:$0xff] %v813_v49  ;;  %v817_v51 = vld [vmem:[%s17161_s27 + $0x1968] sm:$0xff]  ;;  %v819_v52 = vld [vmem:[%s17161_s27 + $0x19bc] sm:$0xff] }
  0x8d   : > { %816 = vst [vmem:[%s17166_s28 + $0x880] sm:$0xff] %v815_v50  ;;  %v821_v53 = vld [vmem:[%s17161_s27 + $0x19c4] sm:$0xff]  ;;  %818 = vst [vmem:[%s17166_s28 + $0x888] sm:$0xff] %v817_v51  ;;  %v823_v54 = vld [vmem:[%s17161_s27 + $0x19cc] sm:$0xff] }
  0x8e   : > { %820 = vst [vmem:[%s17166_s28 + $0x894] sm:$0xff] %v819_v52  ;;  %822 = vst [vmem:[%s17166_s28 + $0x89c] sm:$0xff] %v821_v53  ;;  %v825_v55 = vld [vmem:[%s17161_s27 + $0x19d4] sm:$0xff]  ;;  %v827_v56 = vld [vmem:[%s17161_s27 + $0x1a28] sm:$0xff] }
  0x8f   : > { %824 = vst [vmem:[%s17166_s28 + $0x8a4] sm:$0xff] %v823_v54  ;;  %826 = vst [vmem:[%s17166_s28 + $0x8ac] sm:$0xff] %v825_v55  ;;  %v829_v57 = vld [vmem:[%s17161_s27 + $0x1a30] sm:$0xff]  ;;  %v831_v58 = vld [vmem:[%s17161_s27 + $0x1a38] sm:$0xff] }
  0x90   : > { %828 = vst [vmem:[%s17166_s28 + $0x8b8] sm:$0xff] %v827_v56  ;;  %v833_v59 = vld [vmem:[%s17161_s27 + $0x1a40] sm:$0xff]  ;;  %830 = vst [vmem:[%s17166_s28 + $0x8c0] sm:$0xff] %v829_v57  ;;  %v835_v60 = vld [vmem:[%s17161_s27 + $0x1a94] sm:$0xff] }
  0x91   : > { %832 = vst [vmem:[%s17166_s28 + $0x8c8] sm:$0xff] %v831_v58  ;;  %834 = vst [vmem:[%s17166_s28 + $0x8d0] sm:$0xff] %v833_v59  ;;  %v837_v61 = vld [vmem:[%s17161_s27 + $0x1a9c] sm:$0xff]  ;;  %v839_v62 = vld [vmem:[%s17161_s27 + $0x1aa4] sm:$0xff] }
  0x92   : > { %836 = vst [vmem:[%s17166_s28 + $0x8dc] sm:$0xff] %v835_v60  ;;  %838 = vst [vmem:[%s17166_s28 + $0x8e4] sm:$0xff] %v837_v61  ;;  %v841_v63 = vld [vmem:[%s17161_s27 + $0x1aac] sm:$0xff]  ;;  %v843_v0 = vld [vmem:[%s17161_s27 + $0x1b00] sm:$0xff] }
  0x93   : > { %840 = vst [vmem:[%s17166_s28 + $0x8ec] sm:$0xff] %v839_v62  ;;  %v845_v1 = vld [vmem:[%s17161_s27 + $0x1b08] sm:$0xff]  ;;  %842 = vst [vmem:[%s17166_s28 + $0x8f4] sm:$0xff] %v841_v63  ;;  %v847_v2 = vld [vmem:[%s17161_s27 + $0x1b10] sm:$0xff] }
  0x94   : > { %844 = vst [vmem:[%s17166_s28 + $0x900] sm:$0xff] %v843_v0  ;;  %846 = vst [vmem:[%s17166_s28 + $0x908] sm:$0xff] %v845_v1  ;;  %v849_v3 = vld [vmem:[%s17161_s27 + $0x1b18] sm:$0xff]  ;;  %v851_v4 = vld [vmem:[%s17161_s27 + $0x1b6c] sm:$0xff] }
  0x95   : > { %848 = vst [vmem:[%s17166_s28 + $0x910] sm:$0xff] %v847_v2  ;;  %850 = vst [vmem:[%s17166_s28 + $0x918] sm:$0xff] %v849_v3  ;;  %v853_v5 = vld [vmem:[%s17161_s27 + $0x1b74] sm:$0xff]  ;;  %v855_v6 = vld [vmem:[%s17161_s27 + $0x1b7c] sm:$0xff] }
  0x96   : > { %852 = vst [vmem:[%s17166_s28 + $0x924] sm:$0xff] %v851_v4  ;;  %v857_v7 = vld [vmem:[%s17161_s27 + $0x1b84] sm:$0xff]  ;;  %854 = vst [vmem:[%s17166_s28 + $0x92c] sm:$0xff] %v853_v5  ;;  %v859_v8 = vld [vmem:[%s17161_s27 + $0x1bd8] sm:$0xff] }
  0x97   : > { %856 = vst [vmem:[%s17166_s28 + $0x934] sm:$0xff] %v855_v6  ;;  %858 = vst [vmem:[%s17166_s28 + $0x93c] sm:$0xff] %v857_v7  ;;  %v861_v9 = vld [vmem:[%s17161_s27 + $0x1be0] sm:$0xff]  ;;  %v863_v10 = vld [vmem:[%s17161_s27 + $0x1be8] sm:$0xff] }
  0x98   : > { %860 = vst [vmem:[%s17166_s28 + $0x948] sm:$0xff] %v859_v8  ;;  %862 = vst [vmem:[%s17166_s28 + $0x950] sm:$0xff] %v861_v9  ;;  %v865_v11 = vld [vmem:[%s17161_s27 + $0x1bf0] sm:$0xff]  ;;  %v867_v12 = vld [vmem:[%s17161_s27 + $0x1c44] sm:$0xff] }
  0x99   : > { %864 = vst [vmem:[%s17166_s28 + $0x958] sm:$0xff] %v863_v10  ;;  %v869_v13 = vld [vmem:[%s17161_s27 + $0x1c4c] sm:$0xff]  ;;  %866 = vst [vmem:[%s17166_s28 + $0x960] sm:$0xff] %v865_v11  ;;  %v871_v14 = vld [vmem:[%s17161_s27 + $0x1c54] sm:$0xff] }
  0x9a   : > { %868 = vst [vmem:[%s17166_s28 + $0x96c] sm:$0xff] %v867_v12  ;;  %870 = vst [vmem:[%s17166_s28 + $0x974] sm:$0xff] %v869_v13  ;;  %v873_v15 = vld [vmem:[%s17161_s27 + $0x1c5c] sm:$0xff]  ;;  %v875_v16 = vld [vmem:[%s17161_s27 + $0x1cb0] sm:$0xff] }
  0x9b   : > { %872 = vst [vmem:[%s17166_s28 + $0x97c] sm:$0xff] %v871_v14  ;;  %874 = vst [vmem:[%s17166_s28 + $0x984] sm:$0xff] %v873_v15  ;;  %v877_v17 = vld [vmem:[%s17161_s27 + $0x1cb8] sm:$0xff]  ;;  %v879_v18 = vld [vmem:[%s17161_s27 + $0x1cc0] sm:$0xff] }
  0x9c   : > { %876 = vst [vmem:[%s17166_s28 + $0x990] sm:$0xff] %v875_v16  ;;  %v881_v19 = vld [vmem:[%s17161_s27 + $0x1cc8] sm:$0xff]  ;;  %878 = vst [vmem:[%s17166_s28 + $0x998] sm:$0xff] %v877_v17  ;;  %v883_v20 = vld [vmem:[%s17161_s27 + $0x1d1c] sm:$0xff] }
  0x9d   : > { %880 = vst [vmem:[%s17166_s28 + $0x9a0] sm:$0xff] %v879_v18  ;;  %882 = vst [vmem:[%s17166_s28 + $0x9a8] sm:$0xff] %v881_v19  ;;  %v885_v21 = vld [vmem:[%s17161_s27 + $0x1d24] sm:$0xff]  ;;  %v887_v22 = vld [vmem:[%s17161_s27 + $0x1d2c] sm:$0xff] }
  0x9e   : > { %884 = vst [vmem:[%s17166_s28 + $0x9b4] sm:$0xff] %v883_v20  ;;  %886 = vst [vmem:[%s17166_s28 + $0x9bc] sm:$0xff] %v885_v21  ;;  %v889_v23 = vld [vmem:[%s17161_s27 + $0x1d34] sm:$0xff]  ;;  %v891_v24 = vld [vmem:[%s17161_s27 + $0x1d88] sm:$0xff] }
  0x9f   : > { %888 = vst [vmem:[%s17166_s28 + $0x9c4] sm:$0xff] %v887_v22  ;;  %v893_v25 = vld [vmem:[%s17161_s27 + $0x1d90] sm:$0xff]  ;;  %890 = vst [vmem:[%s17166_s28 + $0x9cc] sm:$0xff] %v889_v23  ;;  %v895_v26 = vld [vmem:[%s17161_s27 + $0x1d98] sm:$0xff] }
  0xa0   : > { %892 = vst [vmem:[%s17166_s28 + $0x9d8] sm:$0xff] %v891_v24  ;;  %894 = vst [vmem:[%s17166_s28 + $0x9e0] sm:$0xff] %v893_v25  ;;  %v897_v27 = vld [vmem:[%s17161_s27 + $0x1da0] sm:$0xff]  ;;  %v899_v28 = vld [vmem:[%s17161_s27 + $0x1df4] sm:$0xff] }
  0xa1   : > { %896 = vst [vmem:[%s17166_s28 + $0x9e8] sm:$0xff] %v895_v26  ;;  %898 = vst [vmem:[%s17166_s28 + $0x9f0] sm:$0xff] %v897_v27  ;;  %v901_v29 = vld [vmem:[%s17161_s27 + $0x1dfc] sm:$0xff]  ;;  %v903_v30 = vld [vmem:[%s17161_s27 + $0x1e04] sm:$0xff] }
  0xa2   : > { %900 = vst [vmem:[%s17166_s28 + $0x9fc] sm:$0xff] %v899_v28  ;;  %v905_v31 = vld [vmem:[%s17161_s27 + $0x1e0c] sm:$0xff]  ;;  %902 = vst [vmem:[%s17166_s28 + $0xa04] sm:$0xff] %v901_v29  ;;  %v13498_v32 = vld [vmem:[%s17161_s27 + $0x20] sm:$0xf] }
  0xa3   : > { %904 = vst [vmem:[%s17166_s28 + $0xa0c] sm:$0xff] %v903_v30  ;;  %906 = vst [vmem:[%s17166_s28 + $0xa14] sm:$0xff] %v905_v31  ;;  %v13500_v33 = vld [vmem:[%s17161_s27 + $0x8c] sm:$0xf]  ;;  %v13502_v34 = vld [vmem:[%s17161_s27 + $0xf8] sm:$0xf] }
  0xa4   : > { %13499 = vst [vmem:[%s17166_s28 + $0x20] sm:$0xf] %v13498_v32  ;;  %13501 = vst [vmem:[%s17166_s28 + $0x44] sm:$0xf] %v13500_v33  ;;  %v13504_v35 = vld [vmem:[%s17161_s27 + $0x164] sm:$0xf] }
  0xa5   : > { %13503 = vst [vmem:[%s17166_s28 + $0x68] sm:$0xf] %v13502_v34  ;;  %v13506_v36 = vld [vmem:[%s17161_s27 + $0x1d0] sm:$0xf]  ;;  %v13508_v37 = vld [vmem:[%s17161_s27 + $0x23c] sm:$0xf] }
  0xa6   : > { %13505 = vst [vmem:[%s17166_s28 + $0x8c] sm:$0xf] %v13504_v35  ;;  %13507 = vst [vmem:[%s17166_s28 + $0xb0] sm:$0xf] %v13506_v36  ;;  %v13510_v38 = vld [vmem:[%s17161_s27 + $0x2a8] sm:$0xf] }
  0xa7   : > { %13509 = vst [vmem:[%s17166_s28 + $0xd4] sm:$0xf] %v13508_v37  ;;  %v13512_v39 = vld [vmem:[%s17161_s27 + $0x314] sm:$0xf]  ;;  %v13514_v40 = vld [vmem:[%s17161_s27 + $0x380] sm:$0xf] }
  0xa8   : > { %13511 = vst [vmem:[%s17166_s28 + $0xf8] sm:$0xf] %v13510_v38  ;;  %13513 = vst [vmem:[%s17166_s28 + $0x11c] sm:$0xf] %v13512_v39  ;;  %v13516_v41 = vld [vmem:[%s17161_s27 + $0x3ec] sm:$0xf] }
  0xa9   : > { %13515 = vst [vmem:[%s17166_s28 + $0x140] sm:$0xf] %v13514_v40  ;;  %v13518_v42 = vld [vmem:[%s17161_s27 + $0x458] sm:$0xf]  ;;  %v13520_v43 = vld [vmem:[%s17161_s27 + $0x4c4] sm:$0xf] }
  0xaa   : > { %13517 = vst [vmem:[%s17166_s28 + $0x164] sm:$0xf] %v13516_v41  ;;  %13519 = vst [vmem:[%s17166_s28 + $0x188] sm:$0xf] %v13518_v42  ;;  %v13522_v44 = vld [vmem:[%s17161_s27 + $0x530] sm:$0xf] }
  0xab   : > { %13521 = vst [vmem:[%s17166_s28 + $0x1ac] sm:$0xf] %v13520_v43  ;;  %v13524_v45 = vld [vmem:[%s17161_s27 + $0x59c] sm:$0xf]  ;;  %v13526_v46 = vld [vmem:[%s17161_s27 + $0x608] sm:$0xf] }
  0xac   : > { %13523 = vst [vmem:[%s17166_s28 + $0x1d0] sm:$0xf] %v13522_v44  ;;  %13525 = vst [vmem:[%s17166_s28 + $0x1f4] sm:$0xf] %v13524_v45  ;;  %v13528_v47 = vld [vmem:[%s17161_s27 + $0x674] sm:$0xf] }
  0xad   : > { %13527 = vst [vmem:[%s17166_s28 + $0x218] sm:$0xf] %v13526_v46  ;;  %v13530_v48 = vld [vmem:[%s17161_s27 + $0x6e0] sm:$0xf]  ;;  %v13532_v49 = vld [vmem:[%s17161_s27 + $0x74c] sm:$0xf] }
  0xae   : > { %13529 = vst [vmem:[%s17166_s28 + $0x23c] sm:$0xf] %v13528_v47  ;;  %13531 = vst [vmem:[%s17166_s28 + $0x260] sm:$0xf] %v13530_v48  ;;  %v13534_v50 = vld [vmem:[%s17161_s27 + $0x7b8] sm:$0xf] }
  0xaf   : > { %13533 = vst [vmem:[%s17166_s28 + $0x284] sm:$0xf] %v13532_v49  ;;  %v13536_v51 = vld [vmem:[%s17161_s27 + $0x824] sm:$0xf]  ;;  %v13538_v52 = vld [vmem:[%s17161_s27 + $0x890] sm:$0xf] }
  0xb0   : > { %13535 = vst [vmem:[%s17166_s28 + $0x2a8] sm:$0xf] %v13534_v50  ;;  %13537 = vst [vmem:[%s17166_s28 + $0x2cc] sm:$0xf] %v13536_v51  ;;  %v13540_v53 = vld [vmem:[%s17161_s27 + $0x8fc] sm:$0xf] }
  0xb1   : > { %13539 = vst [vmem:[%s17166_s28 + $0x2f0] sm:$0xf] %v13538_v52  ;;  %v13542_v54 = vld [vmem:[%s17161_s27 + $0x968] sm:$0xf]  ;;  %v13544_v55 = vld [vmem:[%s17161_s27 + $0x9d4] sm:$0xf] }
  0xb2   : > { %13541 = vst [vmem:[%s17166_s28 + $0x314] sm:$0xf] %v13540_v53  ;;  %13543 = vst [vmem:[%s17166_s28 + $0x338] sm:$0xf] %v13542_v54  ;;  %v13546_v56 = vld [vmem:[%s17161_s27 + $0xa40] sm:$0xf] }
  0xb3   : > { %13545 = vst [vmem:[%s17166_s28 + $0x35c] sm:$0xf] %v13544_v55  ;;  %v13548_v57 = vld [vmem:[%s17161_s27 + $0xaac] sm:$0xf]  ;;  %v13550_v58 = vld [vmem:[%s17161_s27 + $0xb18] sm:$0xf] }
  0xb4   : > { %13547 = vst [vmem:[%s17166_s28 + $0x380] sm:$0xf] %v13546_v56  ;;  %13549 = vst [vmem:[%s17166_s28 + $0x3a4] sm:$0xf] %v13548_v57  ;;  %v13552_v59 = vld [vmem:[%s17161_s27 + $0xb84] sm:$0xf] }
  0xb5   : > { %13551 = vst [vmem:[%s17166_s28 + $0x3c8] sm:$0xf] %v13550_v58  ;;  %v13554_v60 = vld [vmem:[%s17161_s27 + $0xbf0] sm:$0xf]  ;;  %v13556_v61 = vld [vmem:[%s17161_s27 + $0xc5c] sm:$0xf] }
  0xb6   : > { %13553 = vst [vmem:[%s17166_s28 + $0x3ec] sm:$0xf] %v13552_v59  ;;  %13555 = vst [vmem:[%s17166_s28 + $0x410] sm:$0xf] %v13554_v60  ;;  %v13558_v62 = vld [vmem:[%s17161_s27 + $0xcc8] sm:$0xf] }
  0xb7   : > { %13557 = vst [vmem:[%s17166_s28 + $0x434] sm:$0xf] %v13556_v61  ;;  %v13560_v63 = vld [vmem:[%s17161_s27 + $0xd34] sm:$0xf]  ;;  %v13562_v0 = vld [vmem:[%s17161_s27 + $0xda0] sm:$0xf] }
  0xb8   : > { %13559 = vst [vmem:[%s17166_s28 + $0x458] sm:$0xf] %v13558_v62  ;;  %13561 = vst [vmem:[%s17166_s28 + $0x47c] sm:$0xf] %v13560_v63  ;;  %v13564_v1 = vld [vmem:[%s17161_s27 + $0xe0c] sm:$0xf] }
  0xb9   : > { %13563 = vst [vmem:[%s17166_s28 + $0x4a0] sm:$0xf] %v13562_v0  ;;  %v13566_v2 = vld [vmem:[%s17161_s27 + $0xe78] sm:$0xf]  ;;  %v13568_v3 = vld [vmem:[%s17161_s27 + $0xee4] sm:$0xf] }
  0xba   : > { %13565 = vst [vmem:[%s17166_s28 + $0x4c4] sm:$0xf] %v13564_v1  ;;  %13567 = vst [vmem:[%s17166_s28 + $0x4e8] sm:$0xf] %v13566_v2  ;;  %v13570_v4 = vld [vmem:[%s17161_s27 + $0xf50] sm:$0xf] }
  0xbb   : > { %13569 = vst [vmem:[%s17166_s28 + $0x50c] sm:$0xf] %v13568_v3  ;;  %v13572_v5 = vld [vmem:[%s17161_s27 + $0xfbc] sm:$0xf]  ;;  %v13574_v6 = vld [vmem:[%s17161_s27 + $0x1028] sm:$0xf] }
  0xbc   : > { %13571 = vst [vmem:[%s17166_s28 + $0x530] sm:$0xf] %v13570_v4  ;;  %13573 = vst [vmem:[%s17166_s28 + $0x554] sm:$0xf] %v13572_v5  ;;  %v13576_v7 = vld [vmem:[%s17161_s27 + $0x1094] sm:$0xf] }
  0xbd   : > { %13575 = vst [vmem:[%s17166_s28 + $0x578] sm:$0xf] %v13574_v6  ;;  %v13578_v8 = vld [vmem:[%s17161_s27 + $0x1100] sm:$0xf]  ;;  %v13580_v9 = vld [vmem:[%s17161_s27 + $0x116c] sm:$0xf] }
  0xbe   : > { %13577 = vst [vmem:[%s17166_s28 + $0x59c] sm:$0xf] %v13576_v7  ;;  %13579 = vst [vmem:[%s17166_s28 + $0x5c0] sm:$0xf] %v13578_v8  ;;  %v13582_v10 = vld [vmem:[%s17161_s27 + $0x11d8] sm:$0xf] }
  0xbf   : > { %13581 = vst [vmem:[%s17166_s28 + $0x5e4] sm:$0xf] %v13580_v9  ;;  %v13584_v11 = vld [vmem:[%s17161_s27 + $0x1244] sm:$0xf]  ;;  %v13586_v12 = vld [vmem:[%s17161_s27 + $0x12b0] sm:$0xf] }
  0xc0   : > { %13583 = vst [vmem:[%s17166_s28 + $0x608] sm:$0xf] %v13582_v10  ;;  %13585 = vst [vmem:[%s17166_s28 + $0x62c] sm:$0xf] %v13584_v11  ;;  %v13588_v13 = vld [vmem:[%s17161_s27 + $0x131c] sm:$0xf] }
  0xc1   : > { %13587 = vst [vmem:[%s17166_s28 + $0x650] sm:$0xf] %v13586_v12  ;;  %v13590_v14 = vld [vmem:[%s17161_s27 + $0x1388] sm:$0xf]  ;;  %v13592_v15 = vld [vmem:[%s17161_s27 + $0x13f4] sm:$0xf] }
  0xc2   : > { %13589 = vst [vmem:[%s17166_s28 + $0x674] sm:$0xf] %v13588_v13  ;;  %13591 = vst [vmem:[%s17166_s28 + $0x698] sm:$0xf] %v13590_v14  ;;  %v13594_v16 = vld [vmem:[%s17161_s27 + $0x1460] sm:$0xf] }
  0xc3   : > { %13593 = vst [vmem:[%s17166_s28 + $0x6bc] sm:$0xf] %v13592_v15  ;;  %v13596_v17 = vld [vmem:[%s17161_s27 + $0x14cc] sm:$0xf]  ;;  %v13598_v18 = vld [vmem:[%s17161_s27 + $0x1538] sm:$0xf] }
  0xc4   : > { %13595 = vst [vmem:[%s17166_s28 + $0x6e0] sm:$0xf] %v13594_v16  ;;  %13597 = vst [vmem:[%s17166_s28 + $0x704] sm:$0xf] %v13596_v17  ;;  %v13600_v19 = vld [vmem:[%s17161_s27 + $0x15a4] sm:$0xf] }
  0xc5   : > { %13599 = vst [vmem:[%s17166_s28 + $0x728] sm:$0xf] %v13598_v18  ;;  %v13602_v20 = vld [vmem:[%s17161_s27 + $0x1610] sm:$0xf]  ;;  %v13604_v21 = vld [vmem:[%s17161_s27 + $0x167c] sm:$0xf] }
  0xc6   : > { %13601 = vst [vmem:[%s17166_s28 + $0x74c] sm:$0xf] %v13600_v19  ;;  %13603 = vst [vmem:[%s17166_s28 + $0x770] sm:$0xf] %v13602_v20  ;;  %v13606_v22 = vld [vmem:[%s17161_s27 + $0x16e8] sm:$0xf] }
  0xc7   : > { %13605 = vst [vmem:[%s17166_s28 + $0x794] sm:$0xf] %v13604_v21  ;;  %v13608_v23 = vld [vmem:[%s17161_s27 + $0x1754] sm:$0xf]  ;;  %v13610_v24 = vld [vmem:[%s17161_s27 + $0x17c0] sm:$0xf] }
  0xc8   : > { %13607 = vst [vmem:[%s17166_s28 + $0x7b8] sm:$0xf] %v13606_v22  ;;  %13609 = vst [vmem:[%s17166_s28 + $0x7dc] sm:$0xf] %v13608_v23  ;;  %v13612_v25 = vld [vmem:[%s17161_s27 + $0x182c] sm:$0xf] }
  0xc9   : > { %13611 = vst [vmem:[%s17166_s28 + $0x800] sm:$0xf] %v13610_v24  ;;  %v13614_v26 = vld [vmem:[%s17161_s27 + $0x1898] sm:$0xf]  ;;  %v13616_v27 = vld [vmem:[%s17161_s27 + $0x1904] sm:$0xf] }
  0xca   : > { %13613 = vst [vmem:[%s17166_s28 + $0x824] sm:$0xf] %v13612_v25  ;;  %13615 = vst [vmem:[%s17166_s28 + $0x848] sm:$0xf] %v13614_v26  ;;  %v13618_v28 = vld [vmem:[%s17161_s27 + $0x1970] sm:$0xf] }
  0xcb   : > { %13617 = vst [vmem:[%s17166_s28 + $0x86c] sm:$0xf] %v13616_v27  ;;  %v13620_v29 = vld [vmem:[%s17161_s27 + $0x19dc] sm:$0xf]  ;;  %v13622_v30 = vld [vmem:[%s17161_s27 + $0x1a48] sm:$0xf] }
  0xcc   : > { %13619 = vst [vmem:[%s17166_s28 + $0x890] sm:$0xf] %v13618_v28  ;;  %13621 = vst [vmem:[%s17166_s28 + $0x8b4] sm:$0xf] %v13620_v29  ;;  %v13624_v31 = vld [vmem:[%s17161_s27 + $0x1ab4] sm:$0xf] }
  0xcd   : > { %13623 = vst [vmem:[%s17166_s28 + $0x8d8] sm:$0xf] %v13622_v30  ;;  %v13626_v32 = vld [vmem:[%s17161_s27 + $0x1b20] sm:$0xf]  ;;  %v13628_v33 = vld [vmem:[%s17161_s27 + $0x1b8c] sm:$0xf] }
  0xce   : > { %13625 = vst [vmem:[%s17166_s28 + $0x8fc] sm:$0xf] %v13624_v31  ;;  %13627 = vst [vmem:[%s17166_s28 + $0x920] sm:$0xf] %v13626_v32  ;;  %v13630_v34 = vld [vmem:[%s17161_s27 + $0x1bf8] sm:$0xf] }
  0xcf   : > { %13629 = vst [vmem:[%s17166_s28 + $0x944] sm:$0xf] %v13628_v33  ;;  %v13632_v35 = vld [vmem:[%s17161_s27 + $0x1c64] sm:$0xf]  ;;  %v13634_v36 = vld [vmem:[%s17161_s27 + $0x1cd0] sm:$0xf] }
  0xd0   : > { %13631 = vst [vmem:[%s17166_s28 + $0x968] sm:$0xf] %v13630_v34  ;;  %13633 = vst [vmem:[%s17166_s28 + $0x98c] sm:$0xf] %v13632_v35  ;;  %v13636_v37 = vld [vmem:[%s17161_s27 + $0x1d3c] sm:$0xf] }
  0xd1   : > { %13635 = vst [vmem:[%s17166_s28 + $0x9b0] sm:$0xf] %v13634_v36  ;;  %v13638_v38 = vld [vmem:[%s17161_s27 + $0x1da8] sm:$0xf]  ;;  %v13640_v39 = vld [vmem:[%s17161_s27 + $0x1e14] sm:$0xf] }
  0xd2   : > { %13637 = vst [vmem:[%s17166_s28 + $0x9d4] sm:$0xf] %v13636_v37  ;;  %13639 = vst [vmem:[%s17166_s28 + $0x9f8] sm:$0xf] %v13638_v38 }
  0xd3   : > { %13641 = vst [vmem:[%s17166_s28 + $0xa1c] sm:$0xf] %v13640_v39 }
  0xd4 PF: > { %p13642_p7 = scmp.ge.s32.totalorder %s17059_s15, 1  ;;  %p1079_p8 = scmp.lt.s32.totalorder %s17059_s15, 4 }
  0xd6   : > { %p1080_p9 = pnand %p13642_p7, %p1079_p8 }
  0xd8   : > { %1083 = sbr.rel (%p1080_p9) target bundleno = 2057 (0x809), region = 82 }
  0xdd   : > { %v15370_v40 = vld [vmem:[%s24023_s2 + $0x3bc] ss:$68 sps:$4 sm:$0xff]   ;;  %v15372_v41 = vld [vmem:[%s24023_s2 + $0x3c4] ss:$68 sps:$4 sm:$0xff]   ;;  %v24032_v42 = vmov 0   ;;  %vm17063_vm0 = vmmov 0  }
  0xde   : > { %2099 = vmatprep.mubr.bf16.mxu0 %v24032_v42  ;;  %2140 = vmatprep.mubr.bf16.mxu1 %v24032_v42  ;;  %v15374_v43 = vld [vmem:[%s24023_s2 + $0x3b8] ss:$68 sps:$4 sm:$0xff]   ;;  %v15375_v44 = vld [vmem:[%s24023_s2 + $0x3c0] ss:$68 sps:$4 sm:$0xff]   ;;  %v15380_v47 = vld [vmem:[%s24023_s2 + $0x330] ss:$68 sps:$4 sm:$0xff]  }
  0xdf   : > { %2067 = vmatprep.subr.bf16.mxu0 %v15370_v40  ;;  %2108 = vmatprep.subr.bf16.mxu1 %v15372_v41  ;;  %v15376_v45 = vld [vmem:[%s24023_s2 + $0x334] ss:$68 sps:$4 sm:$0xff]   ;;  %v15378_v46 = vld [vmem:[%s24023_s2 + $0x33c] ss:$68 sps:$4 sm:$0xff]   ;;  %v15382_v49 = vld [vmem:[%s24023_s2 + $0x2ac] ss:$68 sps:$4 sm:$0xff]  }
  0xe0   : > { %2068 = vmatpush1.bf16.msra.mxu0 %v15374_v43  ;;  %2109 = vmatpush1.bf16.msra.mxu1 %v15375_v44  ;;  %v15381_v48 = vld [vmem:[%s24023_s2 + $0x338] ss:$68 sps:$4 sm:$0xff]   ;;  %v15386_v51 = vld [vmem:[%s24023_s2 + $0x2a8] ss:$68 sps:$4 sm:$0xff]   ;;  %v15387_v52 = vld [vmem:[%s24023_s2 + $0x2b0] ss:$68 sps:$4 sm:$0xff]  }
  0xe1   : > { %2069 = vmatprep.subr.bf16.mxu0 %v15376_v45  ;;  %2110 = vmatprep.subr.bf16.mxu1 %v15378_v46  ;;  %v15384_v50 = vld [vmem:[%s24023_s2 + $0x2b4] ss:$68 sps:$4 sm:$0xff]   ;;  %v15388_v53 = vld [vmem:[%s24023_s2 + $0x224] ss:$68 sps:$4 sm:$0xff]   ;;  %v15390_v54 = vld [vmem:[%s24023_s2 + $0x22c] ss:$68 sps:$4 sm:$0xff]  }
  0xe2   : > { %v15392_v55 = vld [vmem:[%s24023_s2 + $0x220] ss:$68 sps:$4 sm:$0xff]   ;;  %v15393_v56 = vld [vmem:[%s24023_s2 + $0x228] ss:$68 sps:$4 sm:$0xff]   ;;  %v15398_v59 = vld [vmem:[%s24023_s2 + $0x198] ss:$68 sps:$4 sm:$0xff]  }
  0xe3   : > { %v15394_v57 = vld [vmem:[%s24023_s2 + $0x19c] ss:$68 sps:$4 sm:$0xff]   ;;  %v15396_v58 = vld [vmem:[%s24023_s2 + $0x1a4] ss:$68 sps:$4 sm:$0xff]   ;;  %v15400_v61 = vld [vmem:[%s24023_s2 + $0x114] ss:$68 sps:$4 sm:$0xff]  }
  0xe4   : > { %2070 = vmatpush1.bf16.msra.mxu0 %v15380_v47  ;;  %2111 = vmatpush1.bf16.msra.mxu1 %v15381_v48  ;;  %v15399_v60 = vld [vmem:[%s24023_s2 + $0x1a0] ss:$68 sps:$4 sm:$0xff]   ;;  %v15404_v63 = vld [vmem:[%s24023_s2 + $0x110] ss:$68 sps:$4 sm:$0xff]   ;;  %v15405_v0 = vld [vmem:[%s24023_s2 + $0x118] ss:$68 sps:$4 sm:$0xff]  }
  0xe5   : > { %2071 = vmatprep.subr.bf16.mxu0 %v15382_v49  ;;  %2112 = vmatprep.subr.bf16.mxu1 %v15384_v50  ;;  %v15402_v62 = vld [vmem:[%s24023_s2 + $0x11c] ss:$68 sps:$4 sm:$0xff]   ;;  %v15406_v1 = vld [vmem:[%s24023_s2 + $0x8c] ss:$68 sps:$4 sm:$0xff]   ;;  %v15408_v2 = vld [vmem:[%s24023_s2 + $0x94] ss:$68 sps:$4 sm:$0xff]  }
  0xe6   : > { %v15410_v3 = vld [vmem:[%s24023_s2 + $0x88] ss:$68 sps:$4 sm:$0xff]   ;;  %v15411_v4 = vld [vmem:[%s24023_s2 + $0x90] ss:$68 sps:$4 sm:$0xff]   ;;  %v15416_v7 = vld [vmem:[%s24023_s2] ss:$68 sps:$4 sm:$0xff]  }
  0xe7   : > { %v15412_v5 = vld [vmem:[%s24023_s2 + $0x4] ss:$68 sps:$4 sm:$0xff]   ;;  %v15414_v6 = vld [vmem:[%s24023_s2 + $0xc] ss:$68 sps:$4 sm:$0xff]   ;;  %v15426_v10 = vld [vmem:[%s24023_s2 + $0x3d4] ss:$68 sps:$4 sm:$0xff]  }
  0xe8   : > { %2072 = vmatpush1.bf16.msra.mxu0 %v15386_v51  ;;  %2113 = vmatpush1.bf16.msra.mxu1 %v15387_v52  ;;  %v15417_v8 = vld [vmem:[%s24023_s2 + $0x8] ss:$68 sps:$4 sm:$0xff]   ;;  %v17994_v11 = vld [vmem:[%s24021_s0] sm:$0x1]  ;;  %v15424_v13 = vld [vmem:[%s24023_s2 + $0x3d0] ss:$68 sps:$4 sm:$0xff]  }
  0xe9   : > { %2073 = vmatprep.subr.bf16.mxu0 %v15388_v53  ;;  %2114 = vmatprep.subr.bf16.mxu1 %v15390_v54  ;;  %v15420_v9 = vld [vmem:[%s24023_s2 + $0x3cc] ss:$68 sps:$4 sm:$0xff]   ;;  %v15423_v14 = vld [vmem:[%s24023_s2 + $0x344] ss:$68 sps:$4 sm:$0xff]   ;;  %v15429_v18 = vld [vmem:[%s24023_s2 + $0x2bc] ss:$68 sps:$4 sm:$0xff]  }
  0xea   : > { %v15418_v12 = vld [vmem:[%s24023_s2 + $0x3c8] ss:$68 sps:$4 sm:$0xff]   ;;  %v15421_v16 = vld [vmem:[%s24023_s2 + $0x340] ss:$68 sps:$4 sm:$0xff]   ;;  %v15427_v20 = vld [vmem:[%s24023_s2 + $0x2b8] ss:$68 sps:$4 sm:$0xff]  }
  0xeb   : > { %v15432_v15 = vld [vmem:[%s24023_s2 + $0x34c] ss:$68 sps:$4 sm:$0xff]   ;;  %v15438_v19 = vld [vmem:[%s24023_s2 + $0x2c4] ss:$68 sps:$4 sm:$0xff]   ;;  %v15435_v22 = vld [vmem:[%s24023_s2 + $0x234] ss:$68 sps:$4 sm:$0xff]  }
  0xec   : > { %2074 = vmatpush1.bf16.msra.mxu0 %v15392_v55  ;;  %2115 = vmatpush1.bf16.msra.mxu1 %v15393_v56  ;;  %v15430_v17 = vld [vmem:[%s24023_s2 + $0x348] ss:$68 sps:$4 sm:$0xff]   ;;  %v15436_v21 = vld [vmem:[%s24023_s2 + $0x2c0] ss:$68 sps:$4 sm:$0xff]   ;;  %v15433_v24 = vld [vmem:[%s24023_s2 + $0x230] ss:$68 sps:$4 sm:$0xff]  }
  0xed   : > { %2075 = vmatprep.subr.bf16.mxu0 %v15394_v57  ;;  %2116 = vmatprep.subr.bf16.mxu1 %v15396_v58  ;;  %v15444_v23 = vld [vmem:[%s24023_s2 + $0x23c] ss:$68 sps:$4 sm:$0xff]   ;;  %v15441_v26 = vld [vmem:[%s24023_s2 + $0x1ac] ss:$68 sps:$4 sm:$0xff]   ;;  %v15450_v27 = vld [vmem:[%s24023_s2 + $0x1b4] ss:$68 sps:$4 sm:$0xff]  }
  0xee   : > { %v15442_v25 = vld [vmem:[%s24023_s2 + $0x238] ss:$68 sps:$4 sm:$0xff]   ;;  %v15439_v28 = vld [vmem:[%s24023_s2 + $0x1a8] ss:$68 sps:$4 sm:$0xff]   ;;  %v15448_v29 = vld [vmem:[%s24023_s2 + $0x1b0] ss:$68 sps:$4 sm:$0xff]  }
  0xef   : > { %v15447_v30 = vld [vmem:[%s24023_s2 + $0x124] ss:$68 sps:$4 sm:$0xff]   ;;  %v15456_v31 = vld [vmem:[%s24023_s2 + $0x12c] ss:$68 sps:$4 sm:$0xff]   ;;  %v15453_v34 = vld [vmem:[%s24023_s2 + $0x9c] ss:$68 sps:$4 sm:$0xff]  }
  0xf0   : > { %2076 = vmatpush1.bf16.msra.mxu0 %v15398_v59  ;;  %2117 = vmatpush1.bf16.msra.mxu1 %v15399_v60  ;;  %v15445_v32 = vld [vmem:[%s24023_s2 + $0x120] ss:$68 sps:$4 sm:$0xff]   ;;  %v15454_v33 = vld [vmem:[%s24023_s2 + $0x128] ss:$68 sps:$4 sm:$0xff]   ;;  %v15451_v36 = vld [vmem:[%s24023_s2 + $0x98] ss:$68 sps:$4 sm:$0xff]  }
  0xf1   : > { %2077 = vmatprep.subr.bf16.mxu0 %v15400_v61  ;;  %2118 = vmatprep.subr.bf16.mxu1 %v15402_v62  ;;  %v15462_v35 = vld [vmem:[%s24023_s2 + $0xa4] ss:$68 sps:$4 sm:$0xff]   ;;  %v15459_v38 = vld [vmem:[%s24023_s2 + $0x14] ss:$68 sps:$4 sm:$0xff]   ;;  %v15465_v39 = vld [vmem:[%s24023_s2 + $0x1c] ss:$68 sps:$4 sm:$0xff]  }
  0xf2   : > { %v15460_v37 = vld [vmem:[%s24023_s2 + $0xa0] ss:$68 sps:$4 sm:$0xff]   ;;  %v15457_v40 = vld [vmem:[%s24023_s2 + $0x10] ss:$68 sps:$4 sm:$0xff]   ;;  %v15463_v41 = vld [vmem:[%s24023_s2 + $0x18] ss:$68 sps:$4 sm:$0xff]  }
  0xf3   : > { %v15468_v43 = vld [vmem:[%s24023_s2 + $0x3dc] ss:$68 sps:$4 sm:$0xff]   ;;  %v15486_v44 = vld [vmem:[%s24023_s2 + $0x3e4] ss:$68 sps:$4 sm:$0xff]   ;;  %v15471_v47 = vld [vmem:[%s24023_s2 + $0x354] ss:$68 sps:$4 sm:$0xff]  }
  0xf4   : > { %2078 = vmatpush1.bf16.msra.mxu0 %v15404_v63  ;;  %2119 = vmatpush1.bf16.msra.mxu1 %v15405_v0  ;;  %v15466_v45 = vld [vmem:[%s24023_s2 + $0x3d8] ss:$68 sps:$4 sm:$0xff]   ;;  %v15484_v46 = vld [vmem:[%s24023_s2 + $0x3e0] ss:$68 sps:$4 sm:$0xff]   ;;  %v15469_v49 = vld [vmem:[%s24023_s2 + $0x350] ss:$68 sps:$4 sm:$0xff]  }
  0xf5   : > { %2079 = vmatprep.subr.bf16.mxu0 %v15406_v1  ;;  %2120 = vmatprep.subr.bf16.mxu1 %v15408_v2  ;;  %v15492_v48 = vld [vmem:[%s24023_s2 + $0x35c] ss:$68 sps:$4 sm:$0xff]   ;;  %v15474_v51 = vld [vmem:[%s24023_s2 + $0x2cc] ss:$68 sps:$4 sm:$0xff]   ;;  %v15498_v52 = vld [vmem:[%s24023_s2 + $0x2d4] ss:$68 sps:$4 sm:$0xff]  }
  0xf6   : > { %v15490_v50 = vld [vmem:[%s24023_s2 + $0x358] ss:$68 sps:$4 sm:$0xff]   ;;  %v15472_v53 = vld [vmem:[%s24023_s2 + $0x2c8] ss:$68 sps:$4 sm:$0xff]   ;;  %v15496_v54 = vld [vmem:[%s24023_s2 + $0x2d0] ss:$68 sps:$4 sm:$0xff]  }
  0xf7   : > { %v15477_v55 = vld [vmem:[%s24023_s2 + $0x244] ss:$68 sps:$4 sm:$0xff]   ;;  %v15501_v56 = vld [vmem:[%s24023_s2 + $0x24c] ss:$68 sps:$4 sm:$0xff]   ;;  %v15480_v59 = vld [vmem:[%s24023_s2 + $0x1bc] ss:$68 sps:$4 sm:$0xff]  }
  0xf8   : > { %2080 = vmatpush1.bf16.msra.mxu0 %v15410_v3  ;;  %2121 = vmatpush1.bf16.msra.mxu1 %v15411_v4  ;;  %v15475_v57 = vld [vmem:[%s24023_s2 + $0x240] ss:$68 sps:$4 sm:$0xff]   ;;  %v15499_v58 = vld [vmem:[%s24023_s2 + $0x248] ss:$68 sps:$4 sm:$0xff]   ;;  %v15478_v61 = vld [vmem:[%s24023_s2 + $0x1b8] ss:$68 sps:$4 sm:$0xff]  }
  0xf9   : > { %2081 = vmatprep.subr.bf16.mxu0 %v15412_v5  ;;  %2122 = vmatprep.subr.bf16.mxu1 %v15414_v6  ;;  %v15507_v60 = vld [vmem:[%s24023_s2 + $0x1c4] ss:$68 sps:$4 sm:$0xff]   ;;  %v15483_v62 = vld [vmem:[%s24023_s2 + $0x134] ss:$68 sps:$4 sm:$0xff]   ;;  %v15513_v0 = vld [vmem:[%s24023_s2 + $0x13c] ss:$68 sps:$4 sm:$0xff]  }
  0xfa   : > { %v15505_v63 = vld [vmem:[%s24023_s2 + $0x1c0] ss:$68 sps:$4 sm:$0xff]   ;;  %v15481_v1 = vld [vmem:[%s24023_s2 + $0x130] ss:$68 sps:$4 sm:$0xff]   ;;  %v15511_v3 = vld [vmem:[%s24023_s2 + $0x138] ss:$68 sps:$4 sm:$0xff]  }
  0xfb   : > { %v15489_v2 = vld [vmem:[%s24023_s2 + $0xac] ss:$68 sps:$4 sm:$0xff]   ;;  %v15519_v4 = vld [vmem:[%s24023_s2 + $0xb4] ss:$68 sps:$4 sm:$0xff]   ;;  %v15495_v6 = vld [vmem:[%s24023_s2 + $0x24] ss:$68 sps:$4 sm:$0xff]  }
  0xfc   : > { %2082 = vmatpush1.bf16.msra.mxu0 %v15416_v7  ;;  %2123 = vmatpush1.bf16.msra.mxu1 %v15417_v8  ;;  %v15487_v5 = vld [vmem:[%s24023_s2 + $0xa8] ss:$68 sps:$4 sm:$0xff]   ;;  %v15517_v7 = vld [vmem:[%s24023_s2 + $0xb0] ss:$68 sps:$4 sm:$0xff]   ;;  %vm7039_vm1 = vcmask 130048   ;;  %s1086_s11 = sand.u32 1, %s17051_s13  }
  0xfd   : > { %2149 = vmatprep.subr.bf16.mxu0 %v15420_v9  ;;  %2190 = vmatprep.subr.bf16.mxu1 %v15426_v10  ;;  %v15525_v8 = vld [vmem:[%s24023_s2 + $0x2c] ss:$68 sps:$4 sm:$0xff]   ;;  %v15493_v9 = vld [vmem:[%s24023_s2 + $0x20] ss:$68 sps:$4 sm:$0xff]   ;;  %s15340_s12 = smul.u32 2592, %s1086_s11  ;;  %vm8954_vm2 = vcmask 523264  }
  0xfe   : > { %v15504_v10 = vld [vmem:[%s24023_s2 + $0x3ec] ss:$68 sps:$4 sm:$0xff]   ;;  %s1131_s24 = smul.u32 9, %s17136_s16 }
  0xff   : > { %2100 = vmatmul.mubr.bf16.vlgmr.msra.gmra.mxu0 %v17994_v11  ;;  %2141 = vmatmul.mubr.bf16.vlgmr.msra.gmra.mxu1 %v17994_v11  ;;  %s21689_s18 = scalar_lea.vmem [#allocation2], %s15340_s12 }
 0x100   : > { %2150 = vmatpush1.bf16.msra.mxu0 %v15418_v12  ;;  %2191 = vmatpush1.bf16.msra.mxu1 %v15424_v13  ;;  %v15523_v12 = vld [vmem:[%s24023_s2 + $0x28] ss:$68 sps:$4 sm:$0xff]   ;;  %v15537_v13 = vld [vmem:[%s24023_s2 + $0x3f4] ss:$68 sps:$4 sm:$0xff]   ;;  %p23307_p10 = scmp.lt.s32.totalorder %s1131_s24, 26 }
 0x101   : > { %2151 = vmatprep.subr.bf16.mxu0 %v15423_v14  ;;  %2192 = vmatprep.subr.bf16.mxu1 %v15432_v15  ;;  %v15502_v14 = vld [vmem:[%s24023_s2 + $0x3e8] ss:$68 sps:$4 sm:$0xff]   ;;  %v15535_v15 = vld [vmem:[%s24023_s2 + $0x3f0] ss:$68 sps:$4 sm:$0xff]  }
 0x102   : > { %2181 = vmatprep.mubr.bf16.mxu0 %v24032_v42  ;;  %2222 = vmatprep.mubr.bf16.mxu1 %v24032_v42  ;;  %s24667_s24 = smov (!%p23307_p10, %s1131_s24), 26 }
 0x103   : > { %s23333_s28 = scalar_lea.vmem %s24029_s8, %s24667_s24  ;;  %s23463_s12 = scalar_lea.vmem %s24030_s9, %s24667_s24 }
 0x104   : > { %2152 = vmatpush1.bf16.msra.mxu0 %v15421_v16  ;;  %2193 = vmatpush1.bf16.msra.mxu1 %v15430_v17  ;;  %v15510_v16 = vld [vmem:[%s24023_s2 + $0x364] ss:$68 sps:$4 sm:$0xff]   ;;  %v15543_v17 = vld [vmem:[%s24023_s2 + $0x36c] ss:$68 sps:$4 sm:$0xff]  }
 0x105   : > { %2153 = vmatprep.subr.bf16.mxu0 %v15429_v18  ;;  %2194 = vmatprep.subr.bf16.mxu1 %v15438_v19  ;;  %v15508_v18 = vld [vmem:[%s24023_s2 + $0x360] ss:$68 sps:$4 sm:$0xff]   ;;  %v15541_v19 = vld [vmem:[%s24023_s2 + $0x368] ss:$68 sps:$4 sm:$0xff]  }
 0x108   : > { %2154 = vmatpush1.bf16.msra.mxu0 %v15427_v20  ;;  %2195 = vmatpush1.bf16.msra.mxu1 %v15436_v21  ;;  %v15516_v20 = vld [vmem:[%s24023_s2 + $0x2dc] ss:$68 sps:$4 sm:$0xff]   ;;  %v15547_v21 = vld [vmem:[%s24023_s2 + $0x2e4] ss:$68 sps:$4 sm:$0xff]  }
 0x109   : > { %2155 = vmatprep.subr.bf16.mxu0 %v15435_v22  ;;  %2196 = vmatprep.subr.bf16.mxu1 %v15444_v23  ;;  %v15514_v22 = vld [vmem:[%s24023_s2 + $0x2d8] ss:$68 sps:$4 sm:$0xff]   ;;  %v15545_v23 = vld [vmem:[%s24023_s2 + $0x2e0] ss:$68 sps:$4 sm:$0xff]  }
 0x10c   : > { %2156 = vmatpush1.bf16.msra.mxu0 %v15433_v24  ;;  %2197 = vmatpush1.bf16.msra.mxu1 %v15442_v25  ;;  %v15522_v24 = vld [vmem:[%s24023_s2 + $0x254] ss:$68 sps:$4 sm:$0xff]   ;;  %v15551_v25 = vld [vmem:[%s24023_s2 + $0x25c] ss:$68 sps:$4 sm:$0xff]  }
 0x10d   : > { %2157 = vmatprep.subr.bf16.mxu0 %v15441_v26  ;;  %2198 = vmatprep.subr.bf16.mxu1 %v15450_v27  ;;  %v15520_v26 = vld [vmem:[%s24023_s2 + $0x250] ss:$68 sps:$4 sm:$0xff]   ;;  %v15549_v27 = vld [vmem:[%s24023_s2 + $0x258] ss:$68 sps:$4 sm:$0xff]  }
 0x110   : > { %2158 = vmatpush1.bf16.msra.mxu0 %v15439_v28  ;;  %2199 = vmatpush1.bf16.msra.mxu1 %v15448_v29  ;;  %v15528_v28 = vld [vmem:[%s24023_s2 + $0x1cc] ss:$68 sps:$4 sm:$0xff]   ;;  %v15555_v29 = vld [vmem:[%s24023_s2 + $0x1d4] ss:$68 sps:$4 sm:$0xff]  }
 0x111   : > { %2159 = vmatprep.subr.bf16.mxu0 %v15447_v30  ;;  %2200 = vmatprep.subr.bf16.mxu1 %v15456_v31  ;;  %v15526_v30 = vld [vmem:[%s24023_s2 + $0x1c8] ss:$68 sps:$4 sm:$0xff]   ;;  %v15553_v31 = vld [vmem:[%s24023_s2 + $0x1d0] ss:$68 sps:$4 sm:$0xff]  }
 0x114   : > { %2160 = vmatpush1.bf16.msra.mxu0 %v15445_v32  ;;  %2201 = vmatpush1.bf16.msra.mxu1 %v15454_v33  ;;  %v15531_v32 = vld [vmem:[%s24023_s2 + $0x144] ss:$68 sps:$4 sm:$0xff]   ;;  %v15559_v33 = vld [vmem:[%s24023_s2 + $0x14c] ss:$68 sps:$4 sm:$0xff]  }
 0x115   : > { %2161 = vmatprep.subr.bf16.mxu0 %v15453_v34  ;;  %2202 = vmatprep.subr.bf16.mxu1 %v15462_v35  ;;  %v15529_v34 = vld [vmem:[%s24023_s2 + $0x140] ss:$68 sps:$4 sm:$0xff]   ;;  %v15557_v35 = vld [vmem:[%s24023_s2 + $0x148] ss:$68 sps:$4 sm:$0xff]  }
 0x118   : > { %2162 = vmatpush1.bf16.msra.mxu0 %v15451_v36  ;;  %2203 = vmatpush1.bf16.msra.mxu1 %v15460_v37  ;;  %v15534_v36 = vld [vmem:[%s24023_s2 + $0xbc] ss:$68 sps:$4 sm:$0xff]   ;;  %v15563_v37 = vld [vmem:[%s24023_s2 + $0xc4] ss:$68 sps:$4 sm:$0xff]  }
 0x119   : > { %2163 = vmatprep.subr.bf16.mxu0 %v15459_v38  ;;  %2204 = vmatprep.subr.bf16.mxu1 %v15465_v39  ;;  %v15532_v38 = vld [vmem:[%s24023_s2 + $0xb8] ss:$68 sps:$4 sm:$0xff]   ;;  %v15561_v39 = vld [vmem:[%s24023_s2 + $0xc0] ss:$68 sps:$4 sm:$0xff]  }
 0x11c   : > { %2164 = vmatpush1.bf16.msra.mxu0 %v15457_v40  ;;  %2205 = vmatpush1.bf16.msra.mxu1 %v15463_v41  ;;  %v15540_v40 = vld [vmem:[%s24023_s2 + $0x34] ss:$68 sps:$4 sm:$0xff]   ;;  %v15567_v41 = vld [vmem:[%s24023_s2 + $0x3c] ss:$68 sps:$4 sm:$0xff]  }
 0x11d   : > { %2231 = vmatprep.subr.bf16.mxu0 %v15468_v43  ;;  %2272 = vmatprep.subr.bf16.mxu1 %v15486_v44  ;;  %v15538_v43 = vld [vmem:[%s24023_s2 + $0x30] ss:$68 sps:$4 sm:$0xff]   ;;  %v15565_v44 = vld [vmem:[%s24023_s2 + $0x38] ss:$68 sps:$4 sm:$0xff]  }
 0x11f   : > { %2182 = vmatmul.mubr.bf16.vlgmr.msra.gmra.mxu0 %v17994_v11  ;;  %2223 = vmatmul.mubr.bf16.vlgmr.msra.gmra.mxu1 %v17994_v11 }
 0x120   : > { %2232 = vmatpush1.bf16.msra.mxu0 %v15466_v45  ;;  %2273 = vmatpush1.bf16.msra.mxu1 %v15484_v46  ;;  %v15572_v45 = vld [vmem:[%s24025_s4 + $0x11c] ss:$20 sps:$4 sm:$0xff]  }
 0x121   : > { %2233 = vmatprep.subr.bf16.mxu0 %v15471_v47  ;;  %2274 = vmatprep.subr.bf16.mxu1 %v15492_v48  ;;  %v15544_v46 = vld [vmem:[%s24023_s2 + $0x3f8] ss:$68 sps:$4 sm:$0xff]   ;;  %v17062_v47 = vmov 0.0  }
 0x122   : > { %2263 = vmatprep.mubr.bf16.mxu0 %v24032_v42  ;;  %2304 = vmatprep.mubr.bf16.mxu1 %v24032_v42  ;;  %v15570_v48 = vld [vmem:[%s24025_s4 + $0x118] ss:$20 sps:$4 sm:$0xff]  }
 0x124   : > { %2234 = vmatpush1.bf16.msra.mxu0 %v15469_v49  ;;  %2275 = vmatpush1.bf16.msra.mxu1 %v15490_v50  ;;  %v15578_v49 = vld [vmem:[%s24025_s4 + $0xf4] ss:$20 sps:$4 sm:$0xff]  }
 0x125   : > { %2235 = vmatprep.subr.bf16.mxu0 %v15474_v51  ;;  %2276 = vmatprep.subr.bf16.mxu1 %v15498_v52  ;;  %v15548_v50 = vld [vmem:[%s24023_s2 + $0x370] ss:$68 sps:$4 sm:$0xff]   ;;  %v15584_v52 = vld [vmem:[%s24025_s4 + $0xcc] ss:$20 sps:$4 sm:$0xff]  }
 0x126   : > { %v15576_v51 = vld [vmem:[%s24025_s4 + $0xf0] ss:$20 sps:$4 sm:$0xff]  }
 0x128   : > { %2236 = vmatpush1.bf16.msra.mxu0 %v15472_v53  ;;  %2277 = vmatpush1.bf16.msra.mxu1 %v15496_v54  ;;  %v15552_v53 = vld [vmem:[%s24023_s2 + $0x2e8] ss:$68 sps:$4 sm:$0xff]  }
 0x129   : > { %2237 = vmatprep.subr.bf16.mxu0 %v15477_v55  ;;  %2278 = vmatprep.subr.bf16.mxu1 %v15501_v56  ;;  %v15582_v54 = vld [vmem:[%s24025_s4 + $0xc8] ss:$20 sps:$4 sm:$0xff]   ;;  %v15590_v55 = vld [vmem:[%s24025_s4 + $0xa4] ss:$20 sps:$4 sm:$0xff]  }
 0x12a   : > { %v15556_v56 = vld [vmem:[%s24023_s2 + $0x260] ss:$68 sps:$4 sm:$0xff]  }
 0x12c   : > { %2238 = vmatpush1.bf16.msra.mxu0 %v15475_v57  ;;  %2279 = vmatpush1.bf16.msra.mxu1 %v15499_v58  ;;  %v15588_v57 = vld [vmem:[%s24025_s4 + $0xa0] ss:$20 sps:$4 sm:$0xff]   ;;  %v15560_v58 = vld [vmem:[%s24023_s2 + $0x1d8] ss:$68 sps:$4 sm:$0xff]  }
 0x12d   : > { %2239 = vmatprep.subr.bf16.mxu0 %v15480_v59  ;;  %2280 = vmatprep.subr.bf16.mxu1 %v15507_v60  ;;  %v15596_v59 = vld [vmem:[%s24025_s4 + $0x7c] ss:$20 sps:$4 sm:$0xff]   ;;  %v15594_v60 = vld [vmem:[%s24025_s4 + $0x78] ss:$20 sps:$4 sm:$0xff]  }
 0x130   : > { %2240 = vmatpush1.bf16.msra.mxu0 %v15478_v61  ;;  %2281 = vmatpush1.bf16.msra.mxu1 %v15505_v63  ;;  %v15602_v61 = vld [vmem:[%s24025_s4 + $0x54] ss:$20 sps:$4 sm:$0xff]   ;;  %v15600_v63 = vld [vmem:[%s24025_s4 + $0x50] ss:$20 sps:$4 sm:$0xff]  }
 0x131   : > { %2241 = vmatprep.subr.bf16.mxu0 %v15483_v62  ;;  %2282 = vmatprep.subr.bf16.mxu1 %v15513_v0  ;;  %v15564_v62 = vld [vmem:[%s24023_s2 + $0x150] ss:$68 sps:$4 sm:$0xff]   ;;  %v15568_v0 = vld [vmem:[%s24023_s2 + $0xc8] ss:$68 sps:$4 sm:$0xff]  }
 0x134   : > { %2242 = vmatpush1.bf16.msra.mxu0 %v15481_v1  ;;  %2283 = vmatpush1.bf16.msra.mxu1 %v15511_v3  ;;  %v15608_v1 = vld [vmem:[%s24025_s4 + $0x2c] ss:$20 sps:$4 sm:$0xff]   ;;  %v15614_v3 = vld [vmem:[%s24025_s4 + $0x4] ss:$20 sps:$4 sm:$0xff]  }
 0x135   : > { %2243 = vmatprep.subr.bf16.mxu0 %v15489_v2  ;;  %2284 = vmatprep.subr.bf16.mxu1 %v15519_v4  ;;  %v15606_v2 = vld [vmem:[%s24025_s4 + $0x28] ss:$20 sps:$4 sm:$0xff]   ;;  %v15569_v4 = vld [vmem:[%s24023_s2 + $0x40] ss:$68 sps:$4 sm:$0xff]  }
 0x138   : > { %2244 = vmatpush1.bf16.msra.mxu0 %v15487_v5  ;;  %2285 = vmatpush1.bf16.msra.mxu1 %v15517_v7  ;;  %v15575_v5 = vld [vmem:[%s24025_s4 + $0x39c] ss:$20 sps:$4 sm:$0xff]  }
 0x139   : > { %2245 = vmatprep.subr.bf16.mxu0 %v15495_v6  ;;  %2286 = vmatprep.subr.bf16.mxu1 %v15525_v8  ;;  %v15612_v6 = vld [vmem:[%s24025_s4] ss:$20 sps:$4 sm:$0xff]   ;;  %v15620_v7 = vld [vmem:[%s24025_s4 + $0x25c] ss:$20 sps:$4 sm:$0xff]   ;;  %v15573_v8 = vld [vmem:[%s24025_s4 + $0x398] ss:$20 sps:$4 sm:$0xff]  }
 0x13c   : > { %2246 = vmatpush1.bf16.msra.mxu0 %v15493_v9  ;;  %2287 = vmatpush1.bf16.msra.mxu1 %v15523_v12  ;;  %v15581_v9 = vld [vmem:[%s24025_s4 + $0x374] ss:$20 sps:$4 sm:$0xff]   ;;  %v15579_v12 = vld [vmem:[%s24025_s4 + $0x370] ss:$20 sps:$4 sm:$0xff]  }
 0x13d   : > { %2313 = vmatprep.subr.bf16.mxu0 %v15504_v10  ;;  %2354 = vmatprep.subr.bf16.mxu1 %v15537_v13  ;;  %v15618_v10 = vld [vmem:[%s24025_s4 + $0x258] ss:$20 sps:$4 sm:$0xff]   ;;  %v15626_v13 = vld [vmem:[%s24025_s4 + $0x234] ss:$20 sps:$4 sm:$0xff]  }
 0x13f   : > { %2264 = vmatmul.mubr.bf16.vlgmr.msra.gmra.mxu0 %v17994_v11  ;;  %2305 = vmatmul.mubr.bf16.vlgmr.msra.gmra.mxu1 %v17994_v11 }
 0x140   : > { %2314 = vmatpush1.bf16.msra.mxu0 %v15502_v14  ;;  %2355 = vmatpush1.bf16.msra.mxu1 %v15535_v15  ;;  %v15587_v14 = vld [vmem:[%s24025_s4 + $0x34c] ss:$20 sps:$4 sm:$0xff]   ;;  %v15624_v15 = vld [vmem:[%s24025_s4 + $0x230] ss:$20 sps:$4 sm:$0xff]  }
 0x141   : > { %2315 = vmatprep.subr.bf16.mxu0 %v15510_v16  ;;  %2356 = vmatprep.subr.bf16.mxu1 %v15543_v17  ;;  %v15632_v16 = vld [vmem:[%s24025_s4 + $0x20c] ss:$20 sps:$4 sm:$0xff]   ;;  %v15593_v17 = vld [vmem:[%s24025_s4 + $0x324] ss:$20 sps:$4 sm:$0xff]  }
 0x142   : > { %2345 = vmatprep.mubr.bf16.mxu0 %v24032_v42  ;;  %2386 = vmatprep.mubr.bf16.mxu1 %v24032_v42  ;;  %v15762_v42 = vld [vmem:[%s24025_s4 + $0xb18] ss:$20 sps:$4 sm:$0xff]  }
 0x144   : > { %2316 = vmatpush1.bf16.msra.mxu0 %v15508_v18  ;;  %2357 = vmatpush1.bf16.msra.mxu1 %v15541_v19  ;;  %v15630_v18 = vld [vmem:[%s24025_s4 + $0x208] ss:$20 sps:$4 sm:$0xff]   ;;  %v15638_v19 = vld [vmem:[%s24025_s4 + $0x1e4] ss:$20 sps:$4 sm:$0xff]  }
 0x145   : > { %2317 = vmatprep.subr.bf16.mxu0 %v15516_v20  ;;  %2358 = vmatprep.subr.bf16.mxu1 %v15547_v21  ;;  %v15591_v20 = vld [vmem:[%s24025_s4 + $0x320] ss:$20 sps:$4 sm:$0xff]   ;;  %v15599_v21 = vld [vmem:[%s24025_s4 + $0x2fc] ss:$20 sps:$4 sm:$0xff]  }
 0x148   : > { %2318 = vmatpush1.bf16.msra.mxu0 %v15514_v22  ;;  %2359 = vmatpush1.bf16.msra.mxu1 %v15545_v23  ;;  %v15636_v22 = vld [vmem:[%s24025_s4 + $0x1e0] ss:$20 sps:$4 sm:$0xff]   ;;  %v15644_v23 = vld [vmem:[%s24025_s4 + $0x1bc] ss:$20 sps:$4 sm:$0xff]  }
 0x149   : > { %2319 = vmatprep.subr.bf16.mxu0 %v15522_v24  ;;  %2360 = vmatprep.subr.bf16.mxu1 %v15551_v25  ;;  %v15597_v24 = vld [vmem:[%s24025_s4 + $0x2f8] ss:$20 sps:$4 sm:$0xff]   ;;  %v15605_v25 = vld [vmem:[%s24025_s4 + $0x2d4] ss:$20 sps:$4 sm:$0xff]  }
 0x14c   : > { %2320 = vmatpush1.bf16.msra.mxu0 %v15520_v26  ;;  %2361 = vmatpush1.bf16.msra.mxu1 %v15549_v27  ;;  %v15642_v26 = vld [vmem:[%s24025_s4 + $0x1b8] ss:$20 sps:$4 sm:$0xff]   ;;  %v15650_v27 = vld [vmem:[%s24025_s4 + $0x194] ss:$20 sps:$4 sm:$0xff]  }
 0x14d   : > { %2321 = vmatprep.subr.bf16.mxu0 %v15528_v28  ;;  %2362 = vmatprep.subr.bf16.mxu1 %v15555_v29  ;;  %v15603_v28 = vld [vmem:[%s24025_s4 + $0x2d0] ss:$20 sps:$4 sm:$0xff]   ;;  %v15611_v29 = vld [vmem:[%s24025_s4 + $0x2ac] ss:$20 sps:$4 sm:$0xff]  }
 0x150   : > { %2322 = vmatpush1.bf16.msra.mxu0 %v15526_v30  ;;  %2363 = vmatpush1.bf16.msra.mxu1 %v15553_v31  ;;  %v15648_v30 = vld [vmem:[%s24025_s4 + $0x190] ss:$20 sps:$4 sm:$0xff]   ;;  %v15656_v31 = vld [vmem:[%s24025_s4 + $0x16c] ss:$20 sps:$4 sm:$0xff]  }
 0x151   : > { %2323 = vmatprep.subr.bf16.mxu0 %v15531_v32  ;;  %2364 = vmatprep.subr.bf16.mxu1 %v15559_v33  ;;  %v15609_v32 = vld [vmem:[%s24025_s4 + $0x2a8] ss:$20 sps:$4 sm:$0xff]   ;;  %v15617_v33 = vld [vmem:[%s24025_s4 + $0x284] ss:$20 sps:$4 sm:$0xff]  }
 0x154   : > { %2324 = vmatpush1.bf16.msra.mxu0 %v15529_v34  ;;  %2365 = vmatpush1.bf16.msra.mxu1 %v15557_v35  ;;  %v15654_v34 = vld [vmem:[%s24025_s4 + $0x168] ss:$20 sps:$4 sm:$0xff]   ;;  %v15615_v35 = vld [vmem:[%s24025_s4 + $0x280] ss:$20 sps:$4 sm:$0xff]  }
 0x155   : > { %2325 = vmatprep.subr.bf16.mxu0 %v15534_v36  ;;  %2366 = vmatprep.subr.bf16.mxu1 %v15563_v37  ;;  %v15662_v36 = vld [vmem:[%s24025_s4 + $0x144] ss:$20 sps:$4 sm:$0xff]   ;;  %v15623_v37 = vld [vmem:[%s24025_s4 + $0x4dc] ss:$20 sps:$4 sm:$0xff]  }
 0x158   : > { %2326 = vmatpush1.bf16.msra.mxu0 %v15532_v38  ;;  %2367 = vmatpush1.bf16.msra.mxu1 %v15561_v39  ;;  %v15660_v38 = vld [vmem:[%s24025_s4 + $0x140] ss:$20 sps:$4 sm:$0xff]   ;;  %v15621_v39 = vld [vmem:[%s24025_s4 + $0x4d8] ss:$20 sps:$4 sm:$0xff]  }
 0x159   : > { %2327 = vmatprep.subr.bf16.mxu0 %v15540_v40  ;;  %2368 = vmatprep.subr.bf16.mxu1 %v15567_v41  ;;  %v15668_v40 = vld [vmem:[%s24025_s4 + $0x61c] ss:$20 sps:$4 sm:$0xff]   ;;  %v15629_v41 = vld [vmem:[%s24025_s4 + $0x4b4] ss:$20 sps:$4 sm:$0xff]  }
 0x15c   : > { %2328 = vmatpush1.bf16.msra.mxu0 %v15538_v43  ;;  %2369 = vmatpush1.bf16.msra.mxu1 %v15565_v44  ;;  %v15627_v43 = vld [vmem:[%s24025_s4 + $0x4b0] ss:$20 sps:$4 sm:$0xff]   ;;  %v15635_v44 = vld [vmem:[%s24025_s4 + $0x48c] ss:$20 sps:$4 sm:$0xff]  }
 0x15d   : > { %15285 = vmatprep.subr.bf16.mxu0 %v17062_v47  ;;  %7052 = vmatprep.subr.bf16.mxu1 %v15572_v45  ;;  %v15633_v45 = vld [vmem:[%s24025_s4 + $0x488] ss:$20 sps:$4 sm:$0xff]  }
 0x15f   : > { %2346 = vmatmul.mubr.bf16.vlgmr.msra.gmra.mxu0 %v17994_v11  ;;  %2387 = vmatmul.mubr.bf16.vlgmr.msra.gmra.mxu1 %v17994_v11 }
 0x160   : > { %15286 = vmatpush3.bf16.msra.mxu0 %v15544_v46  ;;  %15301 = vmatprep.mubr.msk.bf16.mxu0 %vm17063_vm0, %v17062_v47  ;;  %v15641_v46 = vld [vmem:[%s24025_s4 + $0x464] ss:$20 sps:$4 sm:$0xff]  }
 0x161   : > { %15287 = vmatprep.subr.bf16.mxu0 %v17062_v47  ;;  %7053 = vmatpush1.bf16.msra.mxu1 %v15570_v48  ;;  %v15647_v48 = vld [vmem:[%s24025_s4 + $0x43c] ss:$20 sps:$4 sm:$0xff]  }
 0x162   : > { %7054 = vmatprep.subr.bf16.mxu1 %v15578_v49  ;;  %v15645_v49 = vld [vmem:[%s24025_s4 + $0x438] ss:$20 sps:$4 sm:$0xff]  }
 0x164   : > { %15288 = vmatpush3.bf16.msra.mxu0 %v15548_v50  ;;  %v15653_v50 = vld [vmem:[%s24025_s4 + $0x414] ss:$20 sps:$4 sm:$0xff]  }
 0x165   : > { %15289 = vmatprep.subr.bf16.mxu0 %v17062_v47  ;;  %7055 = vmatpush1.bf16.msra.mxu1 %v15576_v51  ;;  %v1982_v51 = vlaneseq }
 0x166   : > { %7056 = vmatprep.subr.bf16.mxu1 %v15584_v52  ;;  %v15651_v52 = vld [vmem:[%s24025_s4 + $0x410] ss:$20 sps:$4 sm:$0xff]  }
 0x168   : > { %15290 = vmatpush3.bf16.msra.mxu0 %v15552_v53  ;;  %v15659_v53 = vld [vmem:[%s24025_s4 + $0x3ec] ss:$20 sps:$4 sm:$0xff]  }
 0x169   : > { %15291 = vmatprep.subr.bf16.mxu0 %v17062_v47  ;;  %7057 = vmatpush1.bf16.msra.mxu1 %v15582_v54  ;;  %v18503_v54 = vshrl.u32 %v1982_v51, 7  ;;  %v2574_v51 = vld [vmem:[%s24022_s1 + $0x128] sm:$0xff] }
 0x16a   : > { %7058 = vmatprep.subr.bf16.mxu1 %v15590_v55  ;;  %v15657_v55 = vld [vmem:[%s24025_s4 + $0x3e8] ss:$20 sps:$4 sm:$0xff]  }
 0x16b   : > { %24219 = vst [vmem:[#allocation4_spill] sm:$0xff] %v18503_v54 }
 0x16c   : > { %15292 = vmatpush3.bf16.msra.mxu0 %v15556_v56  ;;  %v15665_v56 = vld [vmem:[%s24025_s4 + $0x3c4] ss:$20 sps:$4 sm:$0xff]  }
 0x16d   : > { %15293 = vmatprep.subr.bf16.mxu0 %v17062_v47  ;;  %7059 = vmatpush1.bf16.msra.mxu1 %v15588_v57  ;;  %v15663_v57 = vld [vmem:[%s24025_s4 + $0x3c0] ss:$20 sps:$4 sm:$0xff]  }
 0x16e   : > { %7060 = vmatprep.subr.bf16.mxu1 %v15596_v59  ;;  %v18518_v59 = vsub.s32 2, %v18503_v54 }
 0x170   : > { %15294 = vmatpush3.bf16.msra.mxu0 %v15560_v58  ;;  %v18515_v58 = vsub.s32 0, %v18503_v54  ;;  %24221 = vst [vmem:[#allocation6_spill] sm:$0xff] %v18518_v59 }
 0x171   : > { %15295 = vmatprep.subr.bf16.mxu0 %v17062_v47  ;;  %7061 = vmatpush1.bf16.msra.mxu1 %v15594_v60  ;;  %v18523_v60 = vld [vmem:[%s24024_s3] sm:$0xff] }
 0x172   : > { %7062 = vmatprep.subr.bf16.mxu1 %v15602_v61  ;;  %24220 = vst [vmem:[#allocation5_spill] sm:$0xff] %v18515_v58  ;;  %v15671_v61 = vld [vmem:[%s24025_s4 + $0x89c] ss:$20 sps:$4 sm:$0xff]  }
 0x174   : > { %15296 = vmatpush3.bf16.msra.mxu0 %v15564_v62  ;;  %v18529_v62 = vsub.s32 1, %v18503_v54 }
 0x175   : > { %15297 = vmatprep.subr.bf16.mxu0 %v17062_v47  ;;  %7063 = vmatpush1.bf16.msra.mxu1 %v15600_v63  ;;  %v18532_v63 = vsub.s32 3, %v18503_v54 }
 0x176   : > { %7064 = vmatprep.subr.bf16.mxu1 %v15608_v1  ;;  %24222 = vst [vmem:[#allocation7_spill] sm:$0xff] %v18529_v62  ;;  %v1993_v1 = vrot.slane %v18523_v60, %v18518_v59 }
 0x177   : > { %24223 = vst [vmem:[#allocation8_spill] sm:$0xff] %v18532_v63 }
 0x178   : > { %15298 = vmatpush3.bf16.msra.mxu0 %v15568_v0  ;;  %v1985_v0 = vrot.slane %v18523_v60, %v18515_v58 }
 0x179   : > { %15299 = vmatprep.subr.bf16.mxu0 %v17062_v47  ;;  %7065 = vmatpush1.bf16.msra.mxu1 %v15606_v2  ;;  %v15639_v47 = vld [vmem:[%s24025_s4 + $0x460] ss:$20 sps:$4 sm:$0xff]   ;;  %v1989_v2 = vrot.slane %v18523_v60, %v18529_v62 }
 0x17a   : > { %7066 = vmatprep.subr.bf16.mxu1 %v15614_v3  ;;  %v1997_v3 = vrot.slane %v18523_v60, %v18532_v63 }
 0x17c   : > { %15300 = vmatpush3.bf16.msra.mxu0 %v15569_v4 }
 0x17d   : > { %7123 = vmatprep.subr.bf16.mxu0 %v15575_v5  ;;  %7067 = vmatpush1.bf16.msra.mxu1 %v15612_v6 }
 0x17e   : > { %7068 = vmatprep.subr.bf16.mxu1 %v15620_v7 }
 0x17f   : > { %15302 = vmatmul.mubr.bf16.vlgmr.msra.gmra.mxu0 %v17994_v11  ;;  %v15585_v11 = vld [vmem:[%s24025_s4 + $0x348] ss:$20 sps:$4 sm:$0xff]  }
 0x180   : > { %7124 = vmatpush1.bf16.msra.mxu0 %v15573_v8 }
 0x181   : > { %7125 = vmatprep.subr.bf16.mxu0 %v15581_v9  ;;  %7069 = vmatpush2.bf16.msra.mxu1 %v15618_v10 }
 0x182   : > { %7070 = vmatprep.subr.bf16.mxu1 %v15626_v13 }
 0x184   : > { %7126 = vmatpush1.bf16.msra.mxu0 %v15579_v12 }
 0x185   : > { %7127 = vmatprep.subr.bf16.mxu0 %v15587_v14  ;;  %7071 = vmatpush2.bf16.msra.mxu1 %v15624_v15 }
 0x186   : > { %7072 = vmatprep.subr.bf16.mxu1 %v15632_v16 }
 0x188   : > { %7128 = vmatpush1.bf16.msra.mxu0 %v15585_v11 }
 0x189   : > { %7129 = vmatprep.subr.bf16.mxu0 %v15593_v17  ;;  %7073 = vmatpush2.bf16.msra.mxu1 %v15630_v18 }
 0x18a   : > { %7074 = vmatprep.subr.bf16.mxu1 %v15638_v19 }
 0x18c   : > { %7130 = vmatpush1.bf16.msra.mxu0 %v15591_v20 }
 0x18d   : > { %7131 = vmatprep.subr.bf16.mxu0 %v15599_v21  ;;  %7075 = vmatpush2.bf16.msra.mxu1 %v15636_v22 }
 0x18e   : > { %7076 = vmatprep.subr.bf16.mxu1 %v15644_v23 }
 0x190   : > { %7132 = vmatpush1.bf16.msra.mxu0 %v15597_v24 }
 0x191   : > { %7133 = vmatprep.subr.bf16.mxu0 %v15605_v25  ;;  %7077 = vmatpush2.bf16.msra.mxu1 %v15642_v26 }
 0x192   : > { %7078 = vmatprep.subr.bf16.mxu1 %v15650_v27 }
 0x194   : > { %7134 = vmatpush1.bf16.msra.mxu0 %v15603_v28  ;;  %v18543_v28 = vsub.s32 5, %v18503_v54 }
 0x195   : > { %7135 = vmatprep.subr.bf16.mxu0 %v15611_v29  ;;  %7079 = vmatpush2.bf16.msra.mxu1 %v15648_v30  ;;  %v2537_v29 = vld [vmem:[%s24022_s1] sm:$0xff] }
 0x196   : > { %7080 = vmatprep.subr.bf16.mxu1 %v15656_v31  ;;  %24224 = vst [vmem:[#allocation9_spill] sm:$0xff] %v18543_v28 }
 0x198   : > { %7136 = vmatpush1.bf16.msra.mxu0 %v15609_v32  ;;  %v2554_v32 = vld [vmem:[%s24022_s1 + $0x88] sm:$0xff] }
 0x199   : > { %7137 = vmatprep.subr.bf16.mxu0 %v15617_v33  ;;  %7081 = vmatpush2.bf16.msra.mxu1 %v15654_v34  ;;  %v2538_v34 = vld [vmem:[%s24022_s1 + $0x8] sm:$0xff] }
 0x19a   : > { %7082 = vmatprep.subr.bf16.mxu1 %v15662_v36 }
 0x19c   : > { %7138 = vmatpush1.bf16.msra.mxu0 %v15615_v35  ;;  %v2555_v35 = vld [vmem:[%s24022_s1 + $0x90] sm:$0xff] }
 0x19d   : > { %7139 = vmatprep.subr.bf16.mxu0 %v15623_v37  ;;  %7083 = vmatpush2.bf16.msra.mxu1 %v15660_v38 }
 0x19e   : > { %7194 = vmatprep.subr.bf16.mxu1 %v15668_v40  ;;  %v2540_v40 = vld [vmem:[%s24022_s1 + $0x18] sm:$0xff] }
 0x1a0   : > { %7140 = vmatpush2.bf16.msra.mxu0 %v15621_v39 }
 0x1a1   : > { %7141 = vmatprep.subr.bf16.mxu0 %v15629_v41  ;;  %v2557_v41 = vld [vmem:[%s24022_s1 + $0xa0] sm:$0xff] }
 0x1a4   : > { %7142 = vmatpush2.bf16.msra.mxu0 %v15627_v43  ;;  %v2539_v43 = vld [vmem:[%s24022_s1 + $0x10] sm:$0xff] }
 0x1a5   : > { %7143 = vmatprep.subr.bf16.mxu0 %v15635_v44  ;;  %v2556_v44 = vld [vmem:[%s24022_s1 + $0x98] sm:$0xff] }
 0x1a8   : > { %7144 = vmatpush2.bf16.msra.mxu0 %v15633_v45  ;;  %v2572_v45 = vld [vmem:[%s24022_s1 + $0x118] sm:$0xff] }
 0x1a9   : > { %7145 = vmatprep.subr.bf16.mxu0 %v15641_v46  ;;  %v2005_v46 = vrot.slane %v18523_v60, %v18543_v28 }
 0x1ac   : > { %7146 = vmatpush2.bf16.msra.mxu0 %v15639_v47  ;;  %v18582_v47 = vsub.s32 7, %v18503_v54 }
 0x1ad   : > { %7147 = vmatprep.subr.bf16.mxu0 %v15647_v48 }
 0x1ae   : > { %24225 = vst [vmem:[#allocation10_spill] sm:$0xff] %v18582_v47 }
 0x1b0   : > { %7148 = vmatpush2.bf16.msra.mxu0 %v15645_v49 }
 0x1b1   : > { %7149 = vmatprep.subr.bf16.mxu0 %v15653_v50  ;;  %v2589_v50 = vld [vmem:[%s24022_s1 + $0x1a0] sm:$0xff] }
 0x1b4   : > { %7150 = vmatpush2.bf16.msra.mxu0 %v15651_v52  ;;  %v2591_v52 = vld [vmem:[%s24022_s1 + $0x1b0] sm:$0xff] }
 0x1b5   : > { %7151 = vmatprep.subr.bf16.mxu0 %v15659_v53 }
 0x1b8   : > { %7152 = vmatpush2.bf16.msra.mxu0 %v15657_v55 }
 0x1b9   : > { %7153 = vmatprep.subr.bf16.mxu0 %v15665_v56 }
 0x1bc   : > { %7154 = vmatpush2.bf16.msra.mxu0 %v15663_v57 }
 0x1bd   : > { %7265 = vmatprep.subr.bf16.mxu0 %v15671_v61 }
 0x1bf   : > { %v2101_v4 = vpop.f32.mrf.mxu0  ;;  %v2142_v5 = vpop.f32.mrf.mxu1 }
 0x1c0   : > { %v2102_v6 = vadd.f32 %v2101_v4, %v1985_v0  ;;  %v2143_v7 = vadd.f32 %v2142_v5, %v1993_v1 }
 0x1c1   : > { %v2103_v8 = vpop.f32.mrf.mxu0  ;;  %v2144_v9 = vpop.f32.mrf.mxu1 }
 0x1c2   : > { %v13780_v10 = vmul.f32 -1.442695, %v2102_v6  ;;  %v13782_v12 = vmul.f32 -1.442695, %v2143_v7  ;;  %v2104_v13 = vadd.f32 %v2103_v8, %v1989_v2  ;;  %v2145_v14 = vadd.f32 %v2144_v9, %v1997_v3  ;;  %v15666_v8 = vld [vmem:[%s24025_s4 + $0x618] ss:$20 sps:$4 sm:$0xff]  }
 0x1c3   : > { %v2105_v15 = vpop.f32.mrf.mxu0  ;;  %v2146_v16 = vpop.f32.mrf.mxu1 }
 0x1c4   : > { %16941 = vpow2.f32 %v13780_v10  ;;  %v13781_v11 = vmul.f32 -1.442695, %v2104_v13  ;;  %v13783_v17 = vmul.f32 -1.442695, %v2145_v14  ;;  %v2013_v10 = vrot.slane %v18523_v60, %v18582_v47  ;;  %v15669_v14 = vld [vmem:[%s24025_s4 + $0x898] ss:$20 sps:$4 sm:$0xff]  }
 0x1c5   : > { %16943 = vpow2.f32 %v13782_v12  ;;  %v2106_v18 = vpop.f32.mrf.mxu0  ;;  %v2147_v19 = vpop.f32.mrf.mxu1 }
 0x1c6   : > { %16945 = vpow2.f32 %v13781_v11  ;;  %v2573_v11 = vld [vmem:[%s24022_s1 + $0x120] sm:$0xff] }
 0x1c7   : > { %16947 = vpow2.f32 %v13783_v17  ;;  %v2590_v17 = vld [vmem:[%s24022_s1 + $0x1a8] sm:$0xff] }
 0x1d1   : > { %v16942_v20 = vpop.eup %16941 }
 0x1d2   : > { %v16944_v21 = vpop.eup %16943  ;;  %v2486_v22 = vadd.f32 1.0, %v16942_v20  ;;  %v15674_v20 = vld [vmem:[%s24025_s4 + $0x5f4] ss:$20 sps:$4 sm:$0xff]  }
 0x1d3   : > { %v16946_v23 = vpop.eup %16945  ;;  %v2488_v24 = vadd.f32 1.0, %v16944_v21 }
 0x1d4   : > { %v16948_v25 = vpop.eup %16947  ;;  %16949 = vrcp.f32 %v2486_v22  ;;  %v2487_v26 = vadd.f32 1.0, %v16946_v23 }
 0x1d5   : > { %16951 = vrcp.f32 %v2488_v24  ;;  %v2489_v27 = vadd.f32 1.0, %v16948_v25  ;;  %v15677_v25 = vld [vmem:[%s24025_s4 + $0x874] ss:$20 sps:$4 sm:$0xff]  }
 0x1d6   : > { %16953 = vrcp.f32 %v2487_v26  ;;  %v2571_v26 = vld [vmem:[%s24022_s1 + $0x110] sm:$0xff] }
 0x1d7   : > { %16955 = vrcp.f32 %v2489_v27  ;;  %v2588_v27 = vld [vmem:[%s24022_s1 + $0x198] sm:$0xff] }
 0x1df   : > { %v18548_v30 = vpop.f32.mrf.mxu0  ;;  %v18550_v31 = vpop.f32.mrf.mxu1 }
 0x1e1   : > { %v16950_v33 = vpop.eup %16949  ;;  %v2185_v36 = vpop.f32.mrf.mxu0 }
 0x1e2   : > { %v2226_v37 = vpop.f32.mrf.mxu1  ;;  %v16952_v38 = vpop.eup %16951  ;;  %v18562_v39 = vrot.slane %v16950_v33, %v18515_v58  ;;  %v2186_v9 = vadd.f32 %v2185_v36, %v2005_v46  ;;  %v2606_v36 = vld [vmem:[%s24022_s1 + $0x228] sm:$0xff]  ;;  %v15675_v46 = vld [vmem:[%s24025_s4 + $0x870] ss:$20 sps:$4 sm:$0xff]  }
 0x1e3   : > { %v16954_v48 = vpop.eup %16953  ;;  %v18585_v49 = vrot.slane %v16952_v38, %v18515_v58  ;;  %v2187_v53 = vpop.f32.mrf.mxu0 }
 0x1e4   : > { %v2228_v55 = vpop.f32.mrf.mxu1  ;;  %v16956_v56 = vpop.eup %16955  ;;  %v18597_v57 = vrot.slane %v16954_v48, %v18515_v58  ;;  %v2724_v61 = vmul.f32 %v18562_v39, %v2537_v29  ;;  %v2741_v1 = vmul.f32 %v18562_v39, %v2554_v32  ;;  %v18650_v29 = vsub.s32 4, %v18503_v54  ;;  %v15680_v48 = vld [vmem:[%s24025_s4 + $0x5cc] ss:$20 sps:$4 sm:$0xff]  }
 0x1e5   : > { %v18601_v0 = vrot.slane %v16956_v56, %v18515_v58  ;;  %v2726_v2 = vmul.f32 %v18585_v49, %v2539_v43  ;;  %v2743_v3 = vmul.f32 %v18585_v49, %v2556_v44  ;;  %v2188_v4 = vpop.f32.mrf.mxu0  ;;  %v2227_v32 = vadd.f32 %v2226_v37, %v2013_v10  ;;  %v2608_v43 = vld [vmem:[%s24022_s1 + $0x238] sm:$0xff]  ;;  %v2625_v44 = vld [vmem:[%s24022_s1 + $0x2c0] sm:$0xff] }
 0x1e6   : > { %v2229_v5 = vpop.f32.mrf.mxu1  ;;  %v2725_v6 = vmul.f32 %v18597_v57, %v2538_v34  ;;  %v2742_v7 = vmul.f32 %v18597_v57, %v2555_v35  ;;  %v2759_v15 = vmul.f32 %v18597_v57, %v2572_v45  ;;  %v2776_v16 = vmul.f32 %v18597_v57, %v2589_v50  ;;  %24228 = vst [vmem:[#allocation13_spill] sm:$0xff] %v18650_v29  ;;  %v15672_v34 = vld [vmem:[%s24025_s4 + $0x5f0] ss:$20 sps:$4 sm:$0xff]   ;;  %v15681_v4 = vld [vmem:[%s24025_s4 + $0x848] ss:$20 sps:$4 sm:$0xff]  }
 0x1e7   : > { %v2727_v12 = vmul.f32 %v18601_v0, %v2540_v40  ;;  %v2744_v13 = vmul.f32 %v18601_v0, %v2557_v41  ;;  %v18628_v19 = vpack.c.bf16 %v2743_v3, %v2726_v2  ;;  %v2761_v21 = vmul.f32 %v18601_v0, %v2574_v51  ;;  %v2623_v41 = vld [vmem:[%s24022_s1 + $0x2b0] sm:$0xff]  ;;  %v15678_v3 = vld [vmem:[%s24025_s4 + $0x5c8] ss:$20 sps:$4 sm:$0xff]   ;;  %v2605_v10 = vld [vmem:[%s24022_s1 + $0x220] sm:$0xff] }
 0x1e8   : > { %v18626_v18 = vpack.c.bf16 %v2742_v7, %v2725_v6  ;;  %v2778_v22 = vmul.f32 %v18601_v0, %v2591_v52  ;;  %v18637_v24 = vpack.c.bf16 %v2741_v1, %v2724_v61  ;;  %v18654_v33 = vpack.c.bf16 %v2776_v16, %v2759_v15  ;;  %v15683_v52 = vld [vmem:[%s24025_s4 + $0x84c] ss:$20 sps:$4 sm:$0xff]  }
 0x1e9   : > { %v18635_v23 = vpack.c.bf16 %v2744_v13, %v2727_v12  ;;  %v13785_v38 = vmul.f32 -1.442695, %v2186_v9  ;;  %v2760_v37 = vmul.f32 %v18585_v49, %v2573_v11  ;;  %v2777_v40 = vmul.f32 %v18585_v49, %v2590_v17  ;;  %v15689_v9 = vld [vmem:[%s24025_s4 + $0x824] ss:$20 sps:$4 sm:$0xff]   ;;  %v2607_v12 = vld [vmem:[%s24022_s1 + $0x230] sm:$0xff] }
 0x1ea   : > { %24226 = vst [vmem:[#allocation11_spill] sm:$0xff] %v18626_v18  ;;  %7084 = vmatprep.mubr.bf16.mxu1 %v18626_v18  ;;  %v18659_v35 = vpack.c.bf16 %v2778_v22, %v2761_v21  ;;  %v18677_v45 = vsub.s32 6, %v18503_v54  ;;  %v2758_v50 = vmul.f32 %v18562_v39, %v2571_v26  ;;  %v2775_v51 = vmul.f32 %v18562_v39, %v2588_v27  ;;  %v2624_v13 = vld [vmem:[%s24022_s1 + $0x2b8] sm:$0xff]  ;;  %v15684_v11 = vld [vmem:[%s24025_s4 + $0x5a0] ss:$20 sps:$4 sm:$0xff]   ;;  %v2642_v26 = vld [vmem:[%s24022_s1 + $0x348] sm:$0xff] }
 0x1eb   : > { %24227 = vst [vmem:[#allocation12_spill] sm:$0xff] %v18635_v23  ;;  %7155 = vmatprep.mubr.bf16.mxu0 %v18635_v23  ;;  %7085 = vmatmul.mubr.bf16.vlgmr.msra.gmra.mxu1 %v18637_v24  ;;  %16957 = vpow2.f32 %v13785_v38  ;;  %v2001_v53 = vrot.slane %v18523_v60, %v18650_v29  ;;  %v13787_v55 = vmul.f32 -1.442695, %v2227_v32  ;;  %v2793_v56 = vmul.f32 %v18597_v57, %v2606_v36  ;;  %v2640_v17 = vld [vmem:[%s24022_s1 + $0x338] sm:$0xff] }
 0x1ec   : > { %7156 = vmatmul.mubr.bf16.vlgmr.msra.gmra.mxu0 %v18628_v19  ;;  %7195 = vmatpush1.bf16.msra.mxu1 %v15666_v8  ;;  %24229 = vst [vmem:[#allocation14_spill] sm:$0xff] %v18677_v45  ;;  %v2810_v61 = vmul.f32 %v18597_v57, %v2623_v41  ;;  %v2795_v1 = vmul.f32 %v18601_v0, %v2608_v43  ;;  %v15686_v8 = vld [vmem:[%s24025_s4 + $0x5a4] ss:$20 sps:$4 sm:$0xff]   ;;  %v15692_v21 = vld [vmem:[%s24025_s4 + $0x57c] ss:$20 sps:$4 sm:$0xff]  }
 0x1ed   : > { %7266 = vmatpush1.bf16.msra.mxu0 %v15669_v14  ;;  %7094 = vmatprep.mubr.bf16.mxu1 %v18654_v33  ;;  %v2812_v2 = vmul.f32 %v18601_v0, %v2625_v44  ;;  %v18704_v5 = vpack.c.bf16 %v2777_v40, %v2760_v37  ;;  %v2009_v6 = vrot.slane %v18523_v60, %v18677_v45  ;;  %16959 = vpow2.f32 %v13787_v55  ;;  %v2622_v60 = vld [vmem:[%s24022_s1 + $0x2a8] sm:$0xff]  ;;  %v2639_v43 = vld [vmem:[%s24022_s1 + $0x330] sm:$0xff] }
 0x1ee   : > { %7196 = vmatprep.subr.bf16.mxu1 %v15674_v20  ;;  %7267 = vmatprep.subr.bf16.mxu0 %v15677_v25  ;;  %v18708_v7 = vpack.c.bf16 %v2775_v51, %v2758_v50  ;;  %v18729_v14 = vpack.c.bf16 %v2810_v61, %v2793_v56  ;;  %v2184_v15 = vadd.f32 %v18548_v30, %v2001_v53  ;;  %v15687_v30 = vld [vmem:[%s24025_s4 + $0x820] ss:$20 sps:$4 sm:$0xff]   ;;  %v15690_v36 = vld [vmem:[%s24025_s4 + $0x578] ss:$20 sps:$4 sm:$0xff]   ;;  %v15696_v53 = vld [vmem:[%s24025_s4 + $0x550] ss:$20 sps:$4 sm:$0xff]  }
 0x1ef   : > { %7165 = vmatprep.mubr.bf16.mxu0 %v18659_v35  ;;  %v18732_v16 = vpack.c.bf16 %v2812_v2, %v2795_v1  ;;  %v2225_v20 = vadd.f32 %v18550_v31, %v2009_v6  ;;  %v2792_v22 = vmul.f32 %v18562_v39, %v2605_v10  ;;  %v2809_v25 = vmul.f32 %v18562_v39, %v2622_v60  ;;  %v15695_v31 = vld [vmem:[%s24025_s4 + $0x7fc] ss:$20 sps:$4 sm:$0xff]   ;;  %v15693_v37 = vld [vmem:[%s24025_s4 + $0x7f8] ss:$20 sps:$4 sm:$0xff]   ;;  %v2641_v50 = vld [vmem:[%s24022_s1 + $0x340] sm:$0xff] }
 0x1f0   : > { %7197 = vmatpush1.bf16.msra.mxu1 %v15672_v34  ;;  %v2794_v27 = vmul.f32 %v18585_v49, %v2607_v12  ;;  %v2811_v32 = vmul.f32 %v18585_v49, %v2624_v13  ;;  %v13784_v34 = vmul.f32 -1.442695, %v2184_v15  ;;  %v2827_v38 = vmul.f32 %v18597_v57, %v2640_v17  ;;  %v15698_v57 = vld [vmem:[%s24025_s4 + $0x554] ss:$20 sps:$4 sm:$0xff]   ;;  %v15699_v61 = vld [vmem:[%s24025_s4 + $0x7d0] ss:$20 sps:$4 sm:$0xff]  }
 0x1f1   : > { %7268 = vmatpush1.bf16.msra.mxu0 %v15675_v46  ;;  %7198 = vmatprep.subr.bf16.mxu1 %v15680_v48  ;;  %v2829_v40 = vmul.f32 %v18601_v0, %v2642_v26  ;;  %v13786_v41 = vmul.f32 -1.442695, %v2225_v20  ;;  %v18771_v44 = vpack.c.bf16 %v2809_v25, %v2792_v22  ;;  %v15701_v0 = vld [vmem:[%s24025_s4 + $0x7d4] ss:$20 sps:$4 sm:$0xff]   ;;  %v15704_v1 = vld [vmem:[%s24025_s4 + $0x52c] ss:$20 sps:$4 sm:$0xff]   ;;  %v2826_v2 = vmul.f32 %v18562_v39, %v2639_v43 }
 0x1f2   : > { %7269 = vmatprep.subr.bf16.mxu0 %v15683_v52  ;;  %v18773_v48 = vpack.c.bf16 %v2811_v32, %v2794_v27  ;;  %16961 = vpow2.f32 %v13784_v34  ;;  %v18785_v52 = vpack.c.bf16 %v2827_v38, %v2827_v38  ;;  %v2828_v6 = vmul.f32 %v18585_v49, %v2641_v50  ;;  %v15710_v60 = vld [vmem:[%s24025_s4 + $0x504] ss:$20 sps:$4 sm:$0xff]   ;;  %v15716_v22 = vld [vmem:[%s24025_s4 + $0x75c] ss:$20 sps:$4 sm:$0xff]   ;;  %v18840_v25 = vld [vmem:[%s24024_s3 + $0x8] sm:$0xff] }
 0x1f3   : > { %7095 = vmatmul.mubr.bf16.gmra.mxu1 %v18708_v7  ;;  %v18791_v55 = vpack.c.bf16 %v2829_v40, %v2829_v40  ;;  %16963 = vpow2.f32 %v13786_v41  ;;  %v18819_v49 = vpack.c.bf16 %v2826_v2, %v2826_v2  ;;  %v15719_v27 = vld [vmem:[%s24025_s4 + $0x9dc] ss:$20 sps:$4 sm:$0xff]   ;;  %v15714_v32 = vld [vmem:[%s24025_s4 + $0x758] ss:$20 sps:$4 sm:$0xff]   ;;  %v2021_v43 = vrot.slane %v18840_v25, %v18529_v62 }
 0x1f4   : > { %7166 = vmatmul.mubr.bf16.gmra.mxu0 %v18704_v5  ;;  %7199 = vmatpush1.bf16.msra.mxu1 %v15678_v3  ;;  %v18821_v15 = vpack.c.bf16 %v2828_v6, %v2828_v6  ;;  %v15717_v34 = vld [vmem:[%s24025_s4 + $0x9d8] ss:$20 sps:$4 sm:$0xff]   ;;  %v2559_v41 = vld [vmem:[%s24022_s1 + $0xb0] sm:$0xff] }
 0x1f5   : > { %7270 = vmatpush1.bf16.msra.mxu0 %v15681_v4  ;;  %7104 = vmatprep.mubr.bf16.mxu1 %v18729_v14  ;;  %v15707_v4 = vld [vmem:[%s24025_s4 + $0x7ac] ss:$20 sps:$4 sm:$0xff]  }
 0x1f6   : > { %7200 = vmatprep.subr.bf16.mxu1 %v15686_v8  ;;  %7271 = vmatprep.subr.bf16.mxu0 %v15689_v9  ;;  %v15702_v8 = vld [vmem:[%s24025_s4 + $0x528] ss:$20 sps:$4 sm:$0xff]  }
 0x1f7   : > { %7175 = vmatprep.mubr.bf16.mxu0 %v18732_v16  ;;  %v15705_v9 = vld [vmem:[%s24025_s4 + $0x7a8] ss:$20 sps:$4 sm:$0xff]  }
 0x1f8   : > { %7201 = vmatpush1.bf16.msra.mxu1 %v15684_v11  ;;  %v16958_v46 = vpop.eup %16957  ;;  %v15713_v11 = vld [vmem:[%s24025_s4 + $0x784] ss:$20 sps:$4 sm:$0xff]   ;;  %v2542_v40 = vld [vmem:[%s24022_s1 + $0x28] sm:$0xff] }
 0x1f9   : > { %7272 = vmatpush1.bf16.msra.mxu0 %v15687_v30  ;;  %7202 = vmatprep.subr.bf16.mxu1 %v15692_v21  ;;  %v2491_v51 = vadd.f32 1.0, %v16958_v46  ;;  %v15708_v30 = vld [vmem:[%s24025_s4 + $0x500] ss:$20 sps:$4 sm:$0xff]  }
 0x1fa   : > { %7273 = vmatprep.subr.bf16.mxu0 %v15695_v31  ;;  %v16960_v56 = vpop.eup %16959  ;;  %v15711_v21 = vld [vmem:[%s24025_s4 + $0x780] ss:$20 sps:$4 sm:$0xff]  }
 0x1fb   : > { %7105 = vmatmul.mubr.bf16.gmra.mxu1 %v18771_v44  ;;  %16965 = vrcp.f32 %v2491_v51  ;;  %v2493_v3 = vadd.f32 1.0, %v16960_v56  ;;  %v15723_v56 = vld [vmem:[%s24025_s4 + $0x9b0] ss:$20 sps:$4 sm:$0xff]  }
 0x1fc   : > { %7176 = vmatmul.mubr.bf16.gmra.mxu0 %v18773_v48  ;;  %7203 = vmatpush1.bf16.msra.mxu1 %v15690_v36  ;;  %v15722_v36 = vld [vmem:[%s24025_s4 + $0x734] ss:$20 sps:$4 sm:$0xff]  }
 0x1fd   : > { %7274 = vmatpush1.bf16.msra.mxu0 %v15693_v37  ;;  %7114 = vmatprep.mubr.bf16.mxu1 %v18785_v52  ;;  %16967 = vrcp.f32 %v2493_v3  ;;  %v15725_v37 = vld [vmem:[%s24025_s4 + $0x9b4] ss:$20 sps:$4 sm:$0xff]   ;;  %v15728_v3 = vld [vmem:[%s24025_s4 + $0x70c] ss:$20 sps:$4 sm:$0xff]  }
 0x1fe   : > { %7185 = vmatprep.mubr.bf16.mxu0 %v18791_v55  ;;  %7204 = vmatprep.subr.bf16.mxu1 %v15698_v57  ;;  %v2029_v57 = vrot.slane %v18840_v25, %v18532_v63 }
 0x1ff   : > { %7275 = vmatprep.subr.bf16.mxu0 %v15701_v0  ;;  %v18812_v39 = vpop.f32.mrf.mxu0  ;;  %v18814_v10 = vpop.f32.mrf.mxu1 }
 0x200   : > { %7205 = vmatpush1.bf16.msra.mxu1 %v15696_v53  ;;  %v16962_v38 = vpop.eup %16961  ;;  %v15720_v53 = vld [vmem:[%s24025_s4 + $0x730] ss:$20 sps:$4 sm:$0xff]  }
 0x201   : > { %7276 = vmatpush1.bf16.msra.mxu0 %v15699_v61  ;;  %7206 = vmatprep.subr.bf16.mxu1 %v15704_v1  ;;  %v2267_v12 = vpop.f32.mrf.mxu0  ;;  %v2308_v13 = vpop.f32.mrf.mxu1  ;;  %v2490_v2 = vadd.f32 1.0, %v16962_v38  ;;  %v15740_v38 = vld [vmem:[%s24025_s4 + $0x6bc] ss:$20 sps:$4 sm:$0xff]  }
 0x202   : > { %7277 = vmatprep.subr.bf16.mxu0 %v15707_v4  ;;  %v16964_v46 = vpop.eup %16963  ;;  %v2268_v61 = vadd.f32 %v2267_v12, %v2021_v43  ;;  %v15746_v43 = vld [vmem:[%s24025_s4 + $0x694] ss:$20 sps:$4 sm:$0xff]  }
 0x203   : > { %7115 = vmatmul.mubr.bf16.gmra.mxu1 %v18819_v49  ;;  %v2269_v17 = vpop.f32.mrf.mxu0  ;;  %v2310_v20 = vpop.f32.mrf.mxu1  ;;  %v2492_v51 = vadd.f32 1.0, %v16964_v46  ;;  %v15749_v46 = vld [vmem:[%s24025_s4 + $0x914] ss:$20 sps:$4 sm:$0xff]  }
 0x204   : > { %7186 = vmatmul.mubr.bf16.gmra.mxu0 %v18821_v15  ;;  %7207 = vmatpush1.bf16.msra.mxu1 %v15702_v8  ;;  %v2544_v8 = vld [vmem:[%s24022_s1 + $0x38] sm:$0xff] }
 0x205   : > { %7278 = vmatpush1.bf16.msra.mxu0 %v15705_v9  ;;  %7208 = vmatprep.subr.bf16.mxu1 %v15710_v60  ;;  %v2270_v26 = vpop.f32.mrf.mxu0  ;;  %v2311_v31 = vpop.f32.mrf.mxu1  ;;  %v2561_v9 = vld [vmem:[%s24022_s1 + $0xc0] sm:$0xff]  ;;  %v2309_v60 = vadd.f32 %v2308_v13, %v2029_v57  ;;  %v15726_v17 = vld [vmem:[%s24025_s4 + $0x708] ss:$20 sps:$4 sm:$0xff]   ;;  %16969 = vrcp.f32 %v2492_v51  ;;  %v2041_v51 = vrot.slane %v18840_v25, %v18677_v45 }
 0x206   : > { %7279 = vmatprep.subr.bf16.mxu0 %v15713_v11  ;;  %v15731_v11 = vld [vmem:[%s24025_s4 + $0x98c] ss:$20 sps:$4 sm:$0xff]   ;;  %v15729_v13 = vld [vmem:[%s24025_s4 + $0x988] ss:$20 sps:$4 sm:$0xff]   ;;  %v13789_v26 = vmul.f32 -1.442695, %v2268_v61  ;;  %16971 = vrcp.f32 %v2490_v2 }
 0x207   : > { %v15737_v31 = vld [vmem:[%s24025_s4 + $0x964] ss:$20 sps:$4 sm:$0xff]   ;;  %v15752_v61 = vld [vmem:[%s24025_s4 + $0x66c] ss:$20 sps:$4 sm:$0xff]  }
 0x208   : > { %7209 = vmatpush1.bf16.msra.mxu1 %v15708_v30  ;;  %v16966_v0 = vpop.eup %16965  ;;  %v15734_v30 = vld [vmem:[%s24025_s4 + $0x6e4] ss:$20 sps:$4 sm:$0xff]   ;;  %16973 = vpow2.f32 %v13789_v26  ;;  %v15755_v2 = vld [vmem:[%s24025_s4 + $0x8ec] ss:$20 sps:$4 sm:$0xff]  }
 0x209   : > { %7280 = vmatpush1.bf16.msra.mxu0 %v15711_v21  ;;  %7210 = vmatprep.subr.bf16.mxu1 %v15716_v22  ;;  %v18868_v50 = vrot.slane %v16966_v0, %v18515_v58  ;;  %v15744_v57 = vld [vmem:[%s24025_s4 + $0x690] ss:$20 sps:$4 sm:$0xff]   ;;  %v2033_v0 = vrot.slane %v18840_v25, %v18650_v29  ;;  %v2017_v29 = vrot.slane %v18840_v25, %v18515_v58 }
 0x20a   : > { %7281 = vmatprep.subr.bf16.mxu0 %v15719_v27  ;;  %v16968_v1 = vpop.eup %16967  ;;  %v13791_v27 = vmul.f32 -1.442695, %v2309_v60 }
 0x20b   : > { %v2729_v4 = vmul.f32 %v18868_v50, %v2542_v40  ;;  %v2746_v6 = vmul.f32 %v18868_v50, %v2559_v41  ;;  %v18888_v12 = vrot.slane %v16968_v1, %v18515_v58  ;;  %v15738_v40 = vld [vmem:[%s24025_s4 + $0x6b8] ss:$20 sps:$4 sm:$0xff]  }
 0x20c   : > { %7211 = vmatpush2.bf16.msra.mxu1 %v15714_v32  ;;  %16975 = vpow2.f32 %v13791_v27  ;;  %v15741_v41 = vld [vmem:[%s24025_s4 + $0x938] ss:$20 sps:$4 sm:$0xff]  }
 0x20d   : > { %7282 = vmatpush2.bf16.msra.mxu0 %v15717_v34  ;;  %7212 = vmatprep.subr.bf16.mxu1 %v15722_v36  ;;  %v18896_v20 = vpack.c.bf16 %v2746_v6, %v2729_v4  ;;  %v2731_v21 = vmul.f32 %v18888_v12, %v2544_v8  ;;  %v2748_v22 = vmul.f32 %v18888_v12, %v2561_v9  ;;  %v15732_v34 = vld [vmem:[%s24025_s4 + $0x6e0] ss:$20 sps:$4 sm:$0xff]   ;;  %v15753_v4 = vld [vmem:[%s24025_s4 + $0x8e8] ss:$20 sps:$4 sm:$0xff]   ;;  %v15758_v6 = vld [vmem:[%s24025_s4 + $0x644] ss:$20 sps:$4 sm:$0xff]  }
 0x20e   : > { %7283 = vmatprep.subr.bf16.mxu0 %v15725_v37  ;;  %v15735_v36 = vld [vmem:[%s24025_s4 + $0x960] ss:$20 sps:$4 sm:$0xff]   ;;  %v15743_v37 = vld [vmem:[%s24025_s4 + $0x93c] ss:$20 sps:$4 sm:$0xff]  }
 0x20f   : > { %7226 = vmatprep.mubr.bf16.mxu1 %v18896_v20  ;;  %v18910_v32 = vpack.c.bf16 %v2748_v22, %v2731_v21 }
 0x210   : > { %7213 = vmatpush2.bf16.msra.mxu1 %v15720_v53 }
 0x211   : > { %7284 = vmatpush2.bf16.msra.mxu0 %v15723_v56  ;;  %7214 = vmatprep.subr.bf16.mxu1 %v15728_v3  ;;  %v15747_v56 = vld [vmem:[%s24025_s4 + $0x910] ss:$20 sps:$4 sm:$0xff]   ;;  %v15750_v3 = vld [vmem:[%s24025_s4 + $0x668] ss:$20 sps:$4 sm:$0xff]  }
 0x212   : > { %7285 = vmatprep.subr.bf16.mxu0 %v15731_v11  ;;  %7297 = vmatprep.mubr.bf16.mxu0 %v18910_v32  ;;  %v16970_v53 = vpop.eup %16969  ;;  %v15761_v11 = vld [vmem:[%s24025_s4 + $0x8c4] ss:$20 sps:$4 sm:$0xff]  }
 0x213   : > { %v16972_v1 = vpop.eup %16971  ;;  %v18963_v60 = vrot.slane %v16970_v53, %v18515_v58 }
 0x214   : > { %7215 = vmatpush2.bf16.msra.mxu1 %v15726_v17  ;;  %v2541_v17 = vld [vmem:[%s24022_s1 + $0x20] sm:$0xff] }
 0x215   : > { %7286 = vmatpush2.bf16.msra.mxu0 %v15729_v13  ;;  %7216 = vmatprep.subr.bf16.mxu1 %v15734_v30  ;;  %v2543_v13 = vld [vmem:[%s24022_s1 + $0x30] sm:$0xff]  ;;  %v2560_v30 = vld [vmem:[%s24022_s1 + $0xb8] sm:$0xff]  ;;  %v16974_v26 = vpop.eup %16973 }
 0x216   : > { %7287 = vmatprep.subr.bf16.mxu0 %v15737_v31  ;;  %v18982_v31 = vrot.slane %v16972_v1, %v18515_v58  ;;  %v2730_v53 = vmul.f32 %v18963_v60, %v2543_v13  ;;  %v2595_v1 = vld [vmem:[%s24022_s1 + $0x1d0] sm:$0xff] }
 0x218   : > { %7217 = vmatpush2.bf16.msra.mxu1 %v15732_v34 }
 0x219   : > { %7288 = vmatpush2.bf16.msra.mxu0 %v15735_v36  ;;  %7218 = vmatprep.subr.bf16.mxu1 %v15740_v38  ;;  %v16976_v36 = vpop.eup %16975  ;;  %v15756_v38 = vld [vmem:[%s24025_s4 + $0x640] ss:$20 sps:$4 sm:$0xff]  }
 0x21a   : > { %7289 = vmatprep.subr.bf16.mxu0 %v15743_v37  ;;  %v2558_v37 = vld [vmem:[%s24022_s1 + $0xa8] sm:$0xff] }
 0x21c   : > { %7219 = vmatpush2.bf16.msra.mxu1 %v15738_v40  ;;  %v15759_v40 = vld [vmem:[%s24025_s4 + $0x8c0] ss:$20 sps:$4 sm:$0xff]  }
 0x21d   : > { %7290 = vmatpush2.bf16.msra.mxu0 %v15741_v41  ;;  %7220 = vmatprep.subr.bf16.mxu1 %v15746_v43  ;;  %v15764_v41 = vld [vmem:[%s24025_s4 + $0xb1c] ss:$20 sps:$4 sm:$0xff]  }
 0x21e   : > { %7291 = vmatprep.subr.bf16.mxu0 %v15749_v46  ;;  %v2576_v43 = vld [vmem:[%s24022_s1 + $0x138] sm:$0xff]  ;;  %v2593_v46 = vld [vmem:[%s24022_s1 + $0x1c0] sm:$0xff] }
 0x21f   : > { %v2347_v8 = vpop.f32.mrf.mxu0  ;;  %v2388_v9 = vpop.f32.mrf.mxu1 }
 0x220   : > { %7221 = vmatpush2.bf16.msra.mxu1 %v15744_v57  ;;  %v18977_v21 = vadd.f32 %v2347_v8, %v2033_v0  ;;  %v18979_v22 = vadd.f32 %v2388_v9, %v2041_v51  ;;  %v2578_v57 = vld [vmem:[%s24022_s1 + $0x148] sm:$0xff]  ;;  %v2728_v8 = vmul.f32 %v18982_v31, %v2541_v17  ;;  %v2745_v9 = vmul.f32 %v18982_v31, %v2558_v37 }
 0x221   : > { %7292 = vmatpush2.bf16.msra.mxu0 %v15747_v56  ;;  %7222 = vmatprep.subr.bf16.mxu1 %v15752_v61  ;;  %v18984_v27 = vpop.f32.mrf.mxu0  ;;  %v18986_v34 = vpop.f32.mrf.mxu1  ;;  %v2747_v56 = vmul.f32 %v18963_v60, %v2560_v30  ;;  %v15767_v61 = vld [vmem:[%s24025_s4 + $0xd9c] ss:$20 sps:$4 sm:$0xff]   ;;  %v2763_v30 = vmul.f32 %v18868_v50, %v2576_v43  ;;  %v2782_v17 = vmul.f32 %v18888_v12, %v2595_v1  ;;  %v15773_v37 = vld [vmem:[%s24025_s4 + $0xd74] ss:$20 sps:$4 sm:$0xff]  }
 0x222   : > { %7293 = vmatprep.subr.bf16.mxu0 %v15755_v2  ;;  %v2495_v2 = vadd.f32 1.0, %v16974_v26  ;;  %v2575_v43 = vld [vmem:[%s24022_s1 + $0x130] sm:$0xff]  ;;  %v2610_v1 = vld [vmem:[%s24022_s1 + $0x248] sm:$0xff] }
 0x223   : > { %v2351_v0 = vpop.f32.mrf.mxu0  ;;  %v2392_v51 = vpop.f32.mrf.mxu1  ;;  %v19032_v26 = vpack.c.bf16 %v2747_v56, %v2730_v53 }
 0x224   : > { %7223 = vmatpush2.bf16.msra.mxu1 %v15750_v3  ;;  %v2497_v3 = vadd.f32 1.0, %v16976_v36  ;;  %v2780_v51 = vmul.f32 %v18868_v50, %v2593_v46  ;;  %v15770_v36 = vld [vmem:[%s24025_s4 + $0xaf4] ss:$20 sps:$4 sm:$0xff]   ;;  %v2592_v46 = vld [vmem:[%s24022_s1 + $0x1b8] sm:$0xff]  ;;  %16977 = vrcp.f32 %v2495_v2 }
 0x225   : > { %7294 = vmatpush2.bf16.msra.mxu0 %v15753_v4  ;;  %7224 = vmatprep.subr.bf16.mxu1 %v15758_v6  ;;  %v2352_v0 = vpop.f32.mrf.mxu0  ;;  %v2393_v13 = vpop.f32.mrf.mxu1  ;;  %v15765_v4 = vld [vmem:[%s24025_s4 + $0xd98] ss:$20 sps:$4 sm:$0xff]   ;;  %v2765_v6 = vmul.f32 %v18888_v12, %v2578_v57  ;;  %v19049_v57 = vpack.c.bf16 %v2745_v9, %v2728_v8  ;;  %v2627_v2 = vld [vmem:[%s24022_s1 + $0x2d0] sm:$0xff]  ;;  %v2629_v9 = vld [vmem:[%s24022_s1 + $0x2e0] sm:$0xff] }
 0x226   : > { %7295 = vmatprep.subr.bf16.mxu0 %v15761_v11  ;;  %v2577_v11 = vld [vmem:[%s24022_s1 + $0x140] sm:$0xff]  ;;  %16979 = vrcp.f32 %v2497_v3  ;;  %v19051_v53 = vpack.c.bf16 %v2780_v51, %v2763_v30  ;;  %v2612_v8 = vld [vmem:[%s24022_s1 + $0x258] sm:$0xff]  ;;  %v2762_v0 = vmul.f32 %v18982_v31, %v2575_v43  ;;  %v2779_v13 = vmul.f32 %v18982_v31, %v2592_v46 }
 0x227   : > { %v19054_v56 = vpack.c.bf16 %v2782_v17, %v2765_v6  ;;  %v15771_v3 = vld [vmem:[%s24025_s4 + $0xd70] ss:$20 sps:$4 sm:$0xff]   ;;  %v15776_v30 = vld [vmem:[%s24025_s4 + $0xacc] ss:$20 sps:$4 sm:$0xff]   ;;  %v15774_v6 = vld [vmem:[%s24025_s4 + $0xac8] ss:$20 sps:$4 sm:$0xff]  }
 0x228   : > { %7225 = vmatpush2.bf16.msra.mxu1 %v15756_v38  ;;  %v2594_v38 = vld [vmem:[%s24022_s1 + $0x1c8] sm:$0xff]  ;;  %v15782_v43 = vld [vmem:[%s24025_s4 + $0xaa4] ss:$20 sps:$4 sm:$0xff]  }
 0x229   : > { %7296 = vmatpush2.bf16.msra.mxu0 %v15759_v40  ;;  %7336 = vmatprep.subr.bf16.mxu1 %v15764_v41  ;;  %v15768_v40 = vld [vmem:[%s24025_s4 + $0xaf0] ss:$20 sps:$4 sm:$0xff]   ;;  %v2764_v41 = vmul.f32 %v18963_v60, %v2577_v11  ;;  %v15779_v51 = vld [vmem:[%s24025_s4 + $0xd4c] ss:$20 sps:$4 sm:$0xff]   ;;  %v15777_v17 = vld [vmem:[%s24025_s4 + $0xd48] ss:$20 sps:$4 sm:$0xff]   ;;  %v2799_v11 = vmul.f32 %v18888_v12, %v2612_v8 }
 0x22a   : > { %7407 = vmatprep.subr.bf16.mxu0 %v15767_v61  ;;  %v2781_v61 = vmul.f32 %v18963_v60, %v2594_v38  ;;  %v15785_v46 = vld [vmem:[%s24025_s4 + $0xd24] ss:$20 sps:$4 sm:$0xff]  }
 0x22b   : > { %7227 = vmatmul.mubr.bf16.vlgmr.msra.gmra.mxu1 %v19049_v57  ;;  %v2609_v38 = vld [vmem:[%s24022_s1 + $0x240] sm:$0xff]  ;;  %v2644_v8 = vld [vmem:[%s24022_s1 + $0x358] sm:$0xff] }
 0x22c   : > { %7298 = vmatmul.mubr.bf16.vlgmr.msra.gmra.mxu0 %v19032_v26  ;;  %7236 = vmatprep.mubr.bf16.mxu1 %v19051_v53 }
 0x22d   : > { %7337 = vmatpush1.bf16.msra.mxu1 %v15762_v42  ;;  %7408 = vmatpush1.bf16.msra.mxu0 %v15765_v4  ;;  %v2797_v42 = vmul.f32 %v18868_v50, %v2610_v1  ;;  %v2814_v4 = vmul.f32 %v18868_v50, %v2627_v2  ;;  %v2626_v1 = vld [vmem:[%s24022_s1 + $0x2c8] sm:$0xff]  ;;  %v2611_v2 = vld [vmem:[%s24022_s1 + $0x250] sm:$0xff] }
 0x22e   : > { %7338 = vmatprep.subr.bf16.mxu1 %v15770_v36  ;;  %7409 = vmatprep.subr.bf16.mxu0 %v15773_v37  ;;  %v2816_v36 = vmul.f32 %v18888_v12, %v2629_v9  ;;  %v19097_v37 = vpack.c.bf16 %v2781_v61, %v2764_v41  ;;  %v2628_v41 = vld [vmem:[%s24022_s1 + $0x2d8] sm:$0xff]  ;;  %v19117_v61 = vpack.c.bf16 %v2779_v13, %v2762_v0  ;;  %v15783_v0 = vld [vmem:[%s24025_s4 + $0xd20] ss:$20 sps:$4 sm:$0xff]  }
 0x22f   : > { %7307 = vmatprep.mubr.bf16.mxu0 %v19054_v56  ;;  %v2025_v9 = vrot.slane %v18840_v25, %v18518_v59  ;;  %v19124_v45 = vpack.c.bf16 %v2814_v4, %v2797_v42  ;;  %v2796_v4 = vmul.f32 %v18982_v31, %v2609_v38  ;;  %v2813_v63 = vmul.f32 %v18982_v31, %v2626_v1  ;;  %v15789_v38 = vld [vmem:[%s24025_s4 + $0xcf8] ss:$20 sps:$4 sm:$0xff]   ;;  %v2643_v1 = vld [vmem:[%s24022_s1 + $0x350] sm:$0xff] }
 0x230   : > { %v19138_v13 = vpack.c.bf16 %v2816_v36, %v2799_v11  ;;  %v2266_v11 = vadd.f32 %v18812_v39, %v2017_v29  ;;  %v15788_v36 = vld [vmem:[%s24025_s4 + $0xa7c] ss:$20 sps:$4 sm:$0xff]   ;;  %v2546_v39 = vld [vmem:[%s24022_s1 + $0x48] sm:$0xff] }
 0x231   : > { %7339 = vmatpush1.bf16.msra.mxu1 %v15768_v40  ;;  %7410 = vmatpush1.bf16.msra.mxu0 %v15771_v3  ;;  %v2646_v40 = vld [vmem:[%s24022_s1 + $0x368] sm:$0xff]  ;;  %v15780_v3 = vld [vmem:[%s24025_s4 + $0xaa0] ss:$20 sps:$4 sm:$0xff]   ;;  %v16978_v42 = vpop.eup %16977  ;;  %v2307_v59 = vadd.f32 %v18814_v10, %v2025_v9 }
 0x232   : > { %7340 = vmatprep.subr.bf16.mxu1 %v15776_v30  ;;  %7411 = vmatprep.subr.bf16.mxu0 %v15779_v51  ;;  %v2798_v30 = vmul.f32 %v18963_v60, %v2611_v2  ;;  %v2815_v51 = vmul.f32 %v18963_v60, %v2628_v41  ;;  %v15786_v10 = vld [vmem:[%s24025_s4 + $0xa78] ss:$20 sps:$4 sm:$0xff]   ;;  %v2833_v29 = vmul.f32 %v18888_v12, %v2646_v40  ;;  %v15794_v12 = vld [vmem:[%s24025_s4 + $0xa54] ss:$20 sps:$4 sm:$0xff]   ;;  %v2565_v41 = vld [vmem:[%s24022_s1 + $0xe0] sm:$0xff] }
 0x233   : > { %7237 = vmatmul.mubr.bf16.gmra.mxu1 %v19117_v61  ;;  %v16980_v62 = vpop.eup %16979  ;;  %v2548_v2 = vld [vmem:[%s24022_s1 + $0x58] sm:$0xff]  ;;  %v13790_v9 = vmul.f32 -1.442695, %v2307_v59  ;;  %v15797_v40 = vld [vmem:[%s24025_s4 + $0xcd4] ss:$20 sps:$4 sm:$0xff]  }
 0x234   : > { %7308 = vmatmul.mubr.bf16.gmra.mxu0 %v19097_v37  ;;  %7246 = vmatprep.mubr.bf16.mxu1 %v19124_v45  ;;  %v15792_v59 = vld [vmem:[%s24025_s4 + $0xa50] ss:$20 sps:$4 sm:$0xff]  }
 0x235   : > { %7341 = vmatpush1.bf16.msra.mxu1 %v15774_v6  ;;  %7412 = vmatpush1.bf16.msra.mxu0 %v15777_v17  ;;  %v15791_v6 = vld [vmem:[%s24025_s4 + $0xcfc] ss:$20 sps:$4 sm:$0xff]   ;;  %v2831_v17 = vmul.f32 %v18868_v50, %v2644_v8  ;;  %v19169_v50 = vpack.c.bf16 %v2815_v51, %v2798_v30  ;;  %v19186_v8 = vpack.c.bf16 %v2813_v63, %v2796_v4  ;;  %v2645_v51 = vld [vmem:[%s24022_s1 + $0x360] sm:$0xff]  ;;  %16981 = vpow2.f32 %v13790_v9 }
 0x236   : > { %7342 = vmatprep.subr.bf16.mxu1 %v15782_v43  ;;  %7413 = vmatprep.subr.bf16.mxu0 %v15785_v46  ;;  %v2563_v43 = vld [vmem:[%s24022_s1 + $0xd0] sm:$0xff]  ;;  %v19167_v46 = vrot.slane %v16978_v42, %v18515_v58  ;;  %v19192_v30 = vrot.slane %v16980_v62, %v18515_v58  ;;  %v13788_v42 = vmul.f32 -1.442695, %v2266_v11  ;;  %v19200_v63 = vpack.c.bf16 %v2833_v29, %v2833_v29 }
 0x237   : > { %7317 = vmatprep.mubr.bf16.mxu0 %v19138_v13  ;;  %v19197_v54 = vpack.c.bf16 %v2831_v17, %v2831_v17  ;;  %v15795_v62 = vld [vmem:[%s24025_s4 + $0xcd0] ss:$20 sps:$4 sm:$0xff]   ;;  %v2830_v4 = vmul.f32 %v18982_v31, %v2643_v1  ;;  %v15800_v17 = vld [vmem:[%s24025_s4 + $0xa2c] ss:$20 sps:$4 sm:$0xff]   ;;  %v15798_v31 = vld [vmem:[%s24025_s4 + $0xa28] ss:$20 sps:$4 sm:$0xff]  }
 0x238   : > { %v2735_v11 = vmul.f32 %v19192_v30, %v2548_v2  ;;  %16983 = vpow2.f32 %v13788_v42  ;;  %v15804_v9 = vld [vmem:[%s24025_s4 + $0xa00] ss:$20 sps:$4 sm:$0xff]  }
 0x239   : > { %7343 = vmatpush1.bf16.msra.mxu1 %v15780_v3  ;;  %7414 = vmatpush1.bf16.msra.mxu0 %v15783_v0  ;;  %v2733_v3 = vmul.f32 %v19167_v46, %v2546_v39  ;;  %v2750_v0 = vmul.f32 %v19167_v46, %v2563_v43  ;;  %v15801_v39 = vld [vmem:[%s24025_s4 + $0xca8] ss:$20 sps:$4 sm:$0xff]  }
 0x23a   : > { %7344 = vmatprep.subr.bf16.mxu1 %v15788_v36  ;;  %7415 = vmatprep.subr.bf16.mxu0 %v15791_v6  ;;  %v2752_v36 = vmul.f32 %v19192_v30, %v2565_v41  ;;  %v2832_v6 = vmul.f32 %v18963_v60, %v2645_v51  ;;  %v15806_v60 = vld [vmem:[%s24025_s4 + $0xa04] ss:$20 sps:$4 sm:$0xff]   ;;  %v15807_v51 = vld [vmem:[%s24025_s4 + $0xc80] ss:$20 sps:$4 sm:$0xff]  }
 0x23b   : > { %7247 = vmatmul.mubr.bf16.gmra.mxu1 %v19186_v8  ;;  %v19234_v43 = vpack.c.bf16 %v2750_v0, %v2733_v3  ;;  %v15810_v3 = vld [vmem:[%s24025_s4 + $0xc58] ss:$20 sps:$4 sm:$0xff]  }
 0x23c   : > { %7318 = vmatmul.mubr.bf16.gmra.mxu0 %v19169_v50  ;;  %7256 = vmatprep.mubr.bf16.mxu1 %v19197_v54  ;;  %v19241_v1 = vpack.c.bf16 %v2752_v36, %v2735_v11  ;;  %v19243_v41 = vpack.c.bf16 %v2832_v6, %v2832_v6  ;;  %v15813_v0 = vld [vmem:[%s24025_s4 + $0xed8] ss:$20 sps:$4 sm:$0xff]   ;;  %v15821_v11 = vld [vmem:[%s24025_s4 + $0xeb4] ss:$20 sps:$4 sm:$0xff]   ;;  %v2037_v36 = vrot.slane %v18840_v25, %v18543_v28 }
 0x23d   : > { %7327 = vmatprep.mubr.bf16.mxu0 %v19200_v63  ;;  %7345 = vmatpush1.bf16.msra.mxu1 %v15786_v10  ;;  %v15803_v10 = vld [vmem:[%s24025_s4 + $0xcac] ss:$20 sps:$4 sm:$0xff]  }
 0x23e   : > { %7416 = vmatpush1.bf16.msra.mxu0 %v15789_v38  ;;  %7346 = vmatprep.subr.bf16.mxu1 %v15794_v12  ;;  %v19236_v38 = vpack.c.bf16 %v2830_v4, %v2830_v4  ;;  %v15809_v12 = vld [vmem:[%s24025_s4 + $0xc84] ss:$20 sps:$4 sm:$0xff]   ;;  %24230 = vst [vmem:[#allocation15_spill] sm:$0xff] %v19241_v1  ;;  %24231 = vst [vmem:[#allocation16_spill] sm:$0xff] %v19243_v41  ;;  %v15818_v4 = vld [vmem:[%s24025_s4 + $0xc34] ss:$20 sps:$4 sm:$0xff]  }
 0x23f   : > { %7417 = vmatprep.subr.bf16.mxu0 %v15797_v40  ;;  %v19226_v29 = vpop.f32.mrf.mxu0 }
 0x241   : > { %7347 = vmatpush1.bf16.msra.mxu1 %v15792_v59  ;;  %v15303_v2 = vpop.f32.mrf.mxu0  ;;  %v15812_v59 = vld [vmem:[%s24025_s4 + $0xc5c] ss:$20 sps:$4 sm:$0xff]  }
 0x242   : > { %7418 = vmatpush1.bf16.msra.mxu0 %v15795_v62  ;;  %7348 = vmatprep.subr.bf16.mxu1 %v15800_v17  ;;  %v15815_v62 = vld [vmem:[%s24025_s4 + $0xedc] ss:$20 sps:$4 sm:$0xff]   ;;  %v16982_v6 = vpop.eup %16981  ;;  %v2045_v17 = vrot.slane %v18840_v25, %v18582_v47  ;;  %v15827_v25 = vld [vmem:[%s24025_s4 + $0xe8c] ss:$20 sps:$4 sm:$0xff]   ;;  %v2350_v2 = vadd.f32 %v18984_v27, %v2037_v36  ;;  %v15833_v27 = vld [vmem:[%s24025_s4 + $0xe64] ss:$20 sps:$4 sm:$0xff]  }
 0x243   : > { %7257 = vmatmul.mubr.bf16.gmra.mxu1 %v19236_v38  ;;  %7419 = vmatprep.subr.bf16.mxu0 %v15803_v10  ;;  %v2432_v40 = vpop.f32.mrf.mxu0  ;;  %v15834_v36 = vld [vmem:[%s24025_s4 + $0xbb8] ss:$20 sps:$4 sm:$0xff]   ;;  %v2599_v47 = vld [vmem:[%s24022_s1 + $0x1f0] sm:$0xff] }
 0x244   : > { %7328 = vmatmul.mubr.bf16.gmra.mxu0 %v19243_v41  ;;  %7368 = vmatprep.mubr.bf16.mxu1 %v19234_v43  ;;  %v2391_v40 = vadd.f32 %v18986_v34, %v2045_v17  ;;  %v13793_v34 = vmul.f32 -1.442695, %v2350_v2  ;;  %v15842_v17 = vld [vmem:[%s24025_s4 + $0xb94] ss:$20 sps:$4 sm:$0xff]   ;;  %v15861_v41 = vld [vmem:[%s24025_s4 + $0x1298] ss:$20 sps:$4 sm:$0xff]  }
 0x245   : > { %7349 = vmatpush1.bf16.msra.mxu1 %v15798_v31  ;;  %7439 = vmatprep.mubr.bf16.mxu0 %v19241_v1  ;;  %v15304_v42 = vpop.f32.mrf.mxu0  ;;  %v16984_v10 = vpop.eup %16983  ;;  %v15816_v31 = vld [vmem:[%s24025_s4 + $0xc30] ss:$20 sps:$4 sm:$0xff]   ;;  %v15858_v1 = vld [vmem:[%s24025_s4 + $0x1018] ss:$20 sps:$4 sm:$0xff]  }
 0x246   : > { %7420 = vmatpush1.bf16.msra.mxu0 %v15801_v39  ;;  %7350 = vmatprep.subr.bf16.mxu1 %v15806_v60  ;;  %v15819_v39 = vld [vmem:[%s24025_s4 + $0xeb0] ss:$20 sps:$4 sm:$0xff]   ;;  %v2496_v60 = vadd.f32 1.0, %v16982_v6  ;;  %v15825_v42 = vld [vmem:[%s24025_s4 + $0xe88] ss:$20 sps:$4 sm:$0xff]  }
 0x247   : > { %7421 = vmatprep.subr.bf16.mxu0 %v15809_v12  ;;  %v15824_v12 = vld [vmem:[%s24025_s4 + $0xc0c] ss:$20 sps:$4 sm:$0xff]  }
 0x248   : > { %16985 = vrcp.f32 %v2496_v60  ;;  %v15837_v6 = vld [vmem:[%s24025_s4 + $0xe38] ss:$20 sps:$4 sm:$0xff]  }
 0x249   : > { %7351 = vmatpush1.bf16.msra.mxu1 %v15804_v9  ;;  %v2494_v9 = vadd.f32 1.0, %v16984_v10  ;;  %v15845_v10 = vld [vmem:[%s24025_s4 + $0xe14] ss:$20 sps:$4 sm:$0xff]   ;;  %v15848_v60 = vld [vmem:[%s24025_s4 + $0xb6c] ss:$20 sps:$4 sm:$0xff]  }
 0x24a   : > { %7422 = vmatpush1.bf16.msra.mxu0 %v15807_v51  ;;  %7352 = vmatprep.subr.bf16.mxu1 %v15812_v59  ;;  %v15822_v51 = vld [vmem:[%s24025_s4 + $0xc08] ss:$20 sps:$4 sm:$0xff]   ;;  %v15830_v59 = vld [vmem:[%s24025_s4 + $0xbe4] ss:$20 sps:$4 sm:$0xff]  }
 0x24b   : > { %7423 = vmatprep.subr.bf16.mxu0 %v15815_v62  ;;  %16987 = vrcp.f32 %v2494_v9  ;;  %v13795_v62 = vmul.f32 -1.442695, %v2391_v40  ;;  %v15846_v9 = vld [vmem:[%s24025_s4 + $0xb68] ss:$20 sps:$4 sm:$0xff]  }
 0x24c   : > { %16989 = vpow2.f32 %v13793_v34  ;;  %v15849_v40 = vld [vmem:[%s24025_s4 + $0xde8] ss:$20 sps:$4 sm:$0xff]   ;;  %v2545_v34 = vld [vmem:[%s24022_s1 + $0x40] sm:$0xff] }
 0x24d   : > { %7353 = vmatpush2.bf16.msra.mxu1 %v15810_v3  ;;  %v15828_v3 = vld [vmem:[%s24025_s4 + $0xbe0] ss:$20 sps:$4 sm:$0xff]   ;;  %16991 = vpow2.f32 %v13795_v62  ;;  %v2562_v62 = vld [vmem:[%s24022_s1 + $0xc8] sm:$0xff] }
 0x24e   : > { %7424 = vmatpush2.bf16.msra.mxu0 %v15813_v0  ;;  %7354 = vmatprep.subr.bf16.mxu1 %v15818_v4  ;;  %v15831_v0 = vld [vmem:[%s24025_s4 + $0xe60] ss:$20 sps:$4 sm:$0xff]   ;;  %v15836_v4 = vld [vmem:[%s24025_s4 + $0xbbc] ss:$20 sps:$4 sm:$0xff]  }
 0x24f   : > { %7425 = vmatprep.subr.bf16.mxu0 %v15821_v11  ;;  %v15839_v11 = vld [vmem:[%s24025_s4 + $0xe3c] ss:$20 sps:$4 sm:$0xff]  }
 0x251   : > { %7355 = vmatpush2.bf16.msra.mxu1 %v15816_v31  ;;  %v15840_v31 = vld [vmem:[%s24025_s4 + $0xb90] ss:$20 sps:$4 sm:$0xff]  }
 0x252   : > { %7426 = vmatpush2.bf16.msra.mxu0 %v15819_v39  ;;  %7356 = vmatprep.subr.bf16.mxu1 %v15824_v12  ;;  %v15843_v39 = vld [vmem:[%s24025_s4 + $0xe10] ss:$20 sps:$4 sm:$0xff]   ;;  %v15851_v12 = vld [vmem:[%s24025_s4 + $0xdec] ss:$20 sps:$4 sm:$0xff]  }
 0x253   : > { %7427 = vmatprep.subr.bf16.mxu0 %v15827_v25 }
 0x255   : > { %7357 = vmatpush2.bf16.msra.mxu1 %v15822_v51  ;;  %v16986_v25 = vpop.eup %16985  ;;  %v15854_v51 = vld [vmem:[%s24025_s4 + $0xb44] ss:$20 sps:$4 sm:$0xff]  }
 0x256   : > { %7428 = vmatpush2.bf16.msra.mxu0 %v15825_v42  ;;  %7358 = vmatprep.subr.bf16.mxu1 %v15830_v59  ;;  %v2547_v42 = vld [vmem:[%s24022_s1 + $0x50] sm:$0xff]  ;;  %v19352_v59 = vrot.slane %v16986_v25, %v18515_v58 }
 0x257   : > { %7429 = vmatprep.subr.bf16.mxu0 %v15833_v27  ;;  %v15857_v27 = vld [vmem:[%s24025_s4 + $0xdc4] ss:$20 sps:$4 sm:$0xff]   ;;  %v15863_v25 = vld [vmem:[%s24025_s4 + $0x129c] ss:$20 sps:$4 sm:$0xff]  }
 0x258   : > { %v16988_v2 = vpop.eup %16987 }
 0x259   : > { %7359 = vmatpush2.bf16.msra.mxu1 %v15828_v3  ;;  %v2564_v3 = vld [vmem:[%s24022_s1 + $0xd8] sm:$0xff] }
 0x25a   : > { %7430 = vmatpush2.bf16.msra.mxu0 %v15831_v0  ;;  %7360 = vmatprep.subr.bf16.mxu1 %v15836_v4  ;;  %v16990_v0 = vpop.eup %16989  ;;  %v19367_v4 = vrot.slane %v16988_v2, %v18515_v58  ;;  %v2582_v2 = vld [vmem:[%s24022_s1 + $0x168] sm:$0xff] }
 0x25b   : > { %7431 = vmatprep.subr.bf16.mxu0 %v15839_v11  ;;  %v2580_v11 = vld [vmem:[%s24022_s1 + $0x158] sm:$0xff] }
 0x25d   : > { %7361 = vmatpush2.bf16.msra.mxu1 %v15834_v36  ;;  %v16992_v36 = vpop.eup %16991 }
 0x25e   : > { %7432 = vmatpush2.bf16.msra.mxu0 %v15837_v6  ;;  %7362 = vmatprep.subr.bf16.mxu1 %v15842_v17  ;;  %v15852_v6 = vld [vmem:[%s24025_s4 + $0xb40] ss:$20 sps:$4 sm:$0xff]  }
 0x25f   : > { %7433 = vmatprep.subr.bf16.mxu0 %v15845_v10  ;;  %v15855_v17 = vld [vmem:[%s24025_s4 + $0xdc0] ss:$20 sps:$4 sm:$0xff]   ;;  %v15860_v10 = vld [vmem:[%s24025_s4 + $0x101c] ss:$20 sps:$4 sm:$0xff]  }
 0x261   : > { %7363 = vmatpush2.bf16.msra.mxu1 %v15840_v31  ;;  %v2597_v31 = vld [vmem:[%s24022_s1 + $0x1e0] sm:$0xff] }
 0x262   : > { %7434 = vmatpush2.bf16.msra.mxu0 %v15843_v39  ;;  %7364 = vmatprep.subr.bf16.mxu1 %v15848_v60  ;;  %v2499_v39 = vadd.f32 1.0, %v16990_v0  ;;  %v2734_v60 = vmul.f32 %v19352_v59, %v2547_v42  ;;  %v2501_v0 = vadd.f32 1.0, %v16992_v36  ;;  %v2749_v42 = vmul.f32 %v19367_v4, %v2562_v62  ;;  %v15866_v62 = vld [vmem:[%s24025_s4 + $0xff4] ss:$20 sps:$4 sm:$0xff]   ;;  %v2596_v36 = vld [vmem:[%s24022_s1 + $0x1d8] sm:$0xff] }
 0x263   : > { %7435 = vmatprep.subr.bf16.mxu0 %v15851_v12  ;;  %v2751_v12 = vmul.f32 %v19352_v59, %v2564_v3  ;;  %v2767_v3 = vmul.f32 %v19167_v46, %v2580_v11  ;;  %v2784_v28 = vmul.f32 %v19167_v46, %v2597_v31  ;;  %v15869_v11 = vld [vmem:[%s24025_s4 + $0x1274] ss:$20 sps:$4 sm:$0xff]  }
 0x264   : > { %16993 = vrcp.f32 %v2499_v39  ;;  %v2614_v31 = vld [vmem:[%s24022_s1 + $0x268] sm:$0xff] }
 0x265   : > { %7365 = vmatpush2.bf16.msra.mxu1 %v15846_v9  ;;  %v2732_v9 = vmul.f32 %v19367_v4, %v2545_v34  ;;  %v19410_v34 = vpack.c.bf16 %v2751_v12, %v2734_v60  ;;  %16995 = vrcp.f32 %v2501_v0  ;;  %v2631_v60 = vld [vmem:[%s24022_s1 + $0x2f0] sm:$0xff]  ;;  %v19435_v12 = vpack.c.bf16 %v2784_v28, %v2767_v3  ;;  %v2633_v28 = vld [vmem:[%s24022_s1 + $0x300] sm:$0xff] }
 0x266   : > { %7436 = vmatpush2.bf16.msra.mxu0 %v15849_v40  ;;  %7366 = vmatprep.subr.bf16.mxu1 %v15854_v51  ;;  %v2769_v40 = vmul.f32 %v19192_v30, %v2582_v2  ;;  %v2786_v51 = vmul.f32 %v19192_v30, %v2599_v47  ;;  %v2579_v47 = vld [vmem:[%s24022_s1 + $0x150] sm:$0xff]  ;;  %v2783_v3 = vmul.f32 %v19367_v4, %v2596_v36  ;;  %v15878_v36 = vld [vmem:[%s24025_s4 + $0xfa4] ss:$20 sps:$4 sm:$0xff]  }
 0x267   : > { %7437 = vmatprep.subr.bf16.mxu0 %v15857_v27  ;;  %v2581_v27 = vld [vmem:[%s24022_s1 + $0x160] sm:$0xff]  ;;  %24232 = vst [vmem:[#allocation17_spill] sm:$0xff] %v19410_v34  ;;  %v19430_v39 = vpack.c.bf16 %v2749_v42, %v2732_v9  ;;  %24234 = vst [vmem:[#allocation19_spill] sm:$0xff] %v19435_v12  ;;  %v2766_v42 = vmul.f32 %v19367_v4, %v2579_v47 }
 0x268   : > { %v15864_v2 = vld [vmem:[%s24025_s4 + $0xff0] ss:$20 sps:$4 sm:$0xff]   ;;  %v19444_v0 = vpack.c.bf16 %v2786_v51, %v2769_v40  ;;  %v2801_v40 = vmul.f32 %v19167_v46, %v2614_v31  ;;  %v15872_v51 = vld [vmem:[%s24025_s4 + $0xfcc] ss:$20 sps:$4 sm:$0xff]  }
 0x269   : > { %7367 = vmatpush2.bf16.msra.mxu1 %v15852_v6  ;;  %v2598_v6 = vld [vmem:[%s24022_s1 + $0x1e8] sm:$0xff]  ;;  %24233 = vst [vmem:[#allocation18_spill] sm:$0xff] %v19430_v39  ;;  %v2613_v31 = vld [vmem:[%s24022_s1 + $0x260] sm:$0xff] }
 0x26a   : > { %7438 = vmatpush2.bf16.msra.mxu0 %v15855_v17  ;;  %7478 = vmatprep.subr.bf16.mxu1 %v15860_v10  ;;  %v15867_v17 = vld [vmem:[%s24025_s4 + $0x1270] ss:$20 sps:$4 sm:$0xff]   ;;  %24235 = vst [vmem:[#allocation20_spill] sm:$0xff] %v19444_v0  ;;  %v2616_v10 = vld [vmem:[%s24022_s1 + $0x278] sm:$0xff]  ;;  %v2785_v9 = vmul.f32 %v19352_v59, %v2598_v6  ;;  %v2818_v6 = vmul.f32 %v19167_v46, %v2631_v60  ;;  %v2630_v60 = vld [vmem:[%s24022_s1 + $0x2e8] sm:$0xff] }
 0x26b   : > { %7549 = vmatprep.subr.bf16.mxu0 %v15863_v25  ;;  %v2768_v25 = vmul.f32 %v19352_v59, %v2581_v27  ;;  %v15875_v27 = vld [vmem:[%s24025_s4 + $0x124c] ss:$20 sps:$4 sm:$0xff]  }
 0x26c   : > { %7369 = vmatmul.mubr.bf16.vlgmr.msra.gmra.mxu1 %v19430_v39 }
 0x26d   : > { %7440 = vmatmul.mubr.bf16.vlgmr.msra.gmra.mxu0 %v19410_v34  ;;  %7378 = vmatprep.mubr.bf16.mxu1 %v19435_v12  ;;  %v19475_v47 = vpack.c.bf16 %v2785_v9, %v2768_v25  ;;  %v2615_v25 = vld [vmem:[%s24022_s1 + $0x270] sm:$0xff]  ;;  %v2648_v9 = vld [vmem:[%s24022_s1 + $0x378] sm:$0xff] }
 0x26e   : > { %7479 = vmatpush1.bf16.msra.mxu1 %v15858_v1  ;;  %7550 = vmatpush1.bf16.msra.mxu0 %v15861_v41  ;;  %v2803_v1 = vmul.f32 %v19192_v30, %v2616_v10  ;;  %v2820_v41 = vmul.f32 %v19192_v30, %v2633_v28  ;;  %v19486_v10 = vpack.c.bf16 %v2783_v3, %v2766_v42  ;;  %v15881_v28 = vld [vmem:[%s24025_s4 + $0x1224] ss:$20 sps:$4 sm:$0xff]   ;;  %v15879_v42 = vld [vmem:[%s24025_s4 + $0x1220] ss:$20 sps:$4 sm:$0xff]  }
 0x26f   : > { %7480 = vmatprep.subr.bf16.mxu1 %v15866_v62  ;;  %7551 = vmatprep.subr.bf16.mxu0 %v15869_v11  ;;  %v15870_v62 = vld [vmem:[%s24025_s4 + $0xfc8] ss:$20 sps:$4 sm:$0xff]   ;;  %24236 = vst [vmem:[#allocation21_spill] sm:$0xff] %v19475_v47 }
 0x270   : > { %7449 = vmatprep.mubr.bf16.mxu0 %v19444_v0  ;;  %v15873_v11 = vld [vmem:[%s24025_s4 + $0x1248] ss:$20 sps:$4 sm:$0xff]   ;;  %24237 = vst [vmem:[#allocation22_spill] sm:$0xff] %v19486_v10  ;;  %v19497_v0 = vpack.c.bf16 %v2818_v6, %v2801_v40  ;;  %v2817_v6 = vmul.f32 %v19367_v4, %v2630_v60 }
 0x271   : > { %v2632_v3 = vld [vmem:[%s24022_s1 + $0x2f8] sm:$0xff]  ;;  %v2650_v40 = vld [vmem:[%s24022_s1 + $0x388] sm:$0xff] }
 0x272   : > { %7481 = vmatpush1.bf16.msra.mxu1 %v15864_v2  ;;  %7552 = vmatpush1.bf16.msra.mxu0 %v15867_v17  ;;  %24238 = vst [vmem:[#allocation23_spill] sm:$0xff] %v19497_v0  ;;  %v19499_v2 = vpack.c.bf16 %v2820_v41, %v2803_v1  ;;  %v15876_v17 = vld [vmem:[%s24025_s4 + $0xfa0] ss:$20 sps:$4 sm:$0xff]   ;;  %v2802_v41 = vmul.f32 %v19352_v59, %v2615_v25  ;;  %v2550_v60 = vld [vmem:[%s24022_s1 + $0x68] sm:$0xff] }
 0x273   : > { %7482 = vmatprep.subr.bf16.mxu1 %v15872_v51  ;;  %7553 = vmatprep.subr.bf16.mxu0 %v15875_v27  ;;  %v16994_v51 = vpop.eup %16993  ;;  %v2800_v27 = vmul.f32 %v19367_v4, %v2613_v31  ;;  %v2819_v34 = vmul.f32 %v19352_v59, %v2632_v3  ;;  %v15882_v31 = vld [vmem:[%s24025_s4 + $0xf78] ss:$20 sps:$4 sm:$0xff]   ;;  %v2567_v25 = vld [vmem:[%s24022_s1 + $0xf0] sm:$0xff] }
 0x274   : > { %24239 = vst [vmem:[#allocation24_spill] sm:$0xff] %v19499_v2  ;;  %7379 = vmatmul.mubr.bf16.gmra.mxu1 %v19486_v10  ;;  %v16996_v1 = vpop.eup %16995  ;;  %v19539_v3 = vrot.slane %v16994_v51, %v18515_v58 }
 0x275   : > { %7450 = vmatmul.mubr.bf16.gmra.mxu0 %v19475_v47  ;;  %7388 = vmatprep.mubr.bf16.mxu1 %v19497_v0  ;;  %v15884_v47 = vld [vmem:[%s24025_s4 + $0xf7c] ss:$20 sps:$4 sm:$0xff]   ;;  %v19554_v51 = vpack.c.bf16 %v2817_v6, %v2800_v27  ;;  %v2569_v0 = vld [vmem:[%s24022_s1 + $0x100] sm:$0xff]  ;;  %v19562_v10 = vpack.c.bf16 %v2819_v34, %v2802_v41  ;;  %v15893_v27 = vld [vmem:[%s24025_s4 + $0x11d4] ss:$20 sps:$4 sm:$0xff]  }
 0x276   : > { %7483 = vmatpush1.bf16.msra.mxu1 %v15870_v62  ;;  %7554 = vmatpush1.bf16.msra.mxu0 %v15873_v11  ;;  %v15887_v62 = vld [vmem:[%s24025_s4 + $0x11fc] ss:$20 sps:$4 sm:$0xff]   ;;  %v2835_v11 = vmul.f32 %v19167_v46, %v2648_v9  ;;  %v15885_v46 = vld [vmem:[%s24025_s4 + $0x11f8] ss:$20 sps:$4 sm:$0xff]   ;;  %v13792_v9 = vmul.f32 -1.442695, %v18977_v21 }
 0x277   : > { %7459 = vmatprep.mubr.bf16.mxu0 %v19499_v2  ;;  %7484 = vmatprep.subr.bf16.mxu1 %v15878_v36  ;;  %v2837_v36 = vmul.f32 %v19192_v30, %v2650_v40  ;;  %v2647_v30 = vld [vmem:[%s24022_s1 + $0x370] sm:$0xff]  ;;  %v19552_v40 = vrot.slane %v16996_v1, %v18515_v58  ;;  %24240 = vst [vmem:[#allocation25_spill] sm:$0xff] %v19554_v51  ;;  %v2552_v2 = vld [vmem:[%s24022_s1 + $0x78] sm:$0xff]  ;;  %24241 = vst [vmem:[#allocation26_spill] sm:$0xff] %v19562_v10  ;;  %v13794_v1 = vmul.f32 -1.442695, %v18979_v22 }
 0x278   : > { %7555 = vmatprep.subr.bf16.mxu0 %v15881_v28  ;;  %v15890_v28 = vld [vmem:[%s24025_s4 + $0xf54] ss:$20 sps:$4 sm:$0xff]   ;;  %v19564_v21 = vpack.c.bf16 %v2835_v11, %v2835_v11  ;;  %v2649_v34 = vld [vmem:[%s24022_s1 + $0x380] sm:$0xff]  ;;  %v2737_v22 = vmul.f32 %v19539_v3, %v2550_v60  ;;  %16997 = vpow2.f32 %v13792_v9  ;;  %v2834_v6 = vmul.f32 %v19367_v4, %v2647_v30 }
 0x279   : > { %v2739_v41 = vmul.f32 %v19552_v40, %v2552_v2  ;;  %v15891_v11 = vld [vmem:[%s24025_s4 + $0x11d0] ss:$20 sps:$4 sm:$0xff]   ;;  %v15896_v60 = vld [vmem:[%s24025_s4 + $0xf2c] ss:$20 sps:$4 sm:$0xff]   ;;  %16999 = vpow2.f32 %v13794_v1  ;;  %v15894_v4 = vld [vmem:[%s24025_s4 + $0xf28] ss:$20 sps:$4 sm:$0xff]  }
 0x27a   : > { %7485 = vmatpush1.bf16.msra.mxu1 %v15876_v17  ;;  %7556 = vmatpush1.bf16.msra.mxu0 %v15879_v42  ;;  %24242 = vst [vmem:[#allocation27_spill] sm:$0xff] %v19564_v21  ;;  %v19568_v17 = vpack.c.bf16 %v2837_v36, %v2837_v36  ;;  %v15888_v42 = vld [vmem:[%s24025_s4 + $0xf50] ss:$20 sps:$4 sm:$0xff]   ;;  %v2836_v36 = vmul.f32 %v19352_v59, %v2649_v34  ;;  %v15897_v59 = vld [vmem:[%s24025_s4 + $0x11a8] ss:$20 sps:$4 sm:$0xff]  }
 0x27b   : > { %7486 = vmatprep.subr.bf16.mxu1 %v15884_v47  ;;  %7557 = vmatprep.subr.bf16.mxu0 %v15887_v62  ;;  %v2754_v47 = vmul.f32 %v19539_v3, %v2567_v25  ;;  %v2756_v62 = vmul.f32 %v19552_v40, %v2569_v0  ;;  %v15899_v0 = vld [vmem:[%s24025_s4 + $0x11ac] ss:$20 sps:$4 sm:$0xff]   ;;  %v15902_v25 = vld [vmem:[%s24025_s4 + $0xf04] ss:$20 sps:$4 sm:$0xff]   ;;  %v15911_v34 = vld [vmem:[%s24025_s4 + $0x13dc] ss:$20 sps:$4 sm:$0xff]  }
 0x27c   : > { %7389 = vmatmul.mubr.bf16.gmra.mxu1 %v19554_v51  ;;  %24243 = vst [vmem:[#allocation28_spill] sm:$0xff] %v19568_v17  ;;  %v15900_v30 = vld [vmem:[%s24025_s4 + $0xf00] ss:$20 sps:$4 sm:$0xff]   ;;  %v15905_v9 = vld [vmem:[%s24025_s4 + $0x1184] ss:$20 sps:$4 sm:$0xff]  }
 0x27d   : > { %7460 = vmatmul.mubr.bf16.gmra.mxu0 %v19562_v10  ;;  %7398 = vmatprep.mubr.bf16.mxu1 %v19564_v21  ;;  %v19600_v2 = vpack.c.bf16 %v2754_v47, %v2737_v22  ;;  %v15903_v1 = vld [vmem:[%s24025_s4 + $0x1180] ss:$20 sps:$4 sm:$0xff]   ;;  %v15909_v22 = vld [vmem:[%s24025_s4 + $0x13d8] ss:$20 sps:$4 sm:$0xff]  }
 0x27e   : > { %7469 = vmatprep.mubr.bf16.mxu0 %v19568_v17  ;;  %7487 = vmatpush1.bf16.msra.mxu1 %v15882_v31  ;;  %v19602_v31 = vpack.c.bf16 %v2834_v6, %v2834_v6  ;;  %v15914_v47 = vld [vmem:[%s24025_s4 + $0x1134] ss:$20 sps:$4 sm:$0xff]   ;;  %v15959_v17 = vld [vmem:[%s24025_s4 + $0x124] ss:$20 sps:$4 sm:$0xff]  }
 0x27f   : > { %7558 = vmatpush1.bf16.msra.mxu0 %v15885_v46  ;;  %7488 = vmatprep.subr.bf16.mxu1 %v15890_v28  ;;  %24244 = vst [vmem:[#allocation29_spill] sm:$0xff] %v19600_v2  ;;  %v19610_v46 = vpack.c.bf16 %v2756_v62, %v2739_v41  ;;  %v19612_v28 = vpack.c.bf16 %v2836_v36, %v2836_v36  ;;  %v15917_v6 = vld [vmem:[%s24025_s4 + $0x13b4] ss:$20 sps:$4 sm:$0xff]   ;;  %v15915_v36 = vld [vmem:[%s24025_s4 + $0x13b0] ss:$20 sps:$4 sm:$0xff]  }
 0x280   : > { %7559 = vmatprep.subr.bf16.mxu0 %v15893_v27  ;;  %24245 = vst [vmem:[#allocation30_spill] sm:$0xff] %v19602_v31  ;;  %v15906_v27 = vld [vmem:[%s24025_s4 + $0x1158] ss:$20 sps:$4 sm:$0xff]   ;;  %v2637_v21 = vld [vmem:[%s24022_s1 + $0x320] sm:$0xff] }
 0x281   : > { %24246 = vst [vmem:[#allocation31_spill] sm:$0xff] %v19610_v46  ;;  %24247 = vst [vmem:[#allocation32_spill] sm:$0xff] %v19612_v28 }
 0x282   : > { %7489 = vmatpush1.bf16.msra.mxu1 %v15888_v42  ;;  %v15908_v42 = vld [vmem:[%s24025_s4 + $0x115c] ss:$20 sps:$4 sm:$0xff]  }
 0x283   : > { %7560 = vmatpush1.bf16.msra.mxu0 %v15891_v11  ;;  %7490 = vmatprep.subr.bf16.mxu1 %v15896_v60  ;;  %v15912_v11 = vld [vmem:[%s24025_s4 + $0x1130] ss:$20 sps:$4 sm:$0xff]  }
 0x284   : > { %7399 = vmatmul.mubr.bf16.gmra.mxu1 %v19602_v31  ;;  %7561 = vmatprep.subr.bf16.mxu0 %v15899_v0 }
 0x285   : > { %7470 = vmatmul.mubr.bf16.gmra.mxu0 %v19612_v28  ;;  %7510 = vmatprep.mubr.bf16.mxu1 %v19600_v2  ;;  %v16998_v41 = vpop.eup %16997 }
 0x286   : > { %7491 = vmatpush1.bf16.msra.mxu1 %v15894_v4  ;;  %7581 = vmatprep.mubr.bf16.mxu0 %v19610_v46  ;;  %v17000_v62 = vpop.eup %16999  ;;  %v2498_v60 = vadd.f32 1.0, %v16998_v41  ;;  %v15920_v4 = vld [vmem:[%s24025_s4 + $0x110c] ss:$20 sps:$4 sm:$0xff]  }
 0x287   : > { %7562 = vmatpush1.bf16.msra.mxu0 %v15897_v59  ;;  %7492 = vmatprep.subr.bf16.mxu1 %v15902_v25  ;;  %v2500_v0 = vadd.f32 1.0, %v17000_v62  ;;  %v13779_v59 = vld [vmem:[%s24024_s3 + $0x10] ss:$0 sm:$0xff]  ;;  %v15918_v25 = vld [vmem:[%s24025_s4 + $0x1108] ss:$20 sps:$4 sm:$0xff]  }
 0x288   : > { %7563 = vmatprep.subr.bf16.mxu0 %v15905_v9  ;;  %v15921_v9 = vld [vmem:[%s24025_s4 + $0x1388] ss:$20 sps:$4 sm:$0xff]   ;;  %17001 = vrcp.f32 %v2498_v60  ;;  %v15933_v62 = vld [vmem:[%s24025_s4 + $0x1338] ss:$20 sps:$4 sm:$0xff]   ;;  %v15936_v60 = vld [vmem:[%s24025_s4 + $0x1090] ss:$20 sps:$4 sm:$0xff]  }
 0x289   : > { %17003 = vrcp.f32 %v2500_v0  ;;  %v15944_v0 = vld [vmem:[%s24025_s4 + $0x106c] ss:$20 sps:$4 sm:$0xff]  }
 0x28a   : > { %7493 = vmatpush1.bf16.msra.mxu1 %v15900_v30  ;;  %v15923_v30 = vld [vmem:[%s24025_s4 + $0x138c] ss:$20 sps:$4 sm:$0xff]  }
 0x28b   : > { %7564 = vmatpush1.bf16.msra.mxu0 %v15903_v1  ;;  %7494 = vmatprep.subr.bf16.mxu1 %v15908_v42  ;;  %v15926_v1 = vld [vmem:[%s24025_s4 + $0x10e4] ss:$20 sps:$4 sm:$0xff]  }
 0x28c   : > { %7565 = vmatprep.subr.bf16.mxu0 %v15911_v34  ;;  %v15929_v42 = vld [vmem:[%s24025_s4 + $0x1364] ss:$20 sps:$4 sm:$0xff]   ;;  %v15924_v34 = vld [vmem:[%s24025_s4 + $0x10e0] ss:$20 sps:$4 sm:$0xff]  }
 0x28e   : > { %7495 = vmatpush2.bf16.msra.mxu1 %v15906_v27  ;;  %v2430_v27 = vadd.f32 %v13779_v59, %v19226_v29  ;;  %v15930_v29 = vld [vmem:[%s24025_s4 + $0x10b8] ss:$20 sps:$4 sm:$0xff]  }
 0x28f   : > { %7566 = vmatpush2.bf16.msra.mxu0 %v15909_v22  ;;  %7496 = vmatprep.subr.bf16.mxu1 %v15914_v47  ;;  %v15927_v22 = vld [vmem:[%s24025_s4 + $0x1360] ss:$20 sps:$4 sm:$0xff]   ;;  %v15932_v47 = vld [vmem:[%s24025_s4 + $0x10bc] ss:$20 sps:$4 sm:$0xff]  }
 0x290   : > { %7567 = vmatprep.subr.bf16.mxu0 %v15917_v6  ;;  %v15935_v6 = vld [vmem:[%s24025_s4 + $0x133c] ss:$20 sps:$4 sm:$0xff]   ;;  %v13796_v41 = vmul.f32 -1.442695, %v2430_v27  ;;  %v15953_v27 = vld [vmem:[%s24025_s4 + $0x12c4] ss:$20 sps:$4 sm:$0xff]  }
 0x292   : > { %7497 = vmatpush2.bf16.msra.mxu1 %v15912_v11  ;;  %v15938_v11 = vld [vmem:[%s24025_s4 + $0x1094] ss:$20 sps:$4 sm:$0xff]   ;;  %17005 = vpow2.f32 %v13796_v41  ;;  %v2584_v41 = vld [vmem:[%s24022_s1 + $0x178] sm:$0xff] }
 0x293   : > { %7568 = vmatpush2.bf16.msra.mxu0 %v15915_v36  ;;  %7498 = vmatprep.subr.bf16.mxu1 %v15920_v4  ;;  %v15941_v36 = vld [vmem:[%s24025_s4 + $0x1314] ss:$20 sps:$4 sm:$0xff]   ;;  %v15939_v4 = vld [vmem:[%s24025_s4 + $0x1310] ss:$20 sps:$4 sm:$0xff]  }
 0x294   : > { %7569 = vmatprep.subr.bf16.mxu0 %v15923_v30  ;;  %v15947_v30 = vld [vmem:[%s24025_s4 + $0x12ec] ss:$20 sps:$4 sm:$0xff]  }
 0x295   : > { %v17002_v59 = vpop.eup %17001 }
 0x296   : > { %7499 = vmatpush2.bf16.msra.mxu1 %v15918_v25  ;;  %v15942_v25 = vld [vmem:[%s24025_s4 + $0x1068] ss:$20 sps:$4 sm:$0xff]  }
 0x297   : > { %7570 = vmatpush2.bf16.msra.mxu0 %v15921_v9  ;;  %7500 = vmatprep.subr.bf16.mxu1 %v15926_v1  ;;  %v17004_v9 = vpop.eup %17003  ;;  %v15945_v1 = vld [vmem:[%s24025_s4 + $0x12e8] ss:$20 sps:$4 sm:$0xff]  }
 0x298   : > { %7571 = vmatprep.subr.bf16.mxu0 %v15929_v42  ;;  %v15950_v42 = vld [vmem:[%s24025_s4 + $0x1044] ss:$20 sps:$4 sm:$0xff]  }
 0x29a   : > { %7501 = vmatpush2.bf16.msra.mxu1 %v15924_v34  ;;  %v2549_v34 = vld [vmem:[%s24022_s1 + $0x60] sm:$0xff] }
 0x29b   : > { %7572 = vmatpush2.bf16.msra.mxu0 %v15927_v22  ;;  %7502 = vmatprep.subr.bf16.mxu1 %v15932_v47  ;;  %v2566_v22 = vld [vmem:[%s24022_s1 + $0xe8] sm:$0xff]  ;;  %v19728_v47 = vrot.slane %v17002_v59, %v18515_v58  ;;  %v15956_v59 = vld [vmem:[%s24025_s4 + $0x1404] ss:$20 sps:$4 sm:$0xff]  }
 0x29c   : > { %7573 = vmatprep.subr.bf16.mxu0 %v15935_v6  ;;  %v2568_v6 = vld [vmem:[%s24022_s1 + $0xf8] sm:$0xff] }
 0x29e   : > { %7503 = vmatpush2.bf16.msra.mxu1 %v15930_v29  ;;  %v2551_v29 = vld [vmem:[%s24022_s1 + $0x70] sm:$0xff] }
 0x29f   : > { %7574 = vmatpush2.bf16.msra.mxu0 %v15933_v62  ;;  %7504 = vmatprep.subr.bf16.mxu1 %v15938_v11  ;;  %v2601_v62 = vld [vmem:[%s24022_s1 + $0x200] sm:$0xff]  ;;  %v19743_v11 = vrot.slane %v17004_v9, %v18515_v58  ;;  %v2753_v9 = vmul.f32 %v19728_v47, %v2566_v22  ;;  %v17006_v2 = vpop.eup %17005 }
 0x2a0   : > { %7575 = vmatprep.subr.bf16.mxu0 %v15941_v36  ;;  %v2586_v36 = vld [vmem:[%s24022_s1 + $0x188] sm:$0xff]  ;;  %v2788_v10 = vmul.f32 %v19539_v3, %v2601_v62  ;;  %v15957_v22 = vld [vmem:[%s24025_s4 + $0x120] ss:$20 sps:$4 sm:$0xff]   ;;  %v2502_v12 = vadd.f32 1.0, %v17006_v2 }
 0x2a1   : > { %v2738_v46 = vmul.f32 %v19743_v11, %v2551_v29  ;;  %v2755_v28 = vmul.f32 %v19743_v11, %v2568_v6  ;;  %v2600_v29 = vld [vmem:[%s24022_s1 + $0x1f8] sm:$0xff]  ;;  %v2585_v6 = vld [vmem:[%s24022_s1 + $0x180] sm:$0xff] }
 0x2a2   : > { %7505 = vmatpush2.bf16.msra.mxu1 %v15936_v60  ;;  %v15948_v60 = vld [vmem:[%s24025_s4 + $0x1040] ss:$20 sps:$4 sm:$0xff]   ;;  %17007 = vrcp.f32 %v2502_v12 }
 0x2a3   : > { %7576 = vmatpush2.bf16.msra.mxu0 %v15939_v4  ;;  %7506 = vmatprep.subr.bf16.mxu1 %v15944_v0  ;;  %v15951_v4 = vld [vmem:[%s24025_s4 + $0x12c0] ss:$20 sps:$4 sm:$0xff]   ;;  %v19797_v31 = vpack.c.bf16 %v2755_v28, %v2738_v46  ;;  %v15983_v46 = vld [vmem:[%s24025_s4 + $0x3a4] ss:$20 sps:$4 sm:$0xff]  }
 0x2a4   : > { %7577 = vmatprep.subr.bf16.mxu0 %v15947_v30  ;;  %v2603_v0 = vld [vmem:[%s24022_s1 + $0x210] sm:$0xff]  ;;  %v2736_v30 = vmul.f32 %v19728_v47, %v2549_v34 }
 0x2a5   : > { %v2583_v34 = vld [vmem:[%s24022_s1 + $0x170] sm:$0xff]  ;;  %24249 = vst [vmem:[#allocation34_spill] sm:$0xff] %v19797_v31 }
 0x2a6   : > { %7507 = vmatpush2.bf16.msra.mxu1 %v15942_v25  ;;  %v2771_v25 = vmul.f32 %v19539_v3, %v2584_v41  ;;  %v19786_v41 = vpack.c.bf16 %v2753_v9, %v2736_v30  ;;  %v2620_v9 = vld [vmem:[%s24022_s1 + $0x298] sm:$0xff]  ;;  %v2770_v51 = vmul.f32 %v19728_v47, %v2583_v34 }
 0x2a7   : > { %7578 = vmatpush2.bf16.msra.mxu0 %v15945_v1  ;;  %7508 = vmatprep.subr.bf16.mxu1 %v15950_v42  ;;  %v15954_v1 = vld [vmem:[%s24025_s4 + $0x1400] ss:$20 sps:$4 sm:$0xff]   ;;  %v2773_v42 = vmul.f32 %v19552_v40, %v2586_v36  ;;  %v2602_v36 = vld [vmem:[%s24022_s1 + $0x208] sm:$0xff] }
 0x2a8   : > { %7579 = vmatprep.subr.bf16.mxu0 %v15953_v27  ;;  %v2790_v27 = vmul.f32 %v19552_v40, %v2603_v0  ;;  %24248 = vst [vmem:[#allocation33_spill] sm:$0xff] %v19786_v41  ;;  %v2635_v0 = vld [vmem:[%s24022_s1 + $0x310] sm:$0xff]  ;;  %v19799_v30 = vpack.c.bf16 %v2788_v10, %v2771_v25 }
 0x2a9   : > { %v2822_v34 = vmul.f32 %v19539_v3, %v2635_v0  ;;  %v15963_v0 = vld [vmem:[%s24025_s4 + $0xd0] ss:$20 sps:$4 sm:$0xff]  }
 0x2aa   : > { %7509 = vmatpush2.bf16.msra.mxu1 %v15948_v60  ;;  %v2618_v60 = vld [vmem:[%s24022_s1 + $0x288] sm:$0xff]  ;;  %24250 = vst [vmem:[#allocation35_spill] sm:$0xff] %v19799_v30 }
 0x2ab   : > { %7580 = vmatpush2.bf16.msra.mxu0 %v15951_v4  ;;  %7634 = vmatprep.subr.bf16.mxu1 %v15956_v59  ;;  %v7086_v62 = vpop.f32.mrf.mxu1  ;;  %v15962_v59 = vld [vmem:[%s24025_s4 + $0xfc] ss:$20 sps:$4 sm:$0xff]   ;;  %v2805_v2 = vmul.f32 %v19539_v3, %v2618_v60 }
 0x2ac   : > { %7691 = vmatprep.subr.bf16.mxu0 %v15959_v17  ;;  %v7157_v4 = vpop.f32.mrf.mxu0  ;;  %v19816_v17 = vpack.c.bf16 %v2790_v27, %v2773_v42  ;;  %v2787_v27 = vmul.f32 %v19728_v47, %v2600_v29  ;;  %v15965_v29 = vld [vmem:[%s24025_s4 + $0xd4] ss:$20 sps:$4 sm:$0xff]  }
 0x2ad   : > { %7511 = vmatmul.mubr.bf16.vlgmr.msra.gmra.mxu1 %v19786_v41  ;;  %v19814_v10 = vadd.f32 %v7157_v4, %v7086_v62  ;;  %v7088_v28 = vpop.f32.mrf.mxu1  ;;  %v15960_v62 = vld [vmem:[%s24025_s4 + $0xf8] ss:$20 sps:$4 sm:$0xff]   ;;  %v2772_v4 = vmul.f32 %v19743_v11, %v2585_v6  ;;  %v2807_v6 = vmul.f32 %v19552_v40, %v2620_v9 }
 0x2ae   : > { %24251 = vst [vmem:[#allocation36_spill] sm:$0xff] %v19816_v17  ;;  %7582 = vmatmul.mubr.bf16.vlgmr.msra.gmra.mxu0 %v19797_v31  ;;  %7520 = vmatprep.mubr.bf16.mxu1 %v19799_v30  ;;  %v7159_v25 = vpop.f32.mrf.mxu0  ;;  %v2789_v30 = vmul.f32 %v19743_v11, %v2602_v36  ;;  %v2617_v36 = vld [vmem:[%s24022_s1 + $0x280] sm:$0xff]  ;;  %v19849_v60 = vpack.c.bf16 %v2787_v27, %v2770_v51  ;;  %v2636_v9 = vld [vmem:[%s24022_s1 + $0x318] sm:$0xff] }
 0x2af   : > { %7591 = vmatprep.mubr.bf16.mxu0 %v19816_v17  ;;  %7635 = vmatpush1.bf16.msra.mxu1 %v15954_v1  ;;  %v19822_v39 = vadd.f32 %v7159_v25, %v7088_v28  ;;  %v7090_v42 = vpop.f32.mrf.mxu1  ;;  %v15968_v17 = vld [vmem:[%s24025_s4 + $0xac] ss:$20 sps:$4 sm:$0xff]  }
 0x2b0   : > { %7692 = vmatpush1.bf16.msra.mxu0 %v15957_v22  ;;  %v7161_v31 = vpop.f32.mrf.mxu0  ;;  %7762 = vmatprep.subr.bf16.mxu1 %v15983_v46  ;;  %v2824_v22 = vmul.f32 %v19552_v40, %v2637_v21  ;;  %24254 = vst [vmem:[#allocation39_spill] sm:$0xff] %v19849_v60  ;;  %v2619_v21 = vld [vmem:[%s24022_s1 + $0x290] sm:$0xff]  ;;  %v2652_v46 = vld [vmem:[%s24022_s1 + $0x398] sm:$0xff]  ;;  %v19863_v12 = vpack.c.bf16 %v2789_v30, %v2772_v4  ;;  %v2654_v30 = vld [vmem:[%s24022_s1 + $0x3a8] sm:$0xff] }
 0x2b1   : > { %7693 = vmatprep.subr.bf16.mxu0 %v15962_v59  ;;  %v19832_v1 = vadd.f32 %v7161_v31, %v7090_v42  ;;  %v19834_v28 = vpop.f32.mrf.mxu1  ;;  %v2634_v31 = vld [vmem:[%s24022_s1 + $0x308] sm:$0xff]  ;;  %v19865_v42 = vpack.c.bf16 %v2822_v34, %v2805_v2 }
 0x2b2   : > { %24252 = vst [vmem:[#allocation37_spill] sm:$0xff] %v19834_v28  ;;  %v19841_v25 = vpop.f32.mrf.mxu0  ;;  %24255 = vst [vmem:[#allocation40_spill] sm:$0xff] %v19863_v12  ;;  %v15966_v2 = vld [vmem:[%s24025_s4 + $0xa8] ss:$20 sps:$4 sm:$0xff]  }
 0x2b3   : > { %24253 = vst [vmem:[#allocation38_spill] sm:$0xff] %v19841_v25  ;;  %v7096_v59 = vpop.f32.mrf.mxu1  ;;  %24256 = vst [vmem:[#allocation41_spill] sm:$0xff] %v19865_v42  ;;  %v19870_v25 = vpack.c.bf16 %v2824_v22, %v2807_v6  ;;  %v2821_v6 = vmul.f32 %v19728_v47, %v2634_v31 }
 0x2b4   : > { %7694 = vmatpush1.bf16.msra.mxu0 %v15960_v62  ;;  %v7167_v51 = vpop.f32.mrf.mxu0 }
 0x2b5   : > { %7521 = vmatmul.mubr.bf16.gmra.mxu1 %v19849_v60  ;;  %7695 = vmatprep.subr.bf16.mxu0 %v15965_v29  ;;  %v19868_v27 = vadd.f32 %v7167_v51, %v7096_v59  ;;  %24257 = vst [vmem:[#allocation42_spill] sm:$0xff] %v19870_v25  ;;  %v7098_v28 = vpop.f32.mrf.mxu1  ;;  %v2804_v29 = vmul.f32 %v19728_v47, %v2617_v36 }
 0x2b6   : > { %7592 = vmatmul.mubr.bf16.gmra.mxu0 %v19863_v12  ;;  %7530 = vmatprep.mubr.bf16.mxu1 %v19865_v42  ;;  %v7169_v62 = vpop.f32.mrf.mxu0  ;;  %v2806_v59 = vmul.f32 %v19743_v11, %v2619_v21  ;;  %v2823_v51 = vmul.f32 %v19743_v11, %v2636_v9  ;;  %v2839_v12 = vmul.f32 %v19539_v3, %v2652_v46  ;;  %v15969_v21 = vld [vmem:[%s24025_s4 + $0x80] ss:$20 sps:$4 sm:$0xff]  }
 0x2b7   : > { %7601 = vmatprep.mubr.bf16.mxu0 %v19870_v25  ;;  %v19881_v4 = vadd.f32 %v7169_v62, %v7098_v28  ;;  %v7100_v34 = vpop.f32.mrf.mxu1  ;;  %v15971_v25 = vld [vmem:[%s24025_s4 + $0x84] ss:$20 sps:$4 sm:$0xff]   ;;  %v2841_v36 = vmul.f32 %v19552_v40, %v2654_v30 }
 0x2b8   : > { %7696 = vmatpush1.bf16.msra.mxu0 %v15963_v0  ;;  %v7171_v22 = vpop.f32.mrf.mxu0  ;;  %v19901_v0 = vpack.c.bf16 %v2821_v6, %v2804_v29  ;;  %v19909_v9 = vpack.c.bf16 %v2823_v51, %v2806_v59  ;;  %v15974_v6 = vld [vmem:[%s24025_s4 + $0x5c] ss:$20 sps:$4 sm:$0xff]  }
 0x2b9   : > { %7697 = vmatprep.subr.bf16.mxu0 %v15968_v17  ;;  %v19891_v28 = vadd.f32 %v7171_v22, %v7100_v34  ;;  %v19893_v62 = vpop.f32.mrf.mxu1  ;;  %v2651_v17 = vld [vmem:[%s24022_s1 + $0x390] sm:$0xff]  ;;  %v19911_v34 = vpack.c.bf16 %v2839_v12, %v2839_v12  ;;  %v19916_v30 = vpack.c.bf16 %v2841_v36, %v2841_v36  ;;  %v15972_v22 = vld [vmem:[%s24025_s4 + $0x58] ss:$20 sps:$4 sm:$0xff]   ;;  %v17008_v36 = vpop.eup %17007 }
 0x2ba   : > { %24258 = vst [vmem:[#allocation43_spill] sm:$0xff] %v19893_v62  ;;  %v19899_v31 = vpop.f32.mrf.mxu0  ;;  %24260 = vst [vmem:[#allocation45_spill] sm:$0xff] %v19901_v0  ;;  %v2838_v51 = vmul.f32 %v19728_v47, %v2651_v17  ;;  %v2553_v47 = vld [vmem:[%s24022_s1 + $0x80] sm:$0xff] }
 0x2bb   : > { %24259 = vst [vmem:[#allocation44_spill] sm:$0xff] %v19899_v31  ;;  %v7106_v3 = vpop.f32.mrf.mxu1  ;;  %24261 = vst [vmem:[#allocation46_spill] sm:$0xff] %v19909_v9 }
 0x2bc   : > { %7698 = vmatpush1.bf16.msra.mxu0 %v15966_v2  ;;  %v7177_v46 = vpop.f32.mrf.mxu0  ;;  %24262 = vst [vmem:[#allocation47_spill] sm:$0xff] %v19911_v34  ;;  %24263 = vst [vmem:[#allocation48_spill] sm:$0xff] %v19916_v30  ;;  %v2653_v2 = vld [vmem:[%s24022_s1 + $0x3a0] sm:$0xff]  ;;  %v19949_v17 = vpack.c.bf16 %v2838_v51, %v2838_v51 }
 0x2bd   : > { %7531 = vmatmul.mubr.bf16.gmra.mxu1 %v19901_v0  ;;  %7699 = vmatprep.subr.bf16.mxu0 %v15971_v25  ;;  %v19914_v40 = vadd.f32 %v7177_v46, %v7106_v3  ;;  %v7108_v29 = vpop.f32.mrf.mxu1  ;;  %v2840_v46 = vmul.f32 %v19743_v11, %v2653_v2  ;;  %v15975_v11 = vld [vmem:[%s24025_s4 + $0x30] ss:$20 sps:$4 sm:$0xff]   ;;  %v2570_v2 = vld [vmem:[%s24022_s1 + $0x108] sm:$0xff] }
 0x2be   : > { %7602 = vmatmul.mubr.bf16.gmra.mxu0 %v19909_v9  ;;  %7540 = vmatprep.mubr.bf16.mxu1 %v19911_v34  ;;  %v7179_v12 = vpop.f32.mrf.mxu0  ;;  %24266 = vst [vmem:[#allocation51_spill] sm:$0xff] %v19949_v17  ;;  %v15981_v9 = vld [vmem:[%s24025_s4 + $0x3a0] ss:$20 sps:$4 sm:$0xff]  }
 0x2bf   : > { %7611 = vmatprep.mubr.bf16.mxu0 %v19916_v30  ;;  %v19927_v25 = vadd.f32 %v7179_v12, %v7108_v29  ;;  %v7110_v59 = vpop.f32.mrf.mxu1  ;;  %v15977_v29 = vld [vmem:[%s24025_s4 + $0x34] ss:$20 sps:$4 sm:$0xff]  }
 0x2c0   : > { %7700 = vmatpush1.bf16.msra.mxu0 %v15969_v21  ;;  %v7181_v3 = vpop.f32.mrf.mxu0  ;;  %v19947_v21 = vrot.slane %v17008_v36, %v18515_v58  ;;  %v15980_v58 = vld [vmem:[%s24025_s4 + $0xc] ss:$20 sps:$4 sm:$0xff]  }
 0x2c1   : > { %7701 = vmatprep.subr.bf16.mxu0 %v15974_v6  ;;  %v19934_v31 = vadd.f32 %v7181_v3, %v7110_v59  ;;  %v19936_v62 = vpop.f32.mrf.mxu1  ;;  %v19957_v59 = vpack.c.bf16 %v2840_v46, %v2840_v46  ;;  %v15978_v46 = vld [vmem:[%s24025_s4 + $0x8] ss:$20 sps:$4 sm:$0xff]  }
 0x2c2   : > { %24264 = vst [vmem:[#allocation49_spill] sm:$0xff] %v19936_v62  ;;  %v19941_v12 = vpop.f32.mrf.mxu0  ;;  %v24268_v62 = vmov 0  }
 0x2c3   : > { %24265 = vst [vmem:[#allocation50_spill] sm:$0xff] %v19941_v12  ;;  %v7116_v6 = vpop.f32.mrf.mxu1  ;;  %24267 = vst [vmem:[#allocation52_spill] sm:$0xff] %v19957_v59 }
 0x2c4   : > { %7702 = vmatpush1.bf16.msra.mxu0 %v15972_v22  ;;  %v7187_v3 = vpop.f32.mrf.mxu0 }
 0x2c5   : > { %7541 = vmatmul.mubr.bf16.gmra.mxu1 %v19949_v17  ;;  %7703 = vmatprep.subr.bf16.mxu0 %v15977_v29  ;;  %v19960_v36 = vadd.f32 %v7187_v3, %v7116_v6  ;;  %v7118_v51 = vpop.f32.mrf.mxu1  ;;  %v2740_v6 = vmul.f32 %v19947_v21, %v2553_v47  ;;  %v2757_v3 = vmul.f32 %v19947_v21, %v2570_v2  ;;  %v15984_v47 = vld [vmem:[%s24025_s4 + $0x260] ss:$20 sps:$4 sm:$0xff]  }
 0x2c6   : > { %7612 = vmatmul.mubr.bf16.gmra.mxu0 %v19957_v59  ;;  %v7189_v12 = vpop.f32.mrf.mxu0  ;;  %7652 = vmatprep.mubr.bf16.mxu1 %v24268_v62 }
 0x2c7   : > { %7723 = vmatprep.mubr.bf16.mxu0 %v18626_v18  ;;  %v19968_v22 = vadd.f32 %v7189_v12, %v7118_v51  ;;  %v7120_v29 = vpop.f32.mrf.mxu1  ;;  %v15986_v12 = vld [vmem:[%s24025_s4 + $0x264] ss:$20 sps:$4 sm:$0xff]   ;;  %v19993_v2 = vpack.c.bf16 %v2757_v3, %v2740_v6  ;;  %v15995_v6 = vld [vmem:[%s24025_s4 + $0x354] ss:$20 sps:$4 sm:$0xff]  }
 0x2c8   : > { %7704 = vmatpush1.bf16.msra.mxu0 %v15975_v11  ;;  %v7191_v30 = vpop.f32.mrf.mxu0  ;;  %v2604_v11 = vld [vmem:[%s24022_s1 + $0x218] sm:$0xff] }
 0x2c9   : > { %7705 = vmatprep.subr.bf16.mxu0 %v15980_v58  ;;  %v7121_v59 = vpop.f32.mrf.mxu1  ;;  %v15989_v30 = vld [vmem:[%s24025_s4 + $0x37c] ss:$20 sps:$4 sm:$0xff]   ;;  %24269 = vst [vmem:[#allocation53_spill] sm:$0xff] %v19993_v2  ;;  %v15987_v29 = vld [vmem:[%s24025_s4 + $0x378] ss:$20 sps:$4 sm:$0xff]   ;;  %v2791_v3 = vmul.f32 %v19947_v21, %v2604_v11 }
 0x2ca   : > { %v7192_v51 = vpop.f32.mrf.mxu0  ;;  %v2587_v58 = vld [vmem:[%s24022_s1 + $0x190] sm:$0xff]  ;;  %v2638_v11 = vld [vmem:[%s24022_s1 + $0x328] sm:$0xff] }
 0x2cb   : > { %v15992_v59 = vld [vmem:[%s24025_s4 + $0x23c] ss:$20 sps:$4 sm:$0xff]   ;;  %v15998_v51 = vld [vmem:[%s24025_s4 + $0x214] ss:$20 sps:$4 sm:$0xff]  }
 0x2cc   : > { %7706 = vmatpush1.bf16.msra.mxu0 %v15978_v46  ;;  %v2774_v46 = vmul.f32 %v19947_v21, %v2587_v58  ;;  %v2621_v58 = vld [vmem:[%s24022_s1 + $0x2a0] sm:$0xff] }
 0x2cd   : > { %14442 = vmatmul.mubr.msk.bf16.vlgmr.msra.gmra.mxu1 %vm7039_vm1, %v19993_v2  ;;  %7707 = vmatprep.subr.bf16.mxu0 %v15986_v12  ;;  %v15993_v12 = vld [vmem:[%s24025_s4 + $0x350] ss:$20 sps:$4 sm:$0xff]  }
 0x2ce   : > { %7763 = vmatpush1.bf16.msra.mxu1 %v15981_v9  ;;  %7662 = vmatprep.mubr.bf16.mxu1 %v24268_v62  ;;  %v15990_v9 = vld [vmem:[%s24025_s4 + $0x238] ss:$20 sps:$4 sm:$0xff]   ;;  %v20030_v18 = vpack.c.bf16 %v2791_v3, %v2774_v46  ;;  %v2808_v46 = vmul.f32 %v19947_v21, %v2621_v58  ;;  %v2825_v3 = vmul.f32 %v19947_v21, %v2638_v11  ;;  %v2655_v58 = vld [vmem:[%s24022_s1 + $0x3b0] sm:$0xff] }
 0x2cf   : > { %7764 = vmatprep.subr.bf16.mxu1 %v15989_v30  ;;  %v16001_v30 = vld [vmem:[%s24025_s4 + $0x32c] ss:$20 sps:$4 sm:$0xff]  }
 0x2d0   : > { %7708 = vmatpush2.bf16.msra.mxu0 %v15984_v47  ;;  %v15996_v47 = vld [vmem:[%s24025_s4 + $0x210] ss:$20 sps:$4 sm:$0xff]   ;;  %24270 = vst [vmem:[#allocation54_spill] sm:$0xff] %v20030_v18  ;;  %v20064_v11 = vpack.c.bf16 %v2825_v3, %v2808_v46  ;;  %v2842_v46 = vmul.f32 %v19947_v21, %v2655_v58  ;;  %v16014_v3 = vld [vmem:[%s24025_s4 + $0x198] ss:$20 sps:$4 sm:$0xff]  }
 0x2d1   : > { %7709 = vmatprep.subr.bf16.mxu0 %v15992_v59  ;;  %v16004_v59 = vld [vmem:[%s24025_s4 + $0x1ec] ss:$20 sps:$4 sm:$0xff]   ;;  %v16020_v21 = vld [vmem:[%s24025_s4 + $0x170] ss:$20 sps:$4 sm:$0xff]  }
 0x2d2   : > { %7765 = vmatpush1.bf16.msra.mxu1 %v15987_v29  ;;  %v15999_v29 = vld [vmem:[%s24025_s4 + $0x328] ss:$20 sps:$4 sm:$0xff]   ;;  %24271 = vst [vmem:[#allocation55_spill] sm:$0xff] %v20064_v11  ;;  %v16028_v58 = vld [vmem:[%s24025_s4 + $0x14c] ss:$20 sps:$4 sm:$0xff]  }
 0x2d3   : > { %7766 = vmatprep.subr.bf16.mxu1 %v15995_v6  ;;  %v16007_v6 = vld [vmem:[%s24025_s4 + $0x304] ss:$20 sps:$4 sm:$0xff]  }
 0x2d4   : > { %7710 = vmatpush2.bf16.msra.mxu0 %v15990_v9  ;;  %v16002_v9 = vld [vmem:[%s24025_s4 + $0x1e8] ss:$20 sps:$4 sm:$0xff]  }
 0x2d5   : > { %14443 = vmatmul.mubr.msk.bf16.gmra.mxu1 %vm7039_vm1, %v20030_v18  ;;  %7711 = vmatprep.subr.bf16.mxu0 %v15998_v51  ;;  %v16010_v51 = vld [vmem:[%s24025_s4 + $0x1c4] ss:$20 sps:$4 sm:$0xff]  }
 0x2d6   : > { %7767 = vmatpush1.bf16.msra.mxu1 %v15993_v12  ;;  %7672 = vmatprep.mubr.bf16.mxu1 %v24268_v62  ;;  %v16005_v12 = vld [vmem:[%s24025_s4 + $0x300] ss:$20 sps:$4 sm:$0xff]  }
 0x2d7   : > { %7768 = vmatprep.subr.bf16.mxu1 %v16001_v30  ;;  %v16013_v30 = vld [vmem:[%s24025_s4 + $0x2dc] ss:$20 sps:$4 sm:$0xff]  }
 0x2d8   : > { %7712 = vmatpush2.bf16.msra.mxu0 %v15996_v47  ;;  %v16008_v47 = vld [vmem:[%s24025_s4 + $0x1c0] ss:$20 sps:$4 sm:$0xff]  }
 0x2d9   : > { %7713 = vmatprep.subr.bf16.mxu0 %v16004_v59  ;;  %v16016_v59 = vld [vmem:[%s24025_s4 + $0x19c] ss:$20 sps:$4 sm:$0xff]  }
 0x2da   : > { %7769 = vmatpush1.bf16.msra.mxu1 %v15999_v29  ;;  %v16011_v29 = vld [vmem:[%s24025_s4 + $0x2d8] ss:$20 sps:$4 sm:$0xff]  }
 0x2db   : > { %7770 = vmatprep.subr.bf16.mxu1 %v16007_v6  ;;  %v16019_v6 = vld [vmem:[%s24025_s4 + $0x2b4] ss:$20 sps:$4 sm:$0xff]  }
 0x2dc   : > { %7714 = vmatpush2.bf16.msra.mxu0 %v16002_v9  ;;  %v16017_v9 = vld [vmem:[%s24025_s4 + $0x2b0] ss:$20 sps:$4 sm:$0xff]  }
 0x2dd   : > { %14444 = vmatmul.mubr.msk.bf16.gmra.mxu1 %vm7039_vm1, %v20064_v11  ;;  %7715 = vmatprep.subr.bf16.mxu0 %v16010_v51  ;;  %v16025_v51 = vld [vmem:[%s24025_s4 + $0x28c] ss:$20 sps:$4 sm:$0xff]  }
 0x2de   : > { %7771 = vmatpush1.bf16.msra.mxu1 %v16005_v12  ;;  %7682 = vmatprep.mubr.bf16.mxu1 %v24268_v62  ;;  %v16022_v12 = vld [vmem:[%s24025_s4 + $0x174] ss:$20 sps:$4 sm:$0xff]  }
 0x2df   : > { %7772 = vmatprep.subr.bf16.mxu1 %v16013_v30  ;;  %v20094_v30 = vpack.c.bf16 %v2842_v46, %v2842_v46  ;;  %v16034_v46 = vld [vmem:[%s24025_s4 + $0x624] ss:$20 sps:$4 sm:$0xff]  }
 0x2e0   : > { %7716 = vmatpush2.bf16.msra.mxu0 %v16008_v47  ;;  %v16023_v47 = vld [vmem:[%s24025_s4 + $0x288] ss:$20 sps:$4 sm:$0xff]  }
 0x2e1   : > { %7717 = vmatprep.subr.bf16.mxu0 %v16016_v59  ;;  %24272 = vst [vmem:[#allocation56_spill] sm:$0xff] %v20094_v30  ;;  %v16031_v59 = vld [vmem:[%s24025_s4 + $0x4e4] ss:$20 sps:$4 sm:$0xff]  }
 0x2e2   : > { %7773 = vmatpush1.bf16.msra.mxu1 %v16011_v29  ;;  %v16026_v29 = vld [vmem:[%s24025_s4 + $0x148] ss:$20 sps:$4 sm:$0xff]  }
 0x2e3   : > { %7774 = vmatprep.subr.bf16.mxu1 %v16019_v6  ;;  %v16029_v6 = vld [vmem:[%s24025_s4 + $0x4e0] ss:$20 sps:$4 sm:$0xff]  }
 0x2e4   : > { %7718 = vmatpush2.bf16.msra.mxu0 %v16014_v3  ;;  %v16037_v3 = vld [vmem:[%s24025_s4 + $0x4bc] ss:$20 sps:$4 sm:$0xff]  }
 0x2e5   : > { %14445 = vmatmul.mubr.msk.bf16.gmra.mxu1 %vm7039_vm1, %v20094_v30  ;;  %7719 = vmatprep.subr.bf16.mxu0 %v16022_v12  ;;  %v16043_v30 = vld [vmem:[%s24025_s4 + $0x494] ss:$20 sps:$4 sm:$0xff]  }
 0x2e6   : > { %7775 = vmatpush1.bf16.msra.mxu1 %v16017_v9  ;;  %7794 = vmatprep.mubr.bf16.mxu1 %v18635_v23  ;;  %v16032_v9 = vld [vmem:[%s24025_s4 + $0x620] ss:$20 sps:$4 sm:$0xff]   ;;  %v16035_v23 = vld [vmem:[%s24025_s4 + $0x4b8] ss:$20 sps:$4 sm:$0xff]  }
 0x2e7   : > { %7776 = vmatprep.subr.bf16.mxu1 %v16025_v51 }
 0x2e8   : > { %7720 = vmatpush2.bf16.msra.mxu0 %v16020_v21 }
 0x2e9   : > { %7721 = vmatprep.subr.bf16.mxu0 %v16028_v58  ;;  %v16040_v58 = vld [vmem:[%s24025_s4 + $0x5fc] ss:$20 sps:$4 sm:$0xff]  }
 0x2ea   : > { %7777 = vmatpush1.bf16.msra.mxu1 %v16023_v47 }
 0x2eb   : > { %7778 = vmatprep.subr.bf16.mxu1 %v16031_v59  ;;  %v7228_v12 = vpop.f32.mrf.mxu1 }
 0x2ec   : > { %7722 = vmatpush2.bf16.msra.mxu0 %v16026_v29  ;;  %v7229_v51 = vadd.f32 %v7228_v12, %v19814_v10  ;;  %v7299_v21 = vpop.f32.mrf.mxu0 }
 0x2ed   : > { %7833 = vmatprep.subr.bf16.mxu0 %v16034_v46  ;;  %v7230_v47 = vpop.f32.mrf.mxu1 }
 0x2ee   : > { %v20133_v59 = vadd.f32 %v7299_v21, %v7229_v51  ;;  %7779 = vmatpush2.bf16.msra.mxu1 %v16029_v6  ;;  %v7231_v10 = vadd.f32 %v7230_v47, %v19822_v39  ;;  %v7301_v29 = vpop.f32.mrf.mxu0  ;;  %v16038_v51 = vld [vmem:[%s24025_s4 + $0x5f8] ss:$20 sps:$4 sm:$0xff]   ;;  %v16046_v39 = vld [vmem:[%s24025_s4 + $0x5d4] ss:$20 sps:$4 sm:$0xff]  }
 0x2ef   : > { %7724 = vmatmul.mubr.bf16.vlgmr.msra.gmra.mxu0 %v18637_v24  ;;  %7780 = vmatprep.subr.bf16.mxu1 %v16037_v3  ;;  %v7232_v12 = vpop.f32.mrf.mxu1  ;;  %v16049_v21 = vld [vmem:[%s24025_s4 + $0x46c] ss:$20 sps:$4 sm:$0xff]  }
 0x2f0   : > { %7733 = vmatprep.mubr.bf16.mxu0 %v18654_v33  ;;  %7834 = vmatpush1.bf16.msra.mxu0 %v16032_v9  ;;  %v20138_v11 = vadd.f32 %v7301_v29, %v7231_v10  ;;  %v7233_v46 = vadd.f32 %v7232_v12, %v19832_v1  ;;  %v7303_v18 = vpop.f32.mrf.mxu0  ;;  %v16041_v1 = vld [vmem:[%s24025_s4 + $0x490] ss:$20 sps:$4 sm:$0xff]  }
 0x2f1   : > { %7835 = vmatprep.subr.bf16.mxu0 %v16040_v58  ;;  %v20147_v6 = vpop.f32.mrf.mxu1 }
 0x2f2   : > { %24273 = vst [vmem:[#allocation57_spill] sm:$0xff] %v20147_v6  ;;  %v20149_v3 = vadd.f32 %v7303_v18, %v7233_v46  ;;  %7781 = vmatpush2.bf16.msra.mxu1 %v16035_v23  ;;  %v20151_v9 = vpop.f32.mrf.mxu0  ;;  %v16044_v18 = vld [vmem:[%s24025_s4 + $0x5d0] ss:$20 sps:$4 sm:$0xff]   ;;  %v16052_v23 = vld [vmem:[%s24025_s4 + $0x5ac] ss:$20 sps:$4 sm:$0xff]  }
 0x2f3   : > { %24274 = vst [vmem:[#allocation58_spill] sm:$0xff] %v20151_v9  ;;  %7782 = vmatprep.subr.bf16.mxu1 %v16043_v30  ;;  %v7238_v47 = vpop.f32.mrf.mxu1  ;;  %v24288_v6 = vld [vmem:[#allocation19_spill] sm:$0xff] }
 0x2f4   : > { %7836 = vmatpush1.bf16.msra.mxu0 %v16038_v51  ;;  %v7239_v58 = vadd.f32 %v7238_v47, %v19868_v27  ;;  %v7309_v10 = vpop.f32.mrf.mxu0  ;;  %v16047_v27 = vld [vmem:[%s24025_s4 + $0x468] ss:$20 sps:$4 sm:$0xff]   ;;  %v16055_v51 = vld [vmem:[%s24025_s4 + $0x444] ss:$20 sps:$4 sm:$0xff]  }
 0x2f5   : > { %7837 = vmatprep.subr.bf16.mxu0 %v16046_v39  ;;  %v7240_v29 = vpop.f32.mrf.mxu1 }
 0x2f6   : > { %v20166_v12 = vadd.f32 %v7309_v10, %v7239_v58  ;;  %7783 = vmatpush2.bf16.msra.mxu1 %v16041_v1  ;;  %v7241_v30 = vadd.f32 %v7240_v29, %v19881_v4  ;;  %v7311_v46 = vpop.f32.mrf.mxu0  ;;  %v16050_v58 = vld [vmem:[%s24025_s4 + $0x5a8] ss:$20 sps:$4 sm:$0xff]   ;;  %v16058_v10 = vld [vmem:[%s24025_s4 + $0x584] ss:$20 sps:$4 sm:$0xff]  }
 0x2f7   : > { %7734 = vmatmul.mubr.bf16.gmra.mxu0 %v18708_v7  ;;  %7784 = vmatprep.subr.bf16.mxu1 %v16049_v21  ;;  %v7242_v47 = vpop.f32.mrf.mxu1 }
 0x2f8   : > { %7743 = vmatprep.mubr.bf16.mxu0 %v18729_v14  ;;  %7838 = vmatpush1.bf16.msra.mxu0 %v16044_v18  ;;  %v20177_v39 = vadd.f32 %v7311_v46, %v7241_v30  ;;  %v7243_v4 = vadd.f32 %v7242_v47, %v19891_v28  ;;  %v7313_v1 = vpop.f32.mrf.mxu0  ;;  %v16053_v28 = vld [vmem:[%s24025_s4 + $0x440] ss:$20 sps:$4 sm:$0xff]   ;;  %v16061_v30 = vld [vmem:[%s24025_s4 + $0x41c] ss:$20 sps:$4 sm:$0xff]  }
 0x2f9   : > { %7839 = vmatprep.subr.bf16.mxu0 %v16052_v23  ;;  %v20186_v29 = vpop.f32.mrf.mxu1 }
 0x2fa   : > { %24275 = vst [vmem:[#allocation59_spill] sm:$0xff] %v20186_v29  ;;  %v20188_v21 = vadd.f32 %v7313_v1, %v7243_v4  ;;  %7785 = vmatpush2.bf16.msra.mxu1 %v16047_v27  ;;  %v20190_v18 = vpop.f32.mrf.mxu0  ;;  %v16056_v27 = vld [vmem:[%s24025_s4 + $0x580] ss:$20 sps:$4 sm:$0xff]   ;;  %v16064_v1 = vld [vmem:[%s24025_s4 + $0x55c] ss:$20 sps:$4 sm:$0xff]  }
 0x2fb   : > { %24276 = vst [vmem:[#allocation60_spill] sm:$0xff] %v20190_v18  ;;  %7786 = vmatprep.subr.bf16.mxu1 %v16055_v51  ;;  %v7248_v46 = vpop.f32.mrf.mxu1 }
 0x2fc   : > { %7840 = vmatpush1.bf16.msra.mxu0 %v16050_v58  ;;  %v7249_v23 = vadd.f32 %v7248_v46, %v19914_v40  ;;  %v7319_v47 = vpop.f32.mrf.mxu0  ;;  %v16059_v40 = vld [vmem:[%s24025_s4 + $0x418] ss:$20 sps:$4 sm:$0xff]  }
 0x2fd   : > { %7841 = vmatprep.subr.bf16.mxu0 %v16058_v10  ;;  %v7250_v4 = vpop.f32.mrf.mxu1  ;;  %v16067_v10 = vld [vmem:[%s24025_s4 + $0x3f4] ss:$20 sps:$4 sm:$0xff]  }
 0x2fe   : > { %v20205_v18 = vadd.f32 %v7319_v47, %v7249_v23  ;;  %7787 = vmatpush2.bf16.msra.mxu1 %v16053_v28  ;;  %v7251_v51 = vadd.f32 %v7250_v4, %v19927_v25  ;;  %v7321_v29 = vpop.f32.mrf.mxu0  ;;  %v16062_v23 = vld [vmem:[%s24025_s4 + $0x558] ss:$20 sps:$4 sm:$0xff]  }
 0x2ff   : > { %7744 = vmatmul.mubr.bf16.gmra.mxu0 %v18771_v44  ;;  %7788 = vmatprep.subr.bf16.mxu1 %v16061_v30  ;;  %v7252_v58 = vpop.f32.mrf.mxu1  ;;  %v16070_v30 = vld [vmem:[%s24025_s4 + $0x534] ss:$20 sps:$4 sm:$0xff]  }
 0x300   : > { %7753 = vmatprep.mubr.bf16.mxu0 %v18785_v52  ;;  %7842 = vmatpush1.bf16.msra.mxu0 %v16056_v27  ;;  %v20216_v46 = vadd.f32 %v7321_v29, %v7251_v51  ;;  %v7253_v25 = vadd.f32 %v7252_v58, %v19934_v31  ;;  %v7323_v28 = vpop.f32.mrf.mxu0  ;;  %v16065_v31 = vld [vmem:[%s24025_s4 + $0x3f0] ss:$20 sps:$4 sm:$0xff]  }
 0x301   : > { %7843 = vmatprep.subr.bf16.mxu0 %v16064_v1  ;;  %v20222_v47 = vpop.f32.mrf.mxu1  ;;  %v16073_v1 = vld [vmem:[%s24025_s4 + $0x3cc] ss:$20 sps:$4 sm:$0xff]  }
 0x302   : > { %24277 = vst [vmem:[#allocation61_spill] sm:$0xff] %v20222_v47  ;;  %v20227_v4 = vadd.f32 %v7323_v28, %v7253_v25  ;;  %7789 = vmatpush2.bf16.msra.mxu1 %v16059_v40  ;;  %v20229_v27 = vpop.f32.mrf.mxu0  ;;  %v16068_v40 = vld [vmem:[%s24025_s4 + $0x530] ss:$20 sps:$4 sm:$0xff]   ;;  %v16076_v28 = vld [vmem:[%s24025_s4 + $0x50c] ss:$20 sps:$4 sm:$0xff]  }
 0x303   : > { %24278 = vst [vmem:[#allocation62_spill] sm:$0xff] %v20229_v27  ;;  %7790 = vmatprep.subr.bf16.mxu1 %v16067_v10  ;;  %v7258_v29 = vpop.f32.mrf.mxu1 }
 0x304   : > { %7844 = vmatpush1.bf16.msra.mxu0 %v16062_v23  ;;  %v7259_v51 = vadd.f32 %v7258_v29, %v19960_v36  ;;  %v7329_v58 = vpop.f32.mrf.mxu0  ;;  %v16071_v36 = vld [vmem:[%s24025_s4 + $0x3c8] ss:$20 sps:$4 sm:$0xff]  }
 0x305   : > { %7845 = vmatprep.subr.bf16.mxu0 %v16070_v30  ;;  %v7260_v25 = vpop.f32.mrf.mxu1  ;;  %v16079_v30 = vld [vmem:[%s24025_s4 + $0x8a4] ss:$20 sps:$4 sm:$0xff]  }
 0x306   : > { %v20244_v10 = vadd.f32 %v7329_v58, %v7259_v51  ;;  %7791 = vmatpush2.bf16.msra.mxu1 %v16065_v31  ;;  %v7261_v27 = vadd.f32 %v7260_v25, %v19968_v22  ;;  %v7331_v47 = vpop.f32.mrf.mxu0  ;;  %v16074_v22 = vld [vmem:[%s24025_s4 + $0x508] ss:$20 sps:$4 sm:$0xff]  }
 0x307   : > { %7754 = vmatmul.mubr.bf16.gmra.mxu0 %v18819_v49  ;;  %7792 = vmatprep.subr.bf16.mxu1 %v16073_v1  ;;  %v7262_v23 = vpop.f32.mrf.mxu1  ;;  %v16082_v1 = vld [vmem:[%s24025_s4 + $0x764] ss:$20 sps:$4 sm:$0xff]   ;;  %v16088_v25 = vld [vmem:[%s24025_s4 + $0x73c] ss:$20 sps:$4 sm:$0xff]  }
 0x308   : > { %7846 = vmatpush1.bf16.msra.mxu0 %v16068_v40  ;;  %7865 = vmatprep.mubr.bf16.mxu0 %v18896_v20  ;;  %v20255_v29 = vadd.f32 %v7331_v47, %v7261_v27  ;;  %v7333_v31 = vpop.f32.mrf.mxu0  ;;  %v16077_v40 = vld [vmem:[%s24025_s4 + $0x8a0] ss:$20 sps:$4 sm:$0xff]   ;;  %v16085_v47 = vld [vmem:[%s24025_s4 + $0x87c] ss:$20 sps:$4 sm:$0xff]   ;;  %v16086_v23 = vld [vmem:[%s24025_s4 + $0x738] ss:$20 sps:$4 sm:$0xff]  }
 0x309   : > { %7847 = vmatprep.subr.bf16.mxu0 %v16076_v28  ;;  %v7263_v51 = vpop.f32.mrf.mxu1  ;;  %v16080_v27 = vld [vmem:[%s24025_s4 + $0x760] ss:$20 sps:$4 sm:$0xff]   ;;  %v16083_v28 = vld [vmem:[%s24025_s4 + $0x878] ss:$20 sps:$4 sm:$0xff]   ;;  %v16089_v31 = vld [vmem:[%s24025_s4 + $0x850] ss:$20 sps:$4 sm:$0xff]  }
 0x30a   : > { %7793 = vmatpush2.bf16.msra.mxu1 %v16071_v36  ;;  %v7334_v58 = vpop.f32.mrf.mxu0  ;;  %v16091_v36 = vld [vmem:[%s24025_s4 + $0x854] ss:$20 sps:$4 sm:$0xff]   ;;  %v16092_v51 = vld [vmem:[%s24025_s4 + $0x710] ss:$20 sps:$4 sm:$0xff]  }
 0x30b   : > { %7904 = vmatprep.subr.bf16.mxu1 %v16079_v30  ;;  %v16094_v30 = vld [vmem:[%s24025_s4 + $0x714] ss:$20 sps:$4 sm:$0xff]  }
 0x30c   : > { %7848 = vmatpush1.bf16.msra.mxu0 %v16074_v22  ;;  %v16097_v22 = vld [vmem:[%s24025_s4 + $0x82c] ss:$20 sps:$4 sm:$0xff]   ;;  %v16095_v58 = vld [vmem:[%s24025_s4 + $0x828] ss:$20 sps:$4 sm:$0xff]  }
 0x30d   : > { %7795 = vmatmul.mubr.bf16.vlgmr.msra.gmra.mxu1 %v18628_v19  ;;  %7849 = vmatprep.subr.bf16.mxu0 %v16082_v1  ;;  %v16100_v1 = vld [vmem:[%s24025_s4 + $0x6ec] ss:$20 sps:$4 sm:$0xff]  }
 0x30e   : > { %7804 = vmatprep.mubr.bf16.mxu1 %v18659_v35  ;;  %7905 = vmatpush1.bf16.msra.mxu1 %v16077_v40  ;;  %v16103_v40 = vld [vmem:[%s24025_s4 + $0x804] ss:$20 sps:$4 sm:$0xff]  }
 0x30f   : > { %7906 = vmatprep.subr.bf16.mxu1 %v16085_v47  ;;  %v16098_v47 = vld [vmem:[%s24025_s4 + $0x6e8] ss:$20 sps:$4 sm:$0xff]  }
 0x310   : > { %7850 = vmatpush2.bf16.msra.mxu0 %v16080_v27  ;;  %v16106_v27 = vld [vmem:[%s24025_s4 + $0x6c4] ss:$20 sps:$4 sm:$0xff]  }
 0x311   : > { %7851 = vmatprep.subr.bf16.mxu0 %v16088_v25  ;;  %v16101_v25 = vld [vmem:[%s24025_s4 + $0x800] ss:$20 sps:$4 sm:$0xff]  }
 0x312   : > { %7907 = vmatpush1.bf16.msra.mxu1 %v16083_v28  ;;  %v16109_v28 = vld [vmem:[%s24025_s4 + $0x7dc] ss:$20 sps:$4 sm:$0xff]  }
 0x313   : > { %7908 = vmatprep.subr.bf16.mxu1 %v16091_v36  ;;  %v16104_v36 = vld [vmem:[%s24025_s4 + $0x6c0] ss:$20 sps:$4 sm:$0xff]  }
 0x314   : > { %7852 = vmatpush2.bf16.msra.mxu0 %v16086_v23  ;;  %v16112_v23 = vld [vmem:[%s24025_s4 + $0x69c] ss:$20 sps:$4 sm:$0xff]  }
 0x315   : > { %7805 = vmatmul.mubr.bf16.gmra.mxu1 %v18704_v5  ;;  %7853 = vmatprep.subr.bf16.mxu0 %v16094_v30  ;;  %v16107_v30 = vld [vmem:[%s24025_s4 + $0x7d8] ss:$20 sps:$4 sm:$0xff]  }
 0x316   : > { %7814 = vmatprep.mubr.bf16.mxu1 %v18732_v16  ;;  %7909 = vmatpush1.bf16.msra.mxu1 %v16089_v31  ;;  %v16115_v31 = vld [vmem:[%s24025_s4 + $0x7b4] ss:$20 sps:$4 sm:$0xff]  }
 0x317   : > { %7910 = vmatprep.subr.bf16.mxu1 %v16097_v22  ;;  %v16110_v22 = vld [vmem:[%s24025_s4 + $0x698] ss:$20 sps:$4 sm:$0xff]  }
 0x318   : > { %7854 = vmatpush2.bf16.msra.mxu0 %v16092_v51  ;;  %v16118_v51 = vld [vmem:[%s24025_s4 + $0x674] ss:$20 sps:$4 sm:$0xff]  }
 0x319   : > { %7855 = vmatprep.subr.bf16.mxu0 %v16100_v1  ;;  %v16113_v1 = vld [vmem:[%s24025_s4 + $0x7b0] ss:$20 sps:$4 sm:$0xff]  }
 0x31a   : > { %7911 = vmatpush1.bf16.msra.mxu1 %v16095_v58  ;;  %v16121_v58 = vld [vmem:[%s24025_s4 + $0x78c] ss:$20 sps:$4 sm:$0xff]  }
 0x31b   : > { %7912 = vmatprep.subr.bf16.mxu1 %v16103_v40  ;;  %v16116_v40 = vld [vmem:[%s24025_s4 + $0x670] ss:$20 sps:$4 sm:$0xff]  }
 0x31c   : > { %7856 = vmatpush2.bf16.msra.mxu0 %v16098_v47  ;;  %v16124_v47 = vld [vmem:[%s24025_s4 + $0x64c] ss:$20 sps:$4 sm:$0xff]  }
 0x31d   : > { %7815 = vmatmul.mubr.bf16.gmra.mxu1 %v18773_v48  ;;  %7857 = vmatprep.subr.bf16.mxu0 %v16106_v27  ;;  %v16119_v27 = vld [vmem:[%s24025_s4 + $0x788] ss:$20 sps:$4 sm:$0xff]  }
 0x31e   : > { %7824 = vmatprep.mubr.bf16.mxu1 %v18791_v55  ;;  %7913 = vmatpush1.bf16.msra.mxu1 %v16101_v25  ;;  %v16127_v25 = vld [vmem:[%s24025_s4 + $0x9e4] ss:$20 sps:$4 sm:$0xff]  }
 0x31f   : > { %7914 = vmatprep.subr.bf16.mxu1 %v16109_v28  ;;  %v16122_v28 = vld [vmem:[%s24025_s4 + $0x648] ss:$20 sps:$4 sm:$0xff]  }
 0x320   : > { %7858 = vmatpush2.bf16.msra.mxu0 %v16104_v36  ;;  %v16130_v36 = vld [vmem:[%s24025_s4 + $0xb24] ss:$20 sps:$4 sm:$0xff]  }
 0x321   : > { %7859 = vmatprep.subr.bf16.mxu0 %v16112_v23  ;;  %v16125_v23 = vld [vmem:[%s24025_s4 + $0x9e0] ss:$20 sps:$4 sm:$0xff]  }
 0x322   : > { %7915 = vmatpush1.bf16.msra.mxu1 %v16107_v30  ;;  %v16133_v30 = vld [vmem:[%s24025_s4 + $0x9bc] ss:$20 sps:$4 sm:$0xff]  }
 0x323   : > { %7916 = vmatprep.subr.bf16.mxu1 %v16115_v31 }
 0x324   : > { %7860 = vmatpush2.bf16.msra.mxu0 %v16110_v22  ;;  %v16128_v22 = vld [vmem:[%s24025_s4 + $0xb20] ss:$20 sps:$4 sm:$0xff]  }
 0x325   : > { %7825 = vmatmul.mubr.bf16.gmra.mxu1 %v18821_v15  ;;  %7861 = vmatprep.subr.bf16.mxu0 %v16118_v51 }
 0x326   : > { %7917 = vmatpush1.bf16.msra.mxu1 %v16113_v1  ;;  %7936 = vmatprep.mubr.bf16.mxu1 %v18910_v32 }
 0x327   : > { %7918 = vmatprep.subr.bf16.mxu1 %v16121_v58  ;;  %v16136_v58 = vld [vmem:[%s24025_s4 + $0xafc] ss:$20 sps:$4 sm:$0xff]  }
 0x328   : > { %7862 = vmatpush2.bf16.msra.mxu0 %v16116_v40 }
 0x329   : > { %7863 = vmatprep.subr.bf16.mxu0 %v16124_v47  ;;  %v16131_v47 = vld [vmem:[%s24025_s4 + $0x9b8] ss:$20 sps:$4 sm:$0xff]  }
 0x32a   : > { %7919 = vmatpush1.bf16.msra.mxu1 %v16119_v27 }
 0x32b   : > { %7920 = vmatprep.subr.bf16.mxu1 %v16127_v25 }
 0x32c   : > { %7864 = vmatpush2.bf16.msra.mxu0 %v16122_v28  ;;  %v7370_v31 = vpop.f32.mrf.mxu1 }
 0x32d   : > { %v7371_v51 = vadd.f32 %v7370_v31, %v20133_v59  ;;  %v7441_v1 = vpop.f32.mrf.mxu0  ;;  %7975 = vmatprep.subr.bf16.mxu0 %v16130_v36  ;;  %v16139_v59 = vld [vmem:[%s24025_s4 + $0x994] ss:$20 sps:$4 sm:$0xff]  }
 0x32e   : > { %7921 = vmatpush2.bf16.msra.mxu1 %v16125_v23  ;;  %v7372_v40 = vpop.f32.mrf.mxu1  ;;  %v16134_v23 = vld [vmem:[%s24025_s4 + $0xaf8] ss:$20 sps:$4 sm:$0xff]  }
 0x32f   : > { %v20383_v27 = vadd.f32 %v7441_v1, %v7371_v51  ;;  %7866 = vmatmul.mubr.bf16.vlgmr.msra.gmra.mxu0 %v19049_v57  ;;  %v7373_v25 = vadd.f32 %v7372_v40, %v20138_v11  ;;  %v7443_v28 = vpop.f32.mrf.mxu0  ;;  %7922 = vmatprep.subr.bf16.mxu1 %v16133_v30  ;;  %v16142_v11 = vld [vmem:[%s24025_s4 + $0xad4] ss:$20 sps:$4 sm:$0xff]  }
 0x330   : > { %7875 = vmatprep.mubr.bf16.mxu0 %v19051_v53  ;;  %7976 = vmatpush1.bf16.msra.mxu0 %v16128_v22  ;;  %v7374_v36 = vpop.f32.mrf.mxu1  ;;  %v16137_v22 = vld [vmem:[%s24025_s4 + $0x990] ss:$20 sps:$4 sm:$0xff]  }
 0x331   : > { %v20394_v31 = vadd.f32 %v7443_v28, %v7373_v25  ;;  %v7375_v51 = vadd.f32 %v7374_v36, %v20149_v3  ;;  %v7445_v1 = vpop.f32.mrf.mxu0  ;;  %7977 = vmatprep.subr.bf16.mxu0 %v16136_v58  ;;  %v16145_v3 = vld [vmem:[%s24025_s4 + $0x96c] ss:$20 sps:$4 sm:$0xff]  }
 0x332   : > { %7923 = vmatpush2.bf16.msra.mxu1 %v16131_v47  ;;  %v20400_v30 = vpop.f32.mrf.mxu1  ;;  %v16140_v47 = vld [vmem:[%s24025_s4 + $0xad0] ss:$20 sps:$4 sm:$0xff]   ;;  %v16148_v36 = vld [vmem:[%s24025_s4 + $0xaac] ss:$20 sps:$4 sm:$0xff]  }
 0x333   : > { %24279 = vst [vmem:[#allocation63_spill] sm:$0xff] %v20400_v30  ;;  %v20405_v40 = vadd.f32 %v7445_v1, %v7375_v51  ;;  %v20407_v9 = vpop.f32.mrf.mxu0  ;;  %7924 = vmatprep.subr.bf16.mxu1 %v16139_v59  ;;  %v16143_v51 = vld [vmem:[%s24025_s4 + $0x968] ss:$20 sps:$4 sm:$0xff]  }
 0x334   : > { %24280 = vst [vmem:[#allocation64_spill] sm:$0xff] %v20407_v9  ;;  %7978 = vmatpush1.bf16.msra.mxu0 %v16134_v23  ;;  %v7380_v58 = vpop.f32.mrf.mxu1 }
 0x335   : > { %v7381_v25 = vadd.f32 %v7380_v58, %v20166_v12  ;;  %v7451_v28 = vpop.f32.mrf.mxu0  ;;  %7979 = vmatprep.subr.bf16.mxu0 %v16142_v11  ;;  %v16151_v12 = vld [vmem:[%s24025_s4 + $0x944] ss:$20 sps:$4 sm:$0xff]  }
 0x336   : > { %7925 = vmatpush2.bf16.msra.mxu1 %v16137_v22  ;;  %v7382_v59 = vpop.f32.mrf.mxu1  ;;  %v16146_v22 = vld [vmem:[%s24025_s4 + $0xaa8] ss:$20 sps:$4 sm:$0xff]  }
 0x337   : > { %v20422_v23 = vadd.f32 %v7451_v28, %v7381_v25  ;;  %7876 = vmatmul.mubr.bf16.gmra.mxu0 %v19117_v61  ;;  %v7383_v1 = vadd.f32 %v7382_v59, %v20177_v39  ;;  %v7453_v9 = vpop.f32.mrf.mxu0  ;;  %7926 = vmatprep.subr.bf16.mxu1 %v16145_v3  ;;  %v16154_v39 = vld [vmem:[%s24025_s4 + $0xa84] ss:$20 sps:$4 sm:$0xff]  }
 0x338   : > { %7885 = vmatprep.mubr.bf16.mxu0 %v19124_v45  ;;  %7980 = vmatpush1.bf16.msra.mxu0 %v16140_v47  ;;  %v7384_v11 = vpop.f32.mrf.mxu1  ;;  %v16149_v47 = vld [vmem:[%s24025_s4 + $0x940] ss:$20 sps:$4 sm:$0xff]  }
 0x339   : > { %v20433_v58 = vadd.f32 %v7453_v9, %v7383_v1  ;;  %v7385_v25 = vadd.f32 %v7384_v11, %v20188_v21  ;;  %v7455_v28 = vpop.f32.mrf.mxu0  ;;  %7981 = vmatprep.subr.bf16.mxu0 %v16148_v36  ;;  %v16157_v9 = vld [vmem:[%s24025_s4 + $0x91c] ss:$20 sps:$4 sm:$0xff]   ;;  %v16152_v36 = vld [vmem:[%s24025_s4 + $0xa80] ss:$20 sps:$4 sm:$0xff]  }
 0x33a   : > { %7927 = vmatpush2.bf16.msra.mxu1 %v16143_v51  ;;  %v20439_v3 = vpop.f32.mrf.mxu1  ;;  %v16160_v11 = vld [vmem:[%s24025_s4 + $0xa5c] ss:$20 sps:$4 sm:$0xff]  }
 0x33b   : > { %24281 = vst [vmem:[#allocation65_spill] sm:$0xff] %v20439_v3  ;;  %v20444_v59 = vadd.f32 %v7455_v28, %v7385_v25  ;;  %v20446_v30 = vpop.f32.mrf.mxu0  ;;  %7928 = vmatprep.subr.bf16.mxu1 %v16151_v12  ;;  %v16155_v25 = vld [vmem:[%s24025_s4 + $0x918] ss:$20 sps:$4 sm:$0xff]  }
 0x33c   : > { %24282 = vst [vmem:[#allocation66_spill] sm:$0xff] %v20446_v30  ;;  %7982 = vmatpush1.bf16.msra.mxu0 %v16146_v22  ;;  %v7390_v21 = vpop.f32.mrf.mxu1 }
 0x33d   : > { %v7391_v51 = vadd.f32 %v7390_v21, %v20205_v18  ;;  %v7461_v1 = vpop.f32.mrf.mxu0  ;;  %7983 = vmatprep.subr.bf16.mxu0 %v16154_v39  ;;  %v16163_v18 = vld [vmem:[%s24025_s4 + $0x8f4] ss:$20 sps:$4 sm:$0xff]  }
 0x33e   : > { %7929 = vmatpush2.bf16.msra.mxu1 %v16149_v47  ;;  %v7392_v12 = vpop.f32.mrf.mxu1  ;;  %v16158_v47 = vld [vmem:[%s24025_s4 + $0xa58] ss:$20 sps:$4 sm:$0xff]  }
 0x33f   : > { %v20461_v22 = vadd.f32 %v7461_v1, %v7391_v51  ;;  %7886 = vmatmul.mubr.bf16.gmra.mxu0 %v19186_v8  ;;  %v7393_v28 = vadd.f32 %v7392_v12, %v20216_v46  ;;  %v7463_v30 = vpop.f32.mrf.mxu0  ;;  %7930 = vmatprep.subr.bf16.mxu1 %v16157_v9  ;;  %v16166_v46 = vld [vmem:[%s24025_s4 + $0xa34] ss:$20 sps:$4 sm:$0xff]  }
 0x340   : > { %7895 = vmatprep.mubr.bf16.mxu0 %v19197_v54  ;;  %7984 = vmatpush1.bf16.msra.mxu0 %v16152_v36  ;;  %v7394_v39 = vpop.f32.mrf.mxu1  ;;  %v16161_v36 = vld [vmem:[%s24025_s4 + $0x8f0] ss:$20 sps:$4 sm:$0xff]  }
 0x341   : > { %v20472_v21 = vadd.f32 %v7463_v30, %v7393_v28  ;;  %v7395_v51 = vadd.f32 %v7394_v39, %v20227_v4  ;;  %v7465_v1 = vpop.f32.mrf.mxu0  ;;  %7985 = vmatprep.subr.bf16.mxu0 %v16160_v11  ;;  %v16169_v4 = vld [vmem:[%s24025_s4 + $0x8cc] ss:$20 sps:$4 sm:$0xff]   ;;  %v16164_v11 = vld [vmem:[%s24025_s4 + $0xa30] ss:$20 sps:$4 sm:$0xff]  }
 0x342   : > { %7931 = vmatpush2.bf16.msra.mxu1 %v16155_v25  ;;  %v20478_v9 = vpop.f32.mrf.mxu1  ;;  %v16172_v39 = vld [vmem:[%s24025_s4 + $0xa0c] ss:$20 sps:$4 sm:$0xff]  }
 0x343   : > { %24283 = vst [vmem:[#allocation67_spill] sm:$0xff] %v20478_v9  ;;  %v20483_v12 = vadd.f32 %v7465_v1, %v7395_v51  ;;  %v20485_v3 = vpop.f32.mrf.mxu0  ;;  %7932 = vmatprep.subr.bf16.mxu1 %v16163_v18  ;;  %v16167_v51 = vld [vmem:[%s24025_s4 + $0x8c8] ss:$20 sps:$4 sm:$0xff]  }
 0x344   : > { %24284 = vst [vmem:[#allocation68_spill] sm:$0xff] %v20485_v3  ;;  %7986 = vmatpush1.bf16.msra.mxu0 %v16158_v47  ;;  %v7400_v30 = vpop.f32.mrf.mxu1 }
 0x345   : > { %v7401_v25 = vadd.f32 %v7400_v30, %v20244_v10  ;;  %v7471_v28 = vpop.f32.mrf.mxu0  ;;  %7987 = vmatprep.subr.bf16.mxu0 %v16166_v46  ;;  %v16175_v10 = vld [vmem:[%s24025_s4 + $0xda4] ss:$20 sps:$4 sm:$0xff]  }
 0x346   : > { %7933 = vmatpush2.bf16.msra.mxu1 %v16161_v36  ;;  %v7402_v18 = vpop.f32.mrf.mxu1  ;;  %v16170_v36 = vld [vmem:[%s24025_s4 + $0xa08] ss:$20 sps:$4 sm:$0xff]  }
 0x347   : > { %v20500_v47 = vadd.f32 %v7471_v28, %v7401_v25  ;;  %7896 = vmatmul.mubr.bf16.gmra.mxu0 %v19236_v38  ;;  %v7403_v1 = vadd.f32 %v7402_v18, %v20255_v29  ;;  %v7473_v3 = vpop.f32.mrf.mxu0  ;;  %7934 = vmatprep.subr.bf16.mxu1 %v16169_v4  ;;  %v16178_v29 = vld [vmem:[%s24025_s4 + $0xc64] ss:$20 sps:$4 sm:$0xff]   ;;  %v16181_v18 = vld [vmem:[%s24025_s4 + $0xd7c] ss:$20 sps:$4 sm:$0xff]  }
 0x348   : > { %7988 = vmatpush1.bf16.msra.mxu0 %v16164_v11  ;;  %8007 = vmatprep.mubr.bf16.mxu0 %v19234_v43  ;;  %v7404_v46 = vpop.f32.mrf.mxu1  ;;  %v16173_v11 = vld [vmem:[%s24025_s4 + $0xda0] ss:$20 sps:$4 sm:$0xff]  }
 0x349   : > { %v20511_v30 = vadd.f32 %v7473_v3, %v7403_v1  ;;  %v7475_v25 = vpop.f32.mrf.mxu0  ;;  %7989 = vmatprep.subr.bf16.mxu0 %v16172_v39  ;;  %v16176_v3 = vld [vmem:[%s24025_s4 + $0xc60] ss:$20 sps:$4 sm:$0xff]   ;;  %v16184_v39 = vld [vmem:[%s24025_s4 + $0xc3c] ss:$20 sps:$4 sm:$0xff]  }
 0x34a   : > { %7935 = vmatpush2.bf16.msra.mxu1 %v16167_v51  ;;  %v7405_v4 = vpop.f32.mrf.mxu1  ;;  %v16179_v51 = vld [vmem:[%s24025_s4 + $0xd78] ss:$20 sps:$4 sm:$0xff]   ;;  %v16187_v1 = vld [vmem:[%s24025_s4 + $0xd54] ss:$20 sps:$4 sm:$0xff]  }
 0x34b   : > { %v7476_v28 = vpop.f32.mrf.mxu0  ;;  %8046 = vmatprep.subr.bf16.mxu1 %v16175_v10  ;;  %v16182_v10 = vld [vmem:[%s24025_s4 + $0xc38] ss:$20 sps:$4 sm:$0xff]   ;;  %v16190_v46 = vld [vmem:[%s24025_s4 + $0xc14] ss:$20 sps:$4 sm:$0xff]  }
 0x34c   : > { %7990 = vmatpush1.bf16.msra.mxu0 %v16170_v36  ;;  %v16185_v36 = vld [vmem:[%s24025_s4 + $0xd50] ss:$20 sps:$4 sm:$0xff]   ;;  %v16193_v25 = vld [vmem:[%s24025_s4 + $0xd2c] ss:$20 sps:$4 sm:$0xff]  }
 0x34d   : > { %7937 = vmatmul.mubr.bf16.vlgmr.msra.gmra.mxu1 %v19032_v26  ;;  %7991 = vmatprep.subr.bf16.mxu0 %v16178_v29  ;;  %v16188_v29 = vld [vmem:[%s24025_s4 + $0xc10] ss:$20 sps:$4 sm:$0xff]   ;;  %v16196_v4 = vld [vmem:[%s24025_s4 + $0xbec] ss:$20 sps:$4 sm:$0xff]  }
 0x34e   : > { %7946 = vmatprep.mubr.bf16.mxu1 %v19054_v56  ;;  %8047 = vmatpush1.bf16.msra.mxu1 %v16173_v11  ;;  %v16191_v11 = vld [vmem:[%s24025_s4 + $0xd28] ss:$20 sps:$4 sm:$0xff]   ;;  %v16199_v28 = vld [vmem:[%s24025_s4 + $0xd04] ss:$20 sps:$4 sm:$0xff]  }
 0x34f   : > { %8048 = vmatprep.subr.bf16.mxu1 %v16181_v18  ;;  %v16194_v18 = vld [vmem:[%s24025_s4 + $0xbe8] ss:$20 sps:$4 sm:$0xff]  }
 0x350   : > { %7992 = vmatpush2.bf16.msra.mxu0 %v16176_v3  ;;  %v16202_v3 = vld [vmem:[%s24025_s4 + $0xbc4] ss:$20 sps:$4 sm:$0xff]  }
 0x351   : > { %7993 = vmatprep.subr.bf16.mxu0 %v16184_v39  ;;  %v16197_v39 = vld [vmem:[%s24025_s4 + $0xd00] ss:$20 sps:$4 sm:$0xff]  }
 0x352   : > { %8049 = vmatpush1.bf16.msra.mxu1 %v16179_v51  ;;  %v16205_v51 = vld [vmem:[%s24025_s4 + $0xcdc] ss:$20 sps:$4 sm:$0xff]  }
 0x353   : > { %8050 = vmatprep.subr.bf16.mxu1 %v16187_v1  ;;  %v16200_v1 = vld [vmem:[%s24025_s4 + $0xbc0] ss:$20 sps:$4 sm:$0xff]  }
 0x354   : > { %7994 = vmatpush2.bf16.msra.mxu0 %v16182_v10  ;;  %v16208_v10 = vld [vmem:[%s24025_s4 + $0xb9c] ss:$20 sps:$4 sm:$0xff]  }
 0x355   : > { %7947 = vmatmul.mubr.bf16.gmra.mxu1 %v19097_v37  ;;  %7995 = vmatprep.subr.bf16.mxu0 %v16190_v46  ;;  %v16203_v46 = vld [vmem:[%s24025_s4 + $0xcd8] ss:$20 sps:$4 sm:$0xff]  }
 0x356   : > { %7956 = vmatprep.mubr.bf16.mxu1 %v19138_v13  ;;  %8051 = vmatpush1.bf16.msra.mxu1 %v16185_v36  ;;  %v16211_v36 = vld [vmem:[%s24025_s4 + $0xcb4] ss:$20 sps:$4 sm:$0xff]  }
 0x357   : > { %8052 = vmatprep.subr.bf16.mxu1 %v16193_v25  ;;  %v16206_v25 = vld [vmem:[%s24025_s4 + $0xb98] ss:$20 sps:$4 sm:$0xff]  }
 0x358   : > { %7996 = vmatpush2.bf16.msra.mxu0 %v16188_v29  ;;  %v16214_v29 = vld [vmem:[%s24025_s4 + $0xb74] ss:$20 sps:$4 sm:$0xff]  }
 0x359   : > { %7997 = vmatprep.subr.bf16.mxu0 %v16196_v4  ;;  %v16209_v4 = vld [vmem:[%s24025_s4 + $0xcb0] ss:$20 sps:$4 sm:$0xff]  }
 0x35a   : > { %8053 = vmatpush1.bf16.msra.mxu1 %v16191_v11  ;;  %v16217_v11 = vld [vmem:[%s24025_s4 + $0xc8c] ss:$20 sps:$4 sm:$0xff]  }
 0x35b   : > { %8054 = vmatprep.subr.bf16.mxu1 %v16199_v28  ;;  %v16212_v28 = vld [vmem:[%s24025_s4 + $0xb70] ss:$20 sps:$4 sm:$0xff]  }
 0x35c   : > { %7998 = vmatpush2.bf16.msra.mxu0 %v16194_v18  ;;  %v24285_v18 = vld [vmem:[#allocation16_spill] sm:$0xff] }
 0x35d   : > { %7957 = vmatmul.mubr.bf16.gmra.mxu1 %v19169_v50  ;;  %7999 = vmatprep.subr.bf16.mxu0 %v16202_v3  ;;  %v16220_v3 = vld [vmem:[%s24025_s4 + $0xb4c] ss:$20 sps:$4 sm:$0xff]  }
 0x35e   : > { %7966 = vmatprep.mubr.bf16.mxu1 %v19200_v63  ;;  %8055 = vmatpush1.bf16.msra.mxu1 %v16197_v39  ;;  %v24286_v39 = vld [vmem:[#allocation15_spill] sm:$0xff] }
 0x35f   : > { %8056 = vmatprep.subr.bf16.mxu1 %v16205_v51  ;;  %v16215_v51 = vld [vmem:[%s24025_s4 + $0xc88] ss:$20 sps:$4 sm:$0xff]  }
 0x360   : > { %8000 = vmatpush2.bf16.msra.mxu0 %v16200_v1  ;;  %v16223_v1 = vld [vmem:[%s24025_s4 + $0xee4] ss:$20 sps:$4 sm:$0xff]  }
 0x361   : > { %8001 = vmatprep.subr.bf16.mxu0 %v16208_v10  ;;  %v16218_v10 = vld [vmem:[%s24025_s4 + $0xb48] ss:$20 sps:$4 sm:$0xff]  }
 0x362   : > { %8057 = vmatpush1.bf16.msra.mxu1 %v16203_v46  ;;  %v16226_v46 = vld [vmem:[%s24025_s4 + $0x1024] ss:$20 sps:$4 sm:$0xff]  }
 0x363   : > { %8058 = vmatprep.subr.bf16.mxu1 %v16211_v36  ;;  %v16221_v36 = vld [vmem:[%s24025_s4 + $0xee0] ss:$20 sps:$4 sm:$0xff]  }
 0x364   : > { %8002 = vmatpush2.bf16.msra.mxu0 %v16206_v25  ;;  %v16229_v25 = vld [vmem:[%s24025_s4 + $0xebc] ss:$20 sps:$4 sm:$0xff]  }
 0x365   : > { %7967 = vmatmul.mubr.bf16.gmra.mxu1 %v24285_v18  ;;  %8003 = vmatprep.subr.bf16.mxu0 %v16214_v29  ;;  %v16224_v29 = vld [vmem:[%s24025_s4 + $0x1020] ss:$20 sps:$4 sm:$0xff]  }
 0x366   : > { %8059 = vmatpush1.bf16.msra.mxu1 %v16209_v4  ;;  %8078 = vmatprep.mubr.bf16.mxu1 %v24286_v39 }
 0x367   : > { %8060 = vmatprep.subr.bf16.mxu1 %v16217_v11  ;;  %v16232_v11 = vld [vmem:[%s24025_s4 + $0xffc] ss:$20 sps:$4 sm:$0xff]  }
 0x368   : > { %8004 = vmatpush2.bf16.msra.mxu0 %v16212_v28 }
 0x369   : > { %8005 = vmatprep.subr.bf16.mxu0 %v16220_v3 }
 0x36a   : > { %8061 = vmatpush1.bf16.msra.mxu1 %v16215_v51  ;;  %v16227_v51 = vld [vmem:[%s24025_s4 + $0xeb8] ss:$20 sps:$4 sm:$0xff]  }
 0x36b   : > { %8062 = vmatprep.subr.bf16.mxu1 %v16223_v1  ;;  %v24287_v1 = vld [vmem:[#allocation18_spill] sm:$0xff] }
 0x36c   : > { %8006 = vmatpush2.bf16.msra.mxu0 %v16218_v10 }
 0x36d   : > { %v7512_v4 = vpop.f32.mrf.mxu1  ;;  %8117 = vmatprep.subr.bf16.mxu0 %v16226_v46  ;;  %v16235_v46 = vld [vmem:[%s24025_s4 + $0xe94] ss:$20 sps:$4 sm:$0xff]  }
 0x36e   : > { %v7513_v28 = vadd.f32 %v7512_v4, %v20383_v27  ;;  %v7583_v3 = vpop.f32.mrf.mxu0  ;;  %8063 = vmatpush2.bf16.msra.mxu1 %v16221_v36  ;;  %v16230_v4 = vld [vmem:[%s24025_s4 + $0xff8] ss:$20 sps:$4 sm:$0xff]  }
 0x36f   : > { %8008 = vmatmul.mubr.bf16.vlgmr.msra.gmra.mxu0 %v24287_v1  ;;  %v7514_v10 = vpop.f32.mrf.mxu1  ;;  %8064 = vmatprep.subr.bf16.mxu1 %v16229_v25  ;;  %v16238_v25 = vld [vmem:[%s24025_s4 + $0xfd4] ss:$20 sps:$4 sm:$0xff]  }
 0x370   : > { %v20640_v9 = vadd.f32 %v7583_v3, %v7513_v28  ;;  %8017 = vmatprep.mubr.bf16.mxu0 %v24288_v6  ;;  %8118 = vmatpush1.bf16.msra.mxu0 %v16224_v29  ;;  %v7515_v27 = vadd.f32 %v7514_v10, %v20394_v31  ;;  %v7585_v36 = vpop.f32.mrf.mxu0  ;;  %v16233_v31 = vld [vmem:[%s24025_s4 + $0xe90] ss:$20 sps:$4 sm:$0xff]  }
 0x371   : > { %v7516_v39 = vpop.f32.mrf.mxu1  ;;  %8119 = vmatprep.subr.bf16.mxu0 %v16232_v11  ;;  %v16241_v11 = vld [vmem:[%s24025_s4 + $0xe6c] ss:$20 sps:$4 sm:$0xff]  }
 0x372   : > { %v20650_v1 = vadd.f32 %v7585_v36, %v7515_v27  ;;  %v7517_v28 = vadd.f32 %v7516_v39, %v20405_v40  ;;  %v7587_v3 = vpop.f32.mrf.mxu0  ;;  %8065 = vmatpush2.bf16.msra.mxu1 %v16227_v51  ;;  %v16236_v40 = vld [vmem:[%s24025_s4 + $0xfd0] ss:$20 sps:$4 sm:$0xff]   ;;  %v16244_v51 = vld [vmem:[%s24025_s4 + $0xfac] ss:$20 sps:$4 sm:$0xff]  }
 0x373   : > { %v20656_v29 = vpop.f32.mrf.mxu1  ;;  %8066 = vmatprep.subr.bf16.mxu1 %v16235_v46 }
 0x374   : > { %24289 = vst [vmem:[#allocation16_spill] sm:$0xff] %v20656_v29  ;;  %v20661_v10 = vadd.f32 %v7587_v3, %v7517_v28  ;;  %8120 = vmatpush1.bf16.msra.mxu0 %v16230_v4  ;;  %v20663_v27 = vpop.f32.mrf.mxu0  ;;  %v16239_v4 = vld [vmem:[%s24025_s4 + $0xe68] ss:$20 sps:$4 sm:$0xff]   ;;  %v24291_v28 = vld [vmem:[#allocation22_spill] sm:$0xff] }
 0x375   : > { %24290 = vst [vmem:[#allocation69_spill] sm:$0xff] %v20663_v27  ;;  %v7522_v39 = vpop.f32.mrf.mxu1  ;;  %8121 = vmatprep.subr.bf16.mxu0 %v16238_v25  ;;  %v16247_v25 = vld [vmem:[%s24025_s4 + $0xe44] ss:$20 sps:$4 sm:$0xff]   ;;  %v24292_v29 = vld [vmem:[#allocation23_spill] sm:$0xff] }
 0x376   : > { %v7523_v46 = vadd.f32 %v7522_v39, %v20422_v23  ;;  %v7593_v36 = vpop.f32.mrf.mxu0  ;;  %8067 = vmatpush2.bf16.msra.mxu1 %v16233_v31  ;;  %v16242_v39 = vld [vmem:[%s24025_s4 + $0xfa8] ss:$20 sps:$4 sm:$0xff]  }
 0x377   : > { %8018 = vmatmul.mubr.bf16.gmra.mxu0 %v24291_v28  ;;  %v7524_v3 = vpop.f32.mrf.mxu1  ;;  %8068 = vmatprep.subr.bf16.mxu1 %v16241_v11  ;;  %v16250_v11 = vld [vmem:[%s24025_s4 + $0xf84] ss:$20 sps:$4 sm:$0xff]  }
 0x378   : > { %v20679_v27 = vadd.f32 %v7593_v36, %v7523_v46  ;;  %8027 = vmatprep.mubr.bf16.mxu0 %v24292_v29  ;;  %8122 = vmatpush1.bf16.msra.mxu0 %v16236_v40  ;;  %v7525_v23 = vadd.f32 %v7524_v3, %v20433_v58  ;;  %v7595_v31 = vpop.f32.mrf.mxu0  ;;  %v16245_v58 = vld [vmem:[%s24025_s4 + $0xe40] ss:$20 sps:$4 sm:$0xff]  }
 0x379   : > { %v7526_v6 = vpop.f32.mrf.mxu1  ;;  %8123 = vmatprep.subr.bf16.mxu0 %v16244_v51  ;;  %v16253_v51 = vld [vmem:[%s24025_s4 + $0xe1c] ss:$20 sps:$4 sm:$0xff]  }
 0x37a   : > { %v20689_v28 = vadd.f32 %v7595_v31, %v7525_v23  ;;  %v7527_v46 = vadd.f32 %v7526_v6, %v20444_v59  ;;  %v7597_v36 = vpop.f32.mrf.mxu0  ;;  %8069 = vmatpush2.bf16.msra.mxu1 %v16239_v4  ;;  %v16248_v6 = vld [vmem:[%s24025_s4 + $0xf80] ss:$20 sps:$4 sm:$0xff]   ;;  %v16256_v4 = vld [vmem:[%s24025_s4 + $0xf5c] ss:$20 sps:$4 sm:$0xff]  }
 0x37b   : > { %v20695_v40 = vpop.f32.mrf.mxu1  ;;  %8070 = vmatprep.subr.bf16.mxu1 %v16247_v25 }
 0x37c   : > { %24293 = vst [vmem:[#allocation70_spill] sm:$0xff] %v20695_v40  ;;  %v20700_v3 = vadd.f32 %v7597_v36, %v7527_v46  ;;  %8124 = vmatpush1.bf16.msra.mxu0 %v16242_v39  ;;  %v20702_v23 = vpop.f32.mrf.mxu0  ;;  %v16251_v39 = vld [vmem:[%s24025_s4 + $0xe18] ss:$20 sps:$4 sm:$0xff]  }
 0x37d   : > { %24294 = vst [vmem:[#allocation71_spill] sm:$0xff] %v20702_v23  ;;  %v7532_v59 = vpop.f32.mrf.mxu1  ;;  %8125 = vmatprep.subr.bf16.mxu0 %v16250_v11  ;;  %v24295_v46 = vld [vmem:[#allocation25_spill] sm:$0xff]  ;;  %v16259_v11 = vld [vmem:[%s24025_s4 + $0xdf4] ss:$20 sps:$4 sm:$0xff]  }
 0x37e   : > { %v7533_v25 = vadd.f32 %v7532_v59, %v20461_v22  ;;  %v7603_v31 = vpop.f32.mrf.mxu0  ;;  %8071 = vmatpush2.bf16.msra.mxu1 %v16245_v58  ;;  %v24296_v40 = vld [vmem:[#allocation27_spill] sm:$0xff] }
 0x37f   : > { %8028 = vmatmul.mubr.bf16.gmra.mxu0 %v24295_v46  ;;  %v7534_v36 = vpop.f32.mrf.mxu1  ;;  %8072 = vmatprep.subr.bf16.mxu1 %v16253_v51  ;;  %v16254_v59 = vld [vmem:[%s24025_s4 + $0xf58] ss:$20 sps:$4 sm:$0xff]   ;;  %v16262_v51 = vld [vmem:[%s24025_s4 + $0xf34] ss:$20 sps:$4 sm:$0xff]  }
 0x380   : > { %v20718_v23 = vadd.f32 %v7603_v31, %v7533_v25  ;;  %8037 = vmatprep.mubr.bf16.mxu0 %v24296_v40  ;;  %8126 = vmatpush1.bf16.msra.mxu0 %v16248_v6  ;;  %v7535_v22 = vadd.f32 %v7534_v36, %v20472_v21  ;;  %v7605_v58 = vpop.f32.mrf.mxu0  ;;  %v16257_v21 = vld [vmem:[%s24025_s4 + $0xdf0] ss:$20 sps:$4 sm:$0xff]  }
 0x381   : > { %v7536_v29 = vpop.f32.mrf.mxu1  ;;  %8127 = vmatprep.subr.bf16.mxu0 %v16256_v4  ;;  %v16265_v4 = vld [vmem:[%s24025_s4 + $0xdcc] ss:$20 sps:$4 sm:$0xff]  }
 0x382   : > { %v20728_v46 = vadd.f32 %v7605_v58, %v7535_v22  ;;  %v7537_v25 = vadd.f32 %v7536_v29, %v20483_v12  ;;  %v7607_v31 = vpop.f32.mrf.mxu0  ;;  %8073 = vmatpush2.bf16.msra.mxu1 %v16251_v39  ;;  %v16260_v12 = vld [vmem:[%s24025_s4 + $0xf30] ss:$20 sps:$4 sm:$0xff]   ;;  %v16268_v39 = vld [vmem:[%s24025_s4 + $0xf0c] ss:$20 sps:$4 sm:$0xff]  }
 0x383   : > { %v20734_v6 = vpop.f32.mrf.mxu1  ;;  %8074 = vmatprep.subr.bf16.mxu1 %v16259_v11 }
 0x384   : > { %24297 = vst [vmem:[#allocation72_spill] sm:$0xff] %v20734_v6  ;;  %v20739_v36 = vadd.f32 %v7607_v31, %v7537_v25  ;;  %8128 = vmatpush1.bf16.msra.mxu0 %v16254_v59  ;;  %v20741_v22 = vpop.f32.mrf.mxu0  ;;  %v16263_v59 = vld [vmem:[%s24025_s4 + $0xdc8] ss:$20 sps:$4 sm:$0xff]   ;;  %v24299_v25 = vld [vmem:[#allocation30_spill] sm:$0xff] }
 0x385   : > { %24298 = vst [vmem:[#allocation73_spill] sm:$0xff] %v20741_v22  ;;  %v7542_v29 = vpop.f32.mrf.mxu1  ;;  %8129 = vmatprep.subr.bf16.mxu0 %v16262_v51  ;;  %v16271_v51 = vld [vmem:[%s24025_s4 + $0x12a4] ss:$20 sps:$4 sm:$0xff]  }
 0x386   : > { %v7543_v11 = vadd.f32 %v7542_v29, %v20500_v47  ;;  %v7613_v58 = vpop.f32.mrf.mxu0  ;;  %8075 = vmatpush2.bf16.msra.mxu1 %v16257_v21  ;;  %v24300_v6 = vld [vmem:[#allocation29_spill] sm:$0xff] }
 0x387   : > { %8038 = vmatmul.mubr.bf16.gmra.mxu0 %v24299_v25  ;;  %v7544_v31 = vpop.f32.mrf.mxu1  ;;  %8076 = vmatprep.subr.bf16.mxu1 %v16265_v4  ;;  %v16266_v29 = vld [vmem:[%s24025_s4 + $0xf08] ss:$20 sps:$4 sm:$0xff]   ;;  %v16274_v4 = vld [vmem:[%s24025_s4 + $0x1164] ss:$20 sps:$4 sm:$0xff]  }
 0x388   : > { %v20757_v22 = vadd.f32 %v7613_v58, %v7543_v11  ;;  %8130 = vmatpush1.bf16.msra.mxu0 %v16260_v12  ;;  %8149 = vmatprep.mubr.bf16.mxu0 %v24300_v6  ;;  %v7545_v47 = vadd.f32 %v7544_v31, %v20511_v30  ;;  %v7615_v21 = vpop.f32.mrf.mxu0  ;;  %v16269_v12 = vld [vmem:[%s24025_s4 + $0x12a0] ss:$20 sps:$4 sm:$0xff]   ;;  %v16277_v58 = vld [vmem:[%s24025_s4 + $0x127c] ss:$20 sps:$4 sm:$0xff]  }
 0x389   : > { %v7546_v40 = vpop.f32.mrf.mxu1  ;;  %8131 = vmatprep.subr.bf16.mxu0 %v16268_v39  ;;  %v16272_v39 = vld [vmem:[%s24025_s4 + $0x1160] ss:$20 sps:$4 sm:$0xff]   ;;  %v24301_v31 = vld [vmem:[#allocation17_spill] sm:$0xff] }
 0x38a   : > { %v20767_v25 = vadd.f32 %v7615_v21, %v7545_v47  ;;  %v7617_v11 = vpop.f32.mrf.mxu0  ;;  %8077 = vmatpush2.bf16.msra.mxu1 %v16263_v59  ;;  %v16280_v59 = vld [vmem:[%s24025_s4 + $0x113c] ss:$20 sps:$4 sm:$0xff]  }
 0x38b   : > { %v7547_v30 = vpop.f32.mrf.mxu1  ;;  %8188 = vmatprep.subr.bf16.mxu1 %v16271_v51  ;;  %v24303_v21 = vld [vmem:[#allocation20_spill] sm:$0xff] }
 0x38c   : > { %8132 = vmatpush1.bf16.msra.mxu0 %v16266_v29  ;;  %v7618_v40 = vpop.f32.mrf.mxu0  ;;  %v16275_v29 = vld [vmem:[%s24025_s4 + $0x1278] ss:$20 sps:$4 sm:$0xff]  }
 0x38d   : > { %8079 = vmatmul.mubr.bf16.vlgmr.msra.gmra.mxu1 %v24301_v31  ;;  %v7654_v47 = vpop.f32.mrf.mxu1  ;;  %8133 = vmatprep.subr.bf16.mxu0 %v16274_v4  ;;  %v16283_v4 = vld [vmem:[%s24025_s4 + $0x1254] ss:$20 sps:$4 sm:$0xff]  }
 0x38e   : > { %v20783_v51 = vadd.f32 %v7654_v47, %v20640_v9  ;;  %8088 = vmatprep.mubr.bf16.mxu1 %v24303_v21  ;;  %8189 = vmatpush1.bf16.msra.mxu1 %v16269_v12  ;;  %v16278_v9 = vld [vmem:[%s24025_s4 + $0x1138] ss:$20 sps:$4 sm:$0xff]   ;;  %v16286_v12 = vld [vmem:[%s24025_s4 + $0x1114] ss:$20 sps:$4 sm:$0xff]  }
 0x38f   : > { %v7656_v11 = vpop.f32.mrf.mxu1  ;;  %8190 = vmatprep.subr.bf16.mxu1 %v16277_v58 }
 0x390   : > { %24302 = vst [vmem:[#allocation29_spill] sm:$0xff] %v20783_v51  ;;  %8134 = vmatpush2.bf16.msra.mxu0 %v16272_v39  ;;  %v20793_v30 = vadd.f32 %v7656_v11, %v20650_v1  ;;  %v16281_v1 = vld [vmem:[%s24025_s4 + $0x1250] ss:$20 sps:$4 sm:$0xff]   ;;  %v16287_v51 = vld [vmem:[%s24025_s4 + $0x1228] ss:$20 sps:$4 sm:$0xff]  }
 0x391   : > { %v7658_v40 = vpop.f32.mrf.mxu1  ;;  %8135 = vmatprep.subr.bf16.mxu0 %v16280_v59  ;;  %v16284_v39 = vld [vmem:[%s24025_s4 + $0x1110] ss:$20 sps:$4 sm:$0xff]   ;;  %v24307_v59 = vld [vmem:[#allocation21_spill] sm:$0xff] }
 0x392   : > { %24304 = vst [vmem:[#allocation17_spill] sm:$0xff] %v20793_v30  ;;  %v20802_v58 = vadd.f32 %v7658_v40, %v20661_v10  ;;  %8191 = vmatpush1.bf16.msra.mxu1 %v16275_v29  ;;  %v16289_v10 = vld [vmem:[%s24025_s4 + $0x122c] ss:$20 sps:$4 sm:$0xff]  }
 0x393   : > { %v20804_v47 = vpop.f32.mrf.mxu1  ;;  %8192 = vmatprep.subr.bf16.mxu1 %v16283_v4  ;;  %v16292_v29 = vld [vmem:[%s24025_s4 + $0x10ec] ss:$20 sps:$4 sm:$0xff]   ;;  %v24309_v4 = vld [vmem:[#allocation24_spill] sm:$0xff] }
 0x394   : > { %24305 = vst [vmem:[#allocation20_spill] sm:$0xff] %v20802_v58  ;;  %24306 = vst [vmem:[#allocation74_spill] sm:$0xff] %v20804_v47  ;;  %8136 = vmatpush2.bf16.msra.mxu0 %v16278_v9  ;;  %v16290_v58 = vld [vmem:[%s24025_s4 + $0x10e8] ss:$20 sps:$4 sm:$0xff]  }
 0x395   : > { %8089 = vmatmul.mubr.bf16.gmra.mxu1 %v24307_v59  ;;  %v7664_v11 = vpop.f32.mrf.mxu1  ;;  %8137 = vmatprep.subr.bf16.mxu0 %v16286_v12 }
 0x396   : > { %v20820_v40 = vadd.f32 %v7664_v11, %v20679_v27  ;;  %8098 = vmatprep.mubr.bf16.mxu1 %v24309_v4  ;;  %8193 = vmatpush1.bf16.msra.mxu1 %v16281_v1  ;;  %v16295_v27 = vld [vmem:[%s24025_s4 + $0x1204] ss:$20 sps:$4 sm:$0xff]  }
 0x397   : > { %v7666_v9 = vpop.f32.mrf.mxu1  ;;  %8194 = vmatprep.subr.bf16.mxu1 %v16289_v10  ;;  %v16296_v10 = vld [vmem:[%s24025_s4 + $0x10c0] ss:$20 sps:$4 sm:$0xff]  }
 0x398   : > { %24308 = vst [vmem:[#allocation21_spill] sm:$0xff] %v20820_v40  ;;  %8138 = vmatpush2.bf16.msra.mxu0 %v16284_v39  ;;  %v20827_v12 = vadd.f32 %v7666_v9, %v20689_v28  ;;  %v16293_v28 = vld [vmem:[%s24025_s4 + $0x1200] ss:$20 sps:$4 sm:$0xff]   ;;  %v16298_v39 = vld [vmem:[%s24025_s4 + $0x10c4] ss:$20 sps:$4 sm:$0xff]  }
 0x399   : > { %v7668_v30 = vpop.f32.mrf.mxu1  ;;  %8139 = vmatprep.subr.bf16.mxu0 %v16292_v29  ;;  %v24313_v29 = vld [vmem:[#allocation26_spill] sm:$0xff] }
 0x39a   : > { %24310 = vst [vmem:[#allocation24_spill] sm:$0xff] %v20827_v12  ;;  %v20836_v1 = vadd.f32 %v7668_v30, %v20700_v3  ;;  %8195 = vmatpush1.bf16.msra.mxu1 %v16287_v51  ;;  %v16301_v51 = vld [vmem:[%s24025_s4 + $0x11dc] ss:$20 sps:$4 sm:$0xff]   ;;  %v16302_v12 = vld [vmem:[%s24025_s4 + $0x1098] ss:$20 sps:$4 sm:$0xff]  }
 0x39b   : > { %v20838_v11 = vpop.f32.mrf.mxu1  ;;  %8196 = vmatprep.subr.bf16.mxu1 %v16295_v27  ;;  %v16304_v30 = vld [vmem:[%s24025_s4 + $0x109c] ss:$20 sps:$4 sm:$0xff]   ;;  %v16299_v27 = vld [vmem:[%s24025_s4 + $0x11d8] ss:$20 sps:$4 sm:$0xff]  }
 0x39c   : > { %24311 = vst [vmem:[#allocation75_spill] sm:$0xff] %v20836_v1  ;;  %24312 = vst [vmem:[#allocation76_spill] sm:$0xff] %v20838_v11  ;;  %8140 = vmatpush2.bf16.msra.mxu0 %v16290_v58  ;;  %v24315_v58 = vld [vmem:[#allocation28_spill] sm:$0xff] }
 0x39d   : > { %8099 = vmatmul.mubr.bf16.gmra.mxu1 %v24313_v29  ;;  %v7674_v3 = vpop.f32.mrf.mxu1  ;;  %8141 = vmatprep.subr.bf16.mxu0 %v16298_v39 }
 0x39e   : > { %v20857_v9 = vadd.f32 %v7674_v3, %v20718_v23  ;;  %8108 = vmatprep.mubr.bf16.mxu1 %v24315_v58  ;;  %8197 = vmatpush1.bf16.msra.mxu1 %v16293_v28  ;;  %v16307_v28 = vld [vmem:[%s24025_s4 + $0x11b4] ss:$20 sps:$4 sm:$0xff]   ;;  %v16308_v3 = vld [vmem:[%s24025_s4 + $0x1070] ss:$20 sps:$4 sm:$0xff]  }
 0x39f   : > { %v7676_v1 = vpop.f32.mrf.mxu1  ;;  %8198 = vmatprep.subr.bf16.mxu1 %v16301_v51  ;;  %v24319_v51 = vld [vmem:[#allocation32_spill] sm:$0xff] }
 0x3a0   : > { %24314 = vst [vmem:[#allocation26_spill] sm:$0xff] %v20857_v9  ;;  %8142 = vmatpush2.bf16.msra.mxu0 %v16296_v10  ;;  %v20864_v40 = vadd.f32 %v7676_v1, %v20728_v46  ;;  %v16310_v10 = vld [vmem:[%s24025_s4 + $0x1074] ss:$20 sps:$4 sm:$0xff]   ;;  %v16305_v1 = vld [vmem:[%s24025_s4 + $0x11b0] ss:$20 sps:$4 sm:$0xff]  }
 0x3a1   : > { %v7678_v23 = vpop.f32.mrf.mxu1  ;;  %8143 = vmatprep.subr.bf16.mxu0 %v16304_v30  ;;  %v16313_v30 = vld [vmem:[%s24025_s4 + $0x118c] ss:$20 sps:$4 sm:$0xff]  }
 0x3a2   : > { %24316 = vst [vmem:[#allocation28_spill] sm:$0xff] %v20864_v40  ;;  %v20873_v39 = vadd.f32 %v7678_v23, %v20739_v36  ;;  %8199 = vmatpush1.bf16.msra.mxu1 %v16299_v27  ;;  %v16316_v27 = vld [vmem:[%s24025_s4 + $0x104c] ss:$20 sps:$4 sm:$0xff]   ;;  %v16314_v40 = vld [vmem:[%s24025_s4 + $0x1048] ss:$20 sps:$4 sm:$0xff]  }
 0x3a3   : > { %v20878_v46 = vpop.f32.mrf.mxu1  ;;  %8200 = vmatprep.subr.bf16.mxu1 %v16307_v28  ;;  %v16311_v28 = vld [vmem:[%s24025_s4 + $0x1188] ss:$20 sps:$4 sm:$0xff]  }
 0x3a4   : > { %24317 = vst [vmem:[#allocation77_spill] sm:$0xff] %v20873_v39  ;;  %24318 = vst [vmem:[#allocation78_spill] sm:$0xff] %v20878_v46  ;;  %8144 = vmatpush2.bf16.msra.mxu0 %v16302_v12  ;;  %v24321_v12 = vld [vmem:[#allocation31_spill] sm:$0xff] }
 0x3a5   : > { %8109 = vmatmul.mubr.bf16.gmra.mxu1 %v24319_v51  ;;  %v7684_v36 = vpop.f32.mrf.mxu1  ;;  %8145 = vmatprep.subr.bf16.mxu0 %v16310_v10 }
 0x3a6   : > { %v20894_v23 = vadd.f32 %v7684_v36, %v20757_v22  ;;  %8201 = vmatpush1.bf16.msra.mxu1 %v16305_v1  ;;  %8220 = vmatprep.mubr.bf16.mxu1 %v24321_v12  ;;  %v16319_v22 = vld [vmem:[%s24025_s4 + $0x13e4] ss:$20 sps:$4 sm:$0xff]   ;;  %v16334_v1 = vld [vmem:[%s24025_s4 + $0x140c] ss:$20 sps:$4 sm:$0xff]   ;;  %v16332_v36 = vld [vmem:[%s24025_s4 + $0x1408] ss:$20 sps:$4 sm:$0xff]  }
 0x3a7   : > { %v7686_v39 = vpop.f32.mrf.mxu1  ;;  %8202 = vmatprep.subr.bf16.mxu1 %v16313_v30  ;;  %v16346_v30 = vld [vmem:[%s24025_s4 + $0x4e8] ss:$20 sps:$4 sm:$0xff]  }
 0x3a8   : > { %24320 = vst [vmem:[#allocation32_spill] sm:$0xff] %v20894_v23  ;;  %8146 = vmatpush2.bf16.msra.mxu0 %v16308_v3  ;;  %v20901_v9 = vadd.f32 %v7686_v39, %v20767_v25  ;;  %v16317_v25 = vld [vmem:[%s24025_s4 + $0x13e0] ss:$20 sps:$4 sm:$0xff]   ;;  %v16322_v39 = vld [vmem:[%s24025_s4 + $0x13bc] ss:$20 sps:$4 sm:$0xff]  }
 0x3a9   : > { %v7688_v10 = vpop.f32.mrf.mxu1  ;;  %8147 = vmatprep.subr.bf16.mxu0 %v16316_v27 }
 0x3aa   : > { %24322 = vst [vmem:[#allocation31_spill] sm:$0xff] %v20901_v9  ;;  %8203 = vmatpush1.bf16.msra.mxu1 %v16311_v28  ;;  %v24323_v28 = vld [vmem:[#allocation35_spill] sm:$0xff]  ;;  %v16337_v9 = vld [vmem:[%s24025_s4 + $0x131c] ss:$20 sps:$4 sm:$0xff]  }
 0x3ab   : > { %v7689_v3 = vpop.f32.mrf.mxu1  ;;  %8204 = vmatprep.subr.bf16.mxu1 %v16319_v22  ;;  %v16325_v22 = vld [vmem:[%s24025_s4 + $0x1394] ss:$20 sps:$4 sm:$0xff]  }
 0x3ac   : > { %8148 = vmatpush2.bf16.msra.mxu0 %v16314_v40  ;;  %v16320_v40 = vld [vmem:[%s24025_s4 + $0x13b8] ss:$20 sps:$4 sm:$0xff]   ;;  %v16323_v3 = vld [vmem:[%s24025_s4 + $0x1390] ss:$20 sps:$4 sm:$0xff]  }
 0x3ad   : > { %8273 = vmatprep.subr.bf16.mxu0 %v16334_v1 }
 0x3ae   : > { %8205 = vmatpush2.bf16.msra.mxu1 %v16317_v25  ;;  %v16328_v25 = vld [vmem:[%s24025_s4 + $0x136c] ss:$20 sps:$4 sm:$0xff]  }
 0x3af   : > { %v7725_v27 = vpop.f32.mrf.mxu0  ;;  %8150 = vmatmul.mubr.bf16.vlgmr.msra.gmra.mxu0 %v19786_v41  ;;  %8206 = vmatprep.subr.bf16.mxu1 %v16322_v39  ;;  %v16349_v41 = vld [vmem:[%s24025_s4 + $0x100] ss:$20 sps:$4 sm:$0xff]  }
 0x3b0   : > { %8159 = vmatprep.mubr.bf16.mxu0 %v24323_v28  ;;  %8274 = vmatpush1.bf16.msra.mxu0 %v16332_v36  ;;  %v16326_v36 = vld [vmem:[%s24025_s4 + $0x1368] ss:$20 sps:$4 sm:$0xff]  }
 0x3b1   : > { %v7727_v10 = vpop.f32.mrf.mxu0  ;;  %14912 = vmatprep.subr.bf16.mxu0 %v16346_v30  ;;  %v16331_v30 = vld [vmem:[%s24025_s4 + $0x1344] ss:$20 sps:$4 sm:$0xff]  }
 0x3b2   : > { %8207 = vmatpush2.bf16.msra.mxu1 %v16320_v40 }
 0x3b3   : > { %v20932_v1 = vpop.f32.mrf.mxu0  ;;  %8208 = vmatprep.subr.bf16.mxu1 %v16325_v22 }
 0x3b5   : > { %v20940_v39 = vpop.f32.mrf.mxu0 }
 0x3b6   : > { %24324 = vst [vmem:[#allocation79_spill] sm:$0xff] %v20940_v39  ;;  %8209 = vmatpush2.bf16.msra.mxu1 %v16323_v3  ;;  %v16329_v3 = vld [vmem:[%s24025_s4 + $0x1340] ss:$20 sps:$4 sm:$0xff]  }
 0x3b7   : > { %v20942_v23 = vpop.f32.mrf.mxu0  ;;  %8160 = vmatmul.mubr.bf16.gmra.mxu0 %v19849_v60  ;;  %8210 = vmatprep.subr.bf16.mxu1 %v16328_v25  ;;  %v24328_v60 = vld [vmem:[#allocation36_spill] sm:$0xff] }
 0x3b8   : > { %8169 = vmatprep.mubr.bf16.mxu0 %v19865_v42  ;;  %v16348_v42 = vld [vmem:[%s24025_s4 + $0x240] ss:$20 sps:$4 sm:$0xff]  }
 0x3b9   : > { %v20952_v40 = vpop.f32.mrf.mxu0 }
 0x3ba   : > { %8211 = vmatpush2.bf16.msra.mxu1 %v16326_v36  ;;  %v16335_v36 = vld [vmem:[%s24025_s4 + $0x1318] ss:$20 sps:$4 sm:$0xff]  }
 0x3bb   : > { %v20954_v22 = vpop.f32.mrf.mxu0  ;;  %8212 = vmatprep.subr.bf16.mxu1 %v16331_v30  ;;  %v16340_v30 = vld [vmem:[%s24025_s4 + $0x12f4] ss:$20 sps:$4 sm:$0xff]  }
 0x3bd   : > { %v20962_v46 = vpop.f32.mrf.mxu0 }
 0x3be   : > { %24325 = vst [vmem:[#allocation80_spill] sm:$0xff] %v20962_v46  ;;  %8213 = vmatpush2.bf16.msra.mxu1 %v16329_v3  ;;  %v16338_v3 = vld [vmem:[%s24025_s4 + $0x12f0] ss:$20 sps:$4 sm:$0xff]   ;;  %v16343_v46 = vld [vmem:[%s24025_s4 + $0x12cc] ss:$20 sps:$4 sm:$0xff]  }
 0x3bf   : > { %v20964_v25 = vpop.f32.mrf.mxu0  ;;  %8170 = vmatmul.mubr.bf16.gmra.mxu0 %v19901_v0  ;;  %8214 = vmatprep.subr.bf16.mxu1 %v16337_v9 }
 0x3c0   : > { %8179 = vmatprep.mubr.bf16.mxu0 %v19911_v34 }
 0x3c1   : > { %v20974_v39 = vpop.f32.mrf.mxu0 }
 0x3c2   : > { %8215 = vmatpush2.bf16.msra.mxu1 %v16335_v36  ;;  %v16341_v36 = vld [vmem:[%s24025_s4 + $0x12c8] ss:$20 sps:$4 sm:$0xff]  }
 0x3c3   : > { %v20976_v11 = vpop.f32.mrf.mxu0  ;;  %8216 = vmatprep.subr.bf16.mxu1 %v16340_v30  ;;  %v16344_v30 = vld [vmem:[%s24025_s4 + $0x268] ss:$20 sps:$4 sm:$0xff]  }
 0x3c5   : > { %v20984_v47 = vpop.f32.mrf.mxu0 }
 0x3c6   : > { %24326 = vst [vmem:[#allocation81_spill] sm:$0xff] %v20984_v47  ;;  %8217 = vmatpush2.bf16.msra.mxu1 %v16338_v3  ;;  %v16345_v3 = vld [vmem:[%s24025_s4 + $0x128] ss:$20 sps:$4 sm:$0xff]  }
 0x3c7   : > { %v20986_v9 = vpop.f32.mrf.mxu0  ;;  %8180 = vmatmul.mubr.bf16.gmra.mxu0 %v19949_v17  ;;  %8218 = vmatprep.subr.bf16.mxu1 %v16343_v46  ;;  %v16347_v47 = vld [vmem:[%s24025_s4 + $0x3a8] ss:$20 sps:$4 sm:$0xff]  }
 0x3c8   : > { %8291 = vmatprep.mubr.bf16.mxu0 %v24268_v62 }
 0x3c9   : > { %v20996_v34 = vpop.f32.mrf.mxu0 }
 0x3ca   : > { %8219 = vmatpush2.bf16.msra.mxu1 %v16341_v36 }
 0x3cb   : > { %v7759_v0 = vpop.f32.mrf.mxu0  ;;  %14872 = vmatprep.subr.bf16.mxu1 %v16344_v30  ;;  %v24327_v30 = vld [vmem:[#allocation34_spill] sm:$0xff] }
 0x3cc   : > { %v16350_v0 = vld [vmem:[%s24025_s4 + $0x4c0] ss:$20 sps:$4 sm:$0xff]  }
 0x3cd   : > { %v7760_v46 = vpop.f32.mrf.mxu0  ;;  %v7796_v17 = vpop.f32.mrf.mxu1  ;;  %8221 = vmatmul.mubr.bf16.vlgmr.msra.gmra.mxu1 %v24327_v30  ;;  %v16357_v30 = vld [vmem:[%s24025_s4 + $0xb0] ss:$20 sps:$4 sm:$0xff]  }
 0x3ce   : > { %v21010_v36 = vadd.f32 %v7796_v17, %v7725_v27  ;;  %8230 = vmatprep.mubr.bf16.mxu1 %v24328_v60  ;;  %14873 = vmatpush3.bf16.msra.mxu1 %v16345_v3  ;;  %v16351_v17 = vld [vmem:[%s24025_s4 + $0x380] ss:$20 sps:$4 sm:$0xff]   ;;  %v16355_v3 = vld [vmem:[%s24025_s4 + $0x358] ss:$20 sps:$4 sm:$0xff]  }
 0x3cf   : > { %14446 = vmatmul.mubr.msk.bf16.vlgmr.msra.gmra.mxu0 %vm7039_vm1, %v19993_v2  ;;  %v7798_v28 = vpop.f32.mrf.mxu1  ;;  %14874 = vmatprep.subr.bf16.mxu1 %v16348_v42  ;;  %v16352_v2 = vld [vmem:[%s24025_s4 + $0x218] ss:$20 sps:$4 sm:$0xff]   ;;  %v24332_v60 = vld [vmem:[#allocation54_spill] sm:$0xff] }
 0x3d0   : > { %v21016_v46 = vadd.f32 %v7798_v28, %v7727_v10  ;;  %14913 = vmatpush3.bf16.msra.mxu0 %v16347_v47  ;;  %v16354_v28 = vld [vmem:[%s24025_s4 + $0x498] ss:$20 sps:$4 sm:$0xff]   ;;  %8301 = vmatprep.mubr.bf16.mxu0 %v24268_v62 }
 0x3d1   : > { %v7800_v27 = vpop.f32.mrf.mxu1  ;;  %14914 = vmatprep.subr.bf16.mxu0 %v16350_v0  ;;  %v16353_v42 = vld [vmem:[%s24025_s4 + $0xd8] ss:$20 sps:$4 sm:$0xff]  }
 0x3d2   : > { %v21031_v47 = vadd.f32 %v7800_v27, %v20932_v1  ;;  %14875 = vmatpush3.bf16.msra.mxu1 %v16349_v41  ;;  %v16356_v1 = vld [vmem:[%s24025_s4 + $0x1f0] ss:$20 sps:$4 sm:$0xff]  }
 0x3d3   : > { %v21034_v10 = vpop.f32.mrf.mxu1  ;;  %14876 = vmatprep.subr.bf16.mxu1 %v16352_v2  ;;  %v16358_v41 = vld [vmem:[%s24025_s4 + $0x470] ss:$20 sps:$4 sm:$0xff]  }
 0x3d4   : > { %24329 = vst [vmem:[#allocation82_spill] sm:$0xff] %v21034_v10  ;;  %14915 = vmatpush3.bf16.msra.mxu0 %v16351_v17  ;;  %v24330_v27 = vld [vmem:[#allocation40_spill] sm:$0xff]  ;;  %v24331_v10 = vld [vmem:[#allocation42_spill] sm:$0xff] }
 0x3d5   : > { %v7806_v0 = vpop.f32.mrf.mxu1  ;;  %14916 = vmatprep.subr.bf16.mxu0 %v16354_v28  ;;  %8231 = vmatmul.mubr.bf16.gmra.mxu1 %v24330_v27  ;;  %v16365_v27 = vld [vmem:[%s24025_s4 + $0x60] ss:$20 sps:$4 sm:$0xff]  }
 0x3d6   : > { %v21049_v17 = vadd.f32 %v7806_v0, %v20942_v23  ;;  %8240 = vmatprep.mubr.bf16.mxu1 %v24331_v10  ;;  %14877 = vmatpush3.bf16.msra.mxu1 %v16353_v42  ;;  %v16359_v23 = vld [vmem:[%s24025_s4 + $0x330] ss:$20 sps:$4 sm:$0xff]   ;;  %v24336_v10 = vld [vmem:[#allocation55_spill] sm:$0xff] }
 0x3d7   : > { %14447 = vmatmul.mubr.msk.bf16.gmra.mxu0 %vm7039_vm1, %v24332_v60  ;;  %v7808_v2 = vpop.f32.mrf.mxu1  ;;  %14878 = vmatprep.subr.bf16.mxu1 %v16356_v1  ;;  %v16360_v60 = vld [vmem:[%s24025_s4 + $0x1c8] ss:$20 sps:$4 sm:$0xff]  }
 0x3d8   : > { %v21056_v28 = vadd.f32 %v7808_v2, %v20952_v40  ;;  %14917 = vmatpush3.bf16.msra.mxu0 %v16355_v3  ;;  %v16362_v40 = vld [vmem:[%s24025_s4 + $0x448] ss:$20 sps:$4 sm:$0xff]   ;;  %8311 = vmatprep.mubr.bf16.mxu0 %v24268_v62 }
 0x3d9   : > { %v7810_v0 = vpop.f32.mrf.mxu1  ;;  %14918 = vmatprep.subr.bf16.mxu0 %v16358_v41  ;;  %v16361_v1 = vld [vmem:[%s24025_s4 + $0x88] ss:$20 sps:$4 sm:$0xff]  }
 0x3da   : > { %v21071_v42 = vadd.f32 %v7810_v0, %v20954_v22  ;;  %14879 = vmatpush3.bf16.msra.mxu1 %v16357_v30  ;;  %v16363_v41 = vld [vmem:[%s24025_s4 + $0x308] ss:$20 sps:$4 sm:$0xff]   ;;  %v16364_v22 = vld [vmem:[%s24025_s4 + $0x1a0] ss:$20 sps:$4 sm:$0xff]  }
 0x3db   : > { %v21074_v3 = vpop.f32.mrf.mxu1  ;;  %14880 = vmatprep.subr.bf16.mxu1 %v16360_v60  ;;  %v16366_v30 = vld [vmem:[%s24025_s4 + $0x420] ss:$20 sps:$4 sm:$0xff]  }
 0x3dc   : > { %24333 = vst [vmem:[#allocation83_spill] sm:$0xff] %v21074_v3  ;;  %14919 = vmatpush3.bf16.msra.mxu0 %v16359_v23  ;;  %v24334_v0 = vld [vmem:[#allocation46_spill] sm:$0xff]  ;;  %v24335_v3 = vld [vmem:[#allocation48_spill] sm:$0xff] }
 0x3dd   : > { %v7816_v2 = vpop.f32.mrf.mxu1  ;;  %14920 = vmatprep.subr.bf16.mxu0 %v16362_v40  ;;  %8241 = vmatmul.mubr.bf16.gmra.mxu1 %v24334_v0 }
 0x3de   : > { %v21089_v23 = vadd.f32 %v7816_v2, %v20964_v25  ;;  %8250 = vmatprep.mubr.bf16.mxu1 %v24335_v3  ;;  %14881 = vmatpush3.bf16.msra.mxu1 %v16361_v1  ;;  %v16367_v25 = vld [vmem:[%s24025_s4 + $0x2e0] ss:$20 sps:$4 sm:$0xff]  }
 0x3df   : > { %14448 = vmatmul.mubr.msk.bf16.gmra.mxu0 %vm7039_vm1, %v24336_v10  ;;  %v7818_v60 = vpop.f32.mrf.mxu1  ;;  %14882 = vmatprep.subr.bf16.mxu1 %v16364_v22  ;;  %v16368_v10 = vld [vmem:[%s24025_s4 + $0x178] ss:$20 sps:$4 sm:$0xff]  }
 0x3e0   : > { %v21096_v40 = vadd.f32 %v7818_v60, %v20974_v39  ;;  %14921 = vmatpush3.bf16.msra.mxu0 %v16363_v41  ;;  %v16370_v39 = vld [vmem:[%s24025_s4 + $0x3f8] ss:$20 sps:$4 sm:$0xff]   ;;  %8321 = vmatprep.mubr.bf16.mxu0 %v24268_v62  ;;  %v24339_v62 = vld [vmem:[#allocation56_spill] sm:$0xff] }
 0x3e1   : > { %v7820_v2 = vpop.f32.mrf.mxu1  ;;  %14922 = vmatprep.subr.bf16.mxu0 %v16366_v30  ;;  %v16369_v22 = vld [vmem:[%s24025_s4 + $0x38] ss:$20 sps:$4 sm:$0xff]  }
 0x3e2   : > { %v21111_v1 = vadd.f32 %v7820_v2, %v20976_v11  ;;  %14883 = vmatpush3.bf16.msra.mxu1 %v16365_v27  ;;  %v16371_v30 = vld [vmem:[%s24025_s4 + $0x2b8] ss:$20 sps:$4 sm:$0xff]   ;;  %v16372_v11 = vld [vmem:[%s24025_s4 + $0x150] ss:$20 sps:$4 sm:$0xff]  }
 0x3e3   : > { %v21114_v41 = vpop.f32.mrf.mxu1  ;;  %14884 = vmatprep.subr.bf16.mxu1 %v16368_v10  ;;  %v24338_v27 = vld [vmem:[#allocation52_spill] sm:$0xff] }
 0x3e4   : > { %24337 = vst [vmem:[#allocation46_spill] sm:$0xff] %v21114_v41  ;;  %14923 = vmatpush3.bf16.msra.mxu0 %v16367_v25  ;;  %v16374_v25 = vld [vmem:[%s24025_s4 + $0x3d0] ss:$20 sps:$4 sm:$0xff]   ;;  %v24340_v41 = vld [vmem:[#allocation11_spill] sm:$0xff] }
 0x3e5   : > { %v7826_v60 = vpop.f32.mrf.mxu1  ;;  %14924 = vmatprep.subr.bf16.mxu0 %v16370_v39  ;;  %8251 = vmatmul.mubr.bf16.gmra.mxu1 %v24338_v27  ;;  %v24341_v27 = vld [vmem:[#allocation12_spill] sm:$0xff] }
 0x3e6   : > { %v21126_v2 = vadd.f32 %v7826_v60, %v20986_v9  ;;  %8362 = vmatprep.mubr.bf16.mxu1 %v24340_v41  ;;  %14885 = vmatpush3.bf16.msra.mxu1 %v16369_v22  ;;  %v16373_v9 = vld [vmem:[%s24025_s4 + $0x10] ss:$20 sps:$4 sm:$0xff]   ;;  %v16376_v41 = vld [vmem:[%s24025_s4 + $0x768] ss:$20 sps:$4 sm:$0xff]  }
 0x3e7   : > { %14449 = vmatmul.mubr.msk.bf16.gmra.mxu0 %vm7039_vm1, %v24339_v62  ;;  %v7828_v10 = vpop.f32.mrf.mxu1  ;;  %v16375_v60 = vld [vmem:[%s24025_s4 + $0x290] ss:$20 sps:$4 sm:$0xff]   ;;  %14886 = vmatprep.subr.bf16.mxu1 %v16372_v11  ;;  %v16380_v11 = vld [vmem:[%s24025_s4 + $0x740] ss:$20 sps:$4 sm:$0xff]  }
 0x3e8   : > { %v21136_v39 = vadd.f32 %v7828_v10, %v20996_v34  ;;  %14925 = vmatpush3.bf16.msra.mxu0 %v16371_v30  ;;  %8426 = vmatprep.mubr.bf16.mxu0 %v24341_v27  ;;  %v16378_v34 = vld [vmem:[%s24025_s4 + $0x9e8] ss:$20 sps:$4 sm:$0xff]   ;;  %v16382_v27 = vld [vmem:[%s24025_s4 + $0x9c0] ss:$20 sps:$4 sm:$0xff]  }
 0x3e9   : > { %v7830_v3 = vpop.f32.mrf.mxu1  ;;  %14926 = vmatprep.subr.bf16.mxu0 %v16374_v25  ;;  %v16377_v30 = vld [vmem:[%s24025_s4 + $0x628] ss:$20 sps:$4 sm:$0xff]  }
 0x3ea   : > { %14887 = vmatpush3.bf16.msra.mxu1 %v16373_v9  ;;  %v16379_v3 = vld [vmem:[%s24025_s4 + $0x8a8] ss:$20 sps:$4 sm:$0xff]   ;;  %v16381_v9 = vld [vmem:[%s24025_s4 + $0x600] ss:$20 sps:$4 sm:$0xff]  }
 0x3eb   : > { %v7831_v22 = vpop.f32.mrf.mxu1  ;;  %14952 = vmatprep.subr.bf16.mxu1 %v16376_v41 }
 0x3ec   : > { %14927 = vmatpush3.bf16.msra.mxu0 %v16375_v60 }
 0x3ed   : > { %14992 = vmatprep.subr.bf16.mxu0 %v16378_v34  ;;  %8363 = vmatmul.mubr.bf16.vlgmr.msra.gmra.mxu1 %v18637_v24  ;;  %v16383_v24 = vld [vmem:[%s24025_s4 + $0x880] ss:$20 sps:$4 sm:$0xff]   ;;  %v16385_v34 = vld [vmem:[%s24025_s4 + $0x5d8] ss:$20 sps:$4 sm:$0xff]  }
 0x3ee   : > { %8370 = vmatprep.mubr.bf16.mxu1 %v18654_v33  ;;  %14953 = vmatpush3.bf16.msra.mxu1 %v16377_v30  ;;  %v16386_v33 = vld [vmem:[%s24025_s4 + $0x998] ss:$20 sps:$4 sm:$0xff]   ;;  %v16388_v30 = vld [vmem:[%s24025_s4 + $0x6f0] ss:$20 sps:$4 sm:$0xff]  }
 0x3ef   : > { %v7867_v25 = vpop.f32.mrf.mxu0  ;;  %8427 = vmatmul.mubr.bf16.vlgmr.msra.gmra.mxu0 %v18628_v19  ;;  %v16384_v19 = vld [vmem:[%s24025_s4 + $0x718] ss:$20 sps:$4 sm:$0xff]   ;;  %14954 = vmatprep.subr.bf16.mxu1 %v16380_v11 }
 0x3f0   : > { %v21166_v10 = vadd.f32 %v7867_v25, %v21010_v36  ;;  %8434 = vmatprep.mubr.bf16.mxu0 %v18659_v35  ;;  %14993 = vmatpush3.bf16.msra.mxu0 %v16379_v3 }
 0x3f1   : > { %v7869_v60 = vpop.f32.mrf.mxu0  ;;  %14994 = vmatprep.subr.bf16.mxu0 %v16382_v27  ;;  %v16389_v27 = vld [vmem:[%s24025_s4 + $0x5b0] ss:$20 sps:$4 sm:$0xff]  }
 0x3f2   : > { %v21180_v36 = vadd.f32 %v7869_v60, %v21016_v46  ;;  %14955 = vmatpush3.bf16.msra.mxu1 %v16381_v9  ;;  %v16387_v46 = vld [vmem:[%s24025_s4 + $0x858] ss:$20 sps:$4 sm:$0xff]   ;;  %v16393_v60 = vld [vmem:[%s24025_s4 + $0x588] ss:$20 sps:$4 sm:$0xff]  }
 0x3f3   : > { %v7871_v35 = vpop.f32.mrf.mxu0  ;;  %14956 = vmatprep.subr.bf16.mxu1 %v16384_v19  ;;  %v16396_v19 = vld [vmem:[%s24025_s4 + $0x6a0] ss:$20 sps:$4 sm:$0xff]  }
 0x3f4   : > { %v21186_v41 = vadd.f32 %v7871_v35, %v21031_v47  ;;  %14995 = vmatpush3.bf16.msra.mxu0 %v16383_v24  ;;  %v16390_v47 = vld [vmem:[%s24025_s4 + $0x970] ss:$20 sps:$4 sm:$0xff]  }
 0x3f5   : > { %v21191_v22 = vpop.f32.mrf.mxu0  ;;  %14996 = vmatprep.subr.bf16.mxu0 %v16386_v33  ;;  %8371 = vmatmul.mubr.bf16.gmra.mxu1 %v18708_v7  ;;  %v16391_v7 = vld [vmem:[%s24025_s4 + $0x830] ss:$20 sps:$4 sm:$0xff]  }
 0x3f6   : > { %8378 = vmatprep.mubr.bf16.mxu1 %v18729_v14  ;;  %14957 = vmatpush3.bf16.msra.mxu1 %v16385_v34  ;;  %v16394_v14 = vld [vmem:[%s24025_s4 + $0x948] ss:$20 sps:$4 sm:$0xff]   ;;  %v16397_v34 = vld [vmem:[%s24025_s4 + $0x560] ss:$20 sps:$4 sm:$0xff]  }
 0x3f7   : > { %v7877_v3 = vpop.f32.mrf.mxu0  ;;  %8435 = vmatmul.mubr.bf16.gmra.mxu0 %v18704_v5  ;;  %v16392_v5 = vld [vmem:[%s24025_s4 + $0x6c8] ss:$20 sps:$4 sm:$0xff]   ;;  %14958 = vmatprep.subr.bf16.mxu1 %v16388_v30 }
 0x3f8   : > { %v21205_v11 = vadd.f32 %v7877_v3, %v21049_v17  ;;  %8442 = vmatprep.mubr.bf16.mxu0 %v18732_v16  ;;  %14997 = vmatpush3.bf16.msra.mxu0 %v16387_v46 }
 0x3f9   : > { %v7879_v25 = vpop.f32.mrf.mxu0  ;;  %14998 = vmatprep.subr.bf16.mxu0 %v16390_v47  ;;  %v16401_v47 = vld [vmem:[%s24025_s4 + $0x538] ss:$20 sps:$4 sm:$0xff]  }
 0x3fa   : > { %v21219_v17 = vadd.f32 %v7879_v25, %v21056_v28  ;;  %14959 = vmatpush3.bf16.msra.mxu1 %v16389_v27  ;;  %v16395_v28 = vld [vmem:[%s24025_s4 + $0x808] ss:$20 sps:$4 sm:$0xff]   ;;  %v16404_v27 = vld [vmem:[%s24025_s4 + $0x650] ss:$20 sps:$4 sm:$0xff]  }
 0x3fb   : > { %v7881_v16 = vpop.f32.mrf.mxu0  ;;  %14960 = vmatprep.subr.bf16.mxu1 %v16392_v5  ;;  %v16405_v5 = vld [vmem:[%s24025_s4 + $0x510] ss:$20 sps:$4 sm:$0xff]  }
 0x3fc   : > { %v21225_v9 = vadd.f32 %v7881_v16, %v21071_v42  ;;  %14999 = vmatpush3.bf16.msra.mxu0 %v16391_v7  ;;  %v16398_v42 = vld [vmem:[%s24025_s4 + $0x920] ss:$20 sps:$4 sm:$0xff]  }
 0x3fd   : > { %v21230_v24 = vpop.f32.mrf.mxu0  ;;  %15000 = vmatprep.subr.bf16.mxu0 %v16394_v14  ;;  %8379 = vmatmul.mubr.bf16.gmra.mxu1 %v18771_v44  ;;  %v16399_v44 = vld [vmem:[%s24025_s4 + $0x7e0] ss:$20 sps:$4 sm:$0xff]  }
 0x3fe   : > { %8386 = vmatprep.mubr.bf16.mxu1 %v18785_v52  ;;  %14961 = vmatpush3.bf16.msra.mxu1 %v16393_v60  ;;  %v16402_v52 = vld [vmem:[%s24025_s4 + $0x8f8] ss:$20 sps:$4 sm:$0xff]  }
 0x3ff   : > { %v7887_v33 = vpop.f32.mrf.mxu0  ;;  %8443 = vmatmul.mubr.bf16.gmra.mxu0 %v18773_v48  ;;  %v16400_v48 = vld [vmem:[%s24025_s4 + $0x678] ss:$20 sps:$4 sm:$0xff]   ;;  %14962 = vmatprep.subr.bf16.mxu1 %v16396_v19 }
 0x400   : > { %v21244_v35 = vadd.f32 %v7887_v33, %v21089_v23  ;;  %8450 = vmatprep.mubr.bf16.mxu0 %v18791_v55  ;;  %15001 = vmatpush3.bf16.msra.mxu0 %v16395_v28  ;;  %v16409_v28 = vld [vmem:[%s24025_s4 + $0xb28] ss:$20 sps:$4 sm:$0xff]  }
 0x401   : > { %v7889_v46 = vpop.f32.mrf.mxu0  ;;  %15002 = vmatprep.subr.bf16.mxu0 %v16398_v42  ;;  %v16412_v42 = vld [vmem:[%s24025_s4 + $0xc40] ss:$20 sps:$4 sm:$0xff]  }
 0x402   : > { %v21258_v23 = vadd.f32 %v7889_v46, %v21096_v40  ;;  %14963 = vmatpush3.bf16.msra.mxu1 %v16397_v34  ;;  %v16403_v40 = vld [vmem:[%s24025_s4 + $0x7b8] ss:$20 sps:$4 sm:$0xff]   ;;  %v16414_v34 = vld [vmem:[%s24025_s4 + $0xec0] ss:$20 sps:$4 sm:$0xff]  }
 0x403   : > { %v7891_v55 = vpop.f32.mrf.mxu0  ;;  %14964 = vmatprep.subr.bf16.mxu1 %v16400_v48 }
 0x404   : > { %v21264_v30 = vadd.f32 %v7891_v55, %v21111_v1  ;;  %15003 = vmatpush3.bf16.msra.mxu0 %v16399_v44  ;;  %v16406_v1 = vld [vmem:[%s24025_s4 + $0x8d0] ss:$20 sps:$4 sm:$0xff]   ;;  %v16419_v55 = vld [vmem:[%s24025_s4 + $0xd58] ss:$20 sps:$4 sm:$0xff]  }
 0x405   : > { %v21269_v3 = vpop.f32.mrf.mxu0  ;;  %15004 = vmatprep.subr.bf16.mxu0 %v16402_v52  ;;  %8387 = vmatmul.mubr.bf16.gmra.mxu1 %v18819_v49  ;;  %v16407_v49 = vld [vmem:[%s24025_s4 + $0x790] ss:$20 sps:$4 sm:$0xff]  }
 0x406   : > { %14965 = vmatpush3.bf16.msra.mxu1 %v16401_v47  ;;  %8490 = vmatprep.mubr.bf16.mxu1 %v18896_v20  ;;  %v16410_v20 = vld [vmem:[%s24025_s4 + $0xee8] ss:$20 sps:$4 sm:$0xff]   ;;  %v16420_v47 = vld [vmem:[%s24025_s4 + $0xbf0] ss:$20 sps:$4 sm:$0xff]  }
 0x407   : > { %v7897_v25 = vpop.f32.mrf.mxu0  ;;  %8451 = vmatmul.mubr.bf16.gmra.mxu0 %v18821_v15  ;;  %v16408_v15 = vld [vmem:[%s24025_s4 + $0xc68] ss:$20 sps:$4 sm:$0xff]   ;;  %14966 = vmatprep.subr.bf16.mxu1 %v16404_v27  ;;  %v16422_v27 = vld [vmem:[%s24025_s4 + $0xe70] ss:$20 sps:$4 sm:$0xff]  }
 0x408   : > { %v21283_v7 = vadd.f32 %v7897_v25, %v21126_v2  ;;  %15005 = vmatpush3.bf16.msra.mxu0 %v16403_v40  ;;  %8554 = vmatprep.mubr.bf16.mxu0 %v18910_v32 }
 0x409   : > { %v7899_v14 = vpop.f32.mrf.mxu0  ;;  %15006 = vmatprep.subr.bf16.mxu0 %v16406_v1 }
 0x40a   : > { %v21297_v2 = vadd.f32 %v7899_v14, %v21136_v39  ;;  %14967 = vmatpush3.bf16.msra.mxu1 %v16405_v5  ;;  %v16411_v39 = vld [vmem:[%s24025_s4 + $0xda8] ss:$20 sps:$4 sm:$0xff]  }
 0x40b   : > { %v7901_v16 = vpop.f32.mrf.mxu0  ;;  %15032 = vmatprep.subr.bf16.mxu1 %v16408_v15  ;;  %v16428_v15 = vld [vmem:[%s24025_s4 + $0xba0] ss:$20 sps:$4 sm:$0xff]  }
 0x40c   : > { %15007 = vmatpush3.bf16.msra.mxu0 %v16407_v49  ;;  %v16427_v49 = vld [vmem:[%s24025_s4 + $0xd08] ss:$20 sps:$4 sm:$0xff]   ;;  %v16430_v16 = vld [vmem:[%s24025_s4 + $0xe20] ss:$20 sps:$4 sm:$0xff]  }
 0x40d   : > { %v7902_v32 = vpop.f32.mrf.mxu0  ;;  %v7938_v60 = vpop.f32.mrf.mxu1  ;;  %15072 = vmatprep.subr.bf16.mxu0 %v16410_v20  ;;  %8491 = vmatmul.mubr.bf16.vlgmr.msra.gmra.mxu1 %v19049_v57  ;;  %v16413_v57 = vld [vmem:[%s24025_s4 + $0xb00] ss:$20 sps:$4 sm:$0xff]  }
 0x40e   : > { %v21306_v19 = vadd.f32 %v7938_v60, %v21166_v10  ;;  %8498 = vmatprep.mubr.bf16.mxu1 %v19051_v53  ;;  %15033 = vmatpush3.bf16.msra.mxu1 %v16409_v28  ;;  %v16416_v53 = vld [vmem:[%s24025_s4 + $0xc18] ss:$20 sps:$4 sm:$0xff]  }
 0x40f   : > { %v7940_v33 = vpop.f32.mrf.mxu1  ;;  %8555 = vmatmul.mubr.bf16.vlgmr.msra.gmra.mxu0 %v19032_v26  ;;  %15034 = vmatprep.subr.bf16.mxu1 %v16412_v42  ;;  %v16415_v26 = vld [vmem:[%s24025_s4 + $0xd80] ss:$20 sps:$4 sm:$0xff]   ;;  %v16435_v42 = vld [vmem:[%s24025_s4 + $0xcb8] ss:$20 sps:$4 sm:$0xff]  }
 0x410   : > { %v21321_v10 = vadd.f32 %v7940_v33, %v21180_v36  ;;  %8562 = vmatprep.mubr.bf16.mxu0 %v19054_v56  ;;  %15073 = vmatpush3.bf16.msra.mxu0 %v16411_v39  ;;  %v16418_v36 = vld [vmem:[%s24025_s4 + $0xe98] ss:$20 sps:$4 sm:$0xff]   ;;  %v16436_v33 = vld [vmem:[%s24025_s4 + $0xb50] ss:$20 sps:$4 sm:$0xff]  }
 0x411   : > { %v7942_v46 = vpop.f32.mrf.mxu1  ;;  %15074 = vmatprep.subr.bf16.mxu0 %v16414_v34 }
 0x412   : > { %v21328_v44 = vadd.f32 %v7942_v46, %v21186_v41  ;;  %15035 = vmatpush3.bf16.msra.mxu1 %v16413_v57  ;;  %v16417_v41 = vld [vmem:[%s24025_s4 + $0xad8] ss:$20 sps:$4 sm:$0xff]   ;;  %v16438_v46 = vld [vmem:[%s24025_s4 + $0xdd0] ss:$20 sps:$4 sm:$0xff]  }
 0x413   : > { %v21336_v56 = vpop.f32.mrf.mxu1  ;;  %15036 = vmatprep.subr.bf16.mxu1 %v16416_v53  ;;  %v24342_v57 = vld [vmem:[#allocation15_spill] sm:$0xff]  ;;  %v16439_v53 = vld [vmem:[%s24025_s4 + $0xc90] ss:$20 sps:$4 sm:$0xff]  }
 0x414   : > { %15075 = vmatpush3.bf16.msra.mxu0 %v16415_v26 }
 0x415   : > { %v7948_v48 = vpop.f32.mrf.mxu1  ;;  %8499 = vmatmul.mubr.bf16.gmra.mxu1 %v19117_v61  ;;  %15076 = vmatprep.subr.bf16.mxu0 %v16418_v36  ;;  %v16421_v61 = vld [vmem:[%s24025_s4 + $0xab0] ss:$20 sps:$4 sm:$0xff]   ;;  %v16441_v36 = vld [vmem:[%s24025_s4 + $0x1028] ss:$20 sps:$4 sm:$0xff]  }
 0x416   : > { %v21345_v52 = vadd.f32 %v7948_v48, %v21205_v11  ;;  %8506 = vmatprep.mubr.bf16.mxu1 %v19124_v45  ;;  %15037 = vmatpush3.bf16.msra.mxu1 %v16417_v41  ;;  %v16423_v45 = vld [vmem:[%s24025_s4 + $0xd30] ss:$20 sps:$4 sm:$0xff]   ;;  %v16443_v41 = vld [vmem:[%s24025_s4 + $0x12a8] ss:$20 sps:$4 sm:$0xff]  }
 0x417   : > { %v7950_v40 = vpop.f32.mrf.mxu1  ;;  %8563 = vmatmul.mubr.bf16.gmra.mxu0 %v19097_v37  ;;  %15038 = vmatprep.subr.bf16.mxu1 %v16420_v47  ;;  %v16424_v37 = vld [vmem:[%s24025_s4 + $0xbc8] ss:$20 sps:$4 sm:$0xff]   ;;  %v24343_v47 = vld [vmem:[#allocation18_spill] sm:$0xff] }
 0x418   : > { %v21360_v11 = vadd.f32 %v7950_v40, %v21219_v17  ;;  %8570 = vmatprep.mubr.bf16.mxu0 %v19138_v13  ;;  %15077 = vmatpush3.bf16.msra.mxu0 %v16419_v55  ;;  %v16426_v17 = vld [vmem:[%s24025_s4 + $0xe48] ss:$20 sps:$4 sm:$0xff]   ;;  %v16444_v55 = vld [vmem:[%s24025_s4 + $0x1140] ss:$20 sps:$4 sm:$0xff]  }
 0x419   : > { %v7952_v1 = vpop.f32.mrf.mxu1  ;;  %15078 = vmatprep.subr.bf16.mxu0 %v16422_v27  ;;  %v16446_v27 = vld [vmem:[%s24025_s4 + $0x13c0] ss:$20 sps:$4 sm:$0xff]  }
 0x41a   : > { %v21367_v25 = vadd.f32 %v7952_v1, %v21225_v9  ;;  %15039 = vmatpush3.bf16.msra.mxu1 %v16421_v61  ;;  %v16425_v9 = vld [vmem:[%s24025_s4 + $0xa88] ss:$20 sps:$4 sm:$0xff]  }
 0x41b   : > { %v21375_v13 = vpop.f32.mrf.mxu1  ;;  %15040 = vmatprep.subr.bf16.mxu1 %v16424_v37  ;;  %v24344_v1 = vld [vmem:[#allocation19_spill] sm:$0xff] }
 0x41c   : > { %15079 = vmatpush3.bf16.msra.mxu0 %v16423_v45 }
 0x41d   : > { %v7958_v5 = vpop.f32.mrf.mxu1  ;;  %8507 = vmatmul.mubr.bf16.gmra.mxu1 %v19186_v8  ;;  %15080 = vmatprep.subr.bf16.mxu0 %v16426_v17  ;;  %v16429_v8 = vld [vmem:[%s24025_s4 + $0xa60] ss:$20 sps:$4 sm:$0xff]  }
 0x41e   : > { %v21384_v14 = vadd.f32 %v7958_v5, %v21244_v35  ;;  %8514 = vmatprep.mubr.bf16.mxu1 %v19197_v54  ;;  %15041 = vmatpush3.bf16.msra.mxu1 %v16425_v9  ;;  %v16431_v54 = vld [vmem:[%s24025_s4 + $0xce0] ss:$20 sps:$4 sm:$0xff]   ;;  %v16449_v9 = vld [vmem:[%s24025_s4 + $0xfd8] ss:$20 sps:$4 sm:$0xff]  }
 0x41f   : > { %v7960_v20 = vpop.f32.mrf.mxu1  ;;  %8571 = vmatmul.mubr.bf16.gmra.mxu0 %v19169_v50  ;;  %15042 = vmatprep.subr.bf16.mxu1 %v16428_v15  ;;  %v16432_v50 = vld [vmem:[%s24025_s4 + $0xb78] ss:$20 sps:$4 sm:$0xff]   ;;  %v16447_v17 = vld [vmem:[%s24025_s4 + $0x1280] ss:$20 sps:$4 sm:$0xff]   ;;  %v16452_v15 = vld [vmem:[%s24025_s4 + $0x10f0] ss:$20 sps:$4 sm:$0xff]  }
 0x420   : > { %v21399_v35 = vadd.f32 %v7960_v20, %v21258_v23  ;;  %8578 = vmatprep.mubr.bf16.mxu0 %v19200_v63  ;;  %15081 = vmatpush3.bf16.msra.mxu0 %v16427_v49  ;;  %v16434_v23 = vld [vmem:[%s24025_s4 + $0xdf8] ss:$20 sps:$4 sm:$0xff]   ;;  %v24345_v20 = vld [vmem:[#allocation22_spill] sm:$0xff] }
 0x421   : > { %v7962_v32 = vpop.f32.mrf.mxu1  ;;  %15082 = vmatprep.subr.bf16.mxu0 %v16430_v16 }
 0x422   : > { %v21406_v60 = vadd.f32 %v7962_v32, %v21264_v30  ;;  %15043 = vmatpush3.bf16.msra.mxu1 %v16429_v8  ;;  %v16433_v30 = vld [vmem:[%s24025_s4 + $0xa38] ss:$20 sps:$4 sm:$0xff]   ;;  %v16454_v32 = vld [vmem:[%s24025_s4 + $0x1370] ss:$20 sps:$4 sm:$0xff]  }
 0x423   : > { %v21414_v63 = vpop.f32.mrf.mxu1  ;;  %15044 = vmatprep.subr.bf16.mxu1 %v16432_v50  ;;  %v24346_v8 = vld [vmem:[#allocation23_spill] sm:$0xff] }
 0x424   : > { %15083 = vmatpush3.bf16.msra.mxu0 %v16431_v54 }
 0x425   : > { %v7968_v28 = vpop.f32.mrf.mxu1  ;;  %8515 = vmatmul.mubr.bf16.gmra.mxu1 %v19236_v38  ;;  %15084 = vmatprep.subr.bf16.mxu0 %v16434_v23  ;;  %v16437_v38 = vld [vmem:[%s24025_s4 + $0xa10] ss:$20 sps:$4 sm:$0xff]  }
 0x426   : > { %v21423_v39 = vadd.f32 %v7968_v28, %v21283_v7  ;;  %8618 = vmatprep.mubr.bf16.mxu1 %v19234_v43  ;;  %15045 = vmatpush3.bf16.msra.mxu1 %v16433_v30  ;;  %v16440_v43 = vld [vmem:[%s24025_s4 + $0x1168] ss:$20 sps:$4 sm:$0xff]   ;;  %v16455_v28 = vld [vmem:[%s24025_s4 + $0x1230] ss:$20 sps:$4 sm:$0xff]  }
 0x427   : > { %v7970_v34 = vpop.f32.mrf.mxu1  ;;  %8579 = vmatmul.mubr.bf16.gmra.mxu0 %v24285_v18  ;;  %15046 = vmatprep.subr.bf16.mxu1 %v16436_v33 }
 0x428   : > { %v21438_v7 = vadd.f32 %v7970_v34, %v21297_v2  ;;  %8682 = vmatprep.mubr.bf16.mxu0 %v24342_v57  ;;  %15085 = vmatpush3.bf16.msra.mxu0 %v16435_v42  ;;  %v16442_v2 = vld [vmem:[%s24025_s4 + $0x13e8] ss:$20 sps:$4 sm:$0xff]   ;;  %v16460_v34 = vld [vmem:[%s24025_s4 + $0x10a0] ss:$20 sps:$4 sm:$0xff]  }
 0x429   : > { %v7972_v26 = vpop.f32.mrf.mxu1  ;;  %15086 = vmatprep.subr.bf16.mxu0 %v16438_v46  ;;  %v16457_v42 = vld [vmem:[%s24025_s4 + $0xf88] ss:$20 sps:$4 sm:$0xff]  }
 0x42a   : > { %15047 = vmatpush3.bf16.msra.mxu1 %v16437_v38  ;;  %v24347_v46 = vld [vmem:[#allocation25_spill] sm:$0xff]  ;;  %v16462_v26 = vld [vmem:[%s24025_s4 + $0x1320] ss:$20 sps:$4 sm:$0xff]   ;;  %v24348_v38 = vld [vmem:[#allocation27_spill] sm:$0xff] }
 0x42b   : > { %v7973_v18 = vpop.f32.mrf.mxu1  ;;  %15112 = vmatprep.subr.bf16.mxu1 %v16440_v43 }
 0x42c   : > { %15087 = vmatpush3.bf16.msra.mxu0 %v16439_v53 }
 0x42d   : > { %15152 = vmatprep.subr.bf16.mxu0 %v16442_v2  ;;  %8619 = vmatmul.mubr.bf16.vlgmr.msra.gmra.mxu1 %v24343_v47  ;;  %v16463_v2 = vld [vmem:[%s24025_s4 + $0x11e0] ss:$20 sps:$4 sm:$0xff]  }
 0x42e   : > { %8626 = vmatprep.mubr.bf16.mxu1 %v24344_v1  ;;  %15113 = vmatpush3.bf16.msra.mxu1 %v16441_v36  ;;  %v24349_v47 = vld [vmem:[#allocation30_spill] sm:$0xff] }
 0x42f   : > { %v8009_v48 = vpop.f32.mrf.mxu0  ;;  %8683 = vmatmul.mubr.bf16.vlgmr.msra.gmra.mxu0 %v24301_v31  ;;  %15114 = vmatprep.subr.bf16.mxu1 %v16444_v55  ;;  %v16448_v31 = vld [vmem:[%s24025_s4 + $0x1118] ss:$20 sps:$4 sm:$0xff]   ;;  %v16468_v55 = vld [vmem:[%s24025_s4 + $0x1050] ss:$20 sps:$4 sm:$0xff]  }
 0x430   : > { %v21464_v40 = vadd.f32 %v8009_v48, %v21306_v19  ;;  %8690 = vmatprep.mubr.bf16.mxu0 %v24303_v21  ;;  %v16445_v19 = vld [vmem:[%s24025_s4 + $0x1000] ss:$20 sps:$4 sm:$0xff]   ;;  %15153 = vmatpush3.bf16.msra.mxu0 %v16443_v41  ;;  %v16465_v48 = vld [vmem:[%s24025_s4 + $0xf38] ss:$20 sps:$4 sm:$0xff]   ;;  %v16470_v1 = vld [vmem:[%s24025_s4 + $0x12d0] ss:$20 sps:$4 sm:$0xff]  }
 0x431   : > { %v8011_v61 = vpop.f32.mrf.mxu0  ;;  %15154 = vmatprep.subr.bf16.mxu0 %v16446_v27 }
 0x432   : > { %v21473_v45 = vadd.f32 %v8011_v61, %v21321_v10  ;;  %v16450_v10 = vld [vmem:[%s24025_s4 + $0x1398] ss:$20 sps:$4 sm:$0xff]   ;;  %15115 = vmatpush3.bf16.msra.mxu1 %v16445_v19 }
 0x433   : > { %v8013_v37 = vpop.f32.mrf.mxu0  ;;  %15116 = vmatprep.subr.bf16.mxu1 %v16448_v31 }
 0x434   : > { %v21485_v21 = vadd.f32 %v8013_v37, %v21328_v44  ;;  %15155 = vmatpush3.bf16.msra.mxu0 %v16447_v17  ;;  %v16451_v44 = vld [vmem:[%s24025_s4 + $0x1258] ss:$20 sps:$4 sm:$0xff]   ;;  %v16469_v37 = vld [vmem:[%s24025_s4 + $0xf10] ss:$20 sps:$4 sm:$0xff]  }
 0x435   : > { %v21490_v5 = vpop.f32.mrf.mxu0  ;;  %8627 = vmatmul.mubr.bf16.gmra.mxu1 %v24345_v20  ;;  %15156 = vmatprep.subr.bf16.mxu0 %v16450_v10  ;;  %v16471_v17 = vld [vmem:[%s24025_s4 + $0x1190] ss:$20 sps:$4 sm:$0xff]  }
 0x436   : > { %8634 = vmatprep.mubr.bf16.mxu1 %v24346_v8  ;;  %15117 = vmatpush3.bf16.msra.mxu1 %v16449_v9  ;;  %v24350_v9 = vld [vmem:[#allocation33_spill] sm:$0xff] }
 0x437   : > { %v8019_v49 = vpop.f32.mrf.mxu0  ;;  %8691 = vmatmul.mubr.bf16.gmra.mxu0 %v24307_v59  ;;  %15118 = vmatprep.subr.bf16.mxu1 %v16452_v15  ;;  %v16456_v59 = vld [vmem:[%s24025_s4 + $0x10c8] ss:$20 sps:$4 sm:$0xff]   ;;  %v24352_v15 = vld [vmem:[#allocation34_spill] sm:$0xff] }
 0x438   : > { %v21503_v16 = vadd.f32 %v8019_v49, %v21345_v52  ;;  %8698 = vmatprep.mubr.bf16.mxu0 %v24309_v4  ;;  %v16453_v52 = vld [vmem:[%s24025_s4 + $0xfb0] ss:$20 sps:$4 sm:$0xff]   ;;  %15157 = vmatpush3.bf16.msra.mxu0 %v16451_v44  ;;  %v24351_v44 = vld [vmem:[#allocation35_spill] sm:$0xff] }
 0x439   : > { %v8021_v54 = vpop.f32.mrf.mxu0  ;;  %15158 = vmatprep.subr.bf16.mxu0 %v16454_v32  ;;  %v24353_v32 = vld [vmem:[#allocation36_spill] sm:$0xff] }
 0x43a   : > { %v21512_v50 = vadd.f32 %v8021_v54, %v21360_v11  ;;  %v16458_v11 = vld [vmem:[%s24025_s4 + $0x1348] ss:$20 sps:$4 sm:$0xff]   ;;  %15119 = vmatpush3.bf16.msra.mxu1 %v16453_v52 }
 0x43b   : > { %v8023_v23 = vpop.f32.mrf.mxu0  ;;  %15120 = vmatprep.subr.bf16.mxu1 %v16456_v59  ;;  %v24355_v59 = vld [vmem:[#allocation41_spill] sm:$0xff] }
 0x43c   : > { %v21524_v4 = vadd.f32 %v8023_v23, %v21367_v25  ;;  %15159 = vmatpush3.bf16.msra.mxu0 %v16455_v28  ;;  %v16459_v25 = vld [vmem:[%s24025_s4 + $0x1208] ss:$20 sps:$4 sm:$0xff]  }
 0x43d   : > { %v21529_v30 = vpop.f32.mrf.mxu0  ;;  %8635 = vmatmul.mubr.bf16.gmra.mxu1 %v24347_v46  ;;  %15160 = vmatprep.subr.bf16.mxu0 %v16458_v11  ;;  %v24354_v23 = vld [vmem:[#allocation39_spill] sm:$0xff]  ;;  %v24356_v11 = vld [vmem:[#allocation40_spill] sm:$0xff] }
 0x43e   : > { %8642 = vmatprep.mubr.bf16.mxu1 %v24348_v38  ;;  %15121 = vmatpush3.bf16.msra.mxu1 %v16457_v42  ;;  %v24357_v42 = vld [vmem:[#allocation42_spill] sm:$0xff]  ;;  %v24359_v38 = vld [vmem:[#allocation47_spill] sm:$0xff] }
 0x43f   : > { %v8029_v33 = vpop.f32.mrf.mxu0  ;;  %8699 = vmatmul.mubr.bf16.gmra.mxu0 %v24313_v29  ;;  %15122 = vmatprep.subr.bf16.mxu1 %v16460_v34  ;;  %v16464_v29 = vld [vmem:[%s24025_s4 + $0x1078] ss:$20 sps:$4 sm:$0xff]  }
 0x440   : > { %v21542_v57 = vadd.f32 %v8029_v33, %v21384_v14  ;;  %8706 = vmatprep.mubr.bf16.mxu0 %v24315_v58  ;;  %v16461_v14 = vld [vmem:[%s24025_s4 + $0xf60] ss:$20 sps:$4 sm:$0xff]   ;;  %15161 = vmatpush3.bf16.msra.mxu0 %v16459_v25 }
 0x441   : > { %v8031_v53 = vpop.f32.mrf.mxu0  ;;  %15162 = vmatprep.subr.bf16.mxu0 %v16462_v26 }
 0x442   : > { %v21551_v43 = vadd.f32 %v8031_v53, %v21399_v35  ;;  %v16466_v35 = vld [vmem:[%s24025_s4 + $0x12f8] ss:$20 sps:$4 sm:$0xff]   ;;  %15123 = vmatpush3.bf16.msra.mxu1 %v16461_v14 }
 0x443   : > { %v8033_v18 = vpop.f32.mrf.mxu0  ;;  %15124 = vmatprep.subr.bf16.mxu1 %v16464_v29 }
 0x444   : > { %v21563_v58 = vadd.f32 %v8033_v18, %v21406_v60  ;;  %15163 = vmatpush3.bf16.msra.mxu0 %v16463_v2  ;;  %v16467_v60 = vld [vmem:[%s24025_s4 + $0x11b8] ss:$20 sps:$4 sm:$0xff]  }
 0x445   : > { %v21568_v36 = vpop.f32.mrf.mxu0  ;;  %8643 = vmatmul.mubr.bf16.gmra.mxu1 %v24349_v47  ;;  %15164 = vmatprep.subr.bf16.mxu0 %v16466_v35  ;;  %v24361_v35 = vld [vmem:[#allocation51_spill] sm:$0xff] }
 0x446   : > { %8746 = vmatprep.mubr.bf16.mxu1 %v24300_v6  ;;  %15125 = vmatpush3.bf16.msra.mxu1 %v16465_v48  ;;  %v16472_v6 = vld [vmem:[%s24025_s4 + $0x1410] ss:$20 sps:$4 sm:$0xff]  }
 0x447   : > { %v8039_v41 = vpop.f32.mrf.mxu0  ;;  %8707 = vmatmul.mubr.bf16.gmra.mxu0 %v24319_v51  ;;  %15126 = vmatprep.subr.bf16.mxu1 %v16468_v55  ;;  %v24362_v48 = vld [vmem:[#allocation52_spill] sm:$0xff] }
 0x448   : > { %v8040_v27 = vadd.f32 %v8039_v41, %v21423_v39  ;;  %8810 = vmatprep.mubr.bf16.mxu0 %v24321_v12  ;;  %15165 = vmatpush3.bf16.msra.mxu0 %v16467_v60  ;;  %v24363_v41 = vld [vmem:[#allocation53_spill] sm:$0xff] }
 0x449   : > { %v8041_v61 = vpop.f32.mrf.mxu0  ;;  %15166 = vmatprep.subr.bf16.mxu0 %v16470_v1  ;;  %v24365_v1 = vld [vmem:[#allocation55_spill] sm:$0xff] }
 0x44a   : > { %v8042_v19 = vadd.f32 %v8041_v61, %v21438_v7  ;;  %15127 = vmatpush3.bf16.msra.mxu1 %v16469_v37 }
 0x44b   : > { %v8043_v39 = vpop.f32.mrf.mxu0  ;;  %15305 = vmatprep.subr.bf16.mxu1 %v16472_v6 }
 0x44c   : > { %15167 = vmatpush3.bf16.msra.mxu0 %v16471_v17 }
 0x44d   : > { %v8044_v51 = vpop.f32.mrf.mxu0  ;;  %v8080_v12 = vpop.f32.mrf.mxu1  ;;  %8747 = vmatmul.mubr.bf16.vlgmr.msra.gmra.mxu1 %v24350_v9 }
 0x44e   : > { %v8081_v7 = vadd.f32 %v8080_v12, %v21464_v40  ;;  %8754 = vmatprep.mubr.bf16.mxu1 %v24351_v44  ;;  %15306 = vmatpush3.bf16.msra.mxu1 %v16472_v6 }
 0x44f   : > { %v8082_v31 = vpop.f32.mrf.mxu1  ;;  %8811 = vmatmul.mubr.bf16.vlgmr.msra.gmra.mxu0 %v24352_v15 }
 0x450   : > { %v8083_v10 = vadd.f32 %v8082_v31, %v21473_v45  ;;  %8818 = vmatprep.mubr.bf16.mxu0 %v24353_v32 }
 0x451   : > { %v8084_v49 = vpop.f32.mrf.mxu1 }
 0x452   : > { %v8085_v20 = vadd.f32 %v8084_v49, %v21485_v21 }
 0x453   : > { %v21604_v8 = vpop.f32.mrf.mxu1 }
 0x455   : > { %v8090_v40 = vpop.f32.mrf.mxu1  ;;  %8755 = vmatmul.mubr.bf16.gmra.mxu1 %v24354_v23 }
 0x456   : > { %v8091_v54 = vadd.f32 %v8090_v40, %v21503_v16  ;;  %8762 = vmatprep.mubr.bf16.mxu1 %v24355_v59 }
 0x457   : > { %v8092_v52 = vpop.f32.mrf.mxu1  ;;  %8819 = vmatmul.mubr.bf16.gmra.mxu0 %v24356_v11 }
 0x458   : > { %v8093_v45 = vadd.f32 %v8092_v52, %v21512_v50  ;;  %8826 = vmatprep.mubr.bf16.mxu0 %v24357_v42  ;;  %v24358_v50 = vld [vmem:[#allocation45_spill] sm:$0xff] }
 0x459   : > { %v8094_v28 = vpop.f32.mrf.mxu1 }
 0x45a   : > { %v8095_v21 = vadd.f32 %v8094_v28, %v21524_v4  ;;  %v24360_v4 = vld [vmem:[#allocation48_spill] sm:$0xff] }
 0x45b   : > { %v21613_v33 = vpop.f32.mrf.mxu1 }
 0x45d   : > { %v8100_v25 = vpop.f32.mrf.mxu1  ;;  %8763 = vmatmul.mubr.bf16.gmra.mxu1 %v24358_v50 }
 0x45e   : > { %v8101_v34 = vadd.f32 %v8100_v25, %v21542_v57  ;;  %8770 = vmatprep.mubr.bf16.mxu1 %v24359_v38 }
 0x45f   : > { %v8102_v16 = vpop.f32.mrf.mxu1  ;;  %8827 = vmatmul.mubr.bf16.gmra.mxu0 %v24334_v0 }
 0x460   : > { %v8103_v46 = vadd.f32 %v8102_v16, %v21551_v43  ;;  %8834 = vmatprep.mubr.bf16.mxu0 %v24360_v4 }
 0x461   : > { %v8104_v26 = vpop.f32.mrf.mxu1 }
 0x462   : > { %v8105_v53 = vadd.f32 %v8104_v26, %v21563_v58  ;;  %v24364_v58 = vld [vmem:[#allocation54_spill] sm:$0xff] }
 0x463   : > { %v21622_v14 = vpop.f32.mrf.mxu1 }
 0x465   : > { %v8110_v18 = vpop.f32.mrf.mxu1  ;;  %8771 = vmatmul.mubr.bf16.gmra.mxu1 %v24361_v35 }
 0x466   : > { %v8111_v2 = vadd.f32 %v8110_v18, %v8040_v27  ;;  %15307 = vmatprep.mubr.msk.bf16.mxu1 %vm7039_vm1, %v24363_v41 }
 0x467   : > { %v8112_v29 = vpop.f32.mrf.mxu1  ;;  %8835 = vmatmul.mubr.bf16.gmra.mxu0 %v24362_v48 }
 0x468   : > { %v8113_v57 = vadd.f32 %v8112_v29, %v8042_v19 }
 0x469   : > { %v8114_v43 = vpop.f32.mrf.mxu1 }
 0x46b   : > { %v8115_v60 = vpop.f32.mrf.mxu1 }
 0x46d   : > { %15308 = vmatmul.mubr.msk.bf16.vlgmr.msra.gmra.mxu1 %vm7039_vm1, %v24364_v58 }
 0x46e   : > { %15311 = vmatprep.mubr.msk.bf16.mxu1 %vm7039_vm1, %v24365_v1 }
 0x46f   : > { %v8151_v0 = vpop.f32.mrf.mxu0 }
 0x470   : > { %v8152_v55 = vadd.f32 %v8151_v0, %v8081_v7 }
 0x471   : > { %v8153_v47 = vpop.f32.mrf.mxu0 }
 0x472   : > { %v8154_v27 = vadd.f32 %v8153_v47, %v8083_v10 }
 0x473   : > { %v8155_v61 = vpop.f32.mrf.mxu0 }
 0x474   : > { %v8156_v19 = vadd.f32 %v8155_v61, %v8085_v20 }
 0x475   : > { %v21632_v37 = vpop.f32.mrf.mxu0  ;;  %15312 = vmatmul.mubr.msk.bf16.gmra.mxu1 %vm7039_vm1, %v24339_v62 }
 0x477   : > { %v8161_v39 = vpop.f32.mrf.mxu0 }
 0x478   : > { %v8162_v17 = vadd.f32 %v8161_v39, %v8091_v54 }
 0x479   : > { %v8163_v6 = vpop.f32.mrf.mxu0 }
 0x47a   : > { %v8164_v51 = vadd.f32 %v8163_v6, %v8093_v45 }
 0x47b   : > { %v8165_v12 = vpop.f32.mrf.mxu0 }
 0x47c   : > { %v8166_v7 = vadd.f32 %v8165_v12, %v8095_v21 }
 0x47d   : > { %v21636_v31 = vpop.f32.mrf.mxu0 }
 0x47f   : > { %v8171_v9 = vpop.f32.mrf.mxu0 }
 0x480   : > { %v8172_v49 = vadd.f32 %v8171_v9, %v8101_v34 }
 0x481   : > { %v8173_v44 = vpop.f32.mrf.mxu0 }
 0x482   : > { %v8174_v15 = vadd.f32 %v8173_v44, %v8103_v46 }
 0x483   : > { %v8175_v10 = vpop.f32.mrf.mxu0 }
 0x484   : > { %v8176_v32 = vadd.f32 %v8175_v10, %v8105_v53 }
 0x485   : > { %v21638_v20 = vpop.f32.mrf.mxu0 }
 0x487   : > { %v8181_v40 = vpop.f32.mrf.mxu0 }
 0x488   : > { %v8182_v52 = vadd.f32 %v8181_v40, %v8111_v2 }
 0x489   : > { %v8183_v54 = vpop.f32.mrf.mxu0 }
 0x48a   : > { %v8184_v23 = vadd.f32 %v8183_v54, %v8113_v57 }
 0x48b   : > { %v8185_v28 = vpop.f32.mrf.mxu0 }
 0x48d   : > { %v8186_v62 = vpop.f32.mrf.mxu0  ;;  %v8222_v59 = vpop.f32.mrf.mxu1 }
 0x48e   : > { %v8223_v45 = vadd.f32 %v8222_v59, %v8152_v55 }
 0x48f   : > { %v8293_v11 = vpop.f32.mrf.mxu0  ;;  %v8224_v21 = vpop.f32.mrf.mxu1 }
 0x490   : > { %v21640_v42 = vadd.f32 %v8293_v11, %v8223_v45  ;;  %v8225_v25 = vadd.f32 %v8224_v21, %v8154_v27 }
 0x491   : > { %v8295_v34 = vpop.f32.mrf.mxu0  ;;  %v8226_v16 = vpop.f32.mrf.mxu1 }
 0x492   : > { %24366 = vst [vmem:[#allocation56_spill] sm:$0xff] %v21640_v42  ;;  %v21642_v46 = vadd.f32 %v8295_v34, %v8225_v25  ;;  %v8227_v50 = vadd.f32 %v8226_v16, %v8156_v19 }
 0x493   : > { %v8297_v26 = vpop.f32.mrf.mxu0  ;;  %v21644_v38 = vpop.f32.mrf.mxu1 }
 0x494   : > { %24367 = vst [vmem:[#allocation11_spill] sm:$0xff] %v21642_v46  ;;  %v21646_v53 = vadd.f32 %v8297_v26, %v8227_v50 }
 0x495   : > { %v21648_v4 = vpop.f32.mrf.mxu0  ;;  %v8232_v18 = vpop.f32.mrf.mxu1 }
 0x496   : > { %24368 = vst [vmem:[#allocation12_spill] sm:$0xff] %v21646_v53  ;;  %v8233_v2 = vadd.f32 %v8232_v18, %v8162_v17 }
 0x497   : > { %v8303_v29 = vpop.f32.mrf.mxu0  ;;  %v8234_v57 = vpop.f32.mrf.mxu1 }
 0x498   : > { %v21650_v35 = vadd.f32 %v8303_v29, %v8233_v2  ;;  %v8235_v48 = vadd.f32 %v8234_v57, %v8164_v51 }
 0x499   : > { %v8305_v43 = vpop.f32.mrf.mxu0  ;;  %v8236_v41 = vpop.f32.mrf.mxu1 }
 0x49a   : > { %24369 = vst [vmem:[#allocation15_spill] sm:$0xff] %v21650_v35  ;;  %v8237_v60 = vadd.f32 %v8236_v41, %v8166_v7  ;;  %v21652_v55 = vadd.f32 %v8305_v43, %v8235_v48 }
 0x49b   : > { %v8307_v0 = vpop.f32.mrf.mxu0  ;;  %v21654_v58 = vpop.f32.mrf.mxu1 }
 0x49c   : > { %24370 = vst [vmem:[#allocation18_spill] sm:$0xff] %v21652_v55  ;;  %v21656_v47 = vadd.f32 %v8307_v0, %v8237_v60 }
 0x49d   : > { %v21658_v1 = vpop.f32.mrf.mxu0  ;;  %v8242_v27 = vpop.f32.mrf.mxu1 }
 0x49e   : > { %24371 = vst [vmem:[#allocation19_spill] sm:$0xff] %v21656_v47  ;;  %v8243_v61 = vadd.f32 %v8242_v27, %v8172_v49 }
 0x49f   : > { %v8313_v19 = vpop.f32.mrf.mxu0  ;;  %v8244_v39 = vpop.f32.mrf.mxu1 }
 0x4a0   : > { %v21660_v17 = vadd.f32 %v8313_v19, %v8243_v61  ;;  %v8245_v12 = vadd.f32 %v8244_v39, %v8174_v15 }
 0x4a1   : > { %v8315_v6 = vpop.f32.mrf.mxu0  ;;  %v8246_v51 = vpop.f32.mrf.mxu1 }
 0x4a2   : > { %24372 = vst [vmem:[#allocation22_spill] sm:$0xff] %v21660_v17  ;;  %v8247_v9 = vadd.f32 %v8246_v51, %v8176_v32  ;;  %v21662_v44 = vadd.f32 %v8315_v6, %v8245_v12 }
 0x4a3   : > { %v8317_v7 = vpop.f32.mrf.mxu0  ;;  %v21664_v10 = vpop.f32.mrf.mxu1 }
 0x4a4   : > { %24373 = vst [vmem:[#allocation23_spill] sm:$0xff] %v21662_v44  ;;  %v21666_v40 = vadd.f32 %v8317_v7, %v8247_v9 }
 0x4a5   : > { %v21668_v54 = vpop.f32.mrf.mxu0  ;;  %v8252_v28 = vpop.f32.mrf.mxu1 }
 0x4a6   : > { %24374 = vst [vmem:[#allocation25_spill] sm:$0xff] %v21666_v40  ;;  %v8253_v62 = vadd.f32 %v8252_v28, %v8182_v52 }
 0x4a7   : > { %v8323_v49 = vpop.f32.mrf.mxu0  ;;  %v8254_v59 = vpop.f32.mrf.mxu1 }
 0x4a8   : > { %v21670_v45 = vadd.f32 %v8323_v49, %v8253_v62  ;;  %v8255_v21 = vadd.f32 %v8254_v59, %v8184_v23 }
 0x4a9   : > { %v8325_v11 = vpop.f32.mrf.mxu0  ;;  %v8256_v15 = vpop.f32.mrf.mxu1 }
 0x4aa   : > { %24375 = vst [vmem:[#allocation27_spill] sm:$0xff] %v21670_v45  ;;  %v21672_v32 = vadd.f32 %v8325_v11, %v8255_v21 }
 0x4ab   : > { %v8327_v25 = vpop.f32.mrf.mxu0  ;;  %v8257_v34 = vpop.f32.mrf.mxu1 }
 0x4ac   : > { %24376 = vst [vmem:[#allocation30_spill] sm:$0xff] %v21672_v32 }
 0x4ad   : > { %v8328_v16 = vpop.f32.mrf.mxu0  ;;  %v14888_v50 = vpop.f32.mrf.mxu1 }
 0x4af   : > { %v14928_v26 = vpop.f32.mrf.mxu0  ;;  %v14889_v18 = vpop.f32.mrf.mxu1 }
 0x4b0   : > { %v14890_v29 = vadd.f32 %v14889_v18, %v14888_v50 }
 0x4b1   : > { %v14929_v2 = vpop.f32.mrf.mxu0  ;;  %v14891_v43 = vpop.f32.mrf.mxu1 }
 0x4b2   : > { %v14930_v57 = vadd.f32 %v14929_v2, %v14928_v26 }
 0x4b3   : > { %v14931_v52 = vpop.f32.mrf.mxu0  ;;  %v14892_v41 = vpop.f32.mrf.mxu1 }
 0x4b4   : > { %v21674_v48 = vadd.f32 %v14930_v57, %v14890_v29  ;;  %v14893_v0 = vadd.f32 %v14892_v41, %v14891_v43 }
 0x4b5   : > { %v14932_v60 = vpop.f32.mrf.mxu0  ;;  %v14894_v27 = vpop.f32.mrf.mxu1 }
 0x4b6   : > { %v14933_v23 = vadd.f32 %v14932_v60, %v14931_v52 }
 0x4b7   : > { %v14934_v61 = vpop.f32.mrf.mxu0  ;;  %v14895_v39 = vpop.f32.mrf.mxu1 }
 0x4b8   : > { %v21676_v19 = vadd.f32 %v14933_v23, %v14893_v0  ;;  %v14896_v12 = vadd.f32 %v14895_v39, %v14894_v27  ;;  %v16475_v27 = vld [vmem:[%s21689_s18 + $0x67c] ss:$36 sps:$4 sm:$0xff]  }
 0x4b9   : > { %v14935_v6 = vpop.f32.mrf.mxu0  ;;  %v14897_v9 = vpop.f32.mrf.mxu1  ;;  %11510 = vmatprep.subr.bf16.mxu1 %v16475_v27 }
 0x4ba   : > { %v14936_v51 = vadd.f32 %v14935_v6, %v14934_v61  ;;  %v16473_v6 = vld [vmem:[%s21689_s18 + $0x678] ss:$36 sps:$4 sm:$0xff]  }
 0x4bb   : > { %v14937_v7 = vpop.f32.mrf.mxu0  ;;  %v14898_v62 = vpop.f32.mrf.mxu1  ;;  %11511 = vmatpush1.bf16.msra.mxu1 %v16473_v6 }
 0x4bc   : > { %v21678_v28 = vadd.f32 %v14936_v51, %v14896_v12  ;;  %v14899_v59 = vadd.f32 %v14898_v62, %v14897_v9  ;;  %v16476_v9 = vld [vmem:[%s21689_s18 + $0x1f8] ss:$36 sps:$4 sm:$0xff]  }
 0x4bd   : > { %v14938_v49 = vpop.f32.mrf.mxu0  ;;  %v14900_v21 = vpop.f32.mrf.mxu1 }
 0x4be   : > { %v14939_v11 = vadd.f32 %v14938_v49, %v14937_v7  ;;  %v16478_v7 = vld [vmem:[%s21689_s18 + $0x1fc] ss:$36 sps:$4 sm:$0xff]  }
 0x4bf   : > { %v14940_v15 = vpop.f32.mrf.mxu0  ;;  %v14901_v34 = vpop.f32.mrf.mxu1  ;;  %11439 = vmatprep.subr.bf16.mxu0 %v16478_v7  ;;  %v16496_v7 = vld [vmem:[%s21689_s18 + $0x124] ss:$36 sps:$4 sm:$0xff]  }
 0x4c0   : > { %v21680_v25 = vadd.f32 %v14939_v11, %v14899_v59  ;;  %v14902_v50 = vadd.f32 %v14901_v34, %v14900_v21  ;;  %v16481_v11 = vld [vmem:[%s21689_s18 + $0x634] ss:$36 sps:$4 sm:$0xff]   ;;  %11440 = vmatpush1.bf16.msra.mxu0 %v16476_v9  ;;  %v16491_v9 = vld [vmem:[%s21689_s18 + $0x5a0] ss:$36 sps:$4 sm:$0xff]  }
 0x4c1   : > { %v14941_v16 = vpop.f32.mrf.mxu0  ;;  %v14903_v18 = vpop.f32.mrf.mxu1  ;;  %v16479_v34 = vld [vmem:[%s21689_s18 + $0x630] ss:$36 sps:$4 sm:$0xff]   ;;  %11512 = vmatprep.subr.bf16.mxu1 %v16481_v11 }
 0x4c2   : > { %v14942_v26 = vadd.f32 %v14941_v16, %v14940_v15  ;;  %v16484_v16 = vld [vmem:[%s21689_s18 + $0x1b4] ss:$36 sps:$4 sm:$0xff]   ;;  %11513 = vmatpush1.bf16.msra.mxu1 %v16479_v34 }
 0x4c3   : > { %v14943_v2 = vpop.f32.mrf.mxu0  ;;  %v14904_v57 = vpop.f32.mrf.mxu1  ;;  %11441 = vmatprep.subr.bf16.mxu0 %v16484_v16 }
 0x4c4   : > { %v21682_v29 = vadd.f32 %v14942_v26, %v14902_v50  ;;  %v14905_v52 = vadd.f32 %v14904_v57, %v14903_v18  ;;  %v16482_v50 = vld [vmem:[%s21689_s18 + $0x1b0] ss:$36 sps:$4 sm:$0xff]  }
 0x4c5   : > { %v14944_v43 = vpop.f32.mrf.mxu0  ;;  %v14906_v60 = vpop.f32.mrf.mxu1  ;;  %11442 = vmatpush1.bf16.msra.mxu0 %v16482_v50  ;;  %v16499_v50 = vld [vmem:[%s21689_s18 + $0x55c] ss:$36 sps:$4 sm:$0xff]  }
 0x4c6   : > { %v14945_v41 = vadd.f32 %v14944_v43, %v14943_v2  ;;  %v16487_v2 = vld [vmem:[%s21689_s18 + $0x5ec] ss:$36 sps:$4 sm:$0xff]  }
 0x4c7   : > { %v14946_v0 = vpop.f32.mrf.mxu0  ;;  %v14907_v61 = vpop.f32.mrf.mxu1  ;;  %v16485_v43 = vld [vmem:[%s21689_s18 + $0x5e8] ss:$36 sps:$4 sm:$0xff]   ;;  %11514 = vmatprep.subr.bf16.mxu1 %v16487_v2  ;;  %v16502_v2 = vld [vmem:[%s21689_s18 + $0xdc] ss:$36 sps:$4 sm:$0xff]  }
 0x4c8   : > { %v21687_v23 = vadd.f32 %v14945_v41, %v14905_v52  ;;  %v14908_v12 = vadd.f32 %v14907_v61, %v14906_v60  ;;  %v16490_v52 = vld [vmem:[%s21689_s18 + $0x16c] ss:$36 sps:$4 sm:$0xff]   ;;  %11515 = vmatpush1.bf16.msra.mxu1 %v16485_v43 }
 0x4c9   : > { %v14947_v39 = vpop.f32.mrf.mxu0  ;;  %v14909_v62 = vpop.f32.mrf.mxu1  ;;  %11443 = vmatprep.subr.bf16.mxu0 %v16490_v52 }
 0x4ca   : > { %v14948_v51 = vadd.f32 %v14947_v39, %v14946_v0  ;;  %v16488_v0 = vld [vmem:[%s21689_s18 + $0x168] ss:$36 sps:$4 sm:$0xff]  }
 0x4cb   : > { %v14949_v49 = vpop.f32.mrf.mxu0  ;;  %v14910_v21 = vpop.f32.mrf.mxu1  ;;  %11444 = vmatpush1.bf16.msra.mxu0 %v16488_v0 }
 0x4cc   : > { %v21695_v59 = vadd.f32 %v14948_v51, %v14908_v12  ;;  %v16493_v12 = vld [vmem:[%s21689_s18 + $0x5a4] ss:$36 sps:$4 sm:$0xff]   ;;  %11445 = vmatprep.subr.bf16.mxu0 %v16496_v7 }
 0x4cd   : > { %v14950_v15 = vpop.f32.mrf.mxu0  ;;  %v14968_v26 = vpop.f32.mrf.mxu1  ;;  %11516 = vmatprep.subr.bf16.mxu1 %v16493_v12  ;;  %v16494_v21 = vld [vmem:[%s21689_s18 + $0x120] ss:$36 sps:$4 sm:$0xff]   ;;  %v16508_v12 = vld [vmem:[%s21689_s18 + $0x94] ss:$36 sps:$4 sm:$0xff]  }
 0x4ce   : > { %11517 = vmatpush1.bf16.msra.mxu1 %v16491_v9 }
 0x4cf   : > { %v15008_v18 = vpop.f32.mrf.mxu0  ;;  %v14969_v57 = vpop.f32.mrf.mxu1  ;;  %11446 = vmatpush1.bf16.msra.mxu0 %v16494_v21  ;;  %11518 = vmatprep.subr.bf16.mxu1 %v16499_v50  ;;  %v16514_v50 = vld [vmem:[%s21689_s18 + $0x4c] ss:$36 sps:$4 sm:$0xff]  }
 0x4d0   : > { %v14970_v41 = vadd.f32 %v14969_v57, %v14968_v26  ;;  %11447 = vmatprep.subr.bf16.mxu0 %v16502_v2 }
 0x4d1   : > { %v15009_v60 = vpop.f32.mrf.mxu0  ;;  %v14971_v61 = vpop.f32.mrf.mxu1 }
 0x4d2   : > { %v15010_v27 = vadd.f32 %v15009_v60, %v15008_v18  ;;  %v8493_v39 = vadd.f32 %v14970_v41, %v21674_v48  ;;  %v16497_v18 = vld [vmem:[%s21689_s18 + $0x558] ss:$36 sps:$4 sm:$0xff]  }
 0x4d3   : > { %v15011_v6 = vpop.f32.mrf.mxu0  ;;  %v14972_v51 = vpop.f32.mrf.mxu1  ;;  %v16500_v41 = vld [vmem:[%s21689_s18 + $0xd8] ss:$36 sps:$4 sm:$0xff]   ;;  %11519 = vmatpush1.bf16.msra.mxu1 %v16497_v18 }
 0x4d4   : > { %v21709_v62 = vadd.f32 %v15010_v27, %v8493_v39  ;;  %v14973_v49 = vadd.f32 %v14972_v51, %v14971_v61  ;;  %v16505_v61 = vld [vmem:[%s21689_s18 + $0x514] ss:$36 sps:$4 sm:$0xff]   ;;  %11448 = vmatpush1.bf16.msra.mxu0 %v16500_v41 }
 0x4d5   : > { %v15012_v11 = vpop.f32.mrf.mxu0  ;;  %v14974_v34 = vpop.f32.mrf.mxu1  ;;  %11520 = vmatprep.subr.bf16.mxu1 %v16505_v61  ;;  %11449 = vmatprep.subr.bf16.mxu0 %v16508_v12  ;;  %v16517_v61 = vld [vmem:[%s21689_s18 + $0x484] ss:$36 sps:$4 sm:$0xff]  }
 0x4d6   : > { %v15013_v15 = vadd.f32 %v15012_v11, %v15011_v6  ;;  %v8496_v48 = vadd.f32 %v14973_v49, %v21676_v19  ;;  %v16503_v6 = vld [vmem:[%s21689_s18 + $0x510] ss:$36 sps:$4 sm:$0xff]   ;;  %v16520_v12 = vld [vmem:[%s21689_s18 + $0x4] ss:$36 sps:$4 sm:$0xff]  }
 0x4d7   : > { %v15014_v16 = vpop.f32.mrf.mxu0  ;;  %v14975_v26 = vpop.f32.mrf.mxu1  ;;  %v16506_v49 = vld [vmem:[%s21689_s18 + $0x90] ss:$36 sps:$4 sm:$0xff]   ;;  %11521 = vmatpush1.bf16.msra.mxu1 %v16503_v6  ;;  %v16515_v6 = vld [vmem:[%s21689_s18 + $0x480] ss:$36 sps:$4 sm:$0xff]  }
 0x4d8   : > { %v21716_v57 = vadd.f32 %v15013_v15, %v8496_v48  ;;  %v14976_v43 = vadd.f32 %v14975_v26, %v14974_v34  ;;  %v16511_v34 = vld [vmem:[%s21689_s18 + $0x4cc] ss:$36 sps:$4 sm:$0xff]   ;;  %11450 = vmatpush1.bf16.msra.mxu0 %v16506_v49 }
 0x4d9   : > { %v15015_v52 = vpop.f32.mrf.mxu0  ;;  %v14977_v0 = vpop.f32.mrf.mxu1  ;;  %11522 = vmatprep.subr.bf16.mxu1 %v16511_v34  ;;  %11451 = vmatprep.subr.bf16.mxu0 %v16514_v50  ;;  %v24384_v50 = vld [vmem:[#allocation43_spill] sm:$0xff] }
 0x4da   : > { %24377 = vst [vmem:[#allocation33_spill] sm:$0xff] %v21716_v57  ;;  %v15016_v60 = vadd.f32 %v15015_v52, %v15014_v16  ;;  %v8501_v19 = vadd.f32 %v14976_v43, %v21678_v28  ;;  %v16509_v16 = vld [vmem:[%s21689_s18 + $0x4c8] ss:$36 sps:$4 sm:$0xff]   ;;  %v16554_v57 = vld [vmem:[%s21689_s18 + $0x2d0] ss:$36 sps:$4 sm:$0xff]  }
 0x4db   : > { %v15017_v27 = vpop.f32.mrf.mxu0  ;;  %v14978_v39 = vpop.f32.mrf.mxu1  ;;  %v16512_v43 = vld [vmem:[%s21689_s18 + $0x48] ss:$36 sps:$4 sm:$0xff]   ;;  %11523 = vmatpush1.bf16.msra.mxu1 %v16509_v16  ;;  %v16523_v16 = vld [vmem:[%s21689_s18 + $0x8bc] ss:$36 sps:$4 sm:$0xff]  }
 0x4dc   : > { %v21723_v51 = vadd.f32 %v15016_v60, %v8501_v19  ;;  %v14979_v9 = vadd.f32 %v14978_v39, %v14977_v0  ;;  %v24381_v60 = vld [vmem:[#allocation38_spill] sm:$0xff]  ;;  %11452 = vmatpush1.bf16.msra.mxu0 %v16512_v43  ;;  %11524 = vmatprep.subr.bf16.mxu1 %v16517_v61  ;;  %v24388_v61 = vld [vmem:[#allocation59_spill] sm:$0xff] }
 0x4dd   : > { %v15018_v7 = vpop.f32.mrf.mxu0  ;;  %v14980_v21 = vpop.f32.mrf.mxu1  ;;  %11453 = vmatprep.subr.bf16.mxu0 %v16520_v12 }
 0x4de   : > { %24378 = vst [vmem:[#allocation35_spill] sm:$0xff] %v21723_v51  ;;  %v15019_v11 = vadd.f32 %v15018_v7, %v15017_v27  ;;  %v8504_v28 = vadd.f32 %v14979_v9, %v21680_v25  ;;  %v24380_v25 = vld [vmem:[#allocation37_spill] sm:$0xff] }
 0x4df   : > { %v15020_v15 = vpop.f32.mrf.mxu0  ;;  %v14981_v48 = vpop.f32.mrf.mxu1  ;;  %v7164_v0 = vadd.f32 %v24381_v60, %v24380_v25  ;;  %v24382_v9 = vld [vmem:[#allocation57_spill] sm:$0xff]  ;;  %11525 = vmatpush1.bf16.msra.mxu1 %v16515_v6  ;;  %v24386_v25 = vld [vmem:[#allocation58_spill] sm:$0xff] }
 0x4e0   : > { %v21730_v26 = vadd.f32 %v15019_v11, %v8504_v28  ;;  %v14982_v18 = vadd.f32 %v14981_v48, %v14980_v21  ;;  %v16518_v28 = vld [vmem:[%s21689_s18] ss:$36 sps:$4 sm:$0xff]   ;;  %11526 = vmatprep.subr.bf16.mxu1 %v16523_v16  ;;  %v16527_v16 = vld [vmem:[%s21689_s18 + $0x870] ss:$36 sps:$4 sm:$0xff]  }
 0x4e1   : > { %v15021_v2 = vpop.f32.mrf.mxu0  ;;  %v14983_v41 = vpop.f32.mrf.mxu1  ;;  %v7235_v7 = vadd.f32 %v24382_v9, %v7164_v0  ;;  %11454 = vmatpush1.bf16.msra.mxu0 %v16518_v28  ;;  %v24389_v9 = vld [vmem:[#allocation63_spill] sm:$0xff]  ;;  %v16529_v28 = vld [vmem:[%s21689_s18 + $0x874] ss:$36 sps:$4 sm:$0xff]  }
 0x4e2   : > { %24379 = vst [vmem:[#allocation34_spill] sm:$0xff] %v21730_v26  ;;  %v15022_v52 = vadd.f32 %v15021_v2, %v15020_v15  ;;  %v8509_v19 = vadd.f32 %v14982_v18, %v21682_v29  ;;  %v24385_v18 = vld [vmem:[#allocation44_spill] sm:$0xff] }
 0x4e3   : > { %v15023_v27 = vpop.f32.mrf.mxu0  ;;  %v14984_v39 = vpop.f32.mrf.mxu1  ;;  %v7174_v2 = vadd.f32 %v24385_v18, %v24384_v50  ;;  %v7306_v60 = vadd.f32 %v24386_v25, %v7235_v7  ;;  %v16532_v18 = vld [vmem:[%s21689_s18 + $0x3f4] ss:$36 sps:$4 sm:$0xff]  }
 0x4e4   : > { %v21740_v49 = vadd.f32 %v15022_v52, %v8509_v19  ;;  %v14985_v11 = vadd.f32 %v14984_v39, %v14983_v41  ;;  %v16521_v52 = vld [vmem:[%s21689_s18 + $0x8b8] ss:$36 sps:$4 sm:$0xff]   ;;  %v24421_v26 = vld [vmem:[#allocation20_spill] sm:$0xff] }
 0x4e5   : > { %v15024_v21 = vpop.f32.mrf.mxu0  ;;  %v14986_v34 = vpop.f32.mrf.mxu1  ;;  %v16526_v41 = vld [vmem:[%s21689_s18 + $0x43c] ss:$36 sps:$4 sm:$0xff]   ;;  %v7245_v39 = vadd.f32 %v24388_v61, %v7174_v2  ;;  %11527 = vmatpush2.bf16.msra.mxu1 %v16521_v52  ;;  %v24393_v52 = vld [vmem:[#allocation60_spill] sm:$0xff] }
 0x4e6   : > { %24383 = vst [vmem:[#allocation36_spill] sm:$0xff] %v21740_v49  ;;  %v15025_v15 = vadd.f32 %v15024_v21, %v15023_v27  ;;  %v8512_v29 = vadd.f32 %v14985_v11, %v21687_v23  ;;  %v16524_v23 = vld [vmem:[%s21689_s18 + $0x438] ss:$36 sps:$4 sm:$0xff]   ;;  %11455 = vmatprep.subr.bf16.mxu0 %v16526_v41  ;;  %v7377_v11 = vadd.f32 %v24389_v9, %v7306_v60  ;;  %v24395_v60 = vld [vmem:[#allocation64_spill] sm:$0xff]  ;;  %v16533_v9 = vld [vmem:[%s21689_s18 + $0x828] ss:$36 sps:$4 sm:$0xff]  }
 0x4e7   : > { %v15026_v48 = vpop.f32.mrf.mxu0  ;;  %v14987_v43 = vpop.f32.mrf.mxu1  ;;  %11456 = vmatpush2.bf16.msra.mxu0 %v16524_v23  ;;  %11528 = vmatprep.subr.bf16.mxu1 %v16529_v28  ;;  %v24394_v41 = vld [vmem:[#allocation61_spill] sm:$0xff]  ;;  %v16535_v23 = vld [vmem:[%s21689_s18 + $0x82c] ss:$36 sps:$4 sm:$0xff]  }
 0x4e8   : > { %v21750_v0 = vadd.f32 %v15025_v15, %v8512_v29  ;;  %v14988_v19 = vadd.f32 %v14987_v43, %v14986_v34  ;;  %v24390_v15 = vld [vmem:[#allocation49_spill] sm:$0xff]  ;;  %v24391_v34 = vld [vmem:[#allocation50_spill] sm:$0xff]  ;;  %v16530_v43 = vld [vmem:[%s21689_s18 + $0x3f0] ss:$36 sps:$4 sm:$0xff]   ;;  %11457 = vmatprep.subr.bf16.mxu0 %v16532_v18 }
 0x4e9   : > { %v15027_v27 = vpop.f32.mrf.mxu0  ;;  %v14989_v12 = vpop.f32.mrf.mxu1  ;;  %v7184_v29 = vadd.f32 %v24391_v34, %v24390_v15  ;;  %11529 = vmatpush2.bf16.msra.mxu1 %v16527_v16  ;;  %v24396_v61 = vld [vmem:[#allocation65_spill] sm:$0xff]  ;;  %v16536_v15 = vld [vmem:[%s21689_s18 + $0x3a8] ss:$36 sps:$4 sm:$0xff]   ;;  %v24402_v18 = vld [vmem:[#allocation66_spill] sm:$0xff] }
 0x4ea   : > { %24387 = vst [vmem:[#allocation39_spill] sm:$0xff] %v21750_v0  ;;  %v15028_v6 = vadd.f32 %v15027_v27, %v15026_v48  ;;  %v8517_v21 = vadd.f32 %v14988_v19, %v21695_v59  ;;  %v7316_v59 = vadd.f32 %v24393_v52, %v7245_v39  ;;  %v7448_v19 = vadd.f32 %v24395_v60, %v7377_v11  ;;  %v24399_v11 = vld [vmem:[#allocation62_spill] sm:$0xff] }
 0x4eb   : > { %v15029_v7 = vpop.f32.mrf.mxu0  ;;  %v14990_v50 = vpop.f32.mrf.mxu1  ;;  %v7255_v25 = vadd.f32 %v24394_v41, %v7184_v29  ;;  %11458 = vmatpush2.bf16.msra.mxu0 %v16530_v43  ;;  %11530 = vmatprep.subr.bf16.mxu1 %v16535_v23  ;;  %v16541_v16 = vld [vmem:[%s21689_s18 + $0x7e4] ss:$36 sps:$4 sm:$0xff]  }
 0x4ec   : > { %v21761_v48 = vadd.f32 %v15028_v6, %v8517_v21  ;;  %v7387_v12 = vadd.f32 %v24396_v61, %v7316_v59  ;;  %v16538_v21 = vld [vmem:[%s21689_s18 + $0x3ac] ss:$36 sps:$4 sm:$0xff]   ;;  %v16539_v41 = vld [vmem:[%s21689_s18 + $0x7e0] ss:$36 sps:$4 sm:$0xff]  }
 0x4ed   : > { %v15030_v2 = vpop.f32.mrf.mxu0  ;;  %v21767_v27 = vpop.f32.mrf.mxu1  ;;  %v24398_v7 = vld [vmem:[#allocation16_spill] sm:$0xff]  ;;  %v7326_v34 = vadd.f32 %v24399_v11, %v7255_v25  ;;  %11459 = vmatprep.subr.bf16.mxu0 %v16538_v21  ;;  %11531 = vmatpush2.bf16.msra.mxu1 %v16533_v9  ;;  %v24403_v43 = vld [vmem:[#allocation67_spill] sm:$0xff]  ;;  %v16542_v61 = vld [vmem:[%s21689_s18 + $0x360] ss:$36 sps:$4 sm:$0xff]  }
 0x4ee   : > { %24392 = vst [vmem:[#allocation41_spill] sm:$0xff] %v21761_v48  ;;  %v7519_v39 = vadd.f32 %v24398_v7, %v7448_v19  ;;  %v7458_v2 = vadd.f32 %v24402_v18, %v7387_v12  ;;  %v16544_v60 = vld [vmem:[%s21689_s18 + $0x364] ss:$36 sps:$4 sm:$0xff]   ;;  %v24405_v19 = vld [vmem:[#allocation69_spill] sm:$0xff]  ;;  %11532 = vmatprep.subr.bf16.mxu1 %v16541_v16  ;;  %v24411_v18 = vld [vmem:[#allocation68_spill] sm:$0xff] }
 0x4ef   : > { %v21771_v6 = vpop.f32.mrf.mxu0  ;;  %v21776_v28 = vpop.f32.mrf.mxu1  ;;  %v7397_v52 = vadd.f32 %v24403_v43, %v7326_v34  ;;  %11460 = vmatpush2.bf16.msra.mxu0 %v16536_v15  ;;  %v24407_v9 = vld [vmem:[#allocation70_spill] sm:$0xff]  ;;  %v16545_v16 = vld [vmem:[%s21689_s18 + $0x798] ss:$36 sps:$4 sm:$0xff]   ;;  %v24417_v48 = vld [vmem:[#allocation76_spill] sm:$0xff] }
 0x4f0   : > { %24397 = vst [vmem:[#allocation40_spill] sm:$0xff] %v21771_v6  ;;  %v7590_v25 = vadd.f32 %v24405_v19, %v7519_v39  ;;  %v7529_v21 = vadd.f32 %v24407_v9, %v7458_v2  ;;  %11461 = vmatprep.subr.bf16.mxu0 %v16544_v60  ;;  %v24409_v7 = vld [vmem:[#allocation74_spill] sm:$0xff]  ;;  %v24413_v60 = vld [vmem:[#allocation71_spill] sm:$0xff]  ;;  %v24414_v9 = vld [vmem:[#allocation72_spill] sm:$0xff] }
 0x4f1   : > { %v21780_v29 = vpop.f32.mrf.mxu0  ;;  %v21782_v50 = vpop.f32.mrf.mxu1  ;;  %11533 = vmatpush2.bf16.msra.mxu1 %v16539_v41  ;;  %v16547_v34 = vld [vmem:[%s21689_s18 + $0x79c] ss:$36 sps:$4 sm:$0xff]   ;;  %v7468_v39 = vadd.f32 %v24411_v18, %v7397_v52  ;;  %v16553_v18 = vld [vmem:[%s21689_s18 + $0x754] ss:$36 sps:$4 sm:$0xff]  }
 0x4f2   : > { %24400 = vst [vmem:[#allocation42_spill] sm:$0xff] %v21780_v29  ;;  %24401 = vst [vmem:[#allocation45_spill] sm:$0xff] %v21782_v50  ;;  %v21799_v11 = vadd.f32 %v24409_v7, %v7590_v25  ;;  %v16550_v19 = vld [vmem:[%s21689_s18 + $0x31c] ss:$36 sps:$4 sm:$0xff]   ;;  %11534 = vmatprep.subr.bf16.mxu1 %v16547_v34  ;;  %v7600_v25 = vadd.f32 %v24413_v60, %v7529_v21  ;;  %v16551_v21 = vld [vmem:[%s21689_s18 + $0x750] ss:$36 sps:$4 sm:$0xff]  }
 0x4f3   : > { %v21787_v59 = vpop.f32.mrf.mxu0  ;;  %v21792_v23 = vpop.f32.mrf.mxu1  ;;  %11462 = vmatpush2.bf16.msra.mxu0 %v16542_v61  ;;  %v16548_v41 = vld [vmem:[%s21689_s18 + $0x318] ss:$36 sps:$4 sm:$0xff]   ;;  %v7539_v7 = vadd.f32 %v24414_v9, %v7468_v39  ;;  %v24434_v29 = vld [vmem:[#allocation75_spill] sm:$0xff] }
 0x4f4   : > { %24404 = vst [vmem:[#allocation47_spill] sm:$0xff] %v21787_v59  ;;  %24406 = vst [vmem:[#allocation48_spill] sm:$0xff] %v21792_v23  ;;  %11463 = vmatprep.subr.bf16.mxu0 %v16550_v19  ;;  %v8980_v52 = vmul.f32 %v21799_v11, %v21799_v11  ;;  %v21822_v49 = vadd.f32 %v24417_v48, %v7600_v25  ;;  %v16556_v60 = vld [vmem:[%s21689_s18 + $0x2d4] ss:$36 sps:$4 sm:$0xff]  }
 0x4f5   : > { %v21796_v12 = vpop.f32.mrf.mxu0  ;;  %24410 = vst [vmem:[#allocation52_spill] sm:$0xff] %v21799_v11  ;;  %v21801_v15 = vpop.f32.mrf.mxu1  ;;  %11535 = vmatpush2.bf16.msra.mxu1 %v16545_v16  ;;  %v24420_v39 = vld [vmem:[#allocation17_spill] sm:$0xff]  ;;  %v8979_v16 = vmul.f32 %v24421_v26, %v24421_v26 }
 0x4f6   : > { %24408 = vst [vmem:[#allocation51_spill] sm:$0xff] %v21796_v12  ;;  %24418 = vst [vmem:[#allocation37_spill] sm:$0xff] %v21822_v49  ;;  %v8975_v9 = vmul.f32 %v24420_v39, %v24420_v39  ;;  %11536 = vmatprep.subr.bf16.mxu1 %v16553_v18  ;;  %v24423_v12 = vld [vmem:[#allocation73_spill] sm:$0xff]  ;;  %v8918_v18 = vadd.f32 %v21799_v11, %v24420_v39 }
 0x4f7   : > { %v21805_v43 = vpop.f32.mrf.mxu0  ;;  %v21809_v2 = vpop.f32.mrf.mxu1  ;;  %11464 = vmatpush2.bf16.msra.mxu0 %v16548_v41  ;;  %v7610_v59 = vadd.f32 %v24423_v12, %v7539_v7  ;;  %v24424_v48 = vld [vmem:[#allocation29_spill] sm:$0xff]  ;;  %v24427_v12 = vld [vmem:[#allocation79_spill] sm:$0xff]  ;;  %v24428_v7 = vld [vmem:[#allocation82_spill] sm:$0xff] }
 0x4f8   : > { %24412 = vst [vmem:[#allocation53_spill] sm:$0xff] %v21805_v43  ;;  %v8906_v25 = vadd.f32 %v24421_v26, %v24424_v48  ;;  %11465 = vmatprep.subr.bf16.mxu0 %v16556_v60  ;;  %v8974_v43 = vmul.f32 %v24424_v48, %v24424_v48  ;;  %v9021_v51 = vadd.f32 %v8980_v52, %v8975_v9  ;;  %v24430_v23 = vld [vmem:[#allocation21_spill] sm:$0xff]  ;;  %v24431_v48 = vld [vmem:[#allocation78_spill] sm:$0xff]  ;;  %v16557_v52 = vld [vmem:[%s21689_s18 + $0x708] ss:$36 sps:$4 sm:$0xff]  }
 0x4f9   : > { %v21814_v0 = vpop.f32.mrf.mxu0  ;;  %v21818_v61 = vpop.f32.mrf.mxu1  ;;  %11537 = vmatpush2.bf16.msra.mxu1 %v16551_v21  ;;  %v8984_v60 = vmul.f32 %v24430_v23, %v24430_v23  ;;  %v8990_v21 = vmul.f32 %v21822_v49, %v21822_v49  ;;  %v16562_v9 = vld [vmem:[%s21689_s18 + $0x28c] ss:$36 sps:$4 sm:$0xff]  }
 0x4fa   : > { %24415 = vst [vmem:[#allocation54_spill] sm:$0xff] %v21814_v0  ;;  %24416 = vst [vmem:[#allocation55_spill] sm:$0xff] %v21818_v61  ;;  %v16559_v61 = vld [vmem:[%s21689_s18 + $0x70c] ss:$36 sps:$4 sm:$0xff]   ;;  %v8907_v50 = vadd.f32 %v8906_v25, %v24430_v23 }
 0x4fb   : > { %v21824_v34 = vpop.f32.mrf.mxu0  ;;  %v21832_v19 = vpop.f32.mrf.mxu1  ;;  %11466 = vmatpush2.bf16.msra.mxu0 %v16554_v57  ;;  %11538 = vmatprep.subr.bf16.mxu1 %v16559_v61  ;;  %v16560_v23 = vld [vmem:[%s21689_s18 + $0x288] ss:$36 sps:$4 sm:$0xff]  }
 0x4fc   : > { %24419 = vst [vmem:[#allocation38_spill] sm:$0xff] %v21824_v34  ;;  %24422 = vst [vmem:[#allocation57_spill] sm:$0xff] %v21832_v19  ;;  %v24425_v34 = vld [vmem:[#allocation24_spill] sm:$0xff]  ;;  %v7803_v19 = vadd.f32 %v24428_v7, %v24427_v12  ;;  %v9009_v12 = vadd.f32 %v8979_v16, %v8974_v43  ;;  %v8908_v6 = vadd.f32 %v8907_v50, %v24434_v29  ;;  %11467 = vmatprep.subr.bf16.mxu0 %v16562_v9 }
 0x4fd   : > { %v8985_v41 = vmul.f32 %v24425_v34, %v24425_v34  ;;  %v21840_v0 = vpop.f32.mrf.mxu0  ;;  %v21848_v26 = vpop.f32.mrf.mxu1  ;;  %v8919_v7 = vadd.f32 %v8918_v18, %v24425_v34  ;;  %11539 = vmatpush2.bf16.msra.mxu1 %v16557_v52  ;;  %v24437_v16 = vld [vmem:[#allocation80_spill] sm:$0xff]  ;;  %v24439_v34 = vld [vmem:[#allocation26_spill] sm:$0xff] }
 0x4fe   : > { %24426 = vst [vmem:[#allocation43_spill] sm:$0xff] %v21840_v0  ;;  %24429 = vst [vmem:[#allocation44_spill] sm:$0xff] %v21848_v26  ;;  %v21857_v0 = vadd.f32 %v24431_v48, %v7610_v59  ;;  %v7874_v25 = vadd.f32 %v21191_v22, %v7803_v19  ;;  %v24435_v59 = vld [vmem:[#allocation28_spill] sm:$0xff]  ;;  %v24438_v22 = vld [vmem:[#allocation83_spill] sm:$0xff]  ;;  %v9010_v50 = vadd.f32 %v9009_v12, %v8984_v60 }
 0x4ff   : > { %v21859_v11 = vpop.f32.mrf.mxu0  ;;  %v21865_v39 = vpop.f32.mrf.mxu1  ;;  %v9022_v26 = vadd.f32 %v9021_v51, %v8985_v41  ;;  %v8995_v48 = vmul.f32 %v24435_v59, %v24435_v59  ;;  %v8920_v43 = vadd.f32 %v8919_v7, %v21822_v49  ;;  %v7813_v19 = vadd.f32 %v24438_v22, %v24437_v16  ;;  %v16565_v51 = vld [vmem:[%s21689_s18 + $0x6c4] ss:$36 sps:$4 sm:$0xff]   ;;  %11468 = vmatpush2.bf16.msra.mxu0 %v16560_v23  ;;  %v24441_v12 = vld [vmem:[#allocation77_spill] sm:$0xff] }
 0x500   : > { %24432 = vst [vmem:[#allocation58_spill] sm:$0xff] %v21857_v0  ;;  %24433 = vst [vmem:[#allocation59_spill] sm:$0xff] %v21859_v11  ;;  %v7945_v61 = vadd.f32 %v21336_v56, %v7874_v25  ;;  %v8909_v11 = vadd.f32 %v8908_v6, %v24439_v34  ;;  %v16563_v52 = vld [vmem:[%s21689_s18 + $0x6c0] ss:$36 sps:$4 sm:$0xff]   ;;  %v8989_v56 = vmul.f32 %v24434_v29, %v24434_v29  ;;  %11540 = vmatprep.subr.bf16.mxu1 %v16565_v51  ;;  %v24442_v23 = vld [vmem:[#allocation31_spill] sm:$0xff] }
 0x501   : > { %v21871_v57 = vpop.f32.mrf.mxu0  ;;  %v21877_v18 = vpop.f32.mrf.mxu1  ;;  %v9023_v41 = vadd.f32 %v9022_v26, %v8990_v21  ;;  %v16568_v7 = vld [vmem:[%s21689_s18 + $0x244] ss:$36 sps:$4 sm:$0xff]   ;;  %v8921_v25 = vadd.f32 %v8920_v43, %v24435_v59  ;;  %v7884_v16 = vadd.f32 %v21230_v24, %v7813_v19  ;;  %v9005_v49 = vmul.f32 %v24442_v23, %v24442_v23  ;;  %11541 = vmatpush2.bf16.msra.mxu1 %v16563_v52  ;;  %v24444_v19 = vld [vmem:[#allocation81_spill] sm:$0xff]  ;;  %v24446_v29 = vld [vmem:[#allocation32_spill] sm:$0xff] }
 0x502   : > { %24436 = vst [vmem:[#allocation63_spill] sm:$0xff] %v21871_v57  ;;  %v9000_v57 = vmul.f32 %v21857_v0, %v21857_v0  ;;  %v8016_v26 = vadd.f32 %v21490_v5, %v7945_v61  ;;  %v16566_v6 = vld [vmem:[%s21689_s18 + $0x240] ss:$36 sps:$4 sm:$0xff]   ;;  %v8910_v22 = vadd.f32 %v8909_v11, %v24441_v12  ;;  %11469 = vmatprep.subr.bf16.mxu0 %v16568_v7 }
 0x503   : > { %v21883_v9 = vpop.f32.mrf.mxu0  ;;  %v21892_v60 = vpop.f32.mrf.mxu1  ;;  %v9024_v21 = vadd.f32 %v9023_v41, %v8995_v48  ;;  %v16571_v43 = vld [vmem:[%s21689_s18 + $0x204] ss:$36 sps:$4 sm:$0xff]   ;;  %v8922_v24 = vadd.f32 %v8921_v25, %v21857_v0  ;;  %v7955_v51 = vadd.f32 %v21375_v13, %v7884_v16  ;;  %v8994_v11 = vmul.f32 %v24439_v34, %v24439_v34  ;;  %11470 = vmatpush2.bf16.msra.mxu0 %v16566_v6  ;;  %v16574_v52 = vld [vmem:[%s21689_s18 + $0x9dc] ss:$36 sps:$4 sm:$0xff]  }
 0x504   : > { %24440 = vst [vmem:[#allocation49_spill] sm:$0xff] %v21883_v9  ;;  %v24445_v5 = vld [vmem:[#allocation46_spill] sm:$0xff]  ;;  %v8087_v48 = vadd.f32 %v21604_v8, %v8016_v26  ;;  %11652 = vmatprep.subr.bf16.mxu1 %v16571_v43  ;;  %v9011_v26 = vadd.f32 %v9010_v50, %v8989_v56  ;;  %11589 = vmatprep.subr.bf16.mxu0 %v16574_v52 }
 0x505   : > { %v21898_v9 = vpop.f32.mrf.mxu0  ;;  %v7823_v61 = vadd.f32 %v24445_v5, %v24444_v19  ;;  %v21906_v41 = vpop.f32.mrf.mxu1  ;;  %v9025_v59 = vadd.f32 %v9024_v21, %v9000_v57  ;;  %v8923_v25 = vadd.f32 %v8922_v24, %v24442_v23  ;;  %v8026_v13 = vadd.f32 %v21529_v30, %v7955_v51 }
 0x506   : > { %24443 = vst [vmem:[#allocation50_spill] sm:$0xff] %v21898_v9  ;;  %v8911_v9 = vadd.f32 %v8910_v22, %v24446_v29  ;;  %v8158_v8 = vadd.f32 %v21632_v37, %v8087_v48  ;;  %v8999_v57 = vmul.f32 %v24441_v12, %v24441_v12  ;;  %v9012_v30 = vadd.f32 %v9011_v26, %v8994_v11 }
 0x507   : > { %v21911_v7 = vpop.f32.mrf.mxu0  ;;  %v7894_v19 = vadd.f32 %v21269_v3, %v7823_v61  ;;  %v21918_v16 = vpop.f32.mrf.mxu1  ;;  %v9026_v21 = vadd.f32 %v9025_v59, %v9005_v49  ;;  %v8097_v43 = vadd.f32 %v21613_v33, %v8026_v13  ;;  %v9004_v37 = vmul.f32 %v24446_v29, %v24446_v29 }
 0x508   : > { %v8229_v3 = vadd.f32 %v21644_v38, %v8158_v8  ;;  %v8912_v50 = vrot.slane %v8911_v9, 4  ;;  %v8924_v56 = vrot.slane %v8923_v25, 4  ;;  %v9013_v51 = vadd.f32 %v9012_v30, %v8999_v57 }
 0x509   : > { %v21922_v22 = vpop.f32.mrf.mxu0  ;;  %v7965_v6 = vadd.f32 %v21414_v63, %v7894_v19  ;;  %v15069_v24 = vpop.f32.mrf.mxu1  ;;  %v8168_v49 = vadd.f32 %v21636_v31, %v8097_v43  ;;  %v9027_v48 = vrot.slane %v9026_v21, 4  ;;  %v8930_v38 = vadd.f32 %v21646_v53, %v21640_v42 }
 0x50a   : > { %v21935_v11 = vadd.f32 %v21648_v4, %v8229_v3  ;;  %v9014_v19 = vadd.f32 %v9013_v51, %v9004_v37  ;;  %v8925_v8 = vadd.f32 %v8924_v56, %v8923_v25  ;;  %v8986_v30 = vmul.f32 %v21650_v35, %v21650_v35 }
 0x50b   : > { %v15109_v5 = vpop.f32.mrf.mxu0  ;;  %v8036_v61 = vadd.f32 %v21568_v36, %v7965_v6  ;;  %v15070_v59 = vpop.f32.mrf.mxu1  ;;  %v8239_v52 = vadd.f32 %v21654_v58, %v8168_v49  ;;  %v8913_v36 = vadd.f32 %v8912_v50, %v8911_v9  ;;  %v8931_v26 = vadd.f32 %v8930_v38, %v21650_v35 }
 0x50c   : > { %24447 = vst [vmem:[#allocation60_spill] sm:$0xff] %v21935_v11  ;;  %v8981_v6 = vmul.f32 %v21646_v53, %v21646_v53  ;;  %v8942_v4 = vadd.f32 %v21935_v11, %v21642_v46  ;;  %v9015_v3 = vrot.slane %v9014_v19, 4  ;;  %v8982_v24 = vmul.f32 %v21935_v11, %v21935_v11  ;;  %v24461_v11 = vld [vmem:[#allocation47_spill] sm:$0xff] }
 0x50d   : > { %v15110_v63 = vpop.f32.mrf.mxu0  ;;  %v8107_v33 = vadd.f32 %v21622_v14, %v8036_v61  ;;  %v21938_v13 = vpop.f32.mrf.mxu1  ;;  %v9028_v14 = vadd.f32 %v9027_v48, %v9026_v21  ;;  %v8932_v58 = vadd.f32 %v8931_v26, %v21656_v47  ;;  %v21952_v9 = vadd.f32 %v21658_v1, %v8239_v52 }
 0x50e   : > { %v8976_v21 = vmul.f32 %v21640_v42, %v21640_v42  ;;  %v8914_v5 = vrot.slane %v8913_v36, 2  ;;  %v8926_v50 = vrot.slane %v8925_v8, 2  ;;  %v8943_v1 = vadd.f32 %v8942_v4, %v21652_v55 }
 0x50f   : > { %v8178_v31 = vadd.f32 %v21638_v20, %v8107_v33  ;;  %v21942_v57 = vpop.f32.mrf.mxu0  ;;  %v21946_v43 = vpop.f32.mrf.mxu1  ;;  %24448 = vst [vmem:[#allocation61_spill] sm:$0xff] %v21952_v9  ;;  %v8977_v61 = vmul.f32 %v21642_v46, %v21642_v46  ;;  %v8987_v59 = vmul.f32 %v21652_v55, %v21652_v55  ;;  %v8991_v51 = vmul.f32 %v21656_v47, %v21656_v47  ;;  %v24463_v46 = vld [vmem:[#allocation44_spill] sm:$0xff] }
 0x510   : > { %v9033_v49 = vadd.f32 %v8981_v6, %v8976_v21  ;;  %v9029_v63 = vrot.slane %v9028_v14, 2  ;;  %v8944_v33 = vadd.f32 %v8943_v1, %v21952_v9  ;;  %v8992_v4 = vmul.f32 %v21952_v9, %v21952_v9  ;;  %v24458_v9 = vld [vmem:[#allocation35_spill] sm:$0xff] }
 0x511   : > { %v8249_v20 = vadd.f32 %v21664_v10, %v8178_v31  ;;  %v21955_v25 = vpop.f32.mrf.mxu0  ;;  %v21963_v37 = vpop.f32.mrf.mxu1  ;;  %v8933_v10 = vadd.f32 %v8932_v58, %v21660_v17  ;;  %v9045_v26 = vadd.f32 %v8982_v24, %v8977_v61  ;;  %v8996_v58 = vmul.f32 %v21660_v17, %v21660_v17 }
 0x512   : > { %v9034_v6 = vadd.f32 %v9033_v49, %v8986_v30  ;;  %v8915_v29 = vadd.f32 %v8914_v5, %v8913_v36  ;;  %v8945_v1 = vadd.f32 %v8944_v33, %v21662_v44  ;;  %v8997_v24 = vmul.f32 %v21662_v44, %v21662_v44 }
 0x513   : > { %v21967_v56 = vpop.f32.mrf.mxu0  ;;  %v21975_v48 = vpop.f32.mrf.mxu1  ;;  %v8934_v38 = vadd.f32 %v8933_v10, %v21666_v40  ;;  %v21980_v52 = vadd.f32 %v21668_v54, %v8249_v20  ;;  %v9046_v54 = vadd.f32 %v9045_v26, %v8987_v59  ;;  %v9001_v30 = vmul.f32 %v21666_v40, %v21666_v40 }
 0x514   : > { %v9035_v20 = vadd.f32 %v9034_v6, %v8991_v51  ;;  %v9016_v49 = vadd.f32 %v9015_v3, %v9014_v19  ;;  %v8927_v17 = vadd.f32 %v8926_v50, %v8925_v8  ;;  %v9030_v12 = vadd.f32 %v9029_v63, %v9028_v14 }
 0x515   : > { %24449 = vst [vmem:[#allocation64_spill] sm:$0xff] %v21980_v52  ;;  %v21982_v31 = vpop.f32.mrf.mxu0  ;;  %v21988_v21 = vpop.f32.mrf.mxu1  ;;  %v8935_v10 = vadd.f32 %v8934_v38, %v21670_v45  ;;  %v8946_v36 = vadd.f32 %v8945_v1, %v21980_v52  ;;  %v9047_v33 = vadd.f32 %v9046_v54, %v8992_v4  ;;  %v9002_v59 = vmul.f32 %v21980_v52, %v21980_v52 }
 0x516   : > { %v9036_v38 = vadd.f32 %v9035_v20, %v8996_v58  ;;  %v9006_v51 = vmul.f32 %v21670_v45, %v21670_v45  ;;  %v8916_v8 = vrot.slane %v8915_v29, 1  ;;  %v9007_v50 = vmul.f32 %v21672_v32, %v21672_v32 }
 0x517   : > { %v21992_v23 = vpop.f32.mrf.mxu0  ;;  %v21998_v61 = vpop.f32.mrf.mxu1  ;;  %v8936_v6 = vrot.slane %v8935_v10, 4  ;;  %v8947_v40 = vadd.f32 %v8946_v36, %v21672_v32  ;;  %v9048_v14 = vadd.f32 %v9047_v33, %v8997_v24  ;;  %v8928_v4 = vrot.slane %v8927_v17, 1 }
 0x518   : > { %v9037_v3 = vadd.f32 %v9036_v38, %v9001_v30  ;;  %v9017_v1 = vrot.slane %v9016_v49, 2  ;;  %v9031_v54 = vrot.slane %v9030_v12, 1  ;;  %v8917_v0 = vadd.f32 %v8916_v8, %v8915_v29 }
 0x519   : > { %v22001_v5 = vpop.f32.mrf.mxu0  ;;  %v22007_v26 = vpop.f32.mrf.mxu1  ;;  %v9049_v20 = vadd.f32 %v9048_v14, %v9002_v59  ;;  %v8937_v52 = vadd.f32 %v8936_v6, %v8935_v10  ;;  %v8948_v36 = vrot.slane %v8947_v40, 4  ;;  %v15050_v30 = vadd.f32 %v21776_v28, %v21767_v27  ;;  %v24451_v28 = vld [vmem:[#allocation40_spill] sm:$0xff] }
 0x51a   : > { %v9038_v45 = vadd.f32 %v9037_v3, %v9006_v51  ;;  %v8929_v38 = vadd.f32 %v8928_v4, %v8927_v17  ;;  %v22026_v47 = vadd.f32 %v9017_v1, %v9016_v49  ;;  %v9032_v59 = vadd.f32 %v9031_v54, %v9030_v12  ;;  %v24453_v1 = vld [vmem:[#allocation45_spill] sm:$0xff]  ;;  %v24454_v54 = vld [vmem:[#allocation48_spill] sm:$0xff] }
 0x51b   : > { %v22010_v19 = vpop.f32.mrf.mxu0  ;;  %v15138_v63 = vpop.f32.mrf.mxu1  ;;  %v9050_v24 = vadd.f32 %v9049_v20, %v9007_v50  ;;  %v8938_v10 = vrot.slane %v8937_v52, 2  ;;  %v8949_v6 = vadd.f32 %v8948_v36, %v8947_v40  ;;  %v15056_v29 = vadd.f32 %v21809_v2, %v21801_v15  ;;  %v24452_v50 = vld [vmem:[#allocation42_spill] sm:$0xff]  ;;  %v24455_v20 = vld [vmem:[#allocation55_spill] sm:$0xff]  ;;  %v24456_v36 = vld [vmem:[#allocation57_spill] sm:$0xff] }
 0x51c   : > { %v9039_v51 = vrot.slane %v9038_v45, 4  ;;  %v22034_v3 = vmul.f32 0.020408163, %v8917_v0  ;;  %v8621_v17 = vadd.f32 %v15050_v30, %v21709_v62  ;;  %v15090_v49 = vadd.f32 %v24452_v50, %v24451_v28  ;;  %v24462_v0 = vld [vmem:[#allocation51_spill] sm:$0xff] }
 0x51d   : > { %v22014_v58 = vpop.f32.mrf.mxu0  ;;  %v22016_v34 = vpop.f32.mrf.mxu1  ;;  %v9051_v27 = vrot.slane %v9050_v24, 4  ;;  %v22041_v12 = vmul.f32 0.020408163, %v8929_v38  ;;  %v15053_v40 = vadd.f32 %v24454_v54, %v24453_v1  ;;  %v15059_v15 = vadd.f32 %v24456_v36, %v24455_v20  ;;  %v24459_v1 = vld [vmem:[#allocation53_spill] sm:$0xff]  ;;  %v24460_v54 = vld [vmem:[#allocation54_spill] sm:$0xff] }
 0x51e   : > { %24450 = vst [vmem:[#allocation65_spill] sm:$0xff] %v22034_v3  ;;  %v22050_v35 = vmul.f32 0.020408163, %v9032_v59  ;;  %v9040_v62 = vadd.f32 %v9039_v51, %v9038_v45  ;;  %v15130_v30 = vadd.f32 %v21946_v43, %v21938_v13  ;;  %v22054_v50 = vadd.f32 %v8938_v10, %v8937_v52  ;;  %v24464_v13 = vld [vmem:[#allocation33_spill] sm:$0xff]  ;;  %v24465_v52 = vld [vmem:[#allocation34_spill] sm:$0xff]  ;;  %v24467_v3 = vld [vmem:[#allocation43_spill] sm:$0xff] }
 0x51f   : > { %v22018_v44 = vpop.f32.mrf.mxu0  ;;  %v22022_v33 = vpop.f32.mrf.mxu1  ;;  %v8950_v38 = vrot.slane %v8949_v6, 2  ;;  %v8629_v55 = vadd.f32 %v15056_v29, %v24458_v9  ;;  %v15096_v53 = vadd.f32 %v24460_v54, %v24459_v1  ;;  %v9052_v36 = vadd.f32 %v9051_v27, %v9050_v24  ;;  %v24470_v54 = vld [vmem:[#allocation63_spill] sm:$0xff] }
 0x520   : > { %24457 = vst [vmem:[#allocation16_spill] sm:$0xff] %v22050_v35  ;;  %v8685_v42 = vadd.f32 %v15090_v49, %v8621_v17  ;;  %v15093_v59 = vadd.f32 %v24462_v0, %v24461_v11  ;;  %v15062_v45 = vadd.f32 %v21865_v39, %v24463_v46  ;;  %v8624_v43 = vadd.f32 %v15053_v40, %v24464_v13  ;;  %v24466_v35 = vld [vmem:[#allocation38_spill] sm:$0xff]  ;;  %v24469_v0 = vld [vmem:[#allocation59_spill] sm:$0xff] }
 0x521   : > { %v22024_v32 = vpop.f32.mrf.mxu0  ;;  %v22028_v14 = vpop.f32.mrf.mxu1  ;;  %v8632_v10 = vadd.f32 %v15059_v15, %v24465_v52  ;;  %v15099_v9 = vadd.f32 %v24467_v3, %v24466_v35  ;;  %v15136_v29 = vadd.f32 %v21998_v61, %v21988_v21  ;;  %v9041_v24 = vrot.slane %v9040_v62, 2  ;;  %v24468_v21 = vld [vmem:[#allocation36_spill] sm:$0xff]  ;;  %v24474_v52 = vld [vmem:[#allocation50_spill] sm:$0xff] }
 0x522   : > { %v15068_v27 = vadd.f32 %v21918_v16, %v21906_v41  ;;  %v8749_v11 = vadd.f32 %v15130_v30, %v8685_v42  ;;  %v15170_v46 = vadd.f32 %v21955_v25, %v21942_v57  ;;  %v8951_v17 = vadd.f32 %v8950_v38, %v8949_v6 }
 0x523   : > { %v22032_v8 = vpop.f32.mrf.mxu0  ;;  %v22039_v4 = vpop.f32.mrf.mxu1  ;;  %v8693_v49 = vadd.f32 %v15096_v53, %v8629_v55  ;;  %v15133_v40 = vadd.f32 %v21975_v48, %v21963_v37  ;;  %v15139_v35 = vadd.f32 %v15138_v63, %v22007_v26  ;;  %v9053_v15 = vrot.slane %v9052_v36, 2  ;;  %v24471_v37 = vld [vmem:[#allocation41_spill] sm:$0xff] }
 0x524   : > { %v8637_v61 = vadd.f32 %v15062_v45, %v24468_v21  ;;  %v15102_v13 = vadd.f32 %v24470_v54, %v24469_v0  ;;  %v15065_v42 = vadd.f32 %v21892_v60, %v21877_v18  ;;  %v8688_v16 = vadd.f32 %v15093_v59, %v8624_v43  ;;  %v24472_v59 = vld [vmem:[#allocation39_spill] sm:$0xff]  ;;  %v24473_v43 = vld [vmem:[#allocation49_spill] sm:$0xff] }
 0x525   : > { %v22047_v2 = vpop.f32.mrf.mxu0  ;;  %v15146_v28 = vpop.f32.mrf.mxu1  ;;  %v8696_v57 = vadd.f32 %v15099_v9, %v8632_v10  ;;  %v8757_v25 = vadd.f32 %v15136_v29, %v8693_v49  ;;  %v15176_v53 = vadd.f32 %v22001_v5, %v21992_v23  ;;  %v8645_v48 = vadd.f32 %v15068_v27, %v24471_v37 }
 0x526   : > { %v15108_v26 = vadd.f32 %v21922_v22, %v21911_v7  ;;  %v15142_v63 = vadd.f32 %v22022_v33, %v22016_v34  ;;  %v8813_v30 = vadd.f32 %v15170_v46, %v8749_v11  ;;  %v8752_v18 = vadd.f32 %v15133_v40, %v8688_v16 }
 0x527   : > { %v15186_v20 = vpop.f32.mrf.mxu0  ;;  %v15147_v51 = vpop.f32.mrf.mxu1  ;;  %v15173_v60 = vadd.f32 %v21982_v31, %v21967_v56  ;;  %v8760_v38 = vadd.f32 %v15139_v35, %v8696_v57  ;;  %v15179_v23 = vadd.f32 %v22014_v58, %v22010_v19  ;;  %v8701_v5 = vadd.f32 %v15102_v13, %v8637_v61 }
 0x528   : > { %v8640_v45 = vadd.f32 %v15065_v42, %v24472_v59  ;;  %v15105_v10 = vadd.f32 %v24474_v52, %v24473_v43  ;;  %v15148_v7 = vadd.f32 %v15147_v51, %v15146_v28  ;;  %v8940_v34 = vrot.slane %v22054_v50, 1 }
 0x529   : > { %v15187_v1 = vpop.f32.mrf.mxu0  ;;  %v15149_v39 = vpop.f32.mrf.mxu1  ;;  %v8952_v33 = vrot.slane %v8951_v17, 1  ;;  %v8821_v9 = vadd.f32 %v15176_v53, %v8757_v25  ;;  %v8709_v27 = vadd.f32 %v15108_v26, %v8645_v48  ;;  %v8765_v56 = vadd.f32 %v15142_v63, %v8701_v5 }
 0x52a   : > { %v15182_v31 = vadd.f32 %v22024_v32, %v22018_v44  ;;  %v15145_v19 = vadd.f32 %v22039_v4, %v22028_v14  ;;  %v9042_v11 = vadd.f32 %v9041_v24, %v9040_v62  ;;  %v8824_v28 = vadd.f32 %v15179_v23, %v8760_v38 }
 0x52b   : > { %v15189_v3 = vpop.f32.mrf.mxu0  ;;  %v15150_v41 = vpop.f32.mrf.mxu1  ;;  %v8816_v51 = vadd.f32 %v15173_v60, %v8752_v18  ;;  %v9054_v39 = vadd.f32 %v9053_v15, %v9052_v36  ;;  %v8704_v49 = vadd.f32 %v15105_v10, %v8640_v45  ;;  %v8773_v40 = vadd.f32 %v15148_v7, %v8709_v27 }
 0x52c   : > { %v15188_v35 = vadd.f32 %v15187_v1, %v15186_v20  ;;  %v8941_v21 = vadd.f32 %v8940_v34, %v22054_v50  ;;  %v8953_v14 = vadd.f32 %v8952_v33, %v8951_v17  ;;  %v15185_v62 = vadd.f32 %v22047_v2, %v22032_v8 }
 0x52d   : > { %v15190_v55 = vpop.f32.mrf.mxu0  ;;  %v15309_v6 = vpop.f32.mrf.mxu1  ;;  %v8768_v4 = vadd.f32 %v15145_v19, %v8704_v49  ;;  %v8829_v36 = vadd.f32 %v15182_v31, %v8765_v56  ;;  %v9055_v0 = vrot.slane %v9054_v39, 1  ;;  %v9043_v57 = vrot.slane %v9042_v11, 1 }
 0x52e   : > { %v22102_v46 = vadd.f32 %v15309_v6, %v8821_v9  ;;  %v8837_v8 = vadd.f32 %v15188_v35, %v8773_v40  ;;  %v22136_v18 = vmul.f32 0.020408163, %v8953_v14  ;;  %v24475_v5 = vrot.slane %v22026_v47, 1 }
 0x52f   : > { %v8876_v22 = vpop.f32.mrf.mxu1  ;;  %v8832_v37 = vadd.f32 %v15185_v62, %v8768_v4  ;;  %v9044_v10 = vadd.f32 %v9043_v57, %v9042_v11  ;;  %v22146_v7 = vmul.f32 0.020408163, %v8941_v21  ;;  %v9087_v11 = vmul.f32 %v22041_v12, %v22041_v12 }
 0x530   : > { %v22096_v29 = vadd.f32 %v8876_v22, %v8813_v30  ;;  %v8988_v20 = vmul.f32 %v22102_v46, %v22102_v46  ;;  %v8958_v17 = vsel %vm8954_vm2, %v22102_v46, 0.0  ;;  %v9056_v30 = vadd.f32 %v9055_v0, %v9054_v39 }
 0x531   : > { %v15310_v58 = vpop.f32.mrf.mxu1  ;;  %v9020_v59 = vadd.f32 %v24475_v5, %v22026_v47  ;;  %v9089_v31 = vmul.f32 %v22136_v18, %v22136_v18  ;;  %v9083_v39 = vmul.f32 0.020408163, %v9044_v10  ;;  %v9088_v49 = vmul.f32 %v22146_v7, %v22146_v7 }
 0x532   : > { %v8978_v61 = vmul.f32 %v22096_v29, %v22096_v29  ;;  %v22107_v44 = vadd.f32 %v15310_v58, %v8824_v28  ;;  %v8955_v50 = vsel %vm8954_vm2, %v22096_v29, 0.0  ;;  %v9060_v48 = vsel %vm8954_vm2, %v8988_v20, 0.0 }
 0x533   : > { %v8879_v3 = vpop.f32.mrf.mxu1  ;;  %v9084_v56 = vmul.f32 0.020408163, %v9056_v30 }
 0x534   : > { %v22109_v32 = vadd.f32 %v8879_v3, %v8816_v51  ;;  %v9057_v13 = vsel %vm8954_vm2, %v8978_v61, 0.0  ;;  %v8993_v42 = vmul.f32 %v22107_v44, %v22107_v44  ;;  %v8960_v26 = vsel %vm8954_vm2, %v22107_v44, 0.0  ;;  %v24476_v61 = vld [vmem:[#allocation65_spill] sm:$0xff] }
 0x535   : > { %v15313_v24 = vpop.f32.mrf.mxu1  ;;  %v9081_v3 = vmul.f32 0.020408163, %v9020_v59  ;;  %v9086_v14 = vmul.f32 %v24476_v61, %v24476_v61  ;;  %v9094_v4 = vsub.f32 %v9084_v56, %v9089_v31 }
 0x536   : > { %v8956_v1 = vsel %vm8954_vm2, %v22109_v32, 0.0  ;;  %v8983_v15 = vmul.f32 %v22109_v32, %v22109_v32  ;;  %v22132_v63 = vadd.f32 %v15313_v24, %v8837_v8  ;;  %v9062_v45 = vsel %vm8954_vm2, %v8993_v42, 0.0 }
 0x537   : > { %v8957_v54 = vadd.f32 %v8956_v1, %v8955_v50  ;;  %v8892_v2 = vpop.f32.mrf.mxu1  ;;  %v9093_v50 = vsub.f32 %v9083_v39, %v9088_v49  ;;  %v9091_v0 = vsub.f32 %v9081_v3, %v9086_v14  ;;  %v24481_v3 = vld [vmem:[#allocation7_spill] sm:$0xff]  ;;  %v24482_v14 = vld [vmem:[#allocation6_spill] sm:$0xff] }
 0x538   : > { %v9058_v41 = vsel %vm8954_vm2, %v8983_v15, 0.0  ;;  %v22127_v16 = vadd.f32 %v8892_v2, %v8829_v36  ;;  %v9008_v33 = vmul.f32 %v22132_v63, %v22132_v63  ;;  %v8966_v28 = vsel %vm8954_vm2, %v22132_v63, 0.0  ;;  %v24477_v36 = vld [vmem:[#allocation16_spill] sm:$0xff] }
 0x539   : > { %v8959_v25 = vadd.f32 %v8958_v17, %v8957_v54  ;;  %v9059_v53 = vadd.f32 %v9058_v41, %v9057_v13  ;;  %v15314_v55 = vpop.f32.mrf.mxu1  ;;  %v9092_v20 = vsub.f32 %v24477_v36, %v9087_v11  ;;  %v9100_v17 = vadd.f32 0.001, %v9094_v4  ;;  %v24484_v36 = vld [vmem:[#allocation13_spill] sm:$0xff] }
 0x53a   : > { %v8998_v6 = vmul.f32 %v22127_v16, %v22127_v16  ;;  %v8962_v43 = vsel %vm8954_vm2, %v22127_v16, 0.0  ;;  %v9068_v21 = vsel %vm8954_vm2, %v9008_v33, 0.0  ;;  %v9099_v13 = vadd.f32 0.001, %v9093_v50 }
 0x53b   : > { %v9061_v60 = vadd.f32 %v9060_v48, %v9059_v53  ;;  %v8961_v38 = vadd.f32 %v8960_v26, %v8959_v25  ;;  %v8895_v23 = vpop.f32.mrf.mxu1  ;;  %v9098_v2 = vadd.f32 0.001, %v9092_v20  ;;  %v9097_v57 = vadd.f32 0.001, %v9091_v0 }
 0x53c   : > { %v22144_v52 = vadd.f32 %v8895_v23, %v8832_v37  ;;  %v9064_v9 = vsel %vm8954_vm2, %v8998_v6, 0.0  ;;  %17009 = vrsqrt.f32 %v9100_v17 }
 0x53d   : > { %v8963_v22 = vadd.f32 %v8962_v43, %v8961_v38  ;;  %v9063_v34 = vadd.f32 %v9062_v45, %v9061_v60  ;;  %17011 = vrsqrt.f32 %v9098_v2  ;;  %v17064_v38 = vmov 1966171168  }
 0x53e   : > { %v8964_v47 = vsel %vm8954_vm2, %v22144_v52, 0.0  ;;  %v9003_v27 = vmul.f32 %v22144_v52, %v22144_v52  ;;  %17013 = vrsqrt.f32 %v9099_v13  ;;  %v9115_v23 = vunpack.c.l.s4 %v17064_v38 }
 0x53f   : > { %v9065_v19 = vadd.f32 %v9064_v9, %v9063_v34  ;;  %v8965_v58 = vadd.f32 %v8964_v47, %v8963_v22  ;;  %17015 = vrsqrt.f32 %v9097_v57  ;;  %v24478_v9 = vld [vmem:[#allocation4_spill] sm:$0xff] }
 0x540   : > { %v9066_v51 = vsel %vm8954_vm2, %v9003_v27, 0.0  ;;  %v9116_v43 = vunpack.c.0.s8 %v9115_v23  ;;  %v24486_v57 = vld [vmem:[#allocation52_spill] sm:$0xff] }
 0x541   : > { %v8967_v40 = vadd.f32 %v8966_v28, %v8965_v58  ;;  %v9067_v35 = vadd.f32 %v9066_v51, %v9065_v19  ;;  %v9096_v28 = vld [vmem:[%s24026_s5] sm:$0x1f]  ;;  %v24492_v23 = vld [vmem:[#allocation12_spill] sm:$0xff] }
 0x542   : > { %v22169_v47 = vsub.s32 %v9116_v43, %v24478_v9 }
 0x543   : > { %v8968_v62 = vrot.slane %v8967_v40, 4  ;;  %v9069_v24 = vadd.f32 %v9068_v21, %v9067_v35 }
 0x544   : > { %24479 = vst [vmem:[#allocation62_spill] sm:$0xff] %v22169_v47 }
 0x545   : > { %v8969_v1 = vadd.f32 %v8968_v62, %v8967_v40  ;;  %v9070_v15 = vrot.slane %v9069_v24, 4  ;;  %v24480_v40 = vld [vmem:[#allocation5_spill] sm:$0xff]  ;;  %v24483_v62 = vld [vmem:[#allocation8_spill] sm:$0xff] }
 0x547   : > { %v8970_v54 = vrot.slane %v8969_v1, 2  ;;  %v9071_v8 = vadd.f32 %v9070_v15, %v9069_v24 }
 0x549   : > { %v8971_v42 = vadd.f32 %v8970_v54, %v8969_v1  ;;  %v9072_v41 = vrot.slane %v9071_v8, 2  ;;  %v17010_v59 = vpop.eup %17009 }
 0x54a   : > { %v17012_v45 = vpop.eup %17011 }
 0x54b   : > { %v8972_v25 = vrot.slane %v8971_v42, 1  ;;  %v9073_v53 = vadd.f32 %v9072_v41, %v9071_v8  ;;  %v17014_v10 = vpop.eup %17013  ;;  %v24485_v41 = vld [vmem:[#allocation17_spill] sm:$0xff] }
 0x54c   : > { %v9113_v22 = vcombine.low %v17014_v10, %v17010_v59  ;;  %v17016_v34 = vpop.eup %17015  ;;  %v24494_v10 = vld [vmem:[#allocation37_spill] sm:$0xff] }
 0x54d   : > { %v8973_v55 = vadd.f32 %v8972_v25, %v8971_v42  ;;  %v9074_v37 = vrot.slane %v9073_v53, 1  ;;  %v9112_v33 = vcombine.low %v17016_v34, %v17012_v45  ;;  %v24493_v45 = vld [vmem:[#allocation24_spill] sm:$0xff]  ;;  %v24495_v34 = vld [vmem:[#allocation18_spill] sm:$0xff] }
 0x54e   : > { %v9127_v27 = vrot.slane %v9113_v22, %v22169_v47 }
 0x54f   : > { %v9075_v48 = vadd.f32 %v9074_v37, %v9073_v53  ;;  %v9080_v26 = vmul.f32 0.020408163, %v8973_v55  ;;  %v9120_v56 = vrot.slane %v9112_v33, %v22169_v47  ;;  %v24487_v53 = vld [vmem:[#allocation11_spill] sm:$0xff]  ;;  %v24488_v37 = vld [vmem:[#allocation60_spill] sm:$0xff] }
 0x551   : > { %v9085_v6 = vmul.f32 0.020408163, %v9075_v48  ;;  %v9090_v30 = vmul.f32 %v9080_v26, %v9080_v26  ;;  %v9135_v31 = vcombine.low %v9120_v56, %v9127_v27  ;;  %v24489_v48 = vld [vmem:[#allocation29_spill] sm:$0xff]  ;;  %v9153_v27 = vld [vmem:[%s24027_s6] sm:$0x1f] }
 0x552   : > { %v24496_v56 = vld [vmem:[#allocation61_spill] sm:$0xff] }
 0x553   : > { %v9095_v60 = vsub.f32 %v9085_v6, %v9090_v30  ;;  %v9142_v11 = vrot.slane %v9135_v31, %v22169_v47  ;;  %v24490_v6 = vld [vmem:[#allocation20_spill] sm:$0xff] }
 0x555   : > { %v9101_v5 = vadd.f32 0.001, %v9095_v60  ;;  %v24491_v60 = vld [vmem:[#allocation56_spill] sm:$0xff] }
 0x557   : > { %17017 = vrsqrt.f32 %v9101_v5 }
 0x564   : > { %v17018_v19 = vpop.eup %17017 }
 0x565   : > { %v9134_v58 = vrot.slane %v17018_v19, %v22169_v47  ;;  %v24497_v19 = vld [vmem:[#allocation21_spill] sm:$0xff] }
 0x567   : > { %v9149_v51 = vrot.slane %v9134_v58, %v22169_v47 }
 0x569   : > { %v9150_v39 = vcombine.low %v9142_v11, %v9149_v51  ;;  %v24498_v11 = vld [vmem:[#allocation75_spill] sm:$0xff] }
 0x56a   : > { %v24499_v51 = vld [vmem:[#allocation15_spill] sm:$0xff] }
 0x56b   : > { %v9152_v49 = vmul.f32 %v9150_v39, %v9096_v28 }
 0x56d   : > { %v9158_v35 = vrot.slane %v9152_v49, %v24480_v40  ;;  %v9162_v21 = vrot.slane %v9152_v49, %v24481_v3  ;;  %v9166_v4 = vrot.slane %v9152_v49, %v24482_v14  ;;  %v9170_v24 = vrot.slane %v9152_v49, %v24483_v62 }
 0x56e   : > { %v22184_v20 = vrot.slane %v9152_v49, %v24484_v36 }
 0x56f   : > { %v9180_v50 = vmul.f32 %v9158_v35, %v24476_v61  ;;  %v9181_v1 = vmul.f32 %v9162_v21, %v22041_v12  ;;  %v9182_v15 = vmul.f32 %v9166_v4, %v22146_v7  ;;  %v9183_v0 = vmul.f32 %v9170_v24, %v22136_v18 }
 0x570   : > { %v9184_v17 = vmul.f32 %v22184_v20, %v9080_v26  ;;  %v9255_v54 = vmul.f32 %v22184_v20, %v22127_v16  ;;  %v9260_v8 = vmul.f32 %v22184_v20, %v22144_v52  ;;  %v9232_v7 = vmul.f32 %v9162_v21, %v24485_v41  ;;  %v24505_v41 = vld [vmem:[#allocation26_spill] sm:$0xff] }
 0x571   : > { %v9190_v2 = vcombine.low %v9180_v50, %v9181_v1  ;;  %v9191_v13 = vcombine.low %v9182_v15, %v9183_v0  ;;  %v9237_v18 = vmul.f32 %v9162_v21, %v24486_v57  ;;  %v9234_v55 = vmul.f32 %v9170_v24, %v24487_v53  ;;  %v24500_v50 = vld [vmem:[#allocation19_spill] sm:$0xff]  ;;  %v24501_v15 = vld [vmem:[#allocation28_spill] sm:$0xff] }
 0x572   : > { %v9212_v42 = vrot.slane %v9184_v17, %v22169_v47  ;;  %v9239_v16 = vmul.f32 %v9170_v24, %v24488_v37  ;;  %v9231_v26 = vmul.f32 %v9158_v35, %v24489_v48  ;;  %v9236_v30 = vmul.f32 %v9158_v35, %v24490_v6  ;;  %v24502_v17 = vld [vmem:[#allocation58_spill] sm:$0xff]  ;;  %v24508_v6 = vld [vmem:[#allocation25_spill] sm:$0xff] }
 0x573   : > { %v9198_v61 = vrot.slane %v9190_v2, %v22169_v47  ;;  %v9205_v12 = vrot.slane %v9191_v13, %v22169_v47  ;;  %v9233_v38 = vmul.f32 %v9166_v4, %v24491_v60  ;;  %v9238_v5 = vmul.f32 %v9166_v4, %v24492_v23  ;;  %v24503_v13 = vld [vmem:[#allocation23_spill] sm:$0xff]  ;;  %v24507_v48 = vld [vmem:[#allocation22_spill] sm:$0xff] }
 0x574   : > { %v9227_v52 = vrot.slane %v9212_v42, %v22169_v47  ;;  %v9242_v43 = vmul.f32 %v9162_v21, %v24493_v45  ;;  %v9247_v22 = vmul.f32 %v9162_v21, %v24494_v10  ;;  %v9244_v33 = vmul.f32 %v9170_v24, %v24495_v34  ;;  %v24509_v23 = vld [vmem:[#allocation31_spill] sm:$0xff]  ;;  %v24510_v45 = vld [vmem:[#allocation30_spill] sm:$0xff]  ;;  %v24511_v34 = vld [vmem:[#allocation32_spill] sm:$0xff] }
 0x575   : > { %v9213_v25 = vcombine.low %v9198_v61, %v9205_v12  ;;  %v9249_v31 = vmul.f32 %v9170_v24, %v24496_v56  ;;  %v9241_v58 = vmul.f32 %v9158_v35, %v24497_v19  ;;  %v9246_v28 = vmul.f32 %v9158_v35, %v24498_v11  ;;  %v24504_v61 = vld [vmem:[#allocation64_spill] sm:$0xff]  ;;  %v24512_v19 = vld [vmem:[#allocation27_spill] sm:$0xff] }
 0x576   : > { %v9243_v39 = vmul.f32 %v9166_v4, %v24499_v51  ;;  %v9248_v1 = vmul.f32 %v9166_v4, %v24500_v50  ;;  %v9252_v0 = vmul.f32 %v9162_v21, %v24501_v15  ;;  %v9257_v2 = vmul.f32 %v9162_v21, %v24502_v17 }
 0x577   : > { %v9220_v59 = vrot.slane %v9213_v25, %v22169_v47  ;;  %v9254_v42 = vmul.f32 %v9170_v24, %v24503_v13  ;;  %v22223_v12 = vmul.f32 %v9170_v24, %v24504_v61  ;;  %v22226_v57 = vmul.f32 %v9158_v35, %v24505_v41  ;;  %v24506_v25 = vld [vmem:[#allocation77_spill] sm:$0xff] }
 0x578   : > { %v22229_v53 = vmul.f32 %v9158_v35, %v24506_v25  ;;  %v22235_v60 = vmul.f32 %v9166_v4, %v24508_v6  ;;  %v22241_v10 = vmul.f32 %v9170_v24, %v24510_v45  ;;  %v22244_v56 = vmul.f32 %v9158_v35, %v24511_v34  ;;  %v16577_v6 = vld [vmem:[%s21689_s18 + $0x1bc] ss:$36 sps:$4 sm:$0xff]   ;;  %v16583_v34 = vld [vmem:[%s21689_s18 + $0x994] ss:$36 sps:$4 sm:$0xff]  }
 0x579   : > { %v9228_v49 = vcombine.low %v9220_v59, %v9227_v52  ;;  %v22232_v52 = vmul.f32 %v9166_v4, %v24507_v48  ;;  %v22238_v59 = vmul.f32 %v9162_v21, %v24509_v23  ;;  %v22247_v11 = vmul.f32 %v9166_v4, %v24512_v19 }
 0x57a   : > { %v22268_v4 = vmul.f32 %v22184_v20, %v22109_v32  ;;  %v22276_v50 = vmul.f32 %v22184_v20, %v22107_v44 }
 0x57b   : > { %v9230_v37 = vsub.f32 %v9153_v27, %v9228_v49  ;;  %v22251_v27 = vmul.f32 %v22184_v20, %v22096_v29  ;;  %v22272_v29 = vmul.f32 %v22184_v20, %v22102_v46 }
 0x57d   : > { %v22254_v51 = vrot.slane %v9230_v37, %v24480_v40  ;;  %v22257_v49 = vrot.slane %v9230_v37, %v24481_v3  ;;  %v22260_v21 = vrot.slane %v9230_v37, %v24482_v14  ;;  %v9282_v24 = vrot.slane %v9230_v37, %v24483_v62 }
 0x57e   : > { %v22264_v35 = vrot.slane %v9230_v37, %v24484_v36  ;;  %v16934_v36 = vld [vmem:[%s21689_s18 + $0x6e0] ss:$36 sps:$4 sm:$0xff]  }
 0x57f   : > { %v9293_v15 = vadd.f32 %v22257_v49, %v9232_v7  ;;  %v9298_v17 = vadd.f32 %v22257_v49, %v9237_v18  ;;  %v9295_v13 = vadd.f32 %v9282_v24, %v9234_v55  ;;  %v9300_v61 = vadd.f32 %v9282_v24, %v9239_v16  ;;  %v16572_v18 = vld [vmem:[%s21689_s18 + $0x9d8] ss:$36 sps:$4 sm:$0xff]  }
 0x580   : > { %v9316_v41 = vadd.f32 %v22264_v35, %v9255_v54  ;;  %v9321_v32 = vadd.f32 %v22264_v35, %v9260_v8  ;;  %v9292_v25 = vadd.f32 %v22254_v51, %v9231_v26  ;;  %v9297_v46 = vadd.f32 %v22254_v51, %v9236_v30  ;;  %v16569_v54 = vld [vmem:[%s21689_s18 + $0x200] ss:$36 sps:$4 sm:$0xff]  }
 0x581   : > { %v22284_v37 = vpack.c.bf16 %v9298_v17, %v9293_v15  ;;  %v22286_v48 = vpack.c.bf16 %v9300_v61, %v9295_v13  ;;  %v9294_v44 = vadd.f32 %v22260_v21, %v9233_v38  ;;  %v9299_v7 = vadd.f32 %v22260_v21, %v9238_v5  ;;  %v16592_v13 = vld [vmem:[%s21689_s18 + $0x94c] ss:$36 sps:$4 sm:$0xff]   ;;  %v16580_v61 = vld [vmem:[%s21689_s18 + $0x174] ss:$36 sps:$4 sm:$0xff]  }
 0x582   : > { %v22291_v55 = vpack.c.bf16 %v9321_v32, %v9316_v41  ;;  %v22294_v16 = vpack.c.bf16 %v9297_v46, %v9292_v25  ;;  %v9303_v8 = vadd.f32 %v22257_v49, %v9242_v43  ;;  %v9308_v26 = vadd.f32 %v22257_v49, %v9247_v22 }
 0x583   : > { %11471 = vmatprep.mubr.bf16.mxu0 %v22284_v37  ;;  %11542 = vmatprep.mubr.bf16.mxu1 %v22286_v48  ;;  %v22300_v30 = vpack.c.bf16 %v9299_v7, %v9294_v44  ;;  %v9305_v38 = vadd.f32 %v9282_v24, %v9244_v33  ;;  %v9310_v5 = vadd.f32 %v9282_v24, %v9249_v31  ;;  %v16581_v31 = vld [vmem:[%s21689_s18 + $0x990] ss:$36 sps:$4 sm:$0xff]  }
 0x584   : > { %11472 = vmatmul.mubr.bf16.vlgmr.msra.gmra.mxu0 %v22294_v16  ;;  %v22304_v23 = vpack.c.bf16 %v9308_v26, %v9303_v8  ;;  %v9302_v45 = vadd.f32 %v22254_v51, %v9241_v58  ;;  %v9307_v43 = vadd.f32 %v22254_v51, %v9246_v28  ;;  %v9304_v22 = vadd.f32 %v22260_v21, %v9243_v39  ;;  %v16575_v58 = vld [vmem:[%s21689_s18 + $0x1b8] ss:$36 sps:$4 sm:$0xff]  }
 0x585   : > { %11543 = vmatmul.mubr.bf16.vlgmr.msra.gmra.mxu1 %v22300_v30  ;;  %v22311_v19 = vpack.c.bf16 %v9310_v5, %v9305_v38  ;;  %11590 = vmatpush1.bf16.msra.mxu0 %v16572_v18  ;;  %v9309_v33 = vadd.f32 %v22260_v21, %v9248_v1  ;;  %v9313_v15 = vadd.f32 %v22257_v49, %v9252_v0  ;;  %v16586_v18 = vld [vmem:[%s21689_s18 + $0x12c] ss:$36 sps:$4 sm:$0xff]   ;;  %v16595_v26 = vld [vmem:[%s21689_s18 + $0x9c] ss:$36 sps:$4 sm:$0xff]  }
 0x586   : > { %11653 = vmatpush1.bf16.msra.mxu1 %v16569_v54  ;;  %11481 = vmatprep.mubr.bf16.mxu0 %v22304_v23  ;;  %v22318_v17 = vpack.c.bf16 %v9307_v43, %v9302_v45  ;;  %v9318_v28 = vadd.f32 %v22257_v49, %v9257_v2  ;;  %v9315_v39 = vadd.f32 %v9282_v24, %v9254_v42  ;;  %v16590_v54 = vld [vmem:[%s21689_s18 + $0x948] ss:$36 sps:$4 sm:$0xff]   ;;  %v16593_v5 = vld [vmem:[%s21689_s18 + $0x98] ss:$36 sps:$4 sm:$0xff]   ;;  %v16596_v45 = vld [vmem:[%s21689_s18 + $0x50] ss:$36 sps:$4 sm:$0xff]  }
 0x587   : > { %11552 = vmatprep.mubr.bf16.mxu1 %v22311_v19  ;;  %11654 = vmatprep.subr.bf16.mxu1 %v16577_v6  ;;  %v22324_v41 = vpack.c.bf16 %v9309_v33, %v9304_v22  ;;  %v9320_v1 = vadd.f32 %v9282_v24, %v22223_v12  ;;  %v9312_v0 = vadd.f32 %v22254_v51, %v22226_v57  ;;  %v16598_v6 = vld [vmem:[%s21689_s18 + $0x54] ss:$36 sps:$4 sm:$0xff]   ;;  %v24515_v33 = vmov 0  }
 0x588   : > { %11591 = vmatprep.subr.bf16.mxu0 %v16583_v34  ;;  %v22329_v32 = vpack.c.bf16 %v9318_v28, %v9313_v15  ;;  %v9317_v2 = vadd.f32 %v22254_v51, %v22229_v53  ;;  %v9314_v42 = vadd.f32 %v22260_v21, %v22232_v52  ;;  %v9319_v25 = vadd.f32 %v22260_v21, %v22235_v60  ;;  %v16578_v53 = vld [vmem:[%s21689_s18 + $0x170] ss:$36 sps:$4 sm:$0xff]   ;;  %v16607_v15 = vld [vmem:[%s21689_s18 + $0x444] ss:$36 sps:$4 sm:$0xff]  }
 0x589   : > { %v22337_v46 = vpack.c.bf16 %v9320_v1, %v9315_v39  ;;  %11592 = vmatpush1.bf16.msra.mxu0 %v16581_v31  ;;  %v9323_v12 = vadd.f32 %v22257_v49, %v22238_v59  ;;  %v9325_v57 = vadd.f32 %v9282_v24, %v22241_v10  ;;  %v9322_v44 = vadd.f32 %v22254_v51, %v22244_v56  ;;  %v16601_v56 = vld [vmem:[%s21689_s18 + $0x904] ss:$36 sps:$4 sm:$0xff]   ;;  %v16604_v34 = vld [vmem:[%s21689_s18 + $0xc] ss:$36 sps:$4 sm:$0xff]   ;;  %v16616_v39 = vld [vmem:[%s21689_s18 + $0x63c] ss:$36 sps:$4 sm:$0xff]  }
 0x58a   : > { %11655 = vmatpush1.bf16.msra.mxu1 %v16575_v58  ;;  %v22345_v7 = vpack.c.bf16 %v9317_v2, %v9312_v0  ;;  %v22347_v52 = vpack.c.bf16 %v9319_v25, %v9314_v42  ;;  %11593 = vmatprep.subr.bf16.mxu0 %v16592_v13  ;;  %v9324_v60 = vadd.f32 %v22260_v21, %v22247_v11  ;;  %v16602_v31 = vld [vmem:[%s21689_s18 + $0x8] ss:$36 sps:$4 sm:$0xff]   ;;  %v16608_v58 = vld [vmem:[%s21689_s18 + $0x680] ss:$36 sps:$4 sm:$0xff]   ;;  %v16611_v1 = vld [vmem:[%s21689_s18 + $0x3f8] ss:$36 sps:$4 sm:$0xff]  }
 0x58b   : > { %11656 = vmatprep.subr.bf16.mxu1 %v16580_v61  ;;  %v9296_v59 = vadd.f32 %v22264_v35, %v22251_v27  ;;  %v9265_v10 = vmul.f32 %v22184_v20, %v22132_v63  ;;  %v9301_v51 = vadd.f32 %v22264_v35, %v22268_v4  ;;  %v9306_v11 = vadd.f32 %v22264_v35, %v22272_v29  ;;  %v16584_v27 = vld [vmem:[%s21689_s18 + $0x128] ss:$36 sps:$4 sm:$0xff]   ;;  %v16599_v29 = vld [vmem:[%s21689_s18 + $0x900] ss:$36 sps:$4 sm:$0xff]   ;;  %v16614_v61 = vld [vmem:[%s21689_s18 + $0x638] ss:$36 sps:$4 sm:$0xff]  }
 0x58c   : > { %11482 = vmatmul.mubr.bf16.gmra.mxu0 %v22318_v17  ;;  %v9311_v49 = vadd.f32 %v22264_v35, %v22276_v50  ;;  %v22368_v63 = vadd.s32 48, %v24478_v9  ;;  %v16589_v4 = vld [vmem:[%s21689_s18 + $0xe4] ss:$36 sps:$4 sm:$0xff]   ;;  %v22391_v8 = vpack.c.bf16 %v9323_v12, %v9323_v12  ;;  %v22395_v38 = vpack.c.bf16 %v9325_v57, %v9325_v57  ;;  %v16613_v13 = vld [vmem:[%s21689_s18 + $0x3fc] ss:$36 sps:$4 sm:$0xff]  }
 0x58d   : > { %11553 = vmatmul.mubr.bf16.gmra.mxu1 %v22324_v41  ;;  %11491 = vmatprep.mubr.bf16.mxu0 %v22329_v32  ;;  %v22371_v20 = vadd.f32 %v22264_v35, %v9265_v10  ;;  %v22375_v21 = vpack.c.bf16 %v9301_v51, %v9296_v59  ;;  %v16610_v50 = vld [vmem:[%s21689_s18 + $0x684] ss:$36 sps:$4 sm:$0xff]   ;;  %v22407_v43 = vpack.c.bf16 %v9322_v44, %v9322_v44  ;;  %v16622_v0 = vld [vmem:[%s21689_s18 + $0x5f4] ss:$36 sps:$4 sm:$0xff]   ;;  %v16628_v12 = vld [vmem:[%s21689_s18 + $0x5ac] ss:$36 sps:$4 sm:$0xff]  }
 0x58e   : > { %11657 = vmatpush1.bf16.msra.mxu1 %v16578_v53  ;;  %11562 = vmatprep.mubr.bf16.mxu1 %v22337_v46  ;;  %v22377_v24 = vpack.c.bf16 %v9311_v49, %v9306_v11  ;;  %vm9341_vm3 = vcmp.lt.s32.totalorder %v22368_v63, 49  ;;  %v16587_v9 = vld [vmem:[%s21689_s18 + $0xe0] ss:$36 sps:$4 sm:$0xff]   ;;  %v22409_v22 = vpack.c.bf16 %v9324_v60, %v9324_v60  ;;  %v16619_v2 = vld [vmem:[%s21689_s18 + $0x3b4] ss:$36 sps:$4 sm:$0xff]  }
 0x58f   : > { %11658 = vmatprep.subr.bf16.mxu1 %v16586_v18  ;;  %11594 = vmatpush1.bf16.msra.mxu0 %v16590_v54  ;;  %vm22387_vm4 = vmpackc.low %vm9341_vm3, %vm9341_vm3  ;;  %v16605_v28 = vld [vmem:[%s21689_s18 + $0x440] ss:$36 sps:$4 sm:$0xff]   ;;  %v16620_v42 = vld [vmem:[%s21689_s18 + $0x5f0] ss:$36 sps:$4 sm:$0xff]  }
 0x590   : > { %11595 = vmatprep.subr.bf16.mxu0 %v16601_v56  ;;  %v16617_v25 = vld [vmem:[%s21689_s18 + $0x3b0] ss:$36 sps:$4 sm:$0xff]   ;;  %v16626_v44 = vld [vmem:[%s21689_s18 + $0x5a8] ss:$36 sps:$4 sm:$0xff]   ;;  %v16632_v54 = vld [vmem:[%s21689_s18 + $0x560] ss:$36 sps:$4 sm:$0xff]  }
 0x591   : > { %v16625_v57 = vld [vmem:[%s21689_s18 + $0x36c] ss:$36 sps:$4 sm:$0xff]   ;;  %v16634_v60 = vld [vmem:[%s21689_s18 + $0x564] ss:$36 sps:$4 sm:$0xff]   ;;  %v16640_v10 = vld [vmem:[%s21689_s18 + $0x51c] ss:$36 sps:$4 sm:$0xff]  }
 0x592   : > { %11659 = vmatpush1.bf16.msra.mxu1 %v16584_v27  ;;  %v16623_v53 = vld [vmem:[%s21689_s18 + $0x368] ss:$36 sps:$4 sm:$0xff]   ;;  %v16629_v59 = vld [vmem:[%s21689_s18 + $0x320] ss:$36 sps:$4 sm:$0xff]   ;;  %v16638_v51 = vld [vmem:[%s21689_s18 + $0x518] ss:$36 sps:$4 sm:$0xff]  }
 0x593   : > { %11660 = vmatprep.subr.bf16.mxu1 %v16589_v4  ;;  %11596 = vmatpush1.bf16.msra.mxu0 %v16599_v29  ;;  %v16631_v18 = vld [vmem:[%s21689_s18 + $0x324] ss:$36 sps:$4 sm:$0xff]   ;;  %v16637_v56 = vld [vmem:[%s21689_s18 + $0x2dc] ss:$36 sps:$4 sm:$0xff]   ;;  %v16646_v49 = vld [vmem:[%s21689_s18 + $0x4d4] ss:$36 sps:$4 sm:$0xff]  }
 0x594   : > { %11492 = vmatmul.mubr.bf16.gmra.mxu0 %v22345_v7  ;;  %11723 = vmatprep.subr.bf16.mxu0 %v16610_v50  ;;  %v16635_v11 = vld [vmem:[%s21689_s18 + $0x2d8] ss:$36 sps:$4 sm:$0xff]   ;;  %v9390_v4 = vsel %vm9341_vm3, %v22371_v20, 0.0  ;;  %v16644_v29 = vld [vmem:[%s21689_s18 + $0x4d0] ss:$36 sps:$4 sm:$0xff]  }
 0x595   : > { %11563 = vmatmul.mubr.bf16.gmra.mxu1 %v22347_v52  ;;  %14780 = vmatprep.mubr.msk.bf16.mxu0 %vm22387_vm4, %v22391_v8  ;;  %v16643_v27 = vld [vmem:[%s21689_s18 + $0x294] ss:$36 sps:$4 sm:$0xff]   ;;  %v16650_v63 = vld [vmem:[%s21689_s18 + $0x488] ss:$36 sps:$4 sm:$0xff]  }
 0x596   : > { %11661 = vmatpush1.bf16.msra.mxu1 %v16587_v9  ;;  %14786 = vmatprep.mubr.msk.bf16.mxu1 %vm22387_vm4, %v22395_v38  ;;  %v16641_v50 = vld [vmem:[%s21689_s18 + $0x290] ss:$36 sps:$4 sm:$0xff]   ;;  %v22460_v9 = vpack.c.bf16 %v9390_v4, %v9390_v4  ;;  %v16647_v20 = vld [vmem:[%s21689_s18 + $0x248] ss:$36 sps:$4 sm:$0xff]  }
 0x597   : > { %11662 = vmatprep.subr.bf16.mxu1 %v16595_v26  ;;  %v16652_v26 = vld [vmem:[%s21689_s18 + $0x48c] ss:$36 sps:$4 sm:$0xff]   ;;  %v16700_v4 = vld [vmem:[%s21689_s18 + $0x1c4] ss:$36 sps:$4 sm:$0xff]  }
 0x59a   : > { %11663 = vmatpush1.bf16.msra.mxu1 %v16593_v5  ;;  %v16649_v5 = vld [vmem:[%s21689_s18 + $0x24c] ss:$36 sps:$4 sm:$0xff]  }
 0x59b   : > { %11664 = vmatprep.subr.bf16.mxu1 %v16598_v6  ;;  %v16655_v6 = vld [vmem:[%s21689_s18 + $0x8c4] ss:$36 sps:$4 sm:$0xff]  }
 0x59c   : > { %14783 = vmatmul.mubr.msk.bf16.gmra.mxu0 %vm22387_vm4, %v22407_v43 }
 0x59d   : > { %14789 = vmatmul.mubr.msk.bf16.gmra.mxu1 %vm22387_vm4, %v22409_v22  ;;  %11613 = vmatprep.mubr.bf16.mxu0 %v24515_v33 }
 0x59e   : > { %11665 = vmatpush1.bf16.msra.mxu1 %v16596_v45  ;;  %11684 = vmatprep.mubr.bf16.mxu1 %v22284_v37  ;;  %v16664_v45 = vld [vmem:[%s21689_s18 + $0x9e4] ss:$36 sps:$4 sm:$0xff]  }
 0x59f   : > { %11666 = vmatprep.subr.bf16.mxu1 %v16604_v34  ;;  %v16653_v34 = vld [vmem:[%s21689_s18 + $0x8c0] ss:$36 sps:$4 sm:$0xff]  }
 0x5a2   : > { %11667 = vmatpush1.bf16.msra.mxu1 %v16602_v31  ;;  %v16658_v31 = vld [vmem:[%s21689_s18 + $0x87c] ss:$36 sps:$4 sm:$0xff]  }
 0x5a3   : > { %11668 = vmatprep.subr.bf16.mxu1 %v16607_v15  ;;  %v16662_v15 = vld [vmem:[%s21689_s18 + $0x9e0] ss:$36 sps:$4 sm:$0xff]  }
 0x5a4   : > { %14790 = vmatmul.mubr.msk.bf16.vlgmr.msra.gmra.mxu0 %vm8954_vm2, %v22375_v21 }
 0x5a5   : > { %11724 = vmatpush1.bf16.msra.mxu0 %v16608_v58  ;;  %11623 = vmatprep.mubr.bf16.mxu0 %v24515_v33  ;;  %v16673_v58 = vld [vmem:[%s21689_s18 + $0x99c] ss:$36 sps:$4 sm:$0xff]  }
 0x5a6   : > { %11669 = vmatpush2.bf16.msra.mxu1 %v16605_v28  ;;  %11725 = vmatprep.subr.bf16.mxu0 %v16616_v39  ;;  %v16656_v28 = vld [vmem:[%s21689_s18 + $0x878] ss:$36 sps:$4 sm:$0xff]  }
 0x5a7   : > { %11670 = vmatprep.subr.bf16.mxu1 %v16613_v13  ;;  %v16661_v39 = vld [vmem:[%s21689_s18 + $0x834] ss:$36 sps:$4 sm:$0xff]  }
 0x5a8   : > { %v16671_v13 = vld [vmem:[%s21689_s18 + $0x998] ss:$36 sps:$4 sm:$0xff]  }
 0x5a9   : > { %11726 = vmatpush1.bf16.msra.mxu0 %v16614_v61  ;;  %v16679_v61 = vld [vmem:[%s21689_s18 + $0x954] ss:$36 sps:$4 sm:$0xff]  }
 0x5aa   : > { %11671 = vmatpush2.bf16.msra.mxu1 %v16611_v1  ;;  %11727 = vmatprep.subr.bf16.mxu0 %v16622_v0  ;;  %v16659_v1 = vld [vmem:[%s21689_s18 + $0x830] ss:$36 sps:$4 sm:$0xff]  }
 0x5ab   : > { %11672 = vmatprep.subr.bf16.mxu1 %v16619_v2  ;;  %v16667_v0 = vld [vmem:[%s21689_s18 + $0x7ec] ss:$36 sps:$4 sm:$0xff]  }
 0x5ac   : > { %14791 = vmatmul.mubr.msk.bf16.gmra.mxu0 %vm8954_vm2, %v22377_v24  ;;  %v16677_v2 = vld [vmem:[%s21689_s18 + $0x950] ss:$36 sps:$4 sm:$0xff]  }
 0x5ad   : > { %11728 = vmatpush1.bf16.msra.mxu0 %v16620_v42  ;;  %11633 = vmatprep.mubr.bf16.mxu0 %v24515_v33  ;;  %v16685_v42 = vld [vmem:[%s21689_s18 + $0x90c] ss:$36 sps:$4 sm:$0xff]  }
 0x5ae   : > { %11673 = vmatpush2.bf16.msra.mxu1 %v16617_v25  ;;  %11729 = vmatprep.subr.bf16.mxu0 %v16628_v12  ;;  %v16665_v25 = vld [vmem:[%s21689_s18 + $0x7e8] ss:$36 sps:$4 sm:$0xff]  }
 0x5af   : > { %11674 = vmatprep.subr.bf16.mxu1 %v16625_v57  ;;  %v16670_v12 = vld [vmem:[%s21689_s18 + $0x7a4] ss:$36 sps:$4 sm:$0xff]  }
 0x5b0   : > { %v16683_v57 = vld [vmem:[%s21689_s18 + $0x908] ss:$36 sps:$4 sm:$0xff]  }
 0x5b1   : > { %11730 = vmatpush1.bf16.msra.mxu0 %v16626_v44  ;;  %v16691_v44 = vld [vmem:[%s21689_s18 + $0x68c] ss:$36 sps:$4 sm:$0xff]  }
 0x5b2   : > { %11675 = vmatpush2.bf16.msra.mxu1 %v16623_v53  ;;  %11731 = vmatprep.subr.bf16.mxu0 %v16634_v60  ;;  %v16668_v53 = vld [vmem:[%s21689_s18 + $0x7a0] ss:$36 sps:$4 sm:$0xff]  }
 0x5b3   : > { %11676 = vmatprep.subr.bf16.mxu1 %v16631_v18  ;;  %v16676_v60 = vld [vmem:[%s21689_s18 + $0x75c] ss:$36 sps:$4 sm:$0xff]  }
 0x5b4   : > { %14792 = vmatmul.mubr.msk.bf16.gmra.mxu0 %vm8954_vm2, %v22291_v55  ;;  %v16674_v18 = vld [vmem:[%s21689_s18 + $0x758] ss:$36 sps:$4 sm:$0xff]  }
 0x5b5   : > { %11732 = vmatpush1.bf16.msra.mxu0 %v16632_v54  ;;  %11643 = vmatprep.mubr.bf16.mxu0 %v24515_v33  ;;  %v16682_v54 = vld [vmem:[%s21689_s18 + $0x714] ss:$36 sps:$4 sm:$0xff]  }
 0x5b6   : > { %11677 = vmatpush2.bf16.msra.mxu1 %v16629_v59  ;;  %11733 = vmatprep.subr.bf16.mxu0 %v16640_v10  ;;  %v16680_v59 = vld [vmem:[%s21689_s18 + $0x710] ss:$36 sps:$4 sm:$0xff]  }
 0x5b7   : > { %11678 = vmatprep.subr.bf16.mxu1 %v16637_v56  ;;  %v16688_v10 = vld [vmem:[%s21689_s18 + $0x6cc] ss:$36 sps:$4 sm:$0xff]  }
 0x5b8   : > { %v16686_v56 = vld [vmem:[%s21689_s18 + $0x6c8] ss:$36 sps:$4 sm:$0xff]  }
 0x5b9   : > { %11734 = vmatpush1.bf16.msra.mxu0 %v16638_v51  ;;  %v16694_v51 = vld [vmem:[%s21689_s18 + $0x20c] ss:$36 sps:$4 sm:$0xff]  }
 0x5ba   : > { %11679 = vmatpush2.bf16.msra.mxu1 %v16635_v11  ;;  %11735 = vmatprep.subr.bf16.mxu0 %v16646_v49  ;;  %v16689_v11 = vld [vmem:[%s21689_s18 + $0x688] ss:$36 sps:$4 sm:$0xff]  }
 0x5bb   : > { %11680 = vmatprep.subr.bf16.mxu1 %v16643_v27  ;;  %v16692_v49 = vld [vmem:[%s21689_s18 + $0x208] ss:$36 sps:$4 sm:$0xff]  }
 0x5bc   : > { %14793 = vmatmul.mubr.msk.bf16.gmra.mxu0 %vm8954_vm2, %v22460_v9  ;;  %v16697_v27 = vld [vmem:[%s21689_s18 + $0x644] ss:$36 sps:$4 sm:$0xff]  }
 0x5bd   : > { %11736 = vmatpush1.bf16.msra.mxu0 %v16644_v29  ;;  %11755 = vmatprep.mubr.bf16.mxu0 %v22286_v48  ;;  %v16695_v29 = vld [vmem:[%s21689_s18 + $0x640] ss:$36 sps:$4 sm:$0xff]  }
 0x5be   : > { %11681 = vmatpush2.bf16.msra.mxu1 %v16641_v50  ;;  %11737 = vmatprep.subr.bf16.mxu0 %v16652_v26  ;;  %v16698_v50 = vld [vmem:[%s21689_s18 + $0x1c0] ss:$36 sps:$4 sm:$0xff]  }
 0x5bf   : > { %11682 = vmatprep.subr.bf16.mxu1 %v16649_v5  ;;  %v16703_v26 = vld [vmem:[%s21689_s18 + $0x5fc] ss:$36 sps:$4 sm:$0xff]  }
 0x5c0   : > { %v16706_v5 = vld [vmem:[%s21689_s18 + $0x17c] ss:$36 sps:$4 sm:$0xff]  }
 0x5c1   : > { %11738 = vmatpush1.bf16.msra.mxu0 %v16650_v63  ;;  %v16701_v63 = vld [vmem:[%s21689_s18 + $0x5f8] ss:$36 sps:$4 sm:$0xff]  }
 0x5c2   : > { %11683 = vmatpush2.bf16.msra.mxu1 %v16647_v20  ;;  %11739 = vmatprep.subr.bf16.mxu0 %v16655_v6  ;;  %v16704_v20 = vld [vmem:[%s21689_s18 + $0x178] ss:$36 sps:$4 sm:$0xff]  }
 0x5c3   : > { %11802 = vmatprep.subr.bf16.mxu1 %v16664_v45  ;;  %v16709_v6 = vld [vmem:[%s21689_s18 + $0x5b4] ss:$36 sps:$4 sm:$0xff]  }
 0x5c4   : > { %v16712_v45 = vld [vmem:[%s21689_s18 + $0x134] ss:$36 sps:$4 sm:$0xff]  }
 0x5c5   : > { %11685 = vmatmul.mubr.bf16.vlgmr.msra.gmra.mxu1 %v22294_v16  ;;  %11740 = vmatpush2.bf16.msra.mxu0 %v16653_v34  ;;  %v16707_v34 = vld [vmem:[%s21689_s18 + $0x5b0] ss:$36 sps:$4 sm:$0xff]  }
 0x5c6   : > { %11694 = vmatprep.mubr.bf16.mxu1 %v22304_v23  ;;  %11741 = vmatprep.subr.bf16.mxu0 %v16658_v31  ;;  %v16710_v31 = vld [vmem:[%s21689_s18 + $0x130] ss:$36 sps:$4 sm:$0xff]  }
 0x5c7   : > { %11803 = vmatpush1.bf16.msra.mxu1 %v16662_v15  ;;  %v16715_v15 = vld [vmem:[%s21689_s18 + $0x56c] ss:$36 sps:$4 sm:$0xff]  }
 0x5c8   : > { %11804 = vmatprep.subr.bf16.mxu1 %v16673_v58  ;;  %v16718_v58 = vld [vmem:[%s21689_s18 + $0xec] ss:$36 sps:$4 sm:$0xff]  }
 0x5c9   : > { %11742 = vmatpush2.bf16.msra.mxu0 %v16656_v28  ;;  %v16713_v28 = vld [vmem:[%s21689_s18 + $0x568] ss:$36 sps:$4 sm:$0xff]  }
 0x5ca   : > { %11743 = vmatprep.subr.bf16.mxu0 %v16661_v39  ;;  %v16716_v39 = vld [vmem:[%s21689_s18 + $0xe8] ss:$36 sps:$4 sm:$0xff]  }
 0x5cb   : > { %11805 = vmatpush1.bf16.msra.mxu1 %v16671_v13  ;;  %v16721_v13 = vld [vmem:[%s21689_s18 + $0x524] ss:$36 sps:$4 sm:$0xff]  }
 0x5cc   : > { %11806 = vmatprep.subr.bf16.mxu1 %v16679_v61  ;;  %v16724_v61 = vld [vmem:[%s21689_s18 + $0xa4] ss:$36 sps:$4 sm:$0xff]  }
 0x5cd   : > { %11695 = vmatmul.mubr.bf16.gmra.mxu1 %v22318_v17  ;;  %11744 = vmatpush2.bf16.msra.mxu0 %v16659_v1  ;;  %v16719_v1 = vld [vmem:[%s21689_s18 + $0x520] ss:$36 sps:$4 sm:$0xff]  }
 0x5ce   : > { %11704 = vmatprep.mubr.bf16.mxu1 %v22329_v32  ;;  %11745 = vmatprep.subr.bf16.mxu0 %v16667_v0  ;;  %v16722_v0 = vld [vmem:[%s21689_s18 + $0xa0] ss:$36 sps:$4 sm:$0xff]  }
 0x5cf   : > { %11807 = vmatpush1.bf16.msra.mxu1 %v16677_v2  ;;  %v16727_v2 = vld [vmem:[%s21689_s18 + $0x4dc] ss:$36 sps:$4 sm:$0xff]  }
 0x5d0   : > { %11808 = vmatprep.subr.bf16.mxu1 %v16685_v42  ;;  %v16730_v42 = vld [vmem:[%s21689_s18 + $0x5c] ss:$36 sps:$4 sm:$0xff]  }
 0x5d1   : > { %11746 = vmatpush2.bf16.msra.mxu0 %v16665_v25  ;;  %v16725_v25 = vld [vmem:[%s21689_s18 + $0x4d8] ss:$36 sps:$4 sm:$0xff]  }
 0x5d2   : > { %11747 = vmatprep.subr.bf16.mxu0 %v16670_v12  ;;  %v16728_v12 = vld [vmem:[%s21689_s18 + $0x58] ss:$36 sps:$4 sm:$0xff]  }
 0x5d3   : > { %11809 = vmatpush1.bf16.msra.mxu1 %v16683_v57  ;;  %v16733_v57 = vld [vmem:[%s21689_s18 + $0x494] ss:$36 sps:$4 sm:$0xff]  }
 0x5d4   : > { %11936 = vmatprep.subr.bf16.mxu1 %v16691_v44  ;;  %v16736_v44 = vld [vmem:[%s21689_s18 + $0x14] ss:$36 sps:$4 sm:$0xff]  }
 0x5d5   : > { %11705 = vmatmul.mubr.bf16.gmra.mxu1 %v22345_v7  ;;  %11748 = vmatpush2.bf16.msra.mxu0 %v16668_v53  ;;  %v16731_v53 = vld [vmem:[%s21689_s18 + $0x490] ss:$36 sps:$4 sm:$0xff]  }
 0x5d6   : > { %14796 = vmatprep.mubr.msk.bf16.mxu1 %vm22387_vm4, %v22391_v8  ;;  %11749 = vmatprep.subr.bf16.mxu0 %v16676_v60  ;;  %v16734_v60 = vld [vmem:[%s21689_s18 + $0x10] ss:$36 sps:$4 sm:$0xff]  }
 0x5d9   : > { %11750 = vmatpush2.bf16.msra.mxu0 %v16674_v18  ;;  %v16739_v18 = vld [vmem:[%s21689_s18 + $0x8cc] ss:$36 sps:$4 sm:$0xff]  }
 0x5da   : > { %11751 = vmatprep.subr.bf16.mxu0 %v16682_v54  ;;  %v16742_v54 = vld [vmem:[%s21689_s18 + $0x44c] ss:$36 sps:$4 sm:$0xff]  }
 0x5dd   : > { %14799 = vmatmul.mubr.msk.bf16.gmra.mxu1 %vm22387_vm4, %v22407_v43  ;;  %11752 = vmatpush2.bf16.msra.mxu0 %v16680_v59  ;;  %v16737_v59 = vld [vmem:[%s21689_s18 + $0x8c8] ss:$36 sps:$4 sm:$0xff]  }
 0x5de   : > { %11753 = vmatprep.subr.bf16.mxu0 %v16688_v10  ;;  %11826 = vmatprep.mubr.bf16.mxu1 %v24515_v33  ;;  %v16740_v10 = vld [vmem:[%s21689_s18 + $0x448] ss:$36 sps:$4 sm:$0xff]  }
 0x5e1   : > { %11754 = vmatpush2.bf16.msra.mxu0 %v16686_v56  ;;  %v16745_v56 = vld [vmem:[%s21689_s18 + $0x884] ss:$36 sps:$4 sm:$0xff]  }
 0x5e2   : > { %11865 = vmatprep.subr.bf16.mxu0 %v16694_v51  ;;  %v16748_v51 = vld [vmem:[%s21689_s18 + $0x404] ss:$36 sps:$4 sm:$0xff]  }
 0x5e4   : > { %11756 = vmatmul.mubr.bf16.vlgmr.msra.gmra.mxu0 %v22300_v30 }
 0x5e5   : > { %14806 = vmatmul.mubr.msk.bf16.vlgmr.msra.gmra.mxu1 %vm8954_vm2, %v22375_v21  ;;  %11765 = vmatprep.mubr.bf16.mxu0 %v22311_v19 }
 0x5e6   : > { %11937 = vmatpush1.bf16.msra.mxu1 %v16689_v11  ;;  %11866 = vmatpush1.bf16.msra.mxu0 %v16692_v49  ;;  %v16743_v11 = vld [vmem:[%s21689_s18 + $0x880] ss:$36 sps:$4 sm:$0xff]  }
 0x5e7   : > { %11938 = vmatprep.subr.bf16.mxu1 %v16697_v27  ;;  %11867 = vmatprep.subr.bf16.mxu0 %v16700_v4  ;;  %v16746_v49 = vld [vmem:[%s21689_s18 + $0x400] ss:$36 sps:$4 sm:$0xff]  }
 0x5e8   : > { %11836 = vmatprep.mubr.bf16.mxu1 %v24515_v33  ;;  %v16751_v27 = vld [vmem:[%s21689_s18 + $0x83c] ss:$36 sps:$4 sm:$0xff]  }
 0x5e9   : > { %v16754_v4 = vld [vmem:[%s21689_s18 + $0x3bc] ss:$36 sps:$4 sm:$0xff]  }
 0x5ea   : > { %11939 = vmatpush1.bf16.msra.mxu1 %v16695_v29  ;;  %11868 = vmatpush1.bf16.msra.mxu0 %v16698_v50  ;;  %v16749_v29 = vld [vmem:[%s21689_s18 + $0x838] ss:$36 sps:$4 sm:$0xff]  }
 0x5eb   : > { %11940 = vmatprep.subr.bf16.mxu1 %v16703_v26  ;;  %11869 = vmatprep.subr.bf16.mxu0 %v16706_v5  ;;  %v16752_v50 = vld [vmem:[%s21689_s18 + $0x3b8] ss:$36 sps:$4 sm:$0xff]  }
 0x5ec   : > { %11766 = vmatmul.mubr.bf16.gmra.mxu0 %v22324_v41  ;;  %v16757_v26 = vld [vmem:[%s21689_s18 + $0x7f4] ss:$36 sps:$4 sm:$0xff]  }
 0x5ed   : > { %14807 = vmatmul.mubr.msk.bf16.gmra.mxu1 %vm8954_vm2, %v22377_v24  ;;  %11775 = vmatprep.mubr.bf16.mxu0 %v22337_v46  ;;  %v16760_v5 = vld [vmem:[%s21689_s18 + $0x374] ss:$36 sps:$4 sm:$0xff]  }
 0x5ee   : > { %11941 = vmatpush1.bf16.msra.mxu1 %v16701_v63  ;;  %11870 = vmatpush1.bf16.msra.mxu0 %v16704_v20  ;;  %v16755_v63 = vld [vmem:[%s21689_s18 + $0x7f0] ss:$36 sps:$4 sm:$0xff]  }
 0x5ef   : > { %11942 = vmatprep.subr.bf16.mxu1 %v16709_v6  ;;  %11871 = vmatprep.subr.bf16.mxu0 %v16712_v45  ;;  %v16758_v20 = vld [vmem:[%s21689_s18 + $0x370] ss:$36 sps:$4 sm:$0xff]  }
 0x5f0   : > { %11846 = vmatprep.mubr.bf16.mxu1 %v24515_v33  ;;  %v16763_v6 = vld [vmem:[%s21689_s18 + $0x7ac] ss:$36 sps:$4 sm:$0xff]  }
 0x5f1   : > { %v16766_v45 = vld [vmem:[%s21689_s18 + $0x32c] ss:$36 sps:$4 sm:$0xff]  }
 0x5f2   : > { %11943 = vmatpush1.bf16.msra.mxu1 %v16707_v34  ;;  %11872 = vmatpush1.bf16.msra.mxu0 %v16710_v31  ;;  %v16761_v34 = vld [vmem:[%s21689_s18 + $0x7a8] ss:$36 sps:$4 sm:$0xff]  }
 0x5f3   : > { %11944 = vmatprep.subr.bf16.mxu1 %v16715_v15  ;;  %11873 = vmatprep.subr.bf16.mxu0 %v16718_v58  ;;  %v16764_v31 = vld [vmem:[%s21689_s18 + $0x328] ss:$36 sps:$4 sm:$0xff]  }
 0x5f4   : > { %11776 = vmatmul.mubr.bf16.gmra.mxu0 %v22347_v52  ;;  %v16769_v15 = vld [vmem:[%s21689_s18 + $0x764] ss:$36 sps:$4 sm:$0xff]  }
 0x5f5   : > { %14808 = vmatmul.mubr.msk.bf16.gmra.mxu1 %vm8954_vm2, %v22291_v55  ;;  %14802 = vmatprep.mubr.msk.bf16.mxu0 %vm22387_vm4, %v22395_v38  ;;  %v16772_v58 = vld [vmem:[%s21689_s18 + $0x2e4] ss:$36 sps:$4 sm:$0xff]  }
 0x5f6   : > { %11945 = vmatpush1.bf16.msra.mxu1 %v16713_v28  ;;  %11874 = vmatpush1.bf16.msra.mxu0 %v16716_v39  ;;  %v16767_v28 = vld [vmem:[%s21689_s18 + $0x760] ss:$36 sps:$4 sm:$0xff]  }
 0x5f7   : > { %11946 = vmatprep.subr.bf16.mxu1 %v16721_v13  ;;  %11875 = vmatprep.subr.bf16.mxu0 %v16724_v61  ;;  %v16770_v39 = vld [vmem:[%s21689_s18 + $0x2e0] ss:$36 sps:$4 sm:$0xff]  }
 0x5f8   : > { %11856 = vmatprep.mubr.bf16.mxu1 %v24515_v33  ;;  %v16775_v13 = vld [vmem:[%s21689_s18 + $0x71c] ss:$36 sps:$4 sm:$0xff]  }
 0x5f9   : > { %v16778_v61 = vld [vmem:[%s21689_s18 + $0x29c] ss:$36 sps:$4 sm:$0xff]  }
 0x5fa   : > { %11947 = vmatpush1.bf16.msra.mxu1 %v16719_v1  ;;  %11876 = vmatpush1.bf16.msra.mxu0 %v16722_v0  ;;  %v16773_v1 = vld [vmem:[%s21689_s18 + $0x718] ss:$36 sps:$4 sm:$0xff]  }
 0x5fb   : > { %11948 = vmatprep.subr.bf16.mxu1 %v16727_v2  ;;  %11877 = vmatprep.subr.bf16.mxu0 %v16730_v42  ;;  %v16776_v0 = vld [vmem:[%s21689_s18 + $0x298] ss:$36 sps:$4 sm:$0xff]  }
 0x5fc   : > { %14805 = vmatmul.mubr.msk.bf16.gmra.mxu0 %vm22387_vm4, %v22409_v22  ;;  %v16781_v2 = vld [vmem:[%s21689_s18 + $0x6d4] ss:$36 sps:$4 sm:$0xff]  }
 0x5fd   : > { %14809 = vmatmul.mubr.msk.bf16.gmra.mxu1 %vm8954_vm2, %v22460_v9  ;;  %11897 = vmatprep.mubr.bf16.mxu0 %v22284_v37  ;;  %v16784_v42 = vld [vmem:[%s21689_s18 + $0x254] ss:$36 sps:$4 sm:$0xff]  }
 0x5fe   : > { %11949 = vmatpush1.bf16.msra.mxu1 %v16725_v25  ;;  %11878 = vmatpush1.bf16.msra.mxu0 %v16728_v12  ;;  %v16779_v25 = vld [vmem:[%s21689_s18 + $0x6d0] ss:$36 sps:$4 sm:$0xff]  }
 0x5ff   : > { %11968 = vmatprep.mubr.bf16.mxu1 %v22286_v48  ;;  %11950 = vmatprep.subr.bf16.mxu1 %v16733_v57  ;;  %v16782_v12 = vld [vmem:[%s21689_s18 + $0x250] ss:$36 sps:$4 sm:$0xff]  }
 0x600   : > { %11879 = vmatprep.subr.bf16.mxu0 %v16736_v44  ;;  %v16787_v57 = vld [vmem:[%s21689_s18 + $0x214] ss:$36 sps:$4 sm:$0xff]   ;;  %v16790_v44 = vld [vmem:[%s21689_s18 + $0x9ec] ss:$36 sps:$4 sm:$0xff]  }
 0x602   : > { %11951 = vmatpush1.bf16.msra.mxu1 %v16731_v53  ;;  %11880 = vmatpush1.bf16.msra.mxu0 %v16734_v60  ;;  %v16785_v53 = vld [vmem:[%s21689_s18 + $0x210] ss:$36 sps:$4 sm:$0xff]   ;;  %v16788_v60 = vld [vmem:[%s21689_s18 + $0x9e8] ss:$36 sps:$4 sm:$0xff]  }
 0x603   : > { %11952 = vmatprep.subr.bf16.mxu1 %v16739_v18  ;;  %11881 = vmatprep.subr.bf16.mxu0 %v16742_v54  ;;  %v16793_v18 = vld [vmem:[%s21689_s18 + $0x1cc] ss:$36 sps:$4 sm:$0xff]   ;;  %v16799_v54 = vld [vmem:[%s21689_s18 + $0x9a4] ss:$36 sps:$4 sm:$0xff]  }
 0x606   : > { %11953 = vmatpush2.bf16.msra.mxu1 %v16737_v59  ;;  %11882 = vmatpush2.bf16.msra.mxu0 %v16740_v10  ;;  %v16791_v59 = vld [vmem:[%s21689_s18 + $0x1c8] ss:$36 sps:$4 sm:$0xff]  }
 0x607   : > { %11954 = vmatprep.subr.bf16.mxu1 %v16745_v56  ;;  %11883 = vmatprep.subr.bf16.mxu0 %v16748_v51  ;;  %v16796_v10 = vld [vmem:[%s21689_s18 + $0x184] ss:$36 sps:$4 sm:$0xff]   ;;  %v16808_v51 = vld [vmem:[%s21689_s18 + $0x95c] ss:$36 sps:$4 sm:$0xff]  }
 0x608   : > { %v16797_v56 = vld [vmem:[%s21689_s18 + $0x9a0] ss:$36 sps:$4 sm:$0xff]  }
 0x60a   : > { %11955 = vmatpush2.bf16.msra.mxu1 %v16743_v11  ;;  %11884 = vmatpush2.bf16.msra.mxu0 %v16746_v49  ;;  %v16794_v11 = vld [vmem:[%s21689_s18 + $0x180] ss:$36 sps:$4 sm:$0xff]  }
 0x60b   : > { %11956 = vmatprep.subr.bf16.mxu1 %v16751_v27  ;;  %11885 = vmatprep.subr.bf16.mxu0 %v16754_v4  ;;  %v16802_v49 = vld [vmem:[%s21689_s18 + $0x13c] ss:$36 sps:$4 sm:$0xff]   ;;  %v16817_v4 = vld [vmem:[%s21689_s18 + $0x914] ss:$36 sps:$4 sm:$0xff]  }
 0x60c   : > { %v16806_v27 = vld [vmem:[%s21689_s18 + $0x958] ss:$36 sps:$4 sm:$0xff]  }
 0x60e   : > { %11957 = vmatpush2.bf16.msra.mxu1 %v16749_v29  ;;  %11886 = vmatpush2.bf16.msra.mxu0 %v16752_v50  ;;  %v16800_v29 = vld [vmem:[%s21689_s18 + $0x138] ss:$36 sps:$4 sm:$0xff]  }
 0x60f   : > { %11958 = vmatprep.subr.bf16.mxu1 %v16757_v26  ;;  %11887 = vmatprep.subr.bf16.mxu0 %v16760_v5  ;;  %v16805_v50 = vld [vmem:[%s21689_s18 + $0xf4] ss:$36 sps:$4 sm:$0xff]  }
 0x610   : > { %v16815_v26 = vld [vmem:[%s21689_s18 + $0x910] ss:$36 sps:$4 sm:$0xff]  }
 0x611   : > { %v16803_v5 = vld [vmem:[%s21689_s18 + $0xf0] ss:$36 sps:$4 sm:$0xff]  }
 0x612   : > { %11959 = vmatpush2.bf16.msra.mxu1 %v16755_v63  ;;  %11888 = vmatpush2.bf16.msra.mxu0 %v16758_v20  ;;  %v16811_v63 = vld [vmem:[%s21689_s18 + $0xac] ss:$36 sps:$4 sm:$0xff]   ;;  %v16826_v20 = vld [vmem:[%s21689_s18 + $0x694] ss:$36 sps:$4 sm:$0xff]  }
 0x613   : > { %11960 = vmatprep.subr.bf16.mxu1 %v16763_v6  ;;  %11889 = vmatprep.subr.bf16.mxu0 %v16766_v45  ;;  %v16809_v6 = vld [vmem:[%s21689_s18 + $0xa8] ss:$36 sps:$4 sm:$0xff]  }
 0x614   : > { %v16814_v45 = vld [vmem:[%s21689_s18 + $0x64] ss:$36 sps:$4 sm:$0xff]  }
 0x616   : > { %11961 = vmatpush2.bf16.msra.mxu1 %v16761_v34  ;;  %11890 = vmatpush2.bf16.msra.mxu0 %v16764_v31  ;;  %v16812_v34 = vld [vmem:[%s21689_s18 + $0x60] ss:$36 sps:$4 sm:$0xff]  }
 0x617   : > { %11962 = vmatprep.subr.bf16.mxu1 %v16769_v15  ;;  %11891 = vmatprep.subr.bf16.mxu0 %v16772_v58  ;;  %v16820_v31 = vld [vmem:[%s21689_s18 + $0x1c] ss:$36 sps:$4 sm:$0xff]   ;;  %v16823_v58 = vld [vmem:[%s21689_s18 + $0x454] ss:$36 sps:$4 sm:$0xff]  }
 0x618   : > { %v16818_v15 = vld [vmem:[%s21689_s18 + $0x18] ss:$36 sps:$4 sm:$0xff]  }
 0x61a   : > { %11963 = vmatpush2.bf16.msra.mxu1 %v16767_v28  ;;  %11892 = vmatpush2.bf16.msra.mxu0 %v16770_v39  ;;  %v16821_v28 = vld [vmem:[%s21689_s18 + $0x450] ss:$36 sps:$4 sm:$0xff]  }
 0x61b   : > { %11964 = vmatprep.subr.bf16.mxu1 %v16775_v13  ;;  %11893 = vmatprep.subr.bf16.mxu0 %v16778_v61  ;;  %v16824_v39 = vld [vmem:[%s21689_s18 + $0x690] ss:$36 sps:$4 sm:$0xff]  }
 0x61c   : > { %v16829_v13 = vld [vmem:[%s21689_s18 + $0x40c] ss:$36 sps:$4 sm:$0xff]  }
 0x61d   : > { %v16832_v61 = vld [vmem:[%s21689_s18 + $0x64c] ss:$36 sps:$4 sm:$0xff]  }
 0x61e   : > { %11965 = vmatpush2.bf16.msra.mxu1 %v16773_v1  ;;  %11894 = vmatpush2.bf16.msra.mxu0 %v16776_v0 }
 0x61f   : > { %11966 = vmatprep.subr.bf16.mxu1 %v16781_v2  ;;  %11895 = vmatprep.subr.bf16.mxu0 %v16784_v42 }
 0x622   : > { %11967 = vmatpush2.bf16.msra.mxu1 %v16779_v25  ;;  %11896 = vmatpush2.bf16.msra.mxu0 %v16782_v12  ;;  %v16827_v25 = vld [vmem:[%s21689_s18 + $0x408] ss:$36 sps:$4 sm:$0xff]  }
 0x623   : > { %12078 = vmatprep.subr.bf16.mxu1 %v16787_v57  ;;  %12015 = vmatprep.subr.bf16.mxu0 %v16790_v44  ;;  %v16830_v12 = vld [vmem:[%s21689_s18 + $0x648] ss:$36 sps:$4 sm:$0xff]  }
 0x624   : > { %v16835_v44 = vld [vmem:[%s21689_s18 + $0x3c4] ss:$36 sps:$4 sm:$0xff]  }
 0x625   : > { %11969 = vmatmul.mubr.bf16.vlgmr.msra.gmra.mxu1 %v22300_v30  ;;  %11898 = vmatmul.mubr.bf16.vlgmr.msra.gmra.mxu0 %v22294_v16 }
 0x626   : > { %11978 = vmatprep.mubr.bf16.mxu1 %v22311_v19  ;;  %12079 = vmatpush1.bf16.msra.mxu1 %v16785_v53  ;;  %v16838_v53 = vld [vmem:[%s21689_s18 + $0x604] ss:$36 sps:$4 sm:$0xff]  }
 0x627   : > { %11907 = vmatprep.mubr.bf16.mxu0 %v22304_v23  ;;  %12016 = vmatpush1.bf16.msra.mxu0 %v16788_v60 }
 0x628   : > { %12080 = vmatprep.subr.bf16.mxu1 %v16793_v18  ;;  %12017 = vmatprep.subr.bf16.mxu0 %v16799_v54 }
 0x62a   : > { %12081 = vmatpush1.bf16.msra.mxu1 %v16791_v59 }
 0x62b   : > { %12082 = vmatprep.subr.bf16.mxu1 %v16796_v10  ;;  %12018 = vmatpush1.bf16.msra.mxu0 %v16797_v56  ;;  %v16833_v56 = vld [vmem:[%s21689_s18 + $0x3c0] ss:$36 sps:$4 sm:$0xff]  }
 0x62c   : > { %12019 = vmatprep.subr.bf16.mxu0 %v16808_v51  ;;  %v16836_v51 = vld [vmem:[%s21689_s18 + $0x600] ss:$36 sps:$4 sm:$0xff]  }
 0x62d   : > { %11979 = vmatmul.mubr.bf16.gmra.mxu1 %v22324_v41  ;;  %11908 = vmatmul.mubr.bf16.gmra.mxu0 %v22318_v17 }
 0x62e   : > { %11988 = vmatprep.mubr.bf16.mxu1 %v22337_v46  ;;  %12083 = vmatpush1.bf16.msra.mxu1 %v16794_v11 }
 0x62f   : > { %11917 = vmatprep.mubr.bf16.mxu0 %v22329_v32  ;;  %12084 = vmatprep.subr.bf16.mxu1 %v16802_v49  ;;  %v16841_v49 = vld [vmem:[%s21689_s18 + $0x37c] ss:$36 sps:$4 sm:$0xff]  }
 0x630   : > { %12020 = vmatpush1.bf16.msra.mxu0 %v16806_v27  ;;  %v16844_v27 = vld [vmem:[%s21689_s18 + $0x5bc] ss:$36 sps:$4 sm:$0xff]  }
 0x631   : > { %12021 = vmatprep.subr.bf16.mxu0 %v16817_v4 }
 0x632   : > { %12085 = vmatpush1.bf16.msra.mxu1 %v16800_v29 }
 0x633   : > { %12086 = vmatprep.subr.bf16.mxu1 %v16805_v50 }
 0x634   : > { %12022 = vmatpush1.bf16.msra.mxu0 %v16815_v26 }
 0x635   : > { %11989 = vmatmul.mubr.bf16.gmra.mxu1 %v22347_v52  ;;  %11918 = vmatmul.mubr.bf16.gmra.mxu0 %v22345_v7 }
 0x636   : > { %14818 = vmatprep.mubr.msk.bf16.mxu1 %vm22387_vm4, %v22395_v38  ;;  %12087 = vmatpush1.bf16.msra.mxu1 %v16803_v5  ;;  %v16839_v5 = vld [vmem:[%s21689_s18 + $0x378] ss:$36 sps:$4 sm:$0xff]  }
 0x637   : > { %14812 = vmatprep.mubr.msk.bf16.mxu0 %vm22387_vm4, %v22391_v8  ;;  %12088 = vmatprep.subr.bf16.mxu1 %v16811_v63  ;;  %v16842_v63 = vld [vmem:[%s21689_s18 + $0x5b8] ss:$36 sps:$4 sm:$0xff]  }
 0x638   : > { %12149 = vmatprep.subr.bf16.mxu0 %v16826_v20 }
 0x63a   : > { %12089 = vmatpush1.bf16.msra.mxu1 %v16809_v6  ;;  %v16847_v6 = vld [vmem:[%s21689_s18 + $0x334] ss:$36 sps:$4 sm:$0xff]  }
 0x63b   : > { %12090 = vmatprep.subr.bf16.mxu1 %v16814_v45  ;;  %v16850_v45 = vld [vmem:[%s21689_s18 + $0x574] ss:$36 sps:$4 sm:$0xff]  }
 0x63d   : > { %14821 = vmatmul.mubr.msk.bf16.gmra.mxu1 %vm22387_vm4, %v22409_v22  ;;  %14815 = vmatmul.mubr.msk.bf16.gmra.mxu0 %vm22387_vm4, %v22407_v43 }
 0x63e   : > { %12091 = vmatpush1.bf16.msra.mxu1 %v16812_v34  ;;  %12110 = vmatprep.mubr.bf16.mxu1 %v22284_v37 }
 0x63f   : > { %12092 = vmatprep.subr.bf16.mxu1 %v16820_v31  ;;  %12039 = vmatprep.mubr.bf16.mxu0 %v24515_v33 }
 0x642   : > { %12093 = vmatpush1.bf16.msra.mxu1 %v16818_v15 }
 0x643   : > { %12094 = vmatprep.subr.bf16.mxu1 %v16823_v58 }
 0x644   : > { %v11473_v1 = vpop.f32.mrf.mxu0 }
 0x645   : > { %14822 = vmatmul.mubr.msk.bf16.vlgmr.msra.gmra.mxu0 %vm8954_vm2, %v22375_v21  ;;  %v11544_v0 = vpop.f32.mrf.mxu1 }
 0x646   : > { %12095 = vmatpush2.bf16.msra.mxu1 %v16821_v28  ;;  %12150 = vmatpush1.bf16.msra.mxu0 %v16824_v39  ;;  %v22649_v2 = vadd.f32 %v11544_v0, %v11473_v1  ;;  %v11475_v42 = vpop.f32.mrf.mxu0  ;;  %v16845_v39 = vld [vmem:[%s21689_s18 + $0x330] ss:$36 sps:$4 sm:$0xff]  }
 0x647   : > { %v11546_v57 = vpop.f32.mrf.mxu1  ;;  %12096 = vmatprep.subr.bf16.mxu1 %v16829_v13  ;;  %12151 = vmatprep.subr.bf16.mxu0 %v16832_v61  ;;  %v16848_v13 = vld [vmem:[%s21689_s18 + $0x570] ss:$36 sps:$4 sm:$0xff]  }
 0x648   : > { %v22655_v60 = vadd.f32 %v11546_v57, %v11475_v42  ;;  %v11477_v18 = vpop.f32.mrf.mxu0  ;;  %12049 = vmatprep.mubr.bf16.mxu0 %v24515_v33  ;;  %v16853_v1 = vld [vmem:[%s21689_s18 + $0x2ec] ss:$36 sps:$4 sm:$0xff]  }
 0x649   : > { %v11548_v54 = vpop.f32.mrf.mxu1  ;;  %v16856_v0 = vld [vmem:[%s21689_s18 + $0x52c] ss:$36 sps:$4 sm:$0xff]  }
 0x64a   : > { %12097 = vmatpush2.bf16.msra.mxu1 %v16827_v25  ;;  %12152 = vmatpush1.bf16.msra.mxu0 %v16830_v12  ;;  %v22658_v59 = vadd.f32 %v11548_v54, %v11477_v18  ;;  %v22660_v10 = vpop.f32.mrf.mxu0  ;;  %v16854_v18 = vld [vmem:[%s21689_s18 + $0x528] ss:$36 sps:$4 sm:$0xff]  }
 0x64b   : > { %v22664_v11 = vpop.f32.mrf.mxu1  ;;  %12098 = vmatprep.subr.bf16.mxu1 %v16835_v44  ;;  %12153 = vmatprep.subr.bf16.mxu0 %v16838_v53  ;;  %v16851_v53 = vld [vmem:[%s21689_s18 + $0x2e8] ss:$36 sps:$4 sm:$0xff]  }
 0x64c   : > { %v11483_v4 = vpop.f32.mrf.mxu0 }
 0x64d   : > { %14823 = vmatmul.mubr.msk.bf16.gmra.mxu0 %vm8954_vm2, %v22377_v24  ;;  %v11554_v29 = vpop.f32.mrf.mxu1 }
 0x64e   : > { %12099 = vmatpush2.bf16.msra.mxu1 %v16833_v56  ;;  %12154 = vmatpush1.bf16.msra.mxu0 %v16836_v51  ;;  %v22670_v50 = vadd.f32 %v11554_v29, %v11483_v4  ;;  %v11485_v26 = vpop.f32.mrf.mxu0  ;;  %v16859_v56 = vld [vmem:[%s21689_s18 + $0x2a4] ss:$36 sps:$4 sm:$0xff]  }
 0x64f   : > { %v11556_v20 = vpop.f32.mrf.mxu1  ;;  %12100 = vmatprep.subr.bf16.mxu1 %v16841_v49  ;;  %12155 = vmatprep.subr.bf16.mxu0 %v16844_v27  ;;  %v16862_v51 = vld [vmem:[%s21689_s18 + $0x4e4] ss:$36 sps:$4 sm:$0xff]  }
 0x650   : > { %v22676_v34 = vadd.f32 %v11556_v20, %v11485_v26  ;;  %v11487_v31 = vpop.f32.mrf.mxu0  ;;  %12059 = vmatprep.mubr.bf16.mxu0 %v24515_v33 }
 0x651   : > { %v11558_v15 = vpop.f32.mrf.mxu1 }
 0x652   : > { %12101 = vmatpush2.bf16.msra.mxu1 %v16839_v5  ;;  %12156 = vmatpush1.bf16.msra.mxu0 %v16842_v63  ;;  %v22679_v58 = vadd.f32 %v11558_v15, %v11487_v31  ;;  %v11489_v28 = vpop.f32.mrf.mxu0  ;;  %v16857_v5 = vld [vmem:[%s21689_s18 + $0x2a0] ss:$36 sps:$4 sm:$0xff]  }
 0x653   : > { %v11560_v61 = vpop.f32.mrf.mxu1  ;;  %12102 = vmatprep.subr.bf16.mxu1 %v16847_v6  ;;  %12157 = vmatprep.subr.bf16.mxu0 %v16850_v45  ;;  %v16860_v63 = vld [vmem:[%s21689_s18 + $0x4e0] ss:$36 sps:$4 sm:$0xff]  }
 0x654   : > { %v22685_v42 = vadd.f32 %v11560_v61, %v11489_v28  ;;  %v11493_v25 = vpop.f32.mrf.mxu0  ;;  %v16865_v6 = vld [vmem:[%s21689_s18 + $0x25c] ss:$36 sps:$4 sm:$0xff]  }
 0x655   : > { %14824 = vmatmul.mubr.msk.bf16.gmra.mxu0 %vm8954_vm2, %v22291_v55  ;;  %v11564_v12 = vpop.f32.mrf.mxu1  ;;  %v16868_v15 = vld [vmem:[%s21689_s18 + $0x49c] ss:$36 sps:$4 sm:$0xff]  }
 0x656   : > { %12103 = vmatpush2.bf16.msra.mxu1 %v16845_v39  ;;  %12158 = vmatpush1.bf16.msra.mxu0 %v16848_v13  ;;  %v22689_v57 = vadd.f32 %v11564_v12, %v11493_v25  ;;  %v11495_v44 = vpop.f32.mrf.mxu0  ;;  %v16863_v61 = vld [vmem:[%s21689_s18 + $0x258] ss:$36 sps:$4 sm:$0xff]  }
 0x657   : > { %v11566_v54 = vpop.f32.mrf.mxu1  ;;  %12104 = vmatprep.subr.bf16.mxu1 %v16853_v1  ;;  %12159 = vmatprep.subr.bf16.mxu0 %v16856_v0  ;;  %v16866_v1 = vld [vmem:[%s21689_s18 + $0x498] ss:$36 sps:$4 sm:$0xff]  }
 0x658   : > { %v22695_v49 = vadd.f32 %v11566_v54, %v11495_v44  ;;  %v11497_v27 = vpop.f32.mrf.mxu0  ;;  %12069 = vmatprep.mubr.bf16.mxu0 %v24515_v33  ;;  %v16871_v25 = vld [vmem:[%s21689_s18 + $0x8d4] ss:$36 sps:$4 sm:$0xff]  }
 0x659   : > { %v11568_v4 = vpop.f32.mrf.mxu1  ;;  %v16880_v12 = vld [vmem:[%s21689_s18 + $0x9f4] ss:$36 sps:$4 sm:$0xff]  }
 0x65a   : > { %12105 = vmatpush2.bf16.msra.mxu1 %v16851_v53  ;;  %12160 = vmatpush1.bf16.msra.mxu0 %v16854_v18  ;;  %v22698_v29 = vadd.f32 %v11568_v4, %v11497_v27  ;;  %v11499_v26 = vpop.f32.mrf.mxu0  ;;  %v16874_v27 = vld [vmem:[%s21689_s18 + $0x88c] ss:$36 sps:$4 sm:$0xff]  }
 0x65b   : > { %v11570_v20 = vpop.f32.mrf.mxu1  ;;  %12106 = vmatprep.subr.bf16.mxu1 %v16859_v56  ;;  %12161 = vmatprep.subr.bf16.mxu0 %v16862_v51  ;;  %v16869_v56 = vld [vmem:[%s21689_s18 + $0x8d0] ss:$36 sps:$4 sm:$0xff]  }
 0x65c   : > { %v22703_v45 = vadd.f32 %v11570_v20, %v11499_v26  ;;  %v11503_v31 = vpop.f32.mrf.mxu0  ;;  %v16878_v4 = vld [vmem:[%s21689_s18 + $0x9f0] ss:$36 sps:$4 sm:$0xff]  }
 0x65d   : > { %14825 = vmatmul.mubr.msk.bf16.gmra.mxu0 %vm8954_vm2, %v22460_v9  ;;  %v11574_v28 = vpop.f32.mrf.mxu1 }
 0x65e   : > { %12107 = vmatpush2.bf16.msra.mxu1 %v16857_v5  ;;  %12162 = vmatpush1.bf16.msra.mxu0 %v16860_v63  ;;  %v22708_v39 = vadd.f32 %v11574_v28, %v11503_v31  ;;  %v11505_v13 = vpop.f32.mrf.mxu0  ;;  %v16889_v5 = vld [vmem:[%s21689_s18 + $0x9ac] ss:$36 sps:$4 sm:$0xff]  }
 0x65f   : > { %12181 = vmatprep.mubr.bf16.mxu0 %v22286_v48  ;;  %v11576_v0 = vpop.f32.mrf.mxu1  ;;  %12108 = vmatprep.subr.bf16.mxu1 %v16865_v6  ;;  %v16872_v6 = vld [vmem:[%s21689_s18 + $0x888] ss:$36 sps:$4 sm:$0xff]  }
 0x660   : > { %v22715_v44 = vadd.f32 %v11576_v0, %v11505_v13  ;;  %12163 = vmatprep.subr.bf16.mxu0 %v16868_v15  ;;  %v11507_v53 = vpop.f32.mrf.mxu0  ;;  %v16877_v15 = vld [vmem:[%s21689_s18 + $0x844] ss:$36 sps:$4 sm:$0xff]  }
 0x661   : > { %v11578_v18 = vpop.f32.mrf.mxu1  ;;  %v16887_v28 = vld [vmem:[%s21689_s18 + $0x9a8] ss:$36 sps:$4 sm:$0xff]   ;;  %v16875_v0 = vld [vmem:[%s21689_s18 + $0x840] ss:$36 sps:$4 sm:$0xff]  }
 0x662   : > { %12109 = vmatpush2.bf16.msra.mxu1 %v16863_v61  ;;  %12164 = vmatpush1.bf16.msra.mxu0 %v16866_v1  ;;  %v11508_v54 = vpop.f32.mrf.mxu0 }
 0x663   : > { %v11579_v51 = vpop.f32.mrf.mxu1  ;;  %12165 = vmatprep.subr.bf16.mxu0 %v16871_v25  ;;  %12228 = vmatprep.subr.bf16.mxu1 %v16880_v12  ;;  %v16896_v12 = vld [vmem:[%s21689_s18 + $0x960] ss:$36 sps:$4 sm:$0xff]   ;;  %v16881_v54 = vld [vmem:[%s21689_s18 + $0x7f8] ss:$36 sps:$4 sm:$0xff]  }
 0x664   : > { %v11615_v26 = vpop.f32.mrf.mxu0  ;;  %v16886_v51 = vld [vmem:[%s21689_s18 + $0x7b4] ss:$36 sps:$4 sm:$0xff]  }
 0x665   : > { %12111 = vmatmul.mubr.bf16.vlgmr.msra.gmra.mxu1 %v22294_v16  ;;  %v22723_v63 = vadd.f32 %v11615_v26, %v22649_v2  ;;  %v16898_v2 = vld [vmem:[%s21689_s18 + $0x964] ss:$36 sps:$4 sm:$0xff]  }
 0x666   : > { %12120 = vmatprep.mubr.bf16.mxu1 %v22304_v23  ;;  %12166 = vmatpush2.bf16.msra.mxu0 %v16869_v56  ;;  %v11617_v20 = vpop.f32.mrf.mxu0 }
 0x667   : > { %v22728_v31 = vadd.f32 %v11617_v20, %v22655_v60  ;;  %12167 = vmatprep.subr.bf16.mxu0 %v16874_v27  ;;  %12229 = vmatpush1.bf16.msra.mxu1 %v16878_v4  ;;  %v16883_v60 = vld [vmem:[%s21689_s18 + $0x7fc] ss:$36 sps:$4 sm:$0xff]  }
 0x668   : > { %v11619_v13 = vpop.f32.mrf.mxu0  ;;  %12230 = vmatprep.subr.bf16.mxu1 %v16889_v5  ;;  %v16902_v4 = vld [vmem:[%s21689_s18 + $0x918] ss:$36 sps:$4 sm:$0xff]   ;;  %v16884_v5 = vld [vmem:[%s21689_s18 + $0x7b0] ss:$36 sps:$4 sm:$0xff]  }
 0x669   : > { %v22734_v61 = vadd.f32 %v11619_v13, %v22658_v59  ;;  %v16904_v59 = vld [vmem:[%s21689_s18 + $0x91c] ss:$36 sps:$4 sm:$0xff]  }
 0x66a   : > { %12168 = vmatpush2.bf16.msra.mxu0 %v16872_v6  ;;  %v22736_v1 = vpop.f32.mrf.mxu0 }
 0x66b   : > { %24516 = vst [vmem:[#allocation66_spill] sm:$0xff] %v22734_v61  ;;  %12169 = vmatprep.subr.bf16.mxu0 %v16877_v15  ;;  %12231 = vmatpush1.bf16.msra.mxu1 %v16887_v28  ;;  %v16906_v15 = vld [vmem:[%s21689_s18 + $0x8d8] ss:$36 sps:$4 sm:$0xff]  }
 0x66c   : > { %v11625_v25 = vpop.f32.mrf.mxu0  ;;  %12232 = vmatprep.subr.bf16.mxu1 %v16898_v2  ;;  %v16895_v2 = vld [vmem:[%s21689_s18 + $0x724] ss:$36 sps:$4 sm:$0xff]  }
 0x66d   : > { %12121 = vmatmul.mubr.bf16.gmra.mxu1 %v22318_v17  ;;  %v22743_v53 = vadd.f32 %v11625_v25, %v22670_v50  ;;  %v16893_v25 = vld [vmem:[%s21689_s18 + $0x720] ss:$36 sps:$4 sm:$0xff]  }
 0x66e   : > { %12130 = vmatprep.mubr.bf16.mxu1 %v22329_v32  ;;  %12170 = vmatpush2.bf16.msra.mxu0 %v16875_v0  ;;  %v11627_v18 = vpop.f32.mrf.mxu0 }
 0x66f   : > { %24517 = vst [vmem:[#allocation67_spill] sm:$0xff] %v22743_v53  ;;  %v22749_v56 = vadd.f32 %v11627_v18, %v22676_v34  ;;  %12171 = vmatprep.subr.bf16.mxu0 %v16883_v60  ;;  %12233 = vmatpush1.bf16.msra.mxu1 %v16896_v12  ;;  %v16892_v34 = vld [vmem:[%s21689_s18 + $0x76c] ss:$36 sps:$4 sm:$0xff]  }
 0x670   : > { %v11629_v27 = vpop.f32.mrf.mxu0  ;;  %12234 = vmatprep.subr.bf16.mxu1 %v16904_v59  ;;  %v16901_v59 = vld [vmem:[%s21689_s18 + $0x6dc] ss:$36 sps:$4 sm:$0xff]  }
 0x671   : > { %24518 = vst [vmem:[#allocation69_spill] sm:$0xff] %v22749_v56  ;;  %v22754_v50 = vadd.f32 %v11629_v27, %v22679_v58 }
 0x672   : > { %12172 = vmatpush2.bf16.msra.mxu0 %v16881_v54  ;;  %v11631_v26 = vpop.f32.mrf.mxu0  ;;  %v16899_v54 = vld [vmem:[%s21689_s18 + $0x6d8] ss:$36 sps:$4 sm:$0xff]  }
 0x673   : > { %24519 = vst [vmem:[#allocation70_spill] sm:$0xff] %v22754_v50  ;;  %v22758_v20 = vadd.f32 %v11631_v26, %v22685_v42  ;;  %12173 = vmatprep.subr.bf16.mxu0 %v16886_v51  ;;  %12235 = vmatpush1.bf16.msra.mxu1 %v16902_v4  ;;  %v16890_v42 = vld [vmem:[%s21689_s18 + $0x768] ss:$36 sps:$4 sm:$0xff]   ;;  %v16905_v51 = vld [vmem:[%s21689_s18 + $0x458] ss:$36 sps:$4 sm:$0xff]  }
 0x674   : > { %v11635_v6 = vpop.f32.mrf.mxu0  ;;  %15237 = vmatprep.subr.bf16.mxu1 %v16906_v15  ;;  %v16907_v26 = vld [vmem:[%s21689_s18 + $0x218] ss:$36 sps:$4 sm:$0xff]  }
 0x675   : > { %24520 = vst [vmem:[#allocation74_spill] sm:$0xff] %v22758_v20  ;;  %12131 = vmatmul.mubr.bf16.gmra.mxu1 %v22345_v7  ;;  %v22764_v58 = vadd.f32 %v11635_v6, %v22689_v57  ;;  %v16911_v6 = vld [vmem:[%s21689_s18 + $0x1d0] ss:$36 sps:$4 sm:$0xff]  }
 0x676   : > { %14828 = vmatprep.mubr.msk.bf16.mxu1 %vm22387_vm4, %v22391_v8  ;;  %12174 = vmatpush2.bf16.msra.mxu0 %v16884_v5  ;;  %v11637_v28 = vpop.f32.mrf.mxu0  ;;  %v16909_v5 = vld [vmem:[%s21689_s18 + $0x410] ss:$36 sps:$4 sm:$0xff]  }
 0x677   : > { %24521 = vst [vmem:[#allocation68_spill] sm:$0xff] %v22764_v58  ;;  %v22771_v13 = vadd.f32 %v11637_v28, %v22695_v49  ;;  %12175 = vmatprep.subr.bf16.mxu0 %v16892_v34  ;;  %v16910_v34 = vld [vmem:[%s21689_s18 + $0x890] ss:$36 sps:$4 sm:$0xff]  }
 0x678   : > { %v11639_v0 = vpop.f32.mrf.mxu0  ;;  %v16912_v28 = vld [vmem:[%s21689_s18 + $0x650] ss:$36 sps:$4 sm:$0xff]  }
 0x679   : > { %24522 = vst [vmem:[#allocation71_spill] sm:$0xff] %v22771_v13  ;;  %v22775_v60 = vadd.f32 %v11639_v0, %v22698_v29 }
 0x67a   : > { %12176 = vmatpush2.bf16.msra.mxu0 %v16890_v42  ;;  %v11641_v57 = vpop.f32.mrf.mxu0  ;;  %v16913_v42 = vld [vmem:[%s21689_s18 + $0x3c8] ss:$36 sps:$4 sm:$0xff]  }
 0x67b   : > { %24523 = vst [vmem:[#allocation72_spill] sm:$0xff] %v22775_v60  ;;  %v22779_v12 = vadd.f32 %v11641_v57, %v22703_v45  ;;  %12177 = vmatprep.subr.bf16.mxu0 %v16895_v2  ;;  %v16914_v2 = vld [vmem:[%s21689_s18 + $0x848] ss:$36 sps:$4 sm:$0xff]  }
 0x67c   : > { %v11645_v49 = vpop.f32.mrf.mxu0  ;;  %v16915_v57 = vld [vmem:[%s21689_s18 + $0x188] ss:$36 sps:$4 sm:$0xff]  }
 0x67d   : > { %24524 = vst [vmem:[#allocation76_spill] sm:$0xff] %v22779_v12  ;;  %14831 = vmatmul.mubr.msk.bf16.gmra.mxu1 %vm22387_vm4, %v22407_v43  ;;  %v22786_v29 = vadd.f32 %v11645_v49, %v22708_v39  ;;  %v16908_v39 = vld [vmem:[%s21689_s18 + $0x698] ss:$36 sps:$4 sm:$0xff]   ;;  %v16917_v49 = vld [vmem:[%s21689_s18 + $0x380] ss:$36 sps:$4 sm:$0xff]  }
 0x67e   : > { %12178 = vmatpush2.bf16.msra.mxu0 %v16893_v25  ;;  %v11647_v18 = vpop.f32.mrf.mxu0  ;;  %12252 = vmatprep.mubr.bf16.mxu1 %v24515_v33 }
 0x67f   : > { %24525 = vst [vmem:[#allocation73_spill] sm:$0xff] %v22786_v29  ;;  %v22791_v45 = vadd.f32 %v11647_v18, %v22715_v44  ;;  %12179 = vmatprep.subr.bf16.mxu0 %v16901_v59  ;;  %v16916_v59 = vld [vmem:[%s21689_s18 + $0x608] ss:$36 sps:$4 sm:$0xff]   ;;  %v16918_v18 = vld [vmem:[%s21689_s18 + $0x800] ss:$36 sps:$4 sm:$0xff]  }
 0x680   : > { %v11649_v27 = vpop.f32.mrf.mxu0 }
 0x681   : > { %24526 = vst [vmem:[#allocation79_spill] sm:$0xff] %v22791_v45 }
 0x682   : > { %12180 = vmatpush2.bf16.msra.mxu0 %v16899_v54  ;;  %v11650_v4 = vpop.f32.mrf.mxu0 }
 0x683   : > { %15197 = vmatprep.subr.bf16.mxu0 %v16905_v51  ;;  %v16919_v51 = vld [vmem:[%s21689_s18 + $0x140] ss:$36 sps:$4 sm:$0xff]  }
 0x684   : > { %v16920_v4 = vld [vmem:[%s21689_s18 + $0x5c0] ss:$36 sps:$4 sm:$0xff]  }
 0x685   : > { %12182 = vmatmul.mubr.bf16.vlgmr.msra.gmra.mxu0 %v22300_v30  ;;  %14838 = vmatmul.mubr.msk.bf16.vlgmr.msra.gmra.mxu1 %vm8954_vm2, %v22375_v21  ;;  %v22801_v44 = vpop.f32.mrf.mxu1 }
 0x686   : > { %12191 = vmatprep.mubr.bf16.mxu0 %v22311_v19  ;;  %15198 = vmatpush3.bf16.msra.mxu0 %v16907_v26  ;;  %v16921_v26 = vld [vmem:[%s21689_s18 + $0x338] ss:$36 sps:$4 sm:$0xff]  }
 0x687   : > { %15238 = vmatpush3.bf16.msra.mxu1 %v16908_v39  ;;  %v22805_v15 = vpop.f32.mrf.mxu1  ;;  %15199 = vmatprep.subr.bf16.mxu0 %v16909_v5  ;;  %v16922_v39 = vld [vmem:[%s21689_s18 + $0x7b8] ss:$36 sps:$4 sm:$0xff]  }
 0x688   : > { %15239 = vmatprep.subr.bf16.mxu1 %v16910_v34  ;;  %12262 = vmatprep.mubr.bf16.mxu1 %v24515_v33  ;;  %v16923_v34 = vld [vmem:[%s21689_s18 + $0xf8] ss:$36 sps:$4 sm:$0xff]  }
 0x689   : > { %v22811_v0 = vpop.f32.mrf.mxu1 }
 0x68a   : > { %15200 = vmatpush3.bf16.msra.mxu0 %v16911_v6 }
 0x68b   : > { %15240 = vmatpush3.bf16.msra.mxu1 %v16912_v28  ;;  %v22814_v25 = vpop.f32.mrf.mxu1  ;;  %15201 = vmatprep.subr.bf16.mxu0 %v16913_v42  ;;  %v16924_v28 = vld [vmem:[%s21689_s18 + $0x578] ss:$36 sps:$4 sm:$0xff]   ;;  %v16925_v42 = vld [vmem:[%s21689_s18 + $0x2f0] ss:$36 sps:$4 sm:$0xff]  }
 0x68c   : > { %15241 = vmatprep.subr.bf16.mxu1 %v16914_v2  ;;  %v16926_v2 = vld [vmem:[%s21689_s18 + $0x770] ss:$36 sps:$4 sm:$0xff]  }
 0x68d   : > { %12192 = vmatmul.mubr.bf16.gmra.mxu0 %v22324_v41  ;;  %14839 = vmatmul.mubr.msk.bf16.gmra.mxu1 %vm8954_vm2, %v22377_v24  ;;  %v22822_v54 = vpop.f32.mrf.mxu1 }
 0x68e   : > { %12201 = vmatprep.mubr.bf16.mxu0 %v22337_v46  ;;  %15202 = vmatpush3.bf16.msra.mxu0 %v16915_v57 }
 0x68f   : > { %15242 = vmatpush3.bf16.msra.mxu1 %v16916_v59  ;;  %v22826_v27 = vpop.f32.mrf.mxu1  ;;  %15203 = vmatprep.subr.bf16.mxu0 %v16917_v49  ;;  %v16927_v59 = vld [vmem:[%s21689_s18 + $0xb0] ss:$36 sps:$4 sm:$0xff]  }
 0x690   : > { %15243 = vmatprep.subr.bf16.mxu1 %v16918_v18  ;;  %12272 = vmatprep.mubr.bf16.mxu1 %v24515_v33  ;;  %v16928_v18 = vld [vmem:[%s21689_s18 + $0x530] ss:$36 sps:$4 sm:$0xff]  }
 0x691   : > { %v22832_v5 = vpop.f32.mrf.mxu1 }
 0x692   : > { %15204 = vmatpush3.bf16.msra.mxu0 %v16919_v51  ;;  %v16929_v51 = vld [vmem:[%s21689_s18 + $0x2a8] ss:$36 sps:$4 sm:$0xff]  }
 0x693   : > { %15244 = vmatpush3.bf16.msra.mxu1 %v16920_v4  ;;  %v22835_v6 = vpop.f32.mrf.mxu1  ;;  %15205 = vmatprep.subr.bf16.mxu0 %v16921_v26  ;;  %v16930_v4 = vld [vmem:[%s21689_s18 + $0x728] ss:$36 sps:$4 sm:$0xff]  }
 0x694   : > { %15245 = vmatprep.subr.bf16.mxu1 %v16922_v39  ;;  %v16931_v39 = vld [vmem:[%s21689_s18 + $0x68] ss:$36 sps:$4 sm:$0xff]  }
 0x695   : > { %12202 = vmatmul.mubr.bf16.gmra.mxu0 %v22347_v52  ;;  %14840 = vmatmul.mubr.msk.bf16.gmra.mxu1 %vm8954_vm2, %v22291_v55  ;;  %v22843_v57 = vpop.f32.mrf.mxu1 }
 0x696   : > { %14834 = vmatprep.mubr.msk.bf16.mxu0 %vm22387_vm4, %v22395_v38  ;;  %15206 = vmatpush3.bf16.msra.mxu0 %v16923_v34 }
 0x697   : > { %15246 = vmatpush3.bf16.msra.mxu1 %v16924_v28  ;;  %v22849_v49 = vpop.f32.mrf.mxu1  ;;  %15207 = vmatprep.subr.bf16.mxu0 %v16925_v42  ;;  %v16932_v28 = vld [vmem:[%s21689_s18 + $0x4e8] ss:$36 sps:$4 sm:$0xff]   ;;  %v16933_v42 = vld [vmem:[%s21689_s18 + $0x260] ss:$36 sps:$4 sm:$0xff]  }
 0x698   : > { %15247 = vmatprep.subr.bf16.mxu1 %v16926_v2  ;;  %12282 = vmatprep.mubr.bf16.mxu1 %v24515_v33  ;;  %v16935_v2 = vld [vmem:[%s21689_s18 + $0x20] ss:$36 sps:$4 sm:$0xff]  }
 0x699   : > { %v22855_v26 = vpop.f32.mrf.mxu1 }
 0x69a   : > { %15208 = vmatpush3.bf16.msra.mxu0 %v16927_v59 }
 0x69b   : > { %15248 = vmatpush3.bf16.msra.mxu1 %v16928_v18  ;;  %v22858_v34 = vpop.f32.mrf.mxu1  ;;  %15209 = vmatprep.subr.bf16.mxu0 %v16929_v51  ;;  %v16936_v18 = vld [vmem:[%s21689_s18 + $0x4a0] ss:$36 sps:$4 sm:$0xff]   ;;  %v16937_v51 = vld [vmem:[%s21689_s18 + $0x9f8] ss:$36 sps:$4 sm:$0xff]  }
 0x69c   : > { %15249 = vmatprep.subr.bf16.mxu1 %v16930_v4 }
 0x69d   : > { %14837 = vmatmul.mubr.msk.bf16.gmra.mxu0 %vm22387_vm4, %v22409_v22  ;;  %14841 = vmatmul.mubr.msk.bf16.gmra.mxu1 %vm8954_vm2, %v22460_v9  ;;  %v22868_v33 = vpop.f32.mrf.mxu1 }
 0x69e   : > { %15210 = vmatpush3.bf16.msra.mxu0 %v16931_v39  ;;  %12323 = vmatprep.mubr.bf16.mxu0 %v22284_v37  ;;  %v16938_v37 = vld [vmem:[%s21689_s18 + $0x9b0] ss:$36 sps:$4 sm:$0xff]  }
 0x69f   : > { %15250 = vmatpush3.bf16.msra.mxu1 %v16932_v28  ;;  %12387 = vmatprep.mubr.bf16.mxu1 %v22286_v48  ;;  %v22873_v59 = vpop.f32.mrf.mxu1 }
 0x6a0   : > { %15211 = vmatprep.subr.bf16.mxu0 %v16933_v42  ;;  %15251 = vmatprep.subr.bf16.mxu1 %v16934_v36 }
 0x6a1   : > { %v11720_v4 = vpop.f32.mrf.mxu1 }
 0x6a2   : > { %15212 = vmatpush3.bf16.msra.mxu0 %v16935_v2 }
 0x6a3   : > { %15252 = vmatpush3.bf16.msra.mxu1 %v16936_v18  ;;  %v11721_v62 = vpop.f32.mrf.mxu1  ;;  %15315 = vmatprep.subr.bf16.mxu0 %v16937_v51 }
 0x6a4   : > { %v11757_v14 = vpop.f32.mrf.mxu0  ;;  %15331 = vmatprep.subr.bf16.mxu1 %v16937_v51 }
 0x6a5   : > { %12324 = vmatmul.mubr.bf16.vlgmr.msra.gmra.mxu0 %v22294_v16  ;;  %v11758_v39 = vadd.f32 %v11757_v14, %v22801_v44  ;;  %v11828_v48 = vpop.f32.mrf.mxu1  ;;  %v16939_v16 = vld [vmem:[%s21689_s18 + $0x968] ss:$36 sps:$4 sm:$0xff]  }
 0x6a6   : > { %12388 = vmatmul.mubr.bf16.vlgmr.msra.gmra.mxu1 %v22300_v30  ;;  %12331 = vmatprep.mubr.bf16.mxu0 %v22304_v23  ;;  %v11759_v28 = vpop.f32.mrf.mxu0 }
 0x6a7   : > { %v22882_v36 = vadd.f32 %v11828_v48, %v11758_v39  ;;  %12395 = vmatprep.mubr.bf16.mxu1 %v22311_v19  ;;  %15316 = vmatpush3.bf16.msra.mxu0 %v16937_v51  ;;  %v11760_v62 = vadd.f32 %v11759_v28, %v22805_v15  ;;  %v11830_v42 = vpop.f32.mrf.mxu1 }
 0x6a8   : > { %v11761_v2 = vpop.f32.mrf.mxu0  ;;  %15317 = vmatprep.subr.bf16.mxu0 %v16938_v37  ;;  %15335 = vmatpush3.bf16.msra.mxu1 %v16937_v51 }
 0x6a9   : > { %v22887_v18 = vadd.f32 %v11830_v42, %v11760_v62  ;;  %v11762_v14 = vadd.f32 %v11761_v2, %v22811_v0  ;;  %v11832_v30 = vpop.f32.mrf.mxu1  ;;  %15332 = vmatprep.subr.bf16.mxu1 %v16938_v37  ;;  %v16940_v0 = vld [vmem:[%s21689_s18 + $0x920] ss:$36 sps:$4 sm:$0xff]   ;;  %s23594_s18 = smul.u32 504, %s1086_s11 }
 0x6aa   : > { %v11763_v23 = vpop.f32.mrf.mxu0  ;;  %s14862_s11 = smul.u32 (%p17151_p5), 72, %s17136_s16 }
 0x6ab   : > { %v22890_v44 = vadd.f32 %v11832_v30, %v11762_v14  ;;  %v11764_v19 = vadd.f32 %v11763_v23, %v22814_v25  ;;  %v11834_v4 = vpop.f32.mrf.mxu1  ;;  %15318 = vmatpush3.bf16.msra.mxu0 %v16938_v37  ;;  %s23697_s13 = scalar_lea.vmem [#allocation3], %s23594_s18 }
 0x6ac   : > { %v11767_v15 = vpop.f32.mrf.mxu0  ;;  %15319 = vmatprep.subr.bf16.mxu0 %v16939_v16  ;;  %15336 = vmatpush3.bf16.msra.mxu1 %v16938_v37  ;;  %s23889_s15 = scalar_lea.vmem (%p17151_p5), %s24031_s10, %s14862_s11 }
 0x6ad   : > { %24527 = vst [vmem:[#allocation82_spill] sm:$0xff] %v22890_v44  ;;  %v22893_v39 = vadd.f32 %v11834_v4, %v11764_v19  ;;  %12332 = vmatmul.mubr.bf16.gmra.mxu0 %v22318_v17  ;;  %v11768_v51 = vadd.f32 %v11767_v15, %v22822_v54  ;;  %v11838_v48 = vpop.f32.mrf.mxu1  ;;  %15333 = vmatprep.subr.bf16.mxu1 %v16939_v16 }
 0x6ae   : > { %12396 = vmatmul.mubr.bf16.gmra.mxu1 %v22324_v41  ;;  %12339 = vmatprep.mubr.bf16.mxu0 %v22329_v32  ;;  %v11769_v28 = vpop.f32.mrf.mxu0 }
 0x6af   : > { %24528 = vst [vmem:[#allocation78_spill] sm:$0xff] %v22893_v39  ;;  %v22900_v62 = vadd.f32 %v11838_v48, %v11768_v51  ;;  %12403 = vmatprep.mubr.bf16.mxu1 %v22337_v46  ;;  %v11840_v25 = vpop.f32.mrf.mxu1  ;;  %v11770_v37 = vadd.f32 %v11769_v28, %v22826_v27  ;;  %15320 = vmatpush3.bf16.msra.mxu0 %v16939_v16 }
 0x6b0   : > { %v11771_v42 = vpop.f32.mrf.mxu0  ;;  %15321 = vmatprep.subr.bf16.mxu0 %v16940_v0  ;;  %15337 = vmatpush3.bf16.msra.mxu1 %v16939_v16 }
 0x6b1   : > { %24529 = vst [vmem:[#allocation80_spill] sm:$0xff] %v22900_v62  ;;  %v11772_v17 = vadd.f32 %v11771_v42, %v22832_v5  ;;  %v11842_v54 = vpop.f32.mrf.mxu1  ;;  %v22905_v2 = vadd.f32 %v11840_v25, %v11770_v37  ;;  %15334 = vmatprep.subr.bf16.mxu1 %v16940_v0 }
 0x6b2   : > { %v11773_v41 = vpop.f32.mrf.mxu0 }
 0x6b3   : > { %24530 = vst [vmem:[#allocation83_spill] sm:$0xff] %v22905_v2  ;;  %v22907_v32 = vadd.f32 %v11842_v54, %v11772_v17  ;;  %v11774_v14 = vadd.f32 %v11773_v41, %v22835_v6  ;;  %v11844_v30 = vpop.f32.mrf.mxu1  ;;  %15322 = vmatpush3.bf16.msra.mxu0 %v16940_v0 }
 0x6b4   : > { %v11777_v46 = vpop.f32.mrf.mxu0  ;;  %15338 = vmatpush3.bf16.msra.mxu1 %v16940_v0 }
 0x6b5   : > { %24531 = vst [vmem:[#allocation81_spill] sm:$0xff] %v22907_v32  ;;  %v22910_v27 = vadd.f32 %v11844_v30, %v11774_v14  ;;  %12340 = vmatmul.mubr.bf16.gmra.mxu0 %v22345_v7  ;;  %v11778_v5 = vadd.f32 %v11777_v46, %v22843_v57  ;;  %v11848_v23 = vpop.f32.mrf.mxu1 }
 0x6b6   : > { %12404 = vmatmul.mubr.bf16.gmra.mxu1 %v22347_v52  ;;  %14844 = vmatprep.mubr.msk.bf16.mxu0 %vm22387_vm4, %v22391_v8  ;;  %v11779_v16 = vpop.f32.mrf.mxu0 }
 0x6b7   : > { %24532 = vst [vmem:[#allocation46_spill] sm:$0xff] %v22910_v27  ;;  %v22918_v19 = vadd.f32 %v11848_v23, %v11778_v5  ;;  %14850 = vmatprep.mubr.msk.bf16.mxu1 %vm22387_vm4, %v22395_v38  ;;  %v11850_v6 = vpop.f32.mrf.mxu1  ;;  %v11780_v4 = vadd.f32 %v11779_v16, %v22849_v49 }
 0x6b8   : > { %v11781_v7 = vpop.f32.mrf.mxu0 }
 0x6b9   : > { %24533 = vst [vmem:[#allocation40_spill] sm:$0xff] %v22918_v19  ;;  %v11782_v57 = vadd.f32 %v11781_v7, %v22855_v26  ;;  %v11852_v15 = vpop.f32.mrf.mxu1  ;;  %v22925_v52 = vadd.f32 %v11850_v6, %v11780_v4 }
 0x6ba   : > { %v11783_v51 = vpop.f32.mrf.mxu0 }
 0x6bb   : > { %24534 = vst [vmem:[#allocation42_spill] sm:$0xff] %v22925_v52  ;;  %v22927_v48 = vadd.f32 %v11852_v15, %v11782_v57  ;;  %v11784_v8 = vadd.f32 %v11783_v51, %v22858_v34  ;;  %v11854_v28 = vpop.f32.mrf.mxu1 }
 0x6bc   : > { %v11787_v25 = vpop.f32.mrf.mxu0 }
 0x6bd   : > { %24535 = vst [vmem:[#allocation45_spill] sm:$0xff] %v22927_v48  ;;  %v22930_v37 = vadd.f32 %v11854_v28, %v11784_v8  ;;  %14847 = vmatmul.mubr.msk.bf16.gmra.mxu0 %vm22387_vm4, %v22407_v43  ;;  %v11788_v38 = vadd.f32 %v11787_v25, %v22868_v33  ;;  %v11858_v49 = vpop.f32.mrf.mxu1 }
 0x6be   : > { %14853 = vmatmul.mubr.msk.bf16.gmra.mxu1 %vm22387_vm4, %v22409_v22  ;;  %15323 = vmatprep.mubr.msk.bf16.mxu0 %vm8954_vm2, %v22375_v21  ;;  %v11789_v26 = vpop.f32.mrf.mxu0 }
 0x6bf   : > { %24536 = vst [vmem:[#allocation48_spill] sm:$0xff] %v22930_v37  ;;  %v22941_v34 = vadd.f32 %v11858_v49, %v11788_v38  ;;  %15327 = vmatprep.mubr.msk.bf16.mxu1 %vm8954_vm2, %v22291_v55  ;;  %v11860_v0 = vpop.f32.mrf.mxu1  ;;  %v11790_v42 = vadd.f32 %v11789_v26, %v22873_v59 }
 0x6c0   : > { %v11791_v43 = vpop.f32.mrf.mxu0 }
 0x6c1   : > { %24537 = vst [vmem:[#allocation55_spill] sm:$0xff] %v22941_v34  ;;  %v11862_v17 = vpop.f32.mrf.mxu1  ;;  %v22946_v33 = vadd.f32 %v11860_v0, %v11790_v42 }
 0x6c2   : > { %v11792_v54 = vpop.f32.mrf.mxu0 }
 0x6c3   : > { %24538 = vst [vmem:[#allocation57_spill] sm:$0xff] %v22946_v33  ;;  %v11863_v41 = vpop.f32.mrf.mxu1 }
 0x6c5   : > { %15324 = vmatmul.mubr.msk.bf16.vlgmr.msra.gmra.mxu0 %vm8954_vm2, %v22377_v24 }
 0x6c6   : > { %15328 = vmatmul.mubr.msk.bf16.vlgmr.msra.gmra.mxu1 %vm8954_vm2, %v22460_v9 }
 0x6e5   : > { %v11970_v21 = vpop.f32.mrf.mxu1  ;;  %v11899_v35 = vpop.f32.mrf.mxu0 }
 0x6e6   : > { %v11971_v22 = vadd.f32 %v11970_v21, %v11899_v35 }
 0x6e7   : > { %v11972_v14 = vpop.f32.mrf.mxu1  ;;  %v11901_v55 = vpop.f32.mrf.mxu0 }
 0x6e8   : > { %v11973_v30 = vadd.f32 %v11972_v14, %v11901_v55 }
 0x6e9   : > { %v11974_v46 = vpop.f32.mrf.mxu1  ;;  %v11903_v59 = vpop.f32.mrf.mxu0 }
 0x6ea   : > { %v11975_v5 = vadd.f32 %v11974_v46, %v11903_v59 }
 0x6eb   : > { %v11976_v23 = vpop.f32.mrf.mxu1  ;;  %v11905_v16 = vpop.f32.mrf.mxu0 }
 0x6ec   : > { %v11977_v6 = vadd.f32 %v11976_v23, %v11905_v16 }
 0x6ed   : > { %v11980_v4 = vpop.f32.mrf.mxu1  ;;  %v11909_v7 = vpop.f32.mrf.mxu0 }
 0x6ee   : > { %v11981_v57 = vadd.f32 %v11980_v4, %v11909_v7 }
 0x6ef   : > { %v11982_v15 = vpop.f32.mrf.mxu1  ;;  %v11911_v24 = vpop.f32.mrf.mxu0 }
 0x6f0   : > { %v11983_v51 = vadd.f32 %v11982_v15, %v11911_v24 }
 0x6f1   : > { %v11984_v8 = vpop.f32.mrf.mxu1  ;;  %v11913_v9 = vpop.f32.mrf.mxu0 }
 0x6f2   : > { %v11985_v28 = vadd.f32 %v11984_v8, %v11913_v9 }
 0x6f3   : > { %v11986_v25 = vpop.f32.mrf.mxu1  ;;  %v11915_v38 = vpop.f32.mrf.mxu0 }
 0x6f4   : > { %v11987_v49 = vadd.f32 %v11986_v25, %v11915_v38 }
 0x6f5   : > { %v11990_v26 = vpop.f32.mrf.mxu1  ;;  %v11919_v0 = vpop.f32.mrf.mxu0 }
 0x6f6   : > { %v11991_v42 = vadd.f32 %v11990_v26, %v11919_v0 }
 0x6f7   : > { %v11992_v43 = vpop.f32.mrf.mxu1  ;;  %v11921_v17 = vpop.f32.mrf.mxu0 }
 0x6f8   : > { %v11993_v54 = vadd.f32 %v11992_v43, %v11921_v17 }
 0x6f9   : > { %v11994_v41 = vpop.f32.mrf.mxu1  ;;  %v11923_v21 = vpop.f32.mrf.mxu0 }
 0x6fa   : > { %v11995_v35 = vadd.f32 %v11994_v41, %v11923_v21 }
 0x6fb   : > { %v11996_v14 = vpop.f32.mrf.mxu1  ;;  %v11925_v55 = vpop.f32.mrf.mxu0 }
 0x6fc   : > { %v11997_v46 = vadd.f32 %v11996_v14, %v11925_v55 }
 0x6fd   : > { %v12000_v59 = vpop.f32.mrf.mxu1  ;;  %v11929_v23 = vpop.f32.mrf.mxu0 }
 0x6fe   : > { %v12001_v16 = vadd.f32 %v12000_v59, %v11929_v23 }
 0x6ff   : > { %v12002_v4 = vpop.f32.mrf.mxu1  ;;  %v11931_v7 = vpop.f32.mrf.mxu0 }
 0x700   : > { %v12003_v15 = vadd.f32 %v12002_v4, %v11931_v7 }
 0x701   : > { %v12004_v24 = vpop.f32.mrf.mxu1  ;;  %v11933_v8 = vpop.f32.mrf.mxu0 }
 0x703   : > { %v12005_v9 = vpop.f32.mrf.mxu1  ;;  %v11934_v25 = vpop.f32.mrf.mxu0 }
 0x704   : > { %v12609_v25 = vmul.f32 %v22743_v53, %v22743_v53 }
 0x705   : > { %v12041_v38 = vpop.f32.mrf.mxu0 }
 0x706   : > { %v22952_v26 = vadd.f32 %v12041_v38, %v11971_v22 }
 0x707   : > { %v12043_v0 = vpop.f32.mrf.mxu0 }
 0x708   : > { %v22954_v43 = vadd.f32 %v12043_v0, %v11973_v30  ;;  %v11551_v30 = vadd.f32 %v22664_v11, %v22660_v10 }
 0x709   : > { %v12045_v17 = vpop.f32.mrf.mxu0 }
 0x70a   : > { %v22956_v41 = vadd.f32 %v12045_v17, %v11975_v5 }
 0x70b   : > { %v12047_v21 = vpop.f32.mrf.mxu0 }
 0x70c   : > { %24539 = vst [vmem:[#allocation35_spill] sm:$0xff] %v22956_v41  ;;  %v22958_v14 = vadd.f32 %v12047_v21, %v11977_v6  ;;  %v12600_v6 = vmul.f32 %v22734_v61, %v22734_v61 }
 0x70d   : > { %v12051_v55 = vpop.f32.mrf.mxu0 }
 0x70e   : > { %24540 = vst [vmem:[#allocation53_spill] sm:$0xff] %v22958_v14  ;;  %v22960_v59 = vadd.f32 %v12051_v55, %v11981_v57  ;;  %v22975_v57 = vadd.f32 %v22736_v1, %v11551_v30  ;;  %v12618_v1 = vmul.f32 %v22754_v50, %v22754_v50 }
 0x70f   : > { %v12053_v23 = vpop.f32.mrf.mxu0 }
 0x710   : > { %24541 = vst [vmem:[#allocation54_spill] sm:$0xff] %v22960_v59  ;;  %v22962_v4 = vadd.f32 %v12053_v23, %v11983_v51  ;;  %24546 = vst [vmem:[#allocation34_spill] sm:$0xff] %v22975_v57  ;;  %v12495_v17 = vadd.f32 %v22975_v57, %v22728_v31 }
 0x711   : > { %v12055_v7 = vpop.f32.mrf.mxu0 }
 0x712   : > { %24542 = vst [vmem:[#allocation47_spill] sm:$0xff] %v22962_v4  ;;  %v22964_v24 = vadd.f32 %v12055_v7, %v11985_v28  ;;  %v12591_v28 = vmul.f32 %v22723_v63, %v22723_v63  ;;  %v12496_v30 = vadd.f32 %v12495_v17, %v22749_v56 }
 0x713   : > { %v12057_v22 = vpop.f32.mrf.mxu0 }
 0x714   : > { %24543 = vst [vmem:[#allocation51_spill] sm:$0xff] %v22964_v24  ;;  %v22966_v8 = vadd.f32 %v12057_v22, %v11987_v49  ;;  %v12483_v49 = vadd.f32 %v22734_v61, %v22723_v63  ;;  %v12654_v38 = vadd.f32 %v12600_v6, %v12591_v28  ;;  %v12601_v22 = vmul.f32 %v22975_v57, %v22975_v57 }
 0x715   : > { %v12061_v5 = vpop.f32.mrf.mxu0 }
 0x716   : > { %24544 = vst [vmem:[#allocation44_spill] sm:$0xff] %v22966_v8  ;;  %v22972_v9 = vadd.f32 %v12061_v5, %v11991_v42  ;;  %v12484_v42 = vadd.f32 %v12483_v49, %v22743_v53  ;;  %v12655_v55 = vadd.f32 %v12654_v38, %v12609_v25  ;;  %v12592_v49 = vmul.f32 %v22728_v31, %v22728_v31 }
 0x717   : > { %v12063_v51 = vpop.f32.mrf.mxu0  ;;  %v12497_v25 = vadd.f32 %v12496_v30, %v22758_v20 }
 0x718   : > { %24545 = vst [vmem:[#allocation33_spill] sm:$0xff] %v22972_v9  ;;  %v22983_v10 = vadd.f32 %v12063_v51, %v11993_v54  ;;  %v12485_v23 = vadd.f32 %v12484_v42, %v22754_v50  ;;  %v12627_v54 = vmul.f32 %v22764_v58, %v22764_v58  ;;  %v12636_v51 = vmul.f32 %v22775_v60, %v22775_v60 }
 0x719   : > { %v12065_v11 = vpop.f32.mrf.mxu0  ;;  %v12621_v50 = vmul.f32 %v22910_v27, %v22910_v27 }
 0x71a   : > { %24547 = vst [vmem:[#allocation38_spill] sm:$0xff] %v22983_v10  ;;  %v22988_v0 = vadd.f32 %v12065_v11, %v11995_v35  ;;  %v12656_v35 = vadd.f32 %v12655_v55, %v12618_v1  ;;  %v12486_v6 = vadd.f32 %v12485_v23, %v22764_v58  ;;  %v12645_v1 = vmul.f32 %v22786_v29, %v22786_v29 }
 0x71b   : > { %v12067_v21 = vpop.f32.mrf.mxu0  ;;  %v12498_v55 = vadd.f32 %v12497_v25, %v22771_v13 }
 0x71c   : > { %24548 = vst [vmem:[#allocation43_spill] sm:$0xff] %v22988_v0  ;;  %v22995_v7 = vadd.f32 %v12067_v21, %v11997_v46  ;;  %v12610_v46 = vmul.f32 %v22749_v56, %v22749_v56  ;;  %v12657_v38 = vadd.f32 %v12656_v35, %v12627_v54  ;;  %v12487_v42 = vadd.f32 %v12486_v6, %v22775_v60 }
 0x71d   : > { %v12071_v5 = vpop.f32.mrf.mxu0  ;;  %v12666_v21 = vadd.f32 %v12601_v22, %v12592_v49  ;;  %v12628_v54 = vmul.f32 %v22771_v13, %v22771_v13  ;;  %v12499_v35 = vadd.f32 %v12498_v55, %v22779_v12  ;;  %v12637_v22 = vmul.f32 %v22779_v12, %v22779_v12 }
 0x71e   : > { %24549 = vst [vmem:[#allocation36_spill] sm:$0xff] %v22995_v7  ;;  %v23003_v28 = vadd.f32 %v12071_v5, %v12001_v16  ;;  %v12619_v16 = vmul.f32 %v22758_v20, %v22758_v20  ;;  %v12658_v5 = vadd.f32 %v12657_v38, %v12636_v51  ;;  %v12488_v58 = vadd.f32 %v12487_v42, %v22786_v29 }
 0x71f   : > { %v12073_v11 = vpop.f32.mrf.mxu0  ;;  %v12667_v30 = vadd.f32 %v12666_v21, %v12610_v46  ;;  %v12500_v49 = vadd.f32 %v12499_v35, %v22791_v45  ;;  %v12646_v46 = vmul.f32 %v22791_v45, %v22791_v45  ;;  %v12602_v38 = vmul.f32 %v22890_v44, %v22890_v44 }
 0x720   : > { %24550 = vst [vmem:[#allocation59_spill] sm:$0xff] %v23003_v28  ;;  %v23013_v17 = vadd.f32 %v12073_v11, %v12003_v15  ;;  %v12659_v60 = vadd.f32 %v12658_v5, %v12645_v1  ;;  %v12489_v25 = vrot.slane %v12488_v58, 4  ;;  %v12507_v1 = vadd.f32 %v22890_v44, %v22882_v36 }
 0x721   : > { %v12075_v23 = vpop.f32.mrf.mxu0  ;;  %v12668_v15 = vadd.f32 %v12667_v30, %v12619_v16  ;;  %v12501_v55 = vrot.slane %v12500_v49, 4  ;;  %v12611_v5 = vmul.f32 %v22900_v62, %v22900_v62  ;;  %v12620_v45 = vmul.f32 %v22907_v32, %v22907_v32 }
 0x722   : > { %24551 = vst [vmem:[#allocation63_spill] sm:$0xff] %v23013_v17  ;;  %v12660_v21 = vrot.slane %v12659_v60, 4  ;;  %v12593_v23 = vmul.f32 %v22882_v36, %v22882_v36  ;;  %v12508_v35 = vadd.f32 %v12507_v1, %v22900_v62  ;;  %v12519_v13 = vadd.f32 %v22893_v39, %v22887_v18 }
 0x723   : > { %v12076_v6 = vpop.f32.mrf.mxu0  ;;  %v12669_v51 = vadd.f32 %v12668_v15, %v12628_v54  ;;  %v12490_v54 = vadd.f32 %v12489_v25, %v12488_v58  ;;  %v12502_v12 = vadd.f32 %v12501_v55, %v12500_v49  ;;  %v12629_v58 = vmul.f32 %v22918_v19, %v22918_v19 }
 0x724   : > { %v12678_v15 = vadd.f32 %v12602_v38, %v12593_v23  ;;  %v12603_v38 = vmul.f32 %v22893_v39, %v22893_v39  ;;  %v12638_v49 = vmul.f32 %v22927_v48, %v22927_v48 }
 0x725   : > { %v23025_v11 = vpop.f32.mrf.mxu1  ;;  %v12670_v16 = vadd.f32 %v12669_v51, %v12637_v22  ;;  %v12661_v22 = vadd.f32 %v12660_v21, %v12659_v60  ;;  %v12509_v51 = vadd.f32 %v12508_v35, %v22907_v32  ;;  %v12520_v60 = vadd.f32 %v12519_v13, %v22905_v2 }
 0x726   : > { %v12679_v20 = vadd.f32 %v12678_v15, %v12611_v5  ;;  %v12594_v5 = vmul.f32 %v22887_v18, %v22887_v18  ;;  %v12612_v35 = vmul.f32 %v22905_v2, %v22905_v2  ;;  %v12503_v32 = vrot.slane %v12502_v12, 2 }
 0x727   : > { %v23031_v42 = vpop.f32.mrf.mxu1  ;;  %v12671_v6 = vadd.f32 %v12670_v16, %v12646_v46  ;;  %v12491_v46 = vrot.slane %v12490_v54, 2  ;;  %v12510_v1 = vadd.f32 %v12509_v51, %v22918_v19  ;;  %v12662_v23 = vrot.slane %v12661_v22, 2 }
 0x728   : > { %v12680_v21 = vadd.f32 %v12679_v20, %v12620_v45  ;;  %v12521_v51 = vadd.f32 %v12520_v60, %v22910_v27  ;;  %v12647_v20 = vmul.f32 %v22941_v34, %v22941_v34  ;;  %v12690_v45 = vadd.f32 %v12603_v38, %v12594_v5 }
 0x729   : > { %v23039_v30 = vpop.f32.mrf.mxu1  ;;  %v12672_v16 = vrot.slane %v12671_v6, 4  ;;  %v12511_v15 = vadd.f32 %v12510_v1, %v22927_v48  ;;  %v12492_v56 = vadd.f32 %v12491_v46, %v12490_v54  ;;  %v12663_v48 = vadd.f32 %v12662_v23, %v12661_v22 }
 0x72a   : > { %v12681_v19 = vadd.f32 %v12680_v21, %v12629_v58  ;;  %v12522_v2 = vadd.f32 %v12521_v51, %v22925_v52  ;;  %v12691_v58 = vadd.f32 %v12690_v45, %v12612_v35  ;;  %v12630_v21 = vmul.f32 %v22925_v52, %v22925_v52 }
 0x72b   : > { %v23044_v29 = vpop.f32.mrf.mxu1  ;;  %v12512_v62 = vadd.f32 %v12511_v15, %v22941_v34  ;;  %v12673_v60 = vadd.f32 %v12672_v16, %v12671_v6  ;;  %v12504_v39 = vadd.f32 %v12503_v32, %v12502_v12  ;;  %v12639_v54 = vmul.f32 %v22930_v37, %v22930_v37 }
 0x72c   : > { %v12682_v53 = vadd.f32 %v12681_v19, %v12638_v49  ;;  %v12523_v38 = vadd.f32 %v12522_v2, %v22930_v37  ;;  %v12692_v27 = vadd.f32 %v12691_v58, %v12621_v50  ;;  %v12493_v19 = vrot.slane %v12492_v56, 1 }
 0x72d   : > { %v23051_v25 = vpop.f32.mrf.mxu1  ;;  %v12513_v46 = vrot.slane %v12512_v62, 4  ;;  %v12664_v6 = vrot.slane %v12663_v48, 1  ;;  %v12674_v16 = vrot.slane %v12673_v60, 2  ;;  %v12648_v12 = vmul.f32 %v22946_v33, %v22946_v33 }
 0x72e   : > { %v12683_v5 = vadd.f32 %v12682_v53, %v12647_v20  ;;  %v12524_v49 = vadd.f32 %v12523_v38, %v22946_v33  ;;  %v12693_v23 = vadd.f32 %v12692_v27, %v12630_v21  ;;  %v12505_v2 = vrot.slane %v12504_v39, 1 }
 0x72f   : > { %v23059_v55 = vpop.f32.mrf.mxu1  ;;  %v12531_v50 = vadd.f32 %v22956_v41, %v22952_v26  ;;  %v12514_v15 = vadd.f32 %v12513_v46, %v12512_v62  ;;  %v12494_v51 = vadd.f32 %v12493_v19, %v12492_v56  ;;  %v23096_v38 = vadd.f32 %v12664_v6, %v12663_v48 }
 0x730   : > { %v12684_v53 = vrot.slane %v12683_v5, 4  ;;  %v12694_v35 = vadd.f32 %v12693_v23, %v12639_v54  ;;  %v12525_v20 = vrot.slane %v12524_v49, 4  ;;  %v12675_v27 = vadd.f32 %v12674_v16, %v12673_v60 }
 0x731   : > { %v23069_v13 = vpop.f32.mrf.mxu1  ;;  %v12532_v45 = vadd.f32 %v12531_v50, %v22960_v59  ;;  %v12605_v33 = vmul.f32 %v22958_v14, %v22958_v14  ;;  %v12506_v34 = vadd.f32 %v12505_v2, %v12504_v39  ;;  %v12604_v52 = vmul.f32 %v22956_v41, %v22956_v41 }
 0x732   : > { %v12695_v21 = vadd.f32 %v12694_v35, %v12648_v12  ;;  %v12685_v37 = vadd.f32 %v12684_v53, %v12683_v5  ;;  %v12515_v54 = vrot.slane %v12514_v15, 2  ;;  %v12596_v46 = vmul.f32 %v22954_v43, %v22954_v43 }
 0x733   : > { %v23075_v1 = vpop.f32.mrf.mxu1  ;;  %v12533_v62 = vadd.f32 %v12532_v45, %v22964_v24  ;;  %v12543_v48 = vadd.f32 %v22958_v14, %v22954_v43  ;;  %v12614_v60 = vmul.f32 %v22962_v4, %v22962_v4  ;;  %v12526_v19 = vadd.f32 %v12525_v20, %v12524_v49 }
 0x734   : > { %v12595_v39 = vmul.f32 %v22952_v26, %v22952_v26  ;;  %v12613_v5 = vmul.f32 %v22960_v59, %v22960_v59  ;;  %v12696_v23 = vrot.slane %v12695_v21, 4  ;;  %v12714_v12 = vadd.f32 %v12605_v33, %v12596_v46 }
 0x735   : > { %v23080_v44 = vpop.f32.mrf.mxu1  ;;  %v12534_v6 = vadd.f32 %v12533_v62, %v22972_v9  ;;  %v12544_v2 = vadd.f32 %v12543_v48, %v22962_v4  ;;  %v12623_v53 = vmul.f32 %v22966_v8, %v22966_v8  ;;  %v12686_v50 = vrot.slane %v12685_v37, 2 }
 0x736   : > { %v12702_v35 = vadd.f32 %v12604_v52, %v12595_v39  ;;  %v12622_v49 = vmul.f32 %v22964_v24, %v22964_v24  ;;  %v12676_v59 = vrot.slane %v12675_v27, 1  ;;  %v12715_v14 = vadd.f32 %v12714_v12, %v12614_v60 }
 0x737   : > { %v23085_v22 = vpop.f32.mrf.mxu1  ;;  %v12535_v20 = vadd.f32 %v12534_v6, %v22988_v0  ;;  %v12545_v62 = vadd.f32 %v12544_v2, %v22966_v8  ;;  %v12632_v33 = vmul.f32 %v22983_v10, %v22983_v10  ;;  %v12516_v46 = vadd.f32 %v12515_v54, %v12514_v15 }
 0x738   : > { %v12703_v48 = vadd.f32 %v12702_v35, %v12613_v5  ;;  %v12631_v4 = vmul.f32 %v22972_v9, %v22972_v9  ;;  %v12697_v41 = vadd.f32 %v12696_v23, %v12695_v21  ;;  %v12716_v24 = vadd.f32 %v12715_v14, %v12623_v53 }
 0x739   : > { %v23091_v32 = vpop.f32.mrf.mxu1  ;;  %v12536_v52 = vadd.f32 %v12535_v20, %v23003_v28  ;;  %v12546_v6 = vadd.f32 %v12545_v62, %v22983_v10  ;;  %v12641_v60 = vmul.f32 %v22995_v7, %v22995_v7  ;;  %v12687_v12 = vadd.f32 %v12686_v50, %v12685_v37 }
 0x73a   : > { %v12527_v2 = vrot.slane %v12526_v19, 2  ;;  %v12640_v15 = vmul.f32 %v22988_v0, %v22988_v0  ;;  %v23135_v35 = vmul.f32 0.020408163, %v12494_v51  ;;  %v12717_v9 = vadd.f32 %v12716_v24, %v12632_v33 }
 0x73b   : > { %v23094_v58 = vpop.f32.mrf.mxu1  ;;  %v12547_v20 = vadd.f32 %v12546_v6, %v22995_v7  ;;  %v12650_v14 = vmul.f32 %v23013_v17, %v23013_v17  ;;  %v12677_v21 = vadd.f32 %v12676_v59, %v12675_v27  ;;  %v12537_v53 = vrot.slane %v12536_v52, 4 }
 0x73c   : > { %v12649_v37 = vmul.f32 %v23003_v28, %v23003_v28  ;;  %v12517_v62 = vrot.slane %v12516_v46, 1  ;;  %v23145_v24 = vmul.f32 0.020408163, %v12506_v34  ;;  %v12688_v33 = vrot.slane %v12687_v12, 1 }
 0x73d   : > { %v23103_v56 = vpop.f32.mrf.mxu1  ;;  %v12548_v51 = vadd.f32 %v12547_v20, %v23013_v17  ;;  %v12528_v6 = vadd.f32 %v12527_v2, %v12526_v19  ;;  %v23148_v27 = vmul.f32 0.020408163, %v23096_v38  ;;  %v12538_v28 = vadd.f32 %v12537_v53, %v12536_v52 }
 0x73e   : > { %v12518_v20 = vadd.f32 %v12517_v62, %v12516_v46  ;;  %v23155_v2 = vmul.f32 0.020408163, %v12677_v21  ;;  %v12689_v38 = vadd.f32 %v12688_v33, %v12687_v12 }
 0x73f   : > { %v23116_v16 = vpop.f32.mrf.mxu1  ;;  %v12549_v17 = vrot.slane %v12548_v51, 4 }
 0x740   : > { %v23165_v53 = vmul.f32 0.020408163, %v12518_v20  ;;  %v23171_v33 = vmul.f32 0.020408163, %v12689_v38 }
 0x741   : > { %v12146_v45 = vpop.f32.mrf.mxu1  ;;  %v12550_v62 = vadd.f32 %v12549_v17, %v12548_v51 }
 0x742   : > { %v12704_v45 = vadd.f32 %v12703_v48, %v12622_v49  ;;  %v12698_v48 = vrot.slane %v12697_v41, 2 }
 0x743   : > { %v12147_v39 = vpop.f32.mrf.mxu1 }
 0x744   : > { %v12705_v23 = vadd.f32 %v12704_v45, %v12631_v4  ;;  %v12718_v39 = vadd.f32 %v12717_v9, %v12641_v60  ;;  %v23152_v45 = vmul.f32 %v23135_v35, %v23135_v35  ;;  %v12699_v34 = vadd.f32 %v12698_v48, %v12697_v41 }
 0x745   : > { %v12183_v54 = vpop.f32.mrf.mxu0  ;;  %v12254_v5 = vpop.f32.mrf.mxu1  ;;  %v12539_v41 = vrot.slane %v12538_v28, 2 }
 0x746   : > { %v12706_v7 = vadd.f32 %v12705_v23, %v12640_v15  ;;  %v12719_v4 = vadd.f32 %v12718_v39, %v12650_v14  ;;  %v23159_v15 = vmul.f32 %v23145_v24, %v23145_v24  ;;  %v12529_v14 = vrot.slane %v12528_v6, 1 }
 0x747   : > { %v12185_v50 = vpop.f32.mrf.mxu0  ;;  %v23142_v49 = vpop.f32.mrf.mxu1  ;;  %v23178_v17 = vadd.f32 %v12539_v41, %v12538_v28 }
 0x748   : > { %v12707_v10 = vadd.f32 %v12706_v7, %v12649_v37  ;;  %v12720_v8 = vrot.slane %v12719_v4, 4  ;;  %v12184_v7 = vadd.f32 %v12183_v54, %v23025_v11  ;;  %v12700_v37 = vrot.slane %v12699_v34, 1 }
 0x749   : > { %v12187_v0 = vpop.f32.mrf.mxu0  ;;  %v12258_v59 = vpop.f32.mrf.mxu1  ;;  %v12530_v11 = vadd.f32 %v12529_v14, %v12528_v6  ;;  %v12186_v20 = vadd.f32 %v12185_v50, %v23031_v42 }
 0x74a   : > { %v12188_v19 = vadd.f32 %v12187_v0, %v23039_v30  ;;  %v12708_v52 = vrot.slane %v12707_v10, 4  ;;  %v12721_v61 = vadd.f32 %v12720_v8, %v12719_v4  ;;  %v23189_v8 = vadd.f32 %v12700_v37, %v12699_v34 }
 0x74b   : > { %v12189_v9 = vpop.f32.mrf.mxu0  ;;  %v12260_v60 = vpop.f32.mrf.mxu1  ;;  %v23193_v28 = vmul.f32 0.020408163, %v12530_v11  ;;  %v23203_v34 = vadd.f32 %v23142_v49, %v12186_v20 }
 0x74c   : > { %v23167_v12 = vadd.f32 %v12258_v59, %v12188_v19  ;;  %v12190_v54 = vadd.f32 %v12189_v9, %v23044_v29  ;;  %v23180_v51 = vadd.f32 %v12708_v52, %v12707_v10  ;;  %v23187_v29 = vmul.f32 %v23165_v53, %v23165_v53 }
 0x74d   : > { %v12193_v23 = vpop.f32.mrf.mxu0  ;;  %v12264_v39 = vpop.f32.mrf.mxu1  ;;  %v12722_v9 = vrot.slane %v12721_v61, 2 }
 0x74e   : > { %v12194_v0 = vadd.f32 %v12193_v23, %v23051_v25  ;;  %v23174_v25 = vadd.f32 %v12254_v5, %v12184_v7  ;;  %v12551_v5 = vrot.slane %v12550_v62, 2  ;;  %v12606_v42 = vmul.f32 %v23167_v12, %v23167_v12 }
 0x74f   : > { %v12195_v30 = vpop.f32.mrf.mxu0  ;;  %v12266_v21 = vpop.f32.mrf.mxu1  ;;  %v23195_v10 = vadd.f32 %v12260_v60, %v12190_v54  ;;  %v12710_v60 = vrot.slane %v23180_v51, 2 }
 0x750   : > { %v23182_v59 = vadd.f32 %v12264_v39, %v12194_v0  ;;  %v12196_v19 = vadd.f32 %v12195_v30, %v23059_v55  ;;  %v12597_v14 = vmul.f32 %v23174_v25, %v23174_v25  ;;  %v12552_v52 = vadd.f32 %v12551_v5, %v12550_v62 }
 0x751   : > { %v12197_v46 = vpop.f32.mrf.mxu0  ;;  %v12268_v57 = vpop.f32.mrf.mxu1  ;;  %v12555_v0 = vadd.f32 %v23167_v12, %v23174_v25  ;;  %v12598_v62 = vmul.f32 %v23203_v34, %v23203_v34  ;;  %v12567_v5 = vadd.f32 %v23195_v10, %v23203_v34 }
 0x752   : > { %v12198_v23 = vadd.f32 %v12197_v46, %v23069_v13  ;;  %v23210_v46 = vadd.f32 %v12266_v21, %v12196_v19  ;;  %v12726_v30 = vadd.f32 %v12606_v42, %v12597_v14 }
 0x753   : > { %v12199_v6 = vpop.f32.mrf.mxu0  ;;  %v12270_v38 = vpop.f32.mrf.mxu1  ;;  %v12556_v19 = vadd.f32 %v12555_v0, %v23182_v59 }
 0x754   : > { %v23197_v13 = vadd.f32 %v12268_v57, %v12198_v23  ;;  %v12200_v55 = vadd.f32 %v12199_v6, %v23075_v1  ;;  %v12615_v57 = vmul.f32 %v23182_v59, %v23182_v59  ;;  %24553 = vst [vmem:[#allocation39_spill] sm:$0xff] %v23210_v46  ;;  %v12723_v23 = vadd.f32 %v12722_v9, %v12721_v61 }
 0x755   : > { %v12203_v50 = vpop.f32.mrf.mxu0  ;;  %v12274_v4 = vpop.f32.mrf.mxu1 }
 0x756   : > { %24552 = vst [vmem:[#allocation41_spill] sm:$0xff] %v23197_v13  ;;  %v12204_v39 = vadd.f32 %v12203_v50, %v23080_v44  ;;  %v12607_v44 = vmul.f32 %v23195_v10, %v23195_v10  ;;  %v12624_v37 = vmul.f32 %v23197_v13, %v23197_v13  ;;  %v23220_v11 = vadd.f32 %v12270_v38, %v12200_v55 }
 0x757   : > { %v12205_v1 = vpop.f32.mrf.mxu0  ;;  %v12276_v41 = vpop.f32.mrf.mxu1  ;;  %v12727_v42 = vadd.f32 %v12726_v30, %v12615_v57  ;;  %v12616_v38 = vmul.f32 %v23210_v46, %v23210_v46  ;;  %v12557_v61 = vadd.f32 %v12556_v19, %v23197_v13  ;;  %v12553_v19 = vrot.slane %v12552_v52, 1 }
 0x758   : > { %v23214_v49 = vadd.f32 %v12274_v4, %v12204_v39  ;;  %24555 = vst [vmem:[#allocation50_spill] sm:$0xff] %v23220_v11  ;;  %v12206_v21 = vadd.f32 %v12205_v1, %v23085_v22  ;;  %v12738_v14 = vadd.f32 %v12607_v44, %v12598_v62  ;;  %v12568_v39 = vadd.f32 %v12567_v5, %v23210_v46 }
 0x759   : > { %v12207_v54 = vpop.f32.mrf.mxu0  ;;  %v12278_v20 = vpop.f32.mrf.mxu1  ;;  %v12728_v57 = vadd.f32 %v12727_v42, %v12624_v37  ;;  %v12625_v1 = vmul.f32 %v23220_v11, %v23220_v11  ;;  %v12711_v5 = vadd.f32 %v12710_v60, %v23180_v51  ;;  %v12554_v60 = vadd.f32 %v12553_v19, %v12552_v52 }
 0x75a   : > { %24554 = vst [vmem:[#allocation49_spill] sm:$0xff] %v23214_v49  ;;  %v12208_v6 = vadd.f32 %v12207_v54, %v23091_v32  ;;  %v23231_v55 = vadd.f32 %v12276_v41, %v12206_v21  ;;  %v12633_v4 = vmul.f32 %v23214_v49, %v23214_v49  ;;  %v12558_v30 = vadd.f32 %v12557_v61, %v23214_v49 }
 0x75b   : > { %v12209_v22 = vpop.f32.mrf.mxu0  ;;  %v12280_v50 = vpop.f32.mrf.mxu1  ;;  %v12569_v44 = vadd.f32 %v12568_v39, %v23220_v11 }
 0x75c   : > { %24556 = vst [vmem:[#allocation65_spill] sm:$0xff] %v23231_v55  ;;  %v23236_v9 = vadd.f32 %v12278_v20, %v12208_v6  ;;  %v12210_v32 = vadd.f32 %v12209_v22, %v23094_v58  ;;  %v12739_v58 = vadd.f32 %v12738_v14, %v12616_v38  ;;  %v12634_v37 = vmul.f32 %v23231_v55, %v23231_v55 }
 0x75d   : > { %v12213_v41 = vpop.f32.mrf.mxu0  ;;  %v12284_v0 = vpop.f32.mrf.mxu1  ;;  %v12729_v42 = vadd.f32 %v12728_v57, %v12633_v4 }
 0x75e   : > { %24557 = vst [vmem:[#allocation16_spill] sm:$0xff] %v23236_v9  ;;  %v12642_v21 = vmul.f32 %v23236_v9, %v23236_v9  ;;  %v23245_v54 = vadd.f32 %v12280_v50, %v12210_v32  ;;  %v12214_v20 = vadd.f32 %v12213_v41, %v23103_v56  ;;  %v12559_v22 = vadd.f32 %v12558_v30, %v23236_v9 }
 0x75f   : > { %v12215_v62 = vpop.f32.mrf.mxu0  ;;  %v12286_v6 = vpop.f32.mrf.mxu1  ;;  %v12740_v50 = vadd.f32 %v12739_v58, %v12625_v1  ;;  %v12570_v32 = vadd.f32 %v12569_v44, %v23231_v55  ;;  %v12724_v41 = vrot.slane %v12723_v23, 1 }
 0x760   : > { %24558 = vst [vmem:[#allocation4_spill] sm:$0xff] %v23245_v54  ;;  %v23253_v61 = vadd.f32 %v12284_v0, %v12214_v20  ;;  %v12643_v56 = vmul.f32 %v23245_v54, %v23245_v54  ;;  %v12216_v38 = vadd.f32 %v12215_v62, %v23116_v16  ;;  %v12730_v48 = vadd.f32 %v12729_v42, %v12642_v21 }
 0x761   : > { %v12217_v14 = vpop.f32.mrf.mxu0  ;;  %v12288_v39 = vpop.f32.mrf.mxu1  ;;  %v12741_v4 = vadd.f32 %v12740_v50, %v12634_v37  ;;  %v12571_v57 = vadd.f32 %v12570_v32, %v23245_v54  ;;  %v12774_v20 = vmul.f32 0.020408163, %v23189_v8  ;;  %v12712_v16 = vrot.slane %v12711_v5, 1 }
 0x762   : > { %24559 = vst [vmem:[#allocation5_spill] sm:$0xff] %v23253_v61  ;;  %v12560_v7 = vadd.f32 %v12559_v22, %v23253_v61  ;;  %v12651_v51 = vmul.f32 %v23253_v61, %v23253_v61  ;;  %v23263_v1 = vadd.f32 %v12286_v6, %v12216_v38  ;;  %v24561_v21 = vrot.slane %v23178_v17, 1 }
 0x763   : > { %v12218_v0 = vpop.f32.mrf.mxu0  ;;  %v12289_v30 = vpop.f32.mrf.mxu1  ;;  %v12742_v42 = vadd.f32 %v12741_v4, %v12643_v56  ;;  %v12783_v37 = vmul.f32 %v23193_v28, %v23193_v28  ;;  %v12725_v6 = vadd.f32 %v12724_v41, %v12723_v23  ;;  %v23276_v38 = vmul.f32 0.020408163, %v12554_v60 }
 0x764   : > { %24560 = vst [vmem:[#allocation7_spill] sm:$0xff] %v23263_v1  ;;  %v12561_v58 = vrot.slane %v12560_v7, 4  ;;  %v12731_v44 = vadd.f32 %v12730_v48, %v12651_v51  ;;  %v12542_v62 = vadd.f32 %v24561_v21, %v23178_v17  ;;  %v12572_v22 = vadd.f32 %v12571_v57, %v23263_v1 }
 0x765   : > { %v12652_v52 = vmul.f32 %v23263_v1, %v23263_v1  ;;  %v15213_v19 = vpop.f32.mrf.mxu0  ;;  %v12791_v48 = vsub.f32 %v23171_v33, %v23187_v29  ;;  %v12713_v39 = vadd.f32 %v12712_v16, %v12711_v5  ;;  %v12776_v1 = vmul.f32 0.020408163, %v12725_v6 }
 0x766   : > { %v12562_v50 = vadd.f32 %v12561_v58, %v12560_v7  ;;  %v12732_v8 = vrot.slane %v12731_v44, 4  ;;  %v15253_v32 = vpop.f32.mrf.mxu1  ;;  %v12573_v17 = vrot.slane %v12572_v22, 4  ;;  %v23278_v30 = vmul.f32 0.020408163, %v12542_v62 }
 0x767   : > { %v12743_v56 = vadd.f32 %v12742_v42, %v12652_v52  ;;  %v15214_v14 = vpop.f32.mrf.mxu0  ;;  %v12792_v58 = vsub.f32 %v12774_v20, %v12783_v37  ;;  %v12785_v60 = vmul.f32 %v23276_v38, %v23276_v38  ;;  %v12775_v52 = vmul.f32 0.020408163, %v12713_v39 }
 0x768   : > { %v12563_v51 = vrot.slane %v12562_v50, 2  ;;  %v12733_v4 = vadd.f32 %v12732_v8, %v12731_v44  ;;  %v15215_v57 = vadd.f32 %v15214_v14, %v15213_v19  ;;  %v15254_v0 = vpop.f32.mrf.mxu1  ;;  %v12574_v21 = vadd.f32 %v12573_v17, %v12572_v22 }
 0x769   : > { %v12744_v23 = vrot.slane %v12743_v56, 4  ;;  %v15255_v7 = vadd.f32 %v15254_v0, %v15253_v32  ;;  %v15216_v41 = vpop.f32.mrf.mxu0  ;;  %v12784_v20 = vmul.f32 %v23278_v30, %v23278_v30  ;;  %v24562_v17 = vsub.f32 %v23155_v2, %v23159_v15 }
 0x76a   : > { %v12564_v61 = vadd.f32 %v12563_v51, %v12562_v50  ;;  %v12734_v33 = vrot.slane %v12733_v4, 2  ;;  %v15256_v29 = vpop.f32.mrf.mxu1  ;;  %v12575_v42 = vrot.slane %v12574_v21, 2  ;;  %v12803_v14 = vadd.f32 0.001, %v12792_v58 }
 0x76b   : > { %v12745_v5 = vadd.f32 %v12744_v23, %v12743_v56  ;;  %v15217_v16 = vpop.f32.mrf.mxu0  ;;  %v23282_v44 = vadd.f32 %v15255_v7, %v15215_v57  ;;  %v12801_v56 = vadd.f32 0.001, %v24562_v17  ;;  %v12802_v15 = vadd.f32 0.001, %v12791_v48 }
 0x76c   : > { %v12565_v62 = vrot.slane %v12564_v61, 1  ;;  %v12735_v19 = vadd.f32 %v12734_v33, %v12733_v4  ;;  %v15218_v22 = vadd.f32 %v15217_v16, %v15216_v41  ;;  %v15257_v8 = vpop.f32.mrf.mxu1  ;;  %v12576_v37 = vadd.f32 %v12575_v42, %v12574_v21 }
 0x76d   : > { %v12746_v6 = vrot.slane %v12745_v5, 2  ;;  %v15258_v50 = vadd.f32 %v15257_v8, %v15256_v29  ;;  %v23286_v32 = vpop.f32.mrf.mxu0  ;;  %v12794_v4 = vsub.f32 %v12776_v1, %v12785_v60  ;;  %v24563_v21 = vsub.f32 %v23148_v27, %v23152_v45 }
 0x76e   : > { %v12566_v51 = vadd.f32 %v12565_v62, %v12564_v61  ;;  %v12736_v57 = vrot.slane %v12735_v19, 1  ;;  %v23291_v39 = vpop.f32.mrf.mxu1  ;;  %v12577_v0 = vrot.slane %v12576_v37, 1  ;;  %v12793_v58 = vsub.f32 %v12775_v52, %v12784_v20 }
 0x76f   : > { %v12747_v23 = vadd.f32 %v12746_v6, %v12745_v5  ;;  %v15220_v7 = vpop.f32.mrf.mxu0  ;;  %v23293_v41 = vadd.f32 %v15258_v50, %v15218_v22  ;;  %v12800_v33 = vadd.f32 0.001, %v24563_v21  ;;  %17019 = vrsqrt.f32 %v12801_v56 }
 0x770   : > { %v12737_v29 = vadd.f32 %v12736_v57, %v12735_v19  ;;  %v23298_v42 = vmul.f32 0.020408163, %v12566_v51  ;;  %v15260_v2 = vpop.f32.mrf.mxu1  ;;  %v12578_v61 = vadd.f32 %v12577_v0, %v12576_v37  ;;  %17021 = vrsqrt.f32 %v12803_v14 }
 0x771   : > { %v12748_v16 = vrot.slane %v12747_v23, 1  ;;  %v15222_v62 = vpop.f32.mrf.mxu0  ;;  %v12805_v22 = vadd.f32 0.001, %v12794_v4  ;;  %17023 = vrsqrt.f32 %v12800_v33  ;;  %v12804_v48 = vadd.f32 0.001, %v12793_v58 }
 0x772   : > { %v12777_v1 = vmul.f32 0.020408163, %v12737_v29  ;;  %v12786_v60 = vmul.f32 %v23298_v42, %v23298_v42  ;;  %v15262_v5 = vpop.f32.mrf.mxu1  ;;  %v23302_v27 = vmul.f32 0.020408163, %v12578_v61  ;;  %17025 = vrsqrt.f32 %v12802_v15 }
 0x773   : > { %v12749_v8 = vadd.f32 %v12748_v16, %v12747_v23  ;;  %v15223_v45 = vpop.f32.mrf.mxu0  ;;  %17027 = vrsqrt.f32 %v12805_v22 }
 0x774   : > { %v12795_v19 = vsub.f32 %v12777_v1, %v12786_v60  ;;  %v15263_v6 = vpop.f32.mrf.mxu1  ;;  %v12787_v20 = vmul.f32 %v23302_v27, %v23302_v27  ;;  %17029 = vrsqrt.f32 %v12804_v48 }
 0x775   : > { %v12778_v52 = vmul.f32 0.020408163, %v12749_v8  ;;  %v15225_v37 = vpop.f32.mrf.mxu0 }
 0x776   : > { %v12806_v50 = vadd.f32 0.001, %v12795_v19  ;;  %v15265_v17 = vpop.f32.mrf.mxu1 }
 0x777   : > { %v12796_v56 = vsub.f32 %v12778_v52, %v12787_v20  ;;  %v15226_v14 = vpop.f32.mrf.mxu0 }
 0x778   : > { %v15266_v51 = vpop.f32.mrf.mxu1  ;;  %17031 = vrsqrt.f32 %v12806_v50  ;;  %v15227_v49 = vadd.f32 %v15226_v14, %v15225_v37 }
 0x779   : > { %v12807_v57 = vadd.f32 0.001, %v12796_v56  ;;  %v15228_v4 = vpop.f32.mrf.mxu0  ;;  %v15221_v56 = vadd.f32 %v15220_v7, %v23286_v32  ;;  %v15267_v11 = vadd.f32 %v15266_v51, %v15265_v17 }
 0x77a   : > { %v15268_v0 = vpop.f32.mrf.mxu1 }
 0x77b   : > { %17033 = vrsqrt.f32 %v12807_v57  ;;  %v15229_v23 = vpop.f32.mrf.mxu0  ;;  %v15261_v57 = vadd.f32 %v15260_v2, %v23291_v39  ;;  %v12406_v37 = vadd.f32 %v15267_v11, %v15227_v49 }
 0x77c   : > { %v15269_v21 = vpop.f32.mrf.mxu1  ;;  %v17020_v15 = vpop.eup %17019  ;;  %v15230_v39 = vadd.f32 %v15229_v23, %v15228_v4 }
 0x77d   : > { %v15231_v33 = vpop.f32.mrf.mxu0  ;;  %v17022_v61 = vpop.eup %17021  ;;  %v15270_v7 = vadd.f32 %v15269_v21, %v15268_v0  ;;  %v12398_v2 = vadd.f32 %v15261_v57, %v15221_v56 }
 0x77e   : > { %v15271_v29 = vpop.f32.mrf.mxu1  ;;  %v17024_v1 = vpop.eup %17023 }
 0x77f   : > { %v15232_v58 = vpop.f32.mrf.mxu0  ;;  %v17026_v22 = vpop.eup %17025  ;;  %v12827_v19 = vcombine.low %v17024_v1, %v17020_v15  ;;  %v12409_v0 = vadd.f32 %v15270_v7, %v15230_v39 }
 0x780   : > { %v15272_v16 = vpop.f32.mrf.mxu1  ;;  %v12828_v48 = vcombine.low %v17026_v22, %v17022_v61  ;;  %v17028_v20 = vpop.eup %17027  ;;  %v15233_v51 = vadd.f32 %v15232_v58, %v15231_v33 }
 0x781   : > { %v15234_v60 = vpop.f32.mrf.mxu0  ;;  %v17030_v9 = vpop.eup %17029  ;;  %v15273_v4 = vadd.f32 %v15272_v16, %v15271_v29  ;;  %v12798_v29 = vld [vmem:[%s23333_s28] sm:$0xff] }
 0x782   : > { %v15274_v8 = vpop.f32.mrf.mxu1  ;;  %v12844_v15 = vrot.slane %v12828_v48, %v22169_v47  ;;  %v12829_v61 = vcombine.low %v17030_v9, %v17028_v20 }
 0x783   : > { %v15235_v52 = vpop.f32.mrf.mxu0  ;;  %v12837_v8 = vrot.slane %v12827_v19, %v22169_v47 }
 0x784   : > { %v15275_v50 = vpop.f32.mrf.mxu1  ;;  %v15224_v52 = vadd.f32 %v15223_v45, %v15222_v62  ;;  %v12851_v62 = vrot.slane %v12829_v61, %v22169_v47 }
 0x785   : > { %v15325_v54 = vpop.f32.mrf.mxu0  ;;  %v17032_v60 = vpop.eup %17031  ;;  %v15264_v50 = vadd.f32 %v15263_v6, %v15262_v5  ;;  %v12859_v48 = vcombine.low %v12837_v8, %v12844_v15 }
 0x786   : > { %v15329_v55 = vpop.f32.mrf.mxu1  ;;  %v23324_v45 = vadd.f32 %v15325_v54, %v12398_v2 }
 0x787   : > { %v12453_v1 = vpop.f32.mrf.mxu0  ;;  %v12401_v17 = vadd.f32 %v15264_v50, %v15224_v52 }
 0x788   : > { %v17034_v22 = vpop.eup %17033  ;;  %v12469_v13 = vpop.f32.mrf.mxu1  ;;  %v23320_v19 = vadd.f32 %v12453_v1, %v23282_v44  ;;  %24566 = vst [vmem:[#allocation52_spill] sm:$0xff] %v23324_v45  ;;  %v12617_v33 = vmul.f32 %v23324_v45, %v23324_v45 }
 0x789   : > { %v12830_v32 = vcombine.low %v17032_v60, %v17034_v22  ;;  %v15326_v46 = vpop.f32.mrf.mxu0  ;;  %v23348_v58 = vadd.f32 %v12469_v13, %v12406_v37  ;;  %v12414_v60 = vadd.f32 %v15273_v4, %v15233_v51  ;;  %v24581_v51 = vld [vmem:[#allocation10_spill] sm:$0xff] }
 0x78a   : > { %24565 = vst [vmem:[#allocation17_spill] sm:$0xff] %v23320_v19  ;;  %v15330_v9 = vpop.f32.mrf.mxu1  ;;  %v12599_v54 = vmul.f32 %v23320_v19, %v23320_v19  ;;  %v23337_v21 = vadd.f32 %v15326_v46, %v12401_v17  ;;  %v24580_v17 = vld [vmem:[#allocation14_spill] sm:$0xff] }
 0x78b   : > { %v12858_v5 = vrot.slane %v12830_v32, %v22169_v47  ;;  %v12456_v6 = vpop.f32.mrf.mxu0  ;;  %24569 = vst [vmem:[#allocation29_spill] sm:$0xff] %v23348_v58  ;;  %v23356_v22 = vadd.f32 %v15329_v55, %v12414_v60  ;;  %v23360_v13 = vmul.f32 %v23348_v58, %v23348_v58  ;;  %v24576_v55 = vld [vmem:[#allocation6_spill] sm:$0xff]  ;;  %v24577_v9 = vld [vmem:[#allocation8_spill] sm:$0xff] }
 0x78c   : > { %v23327_v14 = vadd.f32 %v12456_v6, %v23293_v41  ;;  %v12472_v23 = vpop.f32.mrf.mxu1  ;;  %24568 = vst [vmem:[#allocation60_spill] sm:$0xff] %v23337_v21  ;;  %v12867_v41 = vrot.slane %v12859_v48, %v22169_v47  ;;  %v12626_v8 = vmul.f32 %v23337_v21, %v23337_v21  ;;  %v24579_v6 = vld [vmem:[#allocation9_spill] sm:$0xff] }
 0x78d   : > { %v12860_v44 = vcombine.low %v12851_v62, %v12858_v5  ;;  %v23351_v56 = vadd.f32 %v12472_v23, %v12409_v0  ;;  %24571 = vst [vmem:[#allocation56_spill] sm:$0xff] %v23356_v22  ;;  %24572 = vst [vmem:[#allocation12_spill] sm:$0xff] %v23360_v13  ;;  %v24578_v62 = vld [vmem:[#allocation13_spill] sm:$0xff]  ;;  %v24606_v22 = vld [vmem:[#allocation42_spill] sm:$0xff] }
 0x78e   : > { %24567 = vst [vmem:[#allocation11_spill] sm:$0xff] %v23327_v14  ;;  %v12579_v49 = vadd.f32 %v23327_v14, %v23320_v19  ;;  %v12608_v11 = vmul.f32 %v23327_v14, %v23327_v14  ;;  %v24613_v13 = vld [vmem:[#allocation65_spill] sm:$0xff] }
 0x78f   : > { %v12874_v20 = vrot.slane %v12860_v44, %v22169_v47  ;;  %24570 = vst [vmem:[#allocation20_spill] sm:$0xff] %v23351_v56  ;;  %v23367_v50 = vmul.f32 %v23351_v56, %v23351_v56  ;;  %v24617_v56 = vld [vmem:[#allocation76_spill] sm:$0xff] }
 0x790   : > { %v12580_v16 = vadd.f32 %v12579_v49, %v23324_v45  ;;  %v12750_v46 = vadd.f32 %v12608_v11, %v12599_v54 }
 0x791   : > { %v12875_v57 = vcombine.low %v12867_v41, %v12874_v20  ;;  %24574 = vst [vmem:[#allocation37_spill] sm:$0xff] %v23367_v50  ;;  %v24605_v50 = vld [vmem:[#allocation40_spill] sm:$0xff] }
 0x792   : > { %v12751_v15 = vadd.f32 %v12750_v46, %v12617_v33  ;;  %v12581_v61 = vadd.f32 %v12580_v16, %v23337_v21  ;;  %v24599_v21 = vld [vmem:[#allocation51_spill] sm:$0xff] }
 0x793   : > { %v12892_v1 = vmul.f32 %v12875_v57, %v12798_v29 }
 0x794   : > { %v23363_v52 = vadd.f32 %v12581_v61, %v23348_v58  ;;  %v23369_v32 = vadd.f32 %v12751_v15, %v12626_v8  ;;  %v24582_v8 = vld [vmem:[#allocation66_spill] sm:$0xff] }
 0x795   : > { %v23372_v39 = vrot.slane %v12892_v1, %v24480_v40  ;;  %v23375_v7 = vrot.slane %v12892_v1, %v24481_v3  ;;  %v23378_v2 = vrot.slane %v12892_v1, %v24576_v55  ;;  %v23381_v48 = vrot.slane %v12892_v1, %v24577_v9  ;;  %v24583_v15 = vld [vmem:[#allocation34_spill] sm:$0xff] }
 0x796   : > { %24573 = vst [vmem:[#allocation24_spill] sm:$0xff] %v23363_v52  ;;  %24575 = vst [vmem:[#allocation18_spill] sm:$0xff] %v23369_v32  ;;  %v23384_v5 = vrot.slane %v12892_v1, %v24578_v62  ;;  %v23387_v37 = vrot.slane %v12892_v1, %v24579_v6  ;;  %v23390_v44 = vrot.slane %v12892_v1, %v24580_v17  ;;  %v24584_v61 = vld [vmem:[#allocation82_spill] sm:$0xff]  ;;  %v24611_v32 = vld [vmem:[#allocation49_spill] sm:$0xff] }
 0x797   : > { %v23393_v4 = vrot.slane %v12892_v1, %v24581_v51  ;;  %v12943_v0 = vmul.f32 %v23372_v39, %v23135_v35  ;;  %v12944_v23 = vmul.f32 %v23375_v7, %v23145_v24  ;;  %v12945_v54 = vmul.f32 %v23378_v2, %v23165_v53  ;;  %v24598_v58 = vld [vmem:[#allocation46_spill] sm:$0xff]  ;;  %v24615_v52 = vld [vmem:[#allocation72_spill] sm:$0xff] }
 0x798   : > { %v12946_v49 = vmul.f32 %v23381_v48, %v23193_v28  ;;  %v12947_v11 = vmul.f32 %v23384_v5, %v23278_v30  ;;  %v12948_v41 = vmul.f32 %v23387_v37, %v23276_v38  ;;  %v12949_v20 = vmul.f32 %v23390_v44, %v23298_v42 }
 0x799   : > { %v12950_v35 = vmul.f32 %v23393_v4, %v23302_v27  ;;  %v12961_v33 = vcombine.low %v12943_v0, %v12944_v23  ;;  %v23413_v53 = vmul.f32 %v23372_v39, %v22723_v63  ;;  %v23417_v28 = vmul.f32 %v23375_v7, %v22728_v31  ;;  %v24586_v23 = vld [vmem:[#allocation35_spill] sm:$0xff] }
 0x79a   : > { %v12962_v24 = vcombine.low %v12945_v54, %v12946_v49  ;;  %v12963_v30 = vcombine.low %v12947_v11, %v12948_v41  ;;  %v23421_v38 = vmul.f32 %v23378_v2, %v22882_v36  ;;  %v23425_v42 = vmul.f32 %v23381_v48, %v22887_v18  ;;  %v24587_v49 = vld [vmem:[#allocation53_spill] sm:$0xff] }
 0x79b   : > { %v12964_v29 = vcombine.low %v12949_v20, %v12950_v35  ;;  %v12971_v27 = vrot.slane %v12961_v33, %v22169_v47  ;;  %v23431_v16 = vmul.f32 %v23384_v5, %v22952_v26  ;;  %v23435_v31 = vmul.f32 %v23387_v37, %v22954_v43  ;;  %v24588_v33 = vld [vmem:[#allocation67_spill] sm:$0xff] }
 0x79c   : > { %v12978_v63 = vrot.slane %v12962_v24, %v22169_v47  ;;  %v12985_v46 = vrot.slane %v12963_v30, %v22169_v47  ;;  %v23441_v18 = vmul.f32 %v23390_v44, %v23174_v25  ;;  %v23445_v57 = vmul.f32 %v23393_v4, %v23203_v34  ;;  %v24585_v34 = vld [vmem:[#allocation78_spill] sm:$0xff] }
 0x79d   : > { %v12992_v36 = vrot.slane %v12964_v29, %v22169_v47  ;;  %v23449_v26 = vmul.f32 %v23372_v39, %v24582_v8  ;;  %v23453_v43 = vmul.f32 %v23375_v7, %v24583_v15  ;;  %v23457_v1 = vmul.f32 %v23378_v2, %v24584_v61  ;;  %v24589_v29 = vld [vmem:[#allocation69_spill] sm:$0xff]  ;;  %v24593_v15 = vld [vmem:[#allocation47_spill] sm:$0xff] }
 0x79e   : > { %v12993_v60 = vcombine.low %v12971_v27, %v12978_v63  ;;  %v23467_v0 = vmul.f32 %v23381_v48, %v24585_v34  ;;  %v23471_v54 = vmul.f32 %v23384_v5, %v24586_v23  ;;  %v23475_v11 = vmul.f32 %v23387_v37, %v24587_v49  ;;  %v24590_v63 = vld [vmem:[#allocation80_spill] sm:$0xff]  ;;  %v24594_v34 = vld [vmem:[#allocation39_spill] sm:$0xff] }
 0x79f   : > { %v12994_v25 = vcombine.low %v12985_v46, %v12992_v36  ;;  %v23480_v20 = vmul.f32 %v23390_v44, %v23167_v12  ;;  %v23484_v35 = vmul.f32 %v23393_v4, %v23195_v10  ;;  %v23488_v24 = vmul.f32 %v23372_v39, %v24588_v33  ;;  %v24591_v12 = vld [vmem:[#allocation83_spill] sm:$0xff]  ;;  %v12894_v10 = vld [vmem:[%s23463_s12] sm:$0xff] }
 0x7a0   : > { %v13001_v41 = vrot.slane %v12993_v60, %v22169_v47  ;;  %v23493_v27 = vmul.f32 %v23375_v7, %v24589_v29  ;;  %v23497_v46 = vmul.f32 %v23378_v2, %v24590_v63  ;;  %v23501_v36 = vmul.f32 %v23381_v48, %v24591_v12  ;;  %v24592_v60 = vld [vmem:[#allocation54_spill] sm:$0xff] }
 0x7a1   : > { %v13008_v30 = vrot.slane %v12994_v25, %v22169_v47  ;;  %v23506_v8 = vmul.f32 %v23384_v5, %v24592_v60  ;;  %v23510_v61 = vmul.f32 %v23387_v37, %v24593_v15  ;;  %v23514_v25 = vmul.f32 %v23390_v44, %v23182_v59  ;;  %v24595_v33 = vld [vmem:[#allocation70_spill] sm:$0xff]  ;;  %v24597_v60 = vld [vmem:[#allocation81_spill] sm:$0xff]  ;;  %v24604_v47 = vld [vmem:[#allocation71_spill] sm:$0xff] }
 0x7a2   : > { %v23518_v23 = vmul.f32 %v23393_v4, %v24594_v34  ;;  %v23522_v29 = vmul.f32 %v23372_v39, %v24595_v33  ;;  %v24596_v63 = vld [vmem:[#allocation74_spill] sm:$0xff]  ;;  %v23530_v15 = vmul.f32 %v23378_v2, %v24597_v60  ;;  %v23534_v59 = vmul.f32 %v23381_v48, %v24598_v58  ;;  %v24601_v33 = vld [vmem:[#allocation41_spill] sm:$0xff]  ;;  %v24603_v58 = vld [vmem:[#allocation68_spill] sm:$0xff] }
 0x7a3   : > { %v13009_v49 = vcombine.low %v13001_v41, %v13008_v30  ;;  %v23526_v12 = vmul.f32 %v23375_v7, %v24596_v63  ;;  %v23538_v41 = vmul.f32 %v23384_v5, %v24599_v21  ;;  %v24600_v30 = vld [vmem:[#allocation44_spill] sm:$0xff]  ;;  %v23546_v63 = vmul.f32 %v23390_v44, %v24601_v33  ;;  %v24602_v60 = vld [vmem:[#allocation50_spill] sm:$0xff] }
 0x7a4   : > { %v23542_v34 = vmul.f32 %v23387_v37, %v24600_v30  ;;  %v23550_v14 = vmul.f32 %v23393_v4, %v24602_v60  ;;  %v23554_v19 = vmul.f32 %v23372_v39, %v24603_v58  ;;  %v23558_v21 = vmul.f32 %v23375_v7, %v24604_v47  ;;  %v24609_v60 = vld [vmem:[#allocation38_spill] sm:$0xff] }
 0x7a5   : > { %v13026_v45 = vsub.f32 %v12894_v10, %v13009_v49  ;;  %v23562_v30 = vmul.f32 %v23378_v2, %v24605_v50  ;;  %v23566_v33 = vmul.f32 %v23381_v48, %v24606_v22  ;;  %v24607_v10 = vld [vmem:[#allocation33_spill] sm:$0xff]  ;;  %v23574_v58 = vmul.f32 %v23387_v37, %v24609_v60 }
 0x7a6   : > { %v23570_v49 = vmul.f32 %v23384_v5, %v24607_v10  ;;  %v23578_v47 = vmul.f32 %v23390_v44, %v24611_v32  ;;  %v23582_v50 = vmul.f32 %v23393_v4, %v24613_v13  ;;  %v23586_v22 = vmul.f32 %v23372_v39, %v24615_v52  ;;  %v24619_v60 = vld [vmem:[#allocation45_spill] sm:$0xff]  ;;  %v24621_v32 = vld [vmem:[#allocation48_spill] sm:$0xff]  ;;  %v24623_v13 = vld [vmem:[#allocation43_spill] sm:$0xff] }
 0x7a7   : > { %24610 = vst [vmem:[#allocation21_spill] sm:$0xff] %v23574_v58  ;;  %v23590_v10 = vmul.f32 %v23375_v7, %v24617_v56  ;;  %v23598_v58 = vmul.f32 %v23378_v2, %v24619_v60  ;;  %v24625_v52 = vld [vmem:[#allocation36_spill] sm:$0xff] }
 0x7a8   : > { %24608 = vst [vmem:[#allocation61_spill] sm:$0xff] %v23570_v49  ;;  %24612 = vst [vmem:[#allocation75_spill] sm:$0xff] %v23578_v47  ;;  %v23602_v47 = vmul.f32 %v23381_v48, %v24621_v32  ;;  %v24627_v56 = vld [vmem:[#allocation16_spill] sm:$0xff] }
 0x7a9   : > { %24614 = vst [vmem:[#allocation15_spill] sm:$0xff] %v23582_v50  ;;  %24616 = vst [vmem:[#allocation19_spill] sm:$0xff] %v23586_v22  ;;  %v23606_v50 = vmul.f32 %v23384_v5, %v24623_v13  ;;  %v23610_v22 = vmul.f32 %v23387_v37, %v24625_v52  ;;  %v24629_v49 = vld [vmem:[#allocation4_spill] sm:$0xff] }
 0x7aa   : > { %24618 = vst [vmem:[#allocation28_spill] sm:$0xff] %v23590_v10  ;;  %24620 = vst [vmem:[#allocation58_spill] sm:$0xff] %v23598_v58  ;;  %v23614_v10 = vmul.f32 %v23390_v44, %v24627_v56  ;;  %v23618_v60 = vmul.f32 %v23393_v4, %v24629_v49  ;;  %v24631_v58 = vld [vmem:[#allocation73_spill] sm:$0xff] }
 0x7ab   : > { %24622 = vst [vmem:[#allocation23_spill] sm:$0xff] %v23602_v47  ;;  %24624 = vst [vmem:[#allocation64_spill] sm:$0xff] %v23606_v50  ;;  %v23622_v32 = vmul.f32 %v23372_v39, %v24631_v58  ;;  %v24632_v47 = vld [vmem:[#allocation79_spill] sm:$0xff]  ;;  %v24637_v58 = vld [vmem:[#allocation5_spill] sm:$0xff] }
 0x7ac   : > { %24626 = vst [vmem:[#allocation26_spill] sm:$0xff] %v23610_v22  ;;  %24628 = vst [vmem:[#allocation77_spill] sm:$0xff] %v23614_v10  ;;  %v23626_v13 = vmul.f32 %v23375_v7, %v24632_v47  ;;  %v24633_v50 = vld [vmem:[#allocation55_spill] sm:$0xff]  ;;  %v24634_v22 = vld [vmem:[#allocation57_spill] sm:$0xff]  ;;  %v23646_v7 = vmul.f32 %v23390_v44, %v24637_v58  ;;  %v23665_v44 = vrot.slane %v13026_v45, %v24578_v62 }
 0x7ad   : > { %24630 = vst [vmem:[#allocation22_spill] sm:$0xff] %v23618_v60  ;;  %v23630_v52 = vmul.f32 %v23378_v2, %v24633_v50  ;;  %v23634_v56 = vmul.f32 %v23381_v48, %v24634_v22  ;;  %v24635_v10 = vld [vmem:[#allocation59_spill] sm:$0xff]  ;;  %v23653_v50 = vrot.slane %v13026_v45, %v24480_v40  ;;  %v23656_v48 = vrot.slane %v13026_v45, %v24481_v3 }
 0x7ae   : > { %v23638_v49 = vmul.f32 %v23384_v5, %v24635_v10  ;;  %v24636_v60 = vld [vmem:[#allocation63_spill] sm:$0xff]  ;;  %v23659_v5 = vrot.slane %v13026_v45, %v24576_v55  ;;  %v23668_v22 = vrot.slane %v13026_v45, %v24579_v6  ;;  %v23674_v10 = vrot.slane %v13026_v45, %v24581_v51 }
 0x7af   : > { %v23642_v39 = vmul.f32 %v23387_v37, %v24636_v60  ;;  %v24638_v47 = vld [vmem:[#allocation7_spill] sm:$0xff]  ;;  %v23662_v37 = vrot.slane %v13026_v45, %v24577_v9  ;;  %v13138_v3 = vadd.f32 %v23653_v50, %v23413_v53  ;;  %v13139_v55 = vadd.f32 %v23656_v48, %v23417_v28 }
 0x7b0   : > { %v23650_v2 = vmul.f32 %v23393_v4, %v24638_v47  ;;  %v23671_v4 = vrot.slane %v13026_v45, %v24580_v17  ;;  %v13140_v9 = vadd.f32 %v23659_v5, %v23421_v38  ;;  %v13142_v6 = vadd.f32 %v23665_v44, %v23431_v16  ;;  %v24643_v60 = vld [vmem:[#allocation19_spill] sm:$0xff] }
 0x7b1   : > { %v13141_v62 = vadd.f32 %v23662_v37, %v23425_v42  ;;  %v13143_v17 = vadd.f32 %v23668_v22, %v23435_v31  ;;  %v13145_v51 = vadd.f32 %v23674_v10, %v23445_v57  ;;  %v13147_v53 = vadd.f32 %v23653_v50, %v23449_v26  ;;  %13201 = vst [vmem:[%s23697_s13] sm:$0xff] %v13138_v3  ;;  %v24644_v47 = vld [vmem:[#allocation28_spill] sm:$0xff] }
 0x7b2   : > { %v13144_v45 = vadd.f32 %v23671_v4, %v23441_v18  ;;  %v13148_v28 = vadd.f32 %v23656_v48, %v23453_v43  ;;  %13202 = vst [vmem:[%s23697_s13 + $0x8] sm:$0xff] %v13139_v55  ;;  %v13149_v38 = vadd.f32 %v23659_v5, %v23457_v1  ;;  %v13150_v42 = vadd.f32 %v23662_v37, %v23467_v0  ;;  %v24645_v55 = vld [vmem:[#allocation58_spill] sm:$0xff] }
 0x7b3   : > { %v13151_v16 = vadd.f32 %v23665_v44, %v23471_v54  ;;  %v13152_v31 = vadd.f32 %v23668_v22, %v23475_v11  ;;  %13203 = vst [vmem:[%s23697_s13 + $0x10] sm:$0xff] %v13140_v9  ;;  %13204 = vst [vmem:[%s23697_s13 + $0x18] sm:$0xff] %v13141_v62  ;;  %v13153_v18 = vadd.f32 %v23671_v4, %v23480_v20  ;;  %v24646_v62 = vld [vmem:[#allocation23_spill] sm:$0xff] }
 0x7b4   : > { %13205 = vst [vmem:[%s23697_s13 + $0x20] sm:$0xff] %v13142_v6  ;;  %13206 = vst [vmem:[%s23697_s13 + $0x28] sm:$0xff] %v13143_v17  ;;  %v13154_v57 = vadd.f32 %v23674_v10, %v23484_v35  ;;  %v13156_v26 = vadd.f32 %v23653_v50, %v23488_v24  ;;  %v13157_v43 = vadd.f32 %v23656_v48, %v23493_v27  ;;  %v24647_v17 = vld [vmem:[#allocation64_spill] sm:$0xff] }
 0x7b5   : > { %13207 = vst [vmem:[%s23697_s13 + $0x30] sm:$0xff] %v13144_v45  ;;  %13208 = vst [vmem:[%s23697_s13 + $0x38] sm:$0xff] %v13145_v51  ;;  %v13158_v1 = vadd.f32 %v23659_v5, %v23497_v46  ;;  %v13159_v0 = vadd.f32 %v23662_v37, %v23501_v36  ;;  %v13160_v54 = vadd.f32 %v23665_v44, %v23506_v8  ;;  %v24648_v51 = vld [vmem:[#allocation26_spill] sm:$0xff] }
 0x7b6   : > { %13210 = vst [vmem:[%s23697_s13 + $0x48] sm:$0xff] %v13147_v53  ;;  %13211 = vst [vmem:[%s23697_s13 + $0x50] sm:$0xff] %v13148_v28  ;;  %v13161_v11 = vadd.f32 %v23668_v22, %v23510_v61  ;;  %v13162_v20 = vadd.f32 %v23671_v4, %v23514_v25  ;;  %v13163_v35 = vadd.f32 %v23674_v10, %v23518_v23  ;;  %v24649_v28 = vld [vmem:[#allocation77_spill] sm:$0xff] }
 0x7b7   : > { %13212 = vst [vmem:[%s23697_s13 + $0x58] sm:$0xff] %v13149_v38  ;;  %13213 = vst [vmem:[%s23697_s13 + $0x60] sm:$0xff] %v13150_v42  ;;  %v13165_v24 = vadd.f32 %v23653_v50, %v23522_v29  ;;  %v13166_v27 = vadd.f32 %v23656_v48, %v23526_v12  ;;  %v13167_v46 = vadd.f32 %v23659_v5, %v23530_v15  ;;  %v24650_v42 = vld [vmem:[#allocation22_spill] sm:$0xff] }
 0x7b8   : > { %13214 = vst [vmem:[%s23697_s13 + $0x68] sm:$0xff] %v13151_v16  ;;  %13215 = vst [vmem:[%s23697_s13 + $0x70] sm:$0xff] %v13152_v31  ;;  %v13168_v36 = vadd.f32 %v23662_v37, %v23534_v59  ;;  %v13169_v8 = vadd.f32 %v23665_v44, %v23538_v41  ;;  %v13170_v61 = vadd.f32 %v23668_v22, %v23542_v34  ;;  %v24639_v59 = vld [vmem:[#allocation61_spill] sm:$0xff] }
 0x7b9   : > { %13216 = vst [vmem:[%s23697_s13 + $0x78] sm:$0xff] %v13153_v18  ;;  %13217 = vst [vmem:[%s23697_s13 + $0x80] sm:$0xff] %v13154_v57  ;;  %v13171_v25 = vadd.f32 %v23671_v4, %v23546_v63  ;;  %v13172_v23 = vadd.f32 %v23674_v10, %v23550_v14  ;;  %v13174_v29 = vadd.f32 %v23653_v50, %v23554_v19  ;;  %v24640_v41 = vld [vmem:[#allocation21_spill] sm:$0xff]  ;;  %v24641_v63 = vld [vmem:[#allocation75_spill] sm:$0xff] }
 0x7ba   : > { %13219 = vst [vmem:[%s23697_s13 + $0x90] sm:$0xff] %v13156_v26  ;;  %13220 = vst [vmem:[%s23697_s13 + $0x98] sm:$0xff] %v13157_v43  ;;  %v13175_v12 = vadd.f32 %v23656_v48, %v23558_v21  ;;  %v13176_v15 = vadd.f32 %v23659_v5, %v23562_v30  ;;  %v13177_v14 = vadd.f32 %v23662_v37, %v23566_v33  ;;  %v24642_v30 = vld [vmem:[#allocation15_spill] sm:$0xff] }
 0x7bb   : > { %13221 = vst [vmem:[%s23697_s13 + $0xa0] sm:$0xff] %v13158_v1  ;;  %13222 = vst [vmem:[%s23697_s13 + $0xa8] sm:$0xff] %v13159_v0  ;;  %v13178_v19 = vadd.f32 %v23665_v44, %v24639_v59  ;;  %v13179_v34 = vadd.f32 %v23668_v22, %v24640_v41  ;;  %v13180_v21 = vadd.f32 %v23671_v4, %v24641_v63 }
 0x7bc   : > { %13223 = vst [vmem:[%s23697_s13 + $0xb0] sm:$0xff] %v13160_v54  ;;  %13224 = vst [vmem:[%s23697_s13 + $0xb8] sm:$0xff] %v13161_v11  ;;  %v13181_v33 = vadd.f32 %v23674_v10, %v24642_v30  ;;  %v13183_v58 = vadd.f32 %v23653_v50, %v24643_v60  ;;  %v13184_v3 = vadd.f32 %v23656_v48, %v24644_v47  ;;  %v24658_v30 = vld [vmem:[#allocation17_spill] sm:$0xff]  ;;  %v24659_v60 = vld [vmem:[#allocation11_spill] sm:$0xff] }
 0x7bd   : > { %13225 = vst [vmem:[%s23697_s13 + $0xc0] sm:$0xff] %v13162_v20  ;;  %13226 = vst [vmem:[%s23697_s13 + $0xc8] sm:$0xff] %v13163_v35  ;;  %v13185_v9 = vadd.f32 %v23659_v5, %v24645_v55  ;;  %v13186_v6 = vadd.f32 %v23662_v37, %v24646_v62  ;;  %v13187_v45 = vadd.f32 %v23665_v44, %v24647_v17  ;;  %v24660_v47 = vld [vmem:[#allocation52_spill] sm:$0xff] }
 0x7be   : > { %13228 = vst [vmem:[%s23697_s13 + $0xd8] sm:$0xff] %v13165_v24  ;;  %13229 = vst [vmem:[%s23697_s13 + $0xe0] sm:$0xff] %v13166_v27  ;;  %v13188_v53 = vadd.f32 %v23668_v22, %v24648_v51  ;;  %v13189_v38 = vadd.f32 %v23671_v4, %v24649_v28  ;;  %v13190_v16 = vadd.f32 %v23674_v10, %v24650_v42  ;;  %v24661_v17 = vld [vmem:[#allocation60_spill] sm:$0xff] }
 0x7bf   : > { %13230 = vst [vmem:[%s23697_s13 + $0xe8] sm:$0xff] %v13167_v46  ;;  %13231 = vst [vmem:[%s23697_s13 + $0xf0] sm:$0xff] %v13168_v36  ;;  %v13192_v31 = vadd.f32 %v23653_v50, %v23622_v32  ;;  %v13193_v18 = vadd.f32 %v23656_v48, %v23626_v13  ;;  %v13194_v57 = vadd.f32 %v23659_v5, %v23630_v52  ;;  %v24652_v50 = vld [vmem:[#allocation24_spill] sm:$0xff]  ;;  %v24654_v5 = vld [vmem:[#allocation18_spill] sm:$0xff] }
 0x7c0   : > { %13232 = vst [vmem:[%s23697_s13 + $0xf8] sm:$0xff] %v13169_v8  ;;  %13233 = vst [vmem:[%s23697_s13 + $0x100] sm:$0xff] %v13170_v61  ;;  %v13195_v26 = vadd.f32 %v23662_v37, %v23634_v56  ;;  %v13196_v32 = vadd.f32 %v23665_v44, %v23638_v49  ;;  %v13197_v13 = vadd.f32 %v23668_v22, %v23642_v39  ;;  %v24651_v49 = vld [vmem:[#allocation20_spill] sm:$0xff]  ;;  %v24656_v22 = vld [vmem:[#allocation37_spill] sm:$0xff] }
 0x7c1   : > { %13234 = vst [vmem:[%s23697_s13 + $0x108] sm:$0xff] %v13171_v25  ;;  %13235 = vst [vmem:[%s23697_s13 + $0x110] sm:$0xff] %v13172_v23  ;;  %v13198_v52 = vadd.f32 %v23671_v4, %v23646_v7  ;;  %v13199_v56 = vadd.f32 %v23674_v10, %v23650_v2  ;;  %v12583_v39 = vadd.f32 %v24652_v50, %v24651_v49  ;;  %v24653_v48 = vld [vmem:[#allocation12_spill] sm:$0xff]  ;;  %v13294_v50 = vld [vmem:[%s23697_s13 + $0x20] sm:$0xff] (%p17151_p5) }
 0x7c2   : > { %13237 = vst [vmem:[%s23697_s13 + $0x120] sm:$0xff] %v13174_v29  ;;  %13238 = vst [vmem:[%s23697_s13 + $0x128] sm:$0xff] %v13175_v12  ;;  %v12753_v37 = vadd.f32 %v24654_v5, %v24653_v48  ;;  %v24655_v7 = vld [vmem:[#allocation56_spill] sm:$0xff] }
 0x7c3   : > { %13239 = vst [vmem:[%s23697_s13 + $0x130] sm:$0xff] %v13176_v15  ;;  %13240 = vst [vmem:[%s23697_s13 + $0x138] sm:$0xff] %v13177_v14  ;;  %v12653_v44 = vmul.f32 %v24655_v7, %v24655_v7  ;;  %v12584_v2 = vadd.f32 %v12583_v39, %v24655_v7  ;;  %v24657_v14 = vld [vmem:[#allocation62_spill] sm:$0xff]  ;;  %v13298_v48 = vld [vmem:[%s23697_s13 + $0x30] sm:$0xff] (%p17151_p5) }
 0x7c4   : > { %13241 = vst [vmem:[%s23697_s13 + $0x140] sm:$0xff] %v13178_v19  ;;  %13242 = vst [vmem:[%s23697_s13 + $0x148] sm:$0xff] %v13179_v34  ;;  %v12754_v4 = vadd.f32 %v12753_v37, %v24656_v22  ;;  %v12799_v19 = vld [vmem:[%s23333_s28 + $0x8] sm:$0x1]  ;;  %v13300_v5 = vld [vmem:[%s23697_s13 + $0x38] sm:$0xff] (%p17151_p5) }
 0x7c5   : > { %13243 = vst [vmem:[%s23697_s13 + $0x150] sm:$0xff] %v13180_v21  ;;  %13244 = vst [vmem:[%s23697_s13 + $0x158] sm:$0xff] %v13181_v33  ;;  %v12585_v10 = vrot.slane %v12584_v2, 4  ;;  %v13296_v39 = vld [vmem:[%s23697_s13 + $0x28] sm:$0xff] (%p17151_p5)  ;;  %v13310_v22 = vld [vmem:[%s23697_s13 + $0x60] sm:$0xff] (%p17151_p5) }
 0x7c6   : > { %13246 = vst [vmem:[%s23697_s13 + $0x168] sm:$0xff] %v13183_v58  ;;  %13247 = vst [vmem:[%s23697_s13 + $0x170] sm:$0xff] %v13184_v3  ;;  %v12755_v43 = vadd.f32 %v12754_v4, %v12653_v44  ;;  %v13306_v44 = vld [vmem:[%s23697_s13 + $0x50] sm:$0xff] (%p17151_p5)  ;;  %v13312_v4 = vld [vmem:[%s23697_s13 + $0x68] sm:$0xff] (%p17151_p5) }
 0x7c7   : > { %13248 = vst [vmem:[%s23697_s13 + $0x178] sm:$0xff] %v13185_v9  ;;  %13249 = vst [vmem:[%s23697_s13 + $0x180] sm:$0xff] %v13186_v6  ;;  %v12586_v1 = vadd.f32 %v12585_v10, %v12584_v2  ;;  %v12895_v9 = vld [vmem:[%s23463_s12 + $0x8] sm:$0x1]  ;;  %v13308_v2 = vld [vmem:[%s23697_s13 + $0x58] sm:$0xff] (%p17151_p5) }
 0x7c8   : > { %13250 = vst [vmem:[%s23697_s13 + $0x188] sm:$0xff] %v13187_v45  ;;  %13251 = vst [vmem:[%s23697_s13 + $0x190] sm:$0xff] %v13188_v53  ;;  %v12756_v0 = vrot.slane %v12755_v43, 4  ;;  %v24662_v53 = vld [vmem:[#allocation29_spill] sm:$0xff]  ;;  %v13314_v10 = vld [vmem:[%s23697_s13 + $0x70] sm:$0xff] (%p17151_p5) }
 0x7c9   : > { %13252 = vst [vmem:[%s23697_s13 + $0x198] sm:$0xff] %v13189_v38  ;;  %13253 = vst [vmem:[%s23697_s13 + $0x1a0] sm:$0xff] %v13190_v16  ;;  %v12587_v54 = vrot.slane %v12586_v1, 2 }
 0x7ca   : > { %13255 = vst [vmem:[%s23697_s13 + $0x1b0] sm:$0xff] %v13192_v31  ;;  %13256 = vst [vmem:[%s23697_s13 + $0x1b8] sm:$0xff] %v13193_v18  ;;  %v12757_v11 = vadd.f32 %v12756_v0, %v12755_v43  ;;  %v13316_v43 = vld [vmem:[%s23697_s13 + $0x78] sm:$0xff] (%p17151_p5) }
 0x7cb   : > { %13257 = vst [vmem:[%s23697_s13 + $0x1c0] sm:$0xff] %v13194_v57  ;;  %13258 = vst [vmem:[%s23697_s13 + $0x1c8] sm:$0xff] %v13195_v26  ;;  %v12588_v20 = vadd.f32 %v12587_v54, %v12586_v1  ;;  %v13318_v1 = vld [vmem:[%s23697_s13 + $0x80] sm:$0xff] (%p17151_p5)  ;;  %v13322_v54 = vld [vmem:[%s23697_s13 + $0x90] sm:$0xff] (%p17151_p5) }
 0x7cc   : > { %13259 = vst [vmem:[%s23697_s13 + $0x1d0] sm:$0xff] %v13196_v32  ;;  %13260 = vst [vmem:[%s23697_s13 + $0x1d8] sm:$0xff] %v13197_v13  ;;  %v12758_v35 = vrot.slane %v12757_v11, 2 }
 0x7cd   : > { %13261 = vst [vmem:[%s23697_s13 + $0x1e0] sm:$0xff] %v13198_v52  ;;  %13262 = vst [vmem:[%s23697_s13 + $0x1e8] sm:$0xff] %v13199_v56  ;;  %v12589_v24 = vrot.slane %v12588_v20, 1  ;;  %v13288_v52 = vld [vmem:[%s23697_s13 + $0x8] sm:$0xff] (%p17151_p5)  ;;  %v13290_v56 = vld [vmem:[%s23697_s13 + $0x10] sm:$0xff] (%p17151_p5) }
 0x7ce   : > { %v12759_v27 = vadd.f32 %v12758_v35, %v12757_v11  ;;  %13289 = vst [vmem:[%s23889_s15 + $0x8] sm:$0xff] (%p17151_p5), %v13288_v52  ;;  %13291 = vst [vmem:[%s23889_s15 + $0x10] sm:$0xff] (%p17151_p5), %v13290_v56  ;;  %v13324_v11 = vld [vmem:[%s23697_s13 + $0x98] sm:$0xff] (%p17151_p5)  ;;  %v13328_v35 = vld [vmem:[%s23697_s13 + $0xa8] sm:$0xff] (%p17151_p5) }
 0x7cf   : > { %v12590_v46 = vadd.f32 %v12589_v24, %v12588_v20  ;;  %13295 = vst [vmem:[%s23889_s15 + $0x20] sm:$0xff] (%p17151_p5), %v13294_v50  ;;  %13297 = vst [vmem:[%s23889_s15 + $0x28] sm:$0xff] (%p17151_p5), %v13296_v39  ;;  %v13326_v20 = vld [vmem:[%s23697_s13 + $0xa0] sm:$0xff] (%p17151_p5)  ;;  %v13330_v24 = vld [vmem:[%s23697_s13 + $0xb0] sm:$0xff] (%p17151_p5) }
 0x7d0   : > { %v12760_v36 = vrot.slane %v12759_v27, 1  ;;  %13299 = vst [vmem:[%s23889_s15 + $0x30] sm:$0xff] (%p17151_p5), %v13298_v48  ;;  %13301 = vst [vmem:[%s23889_s15 + $0x38] sm:$0xff] (%p17151_p5), %v13300_v5 }
 0x7d1   : > { %v12770_v61 = vmul.f32 0.020408163, %v12590_v46  ;;  %13307 = vst [vmem:[%s23889_s15 + $0xe0] sm:$0xff] (%p17151_p5), %v13306_v44  ;;  %13309 = vst [vmem:[%s23889_s15 + $0xe8] sm:$0xff] (%p17151_p5), %v13308_v2  ;;  %v13334_v46 = vld [vmem:[%s23697_s13 + $0xc0] sm:$0xff] (%p17151_p5) }
 0x7d2   : > { %v12761_v8 = vadd.f32 %v12760_v36, %v12759_v27  ;;  %13311 = vst [vmem:[%s23889_s15 + $0xf0] sm:$0xff] (%p17151_p5), %v13310_v22  ;;  %13313 = vst [vmem:[%s23889_s15 + $0xf8] sm:$0xff] (%p17151_p5), %v13312_v4  ;;  %v13332_v27 = vld [vmem:[%s23697_s13 + $0xb8] sm:$0xff] (%p17151_p5)  ;;  %v13336_v36 = vld [vmem:[%s23697_s13 + $0xc8] sm:$0xff] (%p17151_p5) }
 0x7d3   : > { %v12788_v23 = vmul.f32 %v12770_v61, %v12770_v61  ;;  %13315 = vst [vmem:[%s23889_s15 + $0x100] sm:$0xff] (%p17151_p5), %v13314_v10  ;;  %13317 = vst [vmem:[%s23889_s15 + $0x108] sm:$0xff] (%p17151_p5), %v13316_v43 }
 0x7d4   : > { %v12779_v25 = vmul.f32 0.020408163, %v12761_v8  ;;  %13319 = vst [vmem:[%s23889_s15 + $0x110] sm:$0xff] (%p17151_p5), %v13318_v1  ;;  %13323 = vst [vmem:[%s23889_s15 + $0x1b0] sm:$0xff] (%p17151_p5), %v13322_v54 }
 0x7d5   : > { %13325 = vst [vmem:[%s23889_s15 + $0x1b8] sm:$0xff] (%p17151_p5), %v13324_v11  ;;  %13327 = vst [vmem:[%s23889_s15 + $0x1c0] sm:$0xff] (%p17151_p5), %v13326_v20 }
 0x7d6   : > { %v12797_v29 = vsub.f32 %v12779_v25, %v12788_v23  ;;  %13329 = vst [vmem:[%s23889_s15 + $0x1c8] sm:$0xff] (%p17151_p5), %v13328_v35  ;;  %13331 = vst [vmem:[%s23889_s15 + $0x1d0] sm:$0xff] (%p17151_p5), %v13330_v24  ;;  %v13342_v25 = vld [vmem:[%s23697_s13 + $0xe0] sm:$0xff] (%p17151_p5)  ;;  %v13344_v23 = vld [vmem:[%s23697_s13 + $0xe8] sm:$0xff] (%p17151_p5) }
 0x7d7   : > { %13333 = vst [vmem:[%s23889_s15 + $0x1d8] sm:$0xff] (%p17151_p5), %v13332_v27  ;;  %13335 = vst [vmem:[%s23889_s15 + $0x1e0] sm:$0xff] (%p17151_p5), %v13334_v46 }
 0x7d8   : > { %v12808_v12 = vadd.f32 0.001, %v12797_v29  ;;  %13337 = vst [vmem:[%s23889_s15 + $0x1e8] sm:$0xff] (%p17151_p5), %v13336_v36  ;;  %13343 = vst [vmem:[%s23889_s15 + $0x290] sm:$0xff] (%p17151_p5), %v13342_v25  ;;  %v13346_v29 = vld [vmem:[%s23697_s13 + $0xf0] sm:$0xff] (%p17151_p5) }
 0x7d9   : > { %13345 = vst [vmem:[%s23889_s15 + $0x298] sm:$0xff] (%p17151_p5), %v13344_v23  ;;  %13347 = vst [vmem:[%s23889_s15 + $0x2a0] sm:$0xff] (%p17151_p5), %v13346_v29 }
 0x7da   : > { %17035 = vrsqrt.f32 %v12808_v12  ;;  %v13348_v12 = vld [vmem:[%s23697_s13 + $0xf8] sm:$0xff] (%p17151_p5) }
 0x7db   : > { %13349 = vst [vmem:[%s23889_s15 + $0x2a8] sm:$0xff] (%p17151_p5), %v13348_v12 }
 0x7e7   : > { %v17036_v15 = vpop.eup %17035 }
 0x7e8   : > { %v12882_v59 = vrot.slane %v17036_v15, %v24657_v14  ;;  %v13350_v15 = vld [vmem:[%s23697_s13 + $0x100] sm:$0xff] (%p17151_p5) }
 0x7e9   : > { %13351 = vst [vmem:[%s23889_s15 + $0x2b0] sm:$0xff] (%p17151_p5), %v13350_v15 }
 0x7ea   : > { %v12889_v41 = vrot.slane %v12882_v59, %v24657_v14  ;;  %v13354_v59 = vld [vmem:[%s23697_s13 + $0x110] sm:$0xff] (%p17151_p5) }
 0x7eb   : > { %13355 = vst [vmem:[%s23889_s15 + $0x2c0] sm:$0xff] (%p17151_p5), %v13354_v59 }
 0x7ec   : > { %v12893_v34 = vmul.f32 %v12889_v41, %v12799_v19  ;;  %v13358_v41 = vld [vmem:[%s23697_s13 + $0x120] sm:$0xff] (%p17151_p5) }
 0x7ed   : > { %13359 = vst [vmem:[%s23889_s15 + $0x360] sm:$0xff] (%p17151_p5), %v13358_v41 }
 0x7ee   : > { %v12933_v63 = vrot.slane %v12893_v34, %v24480_v40  ;;  %v13360_v34 = vld [vmem:[%s23697_s13 + $0x128] sm:$0xff] (%p17151_p5) }
 0x7ef   : > { %13361 = vst [vmem:[%s23889_s15 + $0x368] sm:$0xff] (%p17151_p5), %v13360_v34 }
 0x7f0   : > { %v12951_v21 = vmul.f32 %v12933_v63, %v12770_v61  ;;  %v13036_v33 = vmul.f32 %v12933_v63, %v24658_v30  ;;  %v13045_v58 = vmul.f32 %v12933_v63, %v24659_v60  ;;  %v13054_v3 = vmul.f32 %v12933_v63, %v24660_v47  ;;  %v13340_v61 = vld [vmem:[%s23697_s13 + $0xd8] sm:$0xff] (%p17151_p5)  ;;  %v13366_v30 = vld [vmem:[%s23697_s13 + $0x140] sm:$0xff] (%p17151_p5)  ;;  %v13370_v60 = vld [vmem:[%s23697_s13 + $0x150] sm:$0xff] (%p17151_p5) }
 0x7f1   : > { %v13063_v45 = vmul.f32 %v12933_v63, %v24661_v17  ;;  %v13072_v28 = vmul.f32 %v12933_v63, %v24662_v53  ;;  %v13081_v38 = vmul.f32 %v12933_v63, %v24651_v49  ;;  %v13090_v42 = vmul.f32 %v12933_v63, %v24655_v7  ;;  %v13292_v49 = vld [vmem:[%s23697_s13 + $0x18] sm:$0xff] (%p17151_p5)  ;;  %v13304_v7 = vld [vmem:[%s23697_s13 + $0x48] sm:$0xff] (%p17151_p5)  ;;  %13341 = vst [vmem:[%s23889_s15 + $0x288] sm:$0xff] (%p17151_p5), %v13340_v61  ;;  %v13362_v63 = vld [vmem:[%s23697_s13 + $0x130] sm:$0xff] (%p17151_p5) }
 0x7f2   : > { %v13016_v55 = vrot.slane %v12951_v21, %v24657_v14  ;;  %13293 = vst [vmem:[%s23889_s15 + $0x18] sm:$0xff] (%p17151_p5), %v13292_v49  ;;  %13305 = vst [vmem:[%s23889_s15 + $0xd8] sm:$0xff] (%p17151_p5), %v13304_v7  ;;  %v13364_v21 = vld [vmem:[%s23697_s13 + $0x138] sm:$0xff] (%p17151_p5)  ;;  %v13386_v17 = vld [vmem:[%s23697_s13 + $0x190] sm:$0xff] (%p17151_p5) }
 0x7f3   : > { %13363 = vst [vmem:[%s23889_s15 + $0x370] sm:$0xff] (%p17151_p5), %v13362_v63  ;;  %13365 = vst [vmem:[%s23889_s15 + $0x378] sm:$0xff] (%p17151_p5), %v13364_v21 }
 0x7f4   : > { %v13023_v62 = vrot.slane %v13016_v55, %v24657_v14  ;;  %v13352_v14 = vld [vmem:[%s23697_s13 + $0x108] sm:$0xff] (%p17151_p5)  ;;  %13367 = vst [vmem:[%s23889_s15 + $0x380] sm:$0xff] (%p17151_p5), %v13366_v30  ;;  %13371 = vst [vmem:[%s23889_s15 + $0x390] sm:$0xff] (%p17151_p5), %v13370_v60  ;;  %v13378_v55 = vld [vmem:[%s23697_s13 + $0x170] sm:$0xff] (%p17151_p5) }
 0x7f5   : > { %13353 = vst [vmem:[%s23889_s15 + $0x2b8] sm:$0xff] (%p17151_p5), %v13352_v14  ;;  %13379 = vst [vmem:[%s23889_s15 + $0x440] sm:$0xff] (%p17151_p5), %v13378_v55 }
 0x7f6   : > { %v13027_v6 = vsub.f32 %v12895_v9, %v13023_v62  ;;  %v13380_v9 = vld [vmem:[%s23697_s13 + $0x178] sm:$0xff] (%p17151_p5)  ;;  %v13382_v62 = vld [vmem:[%s23697_s13 + $0x180] sm:$0xff] (%p17151_p5)  ;;  %13387 = vst [vmem:[%s23889_s15 + $0x460] sm:$0xff] (%p17151_p5), %v13386_v17 }
 0x7f7   : > { %13381 = vst [vmem:[%s23889_s15 + $0x448] sm:$0xff] (%p17151_p5), %v13380_v9  ;;  %13383 = vst [vmem:[%s23889_s15 + $0x450] sm:$0xff] (%p17151_p5), %v13382_v62 }
 0x7f8   : > { %v13128_v51 = vrot.slane %v13027_v6, %v24480_v40  ;;  %v13286_v40 = vld [vmem:[%s23697_s13] sm:$0xff] (%p17151_p5)  ;;  %v13384_v6 = vld [vmem:[%s23697_s13 + $0x188] sm:$0xff] (%p17151_p5) }
 0x7f9   : > { %13287 = vst [vmem:[%s23889_s15] sm:$0xff] (%p17151_p5), %v13286_v40  ;;  %13385 = vst [vmem:[%s23889_s15 + $0x458] sm:$0xff] (%p17151_p5), %v13384_v6 }
 0x7fa   : > { %v13146_v16 = vadd.f32 %v13128_v51, %v13036_v33  ;;  %v13155_v31 = vadd.f32 %v13128_v51, %v13045_v58  ;;  %v13164_v18 = vadd.f32 %v13128_v51, %v13054_v3  ;;  %v13173_v57 = vadd.f32 %v13128_v51, %v13063_v45  ;;  %v13368_v33 = vld [vmem:[%s23697_s13 + $0x148] sm:$0xff] (%p17151_p5)  ;;  %v13372_v58 = vld [vmem:[%s23697_s13 + $0x158] sm:$0xff] (%p17151_p5) }
 0x7fb   : > { %v13182_v26 = vadd.f32 %v13128_v51, %v13072_v28  ;;  %v13191_v32 = vadd.f32 %v13128_v51, %v13081_v38  ;;  %v13200_v13 = vadd.f32 %v13128_v51, %v13090_v42  ;;  %13270 = sbr.rel (!%p17151_p5) target bundleno = 2057 (0x809), region = 90  ;;  %13369 = vst [vmem:[%s23889_s15 + $0x388] sm:$0xff] (%p17151_p5), %v13368_v33  ;;  %13373 = vst [vmem:[%s23889_s15 + $0x398] sm:$0xff] (%p17151_p5), %v13372_v58  ;;  %v13376_v3 = vld [vmem:[%s23697_s13 + $0x168] sm:$0xff] (%p17151_p5)  ;;  %v13388_v45 = vld [vmem:[%s23697_s13 + $0x198] sm:$0xff] (%p17151_p5) }
 0x7fc   : > { %13209 = vst [vmem:[%s23697_s13 + $0x40] sm:$0xff] %v13146_v16  ;;  %13218 = vst [vmem:[%s23697_s13 + $0x88] sm:$0xff] %v13155_v31  ;;  %v13390_v51 = vld [vmem:[%s23697_s13 + $0x1a0] sm:$0xff] (%p17151_p5)  ;;  %v13394_v28 = vld [vmem:[%s23697_s13 + $0x1b0] sm:$0xff] (%p17151_p5) }
 0x7fd   : > { %13227 = vst [vmem:[%s23697_s13 + $0xd0] sm:$0xff] %v13164_v18  ;;  %13236 = vst [vmem:[%s23697_s13 + $0x118] sm:$0xff] %v13173_v57  ;;  %v13396_v38 = vld [vmem:[%s23697_s13 + $0x1b8] sm:$0xff] (%p17151_p5)  ;;  %v13398_v42 = vld [vmem:[%s23697_s13 + $0x1c0] sm:$0xff] (%p17151_p5) }
 0x7fe   : > { %13245 = vst [vmem:[%s23697_s13 + $0x160] sm:$0xff] %v13182_v26  ;;  %13254 = vst [vmem:[%s23697_s13 + $0x1a8] sm:$0xff] %v13191_v32  ;;  %v13400_v16 = vld [vmem:[%s23697_s13 + $0x1c8] sm:$0xff] (%p17151_p5)  ;;  %v13402_v31 = vld [vmem:[%s23697_s13 + $0x1d0] sm:$0xff] (%p17151_p5) }
 0x7ff   : > { %13263 = vst [vmem:[%s23697_s13 + $0x1f0] sm:$0xff] %v13200_v13  ;;  %13377 = vst [vmem:[%s23889_s15 + $0x438] sm:$0xff] (%p17151_p5), %v13376_v3  ;;  %v13404_v18 = vld [vmem:[%s23697_s13 + $0x1d8] sm:$0xff] (%p17151_p5)  ;;  %v13406_v57 = vld [vmem:[%s23697_s13 + $0x1e0] sm:$0xff] (%p17151_p5) }
 0x800   : > { %13389 = vst [vmem:[%s23889_s15 + $0x468] sm:$0xff] %v13388_v45  ;;  %13391 = vst [vmem:[%s23889_s15 + $0x470] sm:$0xff] %v13390_v51  ;;  %v13408_v26 = vld [vmem:[%s23697_s13 + $0x1e8] sm:$0xff] }
 0x801   : > { %13395 = vst [vmem:[%s23889_s15 + $0x510] sm:$0xff] %v13394_v28  ;;  %13397 = vst [vmem:[%s23889_s15 + $0x518] sm:$0xff] %v13396_v38 }
 0x802   : > { %13399 = vst [vmem:[%s23889_s15 + $0x520] sm:$0xff] %v13398_v42  ;;  %13401 = vst [vmem:[%s23889_s15 + $0x528] sm:$0xff] %v13400_v16 }
 0x803   : > { %v13302_v37 = vld [vmem:[%s23697_s13 + $0x40] sm:$0xff]  ;;  %v13320_v0 = vld [vmem:[%s23697_s13 + $0x88] sm:$0xff]  ;;  %13403 = vst [vmem:[%s23889_s15 + $0x530] sm:$0xff] %v13402_v31  ;;  %13405 = vst [vmem:[%s23889_s15 + $0x538] sm:$0xff] %v13404_v18 }
 0x804   : > { %13303 = vst [vmem:[%s23889_s15 + $0x40] sm:$0xff] %v13302_v37  ;;  %13321 = vst [vmem:[%s23889_s15 + $0x118] sm:$0xff] %v13320_v0  ;;  %v13338_v8 = vld [vmem:[%s23697_s13 + $0xd0] sm:$0xff]  ;;  %v13356_v19 = vld [vmem:[%s23697_s13 + $0x118] sm:$0xff] }
 0x805   : > { %13339 = vst [vmem:[%s23889_s15 + $0x1f0] sm:$0xff] %v13338_v8  ;;  %13357 = vst [vmem:[%s23889_s15 + $0x2c8] sm:$0xff] %v13356_v19  ;;  %v13374_v47 = vld [vmem:[%s23697_s13 + $0x160] sm:$0xff]  ;;  %v13392_v53 = vld [vmem:[%s23697_s13 + $0x1a8] sm:$0xff] }
 0x806   : > { %13375 = vst [vmem:[%s23889_s15 + $0x3a0] sm:$0xff] %v13374_v47  ;;  %13393 = vst [vmem:[%s23889_s15 + $0x478] sm:$0xff] %v13392_v53  ;;  %v13410_v32 = vld [vmem:[%s23697_s13 + $0x1f0] sm:$0xff] }
 0x807   : > { %13407 = vst [vmem:[%s23889_s15 + $0x540] sm:$0xff] %v13406_v57  ;;  %13409 = vst [vmem:[%s23889_s15 + $0x548] sm:$0xff] %v13408_v26 }
 0x808   : > { %13411 = vst [vmem:[%s23889_s15 + $0x550] sm:$0xff] %v13410_v32 }
 0x809 PF: > { %p17_p11 = scmp.ge.s32.totalorder %s17139_s17, 5   ;;  %s24663_s13 = smov %s17055_s14 }
 0x80a   : > { %s24664_s14 = smov %s17149_s20  ;;  %s24665_s15 = smov %s17139_s17 }
 0x80b   :  { %19 = sbr.rel (!%p17_p11) target bundleno = 2 (0x2), region = 156 }

</bundles_post_ra>
